<compile_context>
chip_gen: v6e
topology: v6e:2x2x1
jax: 0.10.0
libtpu: 0.0.40
codegen_flags: <defaults>
</compile_context>

<pallas_src>
import functools

import jax
import jax.numpy as jnp
from jax.experimental import pallas as pl
from jax.experimental.pallas import tpu as pltpu


# ----------------------------------------------------------------------------
# In-kernel Mish:  mish(y) = y * tanh(softplus(y)) = y * (1 - 2/(e*(e+2)+2))
# with e = exp(y).  One exp (EUP) + one approximate reciprocal (EUP) + a few
# VALU ops.  The exponent is clamped at 20 (tanh(softplus(20)) == 1 in f32) so
# nothing overflows.
# ----------------------------------------------------------------------------
def _mish(y):
    e = jnp.exp(jnp.minimum(y, 20.0))
    d = e * (e + 2.0) + 2.0
    return y * (1.0 - 2.0 * pl.reciprocal(d, approx=True))


# ----------------------------------------------------------------------------
# Kernels
# ----------------------------------------------------------------------------
def _mm_bias_mish_kernel(x_ref, w_ref, b_ref, o_ref):
    y = jnp.dot(x_ref[...], w_ref[...], preferred_element_type=jnp.float32)
    o_ref[...] = _mish(y + b_ref[...]).astype(o_ref.dtype)


def _mm_dual_bias_mish_kernel(x_ref, wa_ref, ba_ref, wb_ref, bb_ref,
                              oa_ref, ob_ref):
    """c2 + c3 fused: one read of x1, two independent 1x1 convs + Mish."""
    x = x_ref[...]
    ya = jnp.dot(x, wa_ref[...], preferred_element_type=jnp.float32)
    oa_ref[...] = _mish(ya + ba_ref[...]).astype(oa_ref.dtype)
    yb = jnp.dot(x, wb_ref[...], preferred_element_type=jnp.float32)
    ob_ref[...] = _mish(yb + bb_ref[...]).astype(ob_ref.dtype)


def _resblock_kernel(x_ref, w1_ref, b1_ref, w3_ref, b3_ref, o_ref, hpad_ref,
                     *, H, W):
    """One fused YOLO res block per image:
         h = mish(x @ w1 + b1)          (1x1 conv, h kept in VMEM)
         y = mish(conv3x3(h, w3) + b3)  (9 shifted-tap matmuls on padded h)
         o = y + x                      (residual add in f32, stored bf16)
    x_ref / o_ref: (1, H*W, C) bf16;  hpad_ref: (H+2, W+2, C) bf16 scratch.
    """
    C = x_ref.shape[2]
    x2d = x_ref[0]                                           # (H*W, C) bf16
    h = _mish(jnp.dot(x2d, w1_ref[...], preferred_element_type=jnp.float32)
              + b1_ref[...]).astype(jnp.bfloat16)

    # Zero-padded copy of h in VMEM (re-zeroed every iteration so the kernel
    # is safe under megacore "parallel" splitting of the batch grid axis).
    hpad_ref[...] = jnp.zeros_like(hpad_ref)
    hpad_ref[1:H + 1, 1:W + 1, :] = h.reshape(H, W, C)

    y = jnp.zeros((H * W, C), jnp.float32)
    for dh in range(3):
        for dw in range(3):
            win = hpad_ref[dh:dh + H, dw:dw + W, :].reshape(H * W, C)
            y = y + jnp.dot(win, w3_ref[dh * 3 + dw],
                            preferred_element_type=jnp.float32)

    out = _mish(y + b3_ref[...]) + x2d.astype(jnp.float32)   # residual in f32
    o_ref[0] = out.astype(o_ref.dtype)


def _c4c5_kernel(r_ref, x2_ref, w4_ref, b4_ref, w5a_ref, w5b_ref, b5_ref,
                 o_ref):
    """c4 folded into the concat-free c5: x4 = mish(r@w4+b4) stays in VMEM,
    then x5 = mish(x4@w5a + x2@w5b + b5)."""
    x4 = _mish(jnp.dot(r_ref[...], w4_ref[...],
                       preferred_element_type=jnp.float32)
               + b4_ref[...]).astype(jnp.bfloat16)
    y = jnp.dot(x4, w5a_ref[...], preferred_element_type=jnp.float32)
    y = y + jnp.dot(x2_ref[...], w5b_ref[...],
                    preferred_element_type=jnp.float32)
    o_ref[...] = _mish(y + b5_ref[...]).astype(o_ref.dtype)


# ----------------------------------------------------------------------------
# pallas_call wrappers
# ----------------------------------------------------------------------------
def _pick_tm(M, max_tm=512):
    """Largest multiple-of-8 divisor of M (<= max_tm); then ensure >= 2 row
    blocks when possible so both v7x TensorCores get work."""
    tm = min(max_tm, M)
    while tm > 8 and (M % tm or tm % 8):
        tm -= 8
    if M % tm:
        tm = M
    if M // tm < 2 and tm % 16 == 0:
        tm //= 2
    return tm


def _parallel():
    return pltpu.CompilerParams(dimension_semantics=("parallel",))


def matmul_bias_mish(x, w, bias, out_dtype=jnp.bfloat16):
    """x: (M,K) bf16; w: (K,N) bf16 (BN scale pre-folded, VMEM-resident);
    bias: (1,N) f32."""
    M, K = x.shape
    N = w.shape[1]
    tm = _pick_tm(M)
    return pl.pallas_call(
        _mm_bias_mish_kernel,
        out_shape=jax.ShapeDtypeStruct((M, N), out_dtype),
        grid_spec=pltpu.PrefetchScalarGridSpec(
            num_scalar_prefetch=0,
            grid=(M // tm,),
            in_specs=[
                pl.BlockSpec((tm, K), lambda i: (i, 0)),
                pl.BlockSpec((K, N), lambda i: (0, 0)),    # weight resident
                pl.BlockSpec((1, N), lambda i: (0, 0)),
            ],
            out_specs=pl.BlockSpec((tm, N), lambda i: (i, 0)),
        ),
        compiler_params=_parallel(),
    )(x, w, bias)


def matmul_dual_bias_mish(x, wa, ba, wb, bb):
    """c2+c3 fused: one (M,K) input, two resident weights, two bf16 outputs."""
    M, K = x.shape
    Na, Nb = wa.shape[1], wb.shape[1]
    tm = _pick_tm(M)
    return pl.pallas_call(
        _mm_dual_bias_mish_kernel,
        out_shape=(jax.ShapeDtypeStruct((M, Na), jnp.bfloat16),
                   jax.ShapeDtypeStruct((M, Nb), jnp.bfloat16)),
        grid_spec=pltpu.PrefetchScalarGridSpec(
            num_scalar_prefetch=0,
            grid=(M // tm,),
            in_specs=[
                pl.BlockSpec((tm, K), lambda i: (i, 0)),
                pl.BlockSpec((K, Na), lambda i: (0, 0)),
                pl.BlockSpec((1, Na), lambda i: (0, 0)),
                pl.BlockSpec((K, Nb), lambda i: (0, 0)),
                pl.BlockSpec((1, Nb), lambda i: (0, 0)),
            ],
            out_specs=[pl.BlockSpec((tm, Na), lambda i: (i, 0)),
                       pl.BlockSpec((tm, Nb), lambda i: (i, 0))],
        ),
        compiler_params=_parallel(),
    )(x, wa, ba, wb, bb)


def resblock(r, w1, b1, w3, b3, *, H, W):
    """r: (N, H*W, C) bf16 -> (N, H*W, C) bf16, one grid step per image."""
    Nimg, HW, C = r.shape
    kernel = functools.partial(_resblock_kernel, H=H, W=W)
    return pl.pallas_call(
        kernel,
        out_shape=jax.ShapeDtypeStruct((Nimg, HW, C), jnp.bfloat16),
        grid_spec=pltpu.PrefetchScalarGridSpec(
            num_scalar_prefetch=0,
            grid=(Nimg,),
            in_specs=[
                pl.BlockSpec((1, HW, C), lambda b: (b, 0, 0)),
                pl.BlockSpec((C, C), lambda b: (0, 0)),
                pl.BlockSpec((1, C), lambda b: (0, 0)),
                pl.BlockSpec((9, C, C), lambda b: (0, 0, 0)),
                pl.BlockSpec((1, C), lambda b: (0, 0)),
            ],
            out_specs=pl.BlockSpec((1, HW, C), lambda b: (b, 0, 0)),
            scratch_shapes=[pltpu.VMEM((H + 2, W + 2, C), jnp.bfloat16)],
        ),
        compiler_params=_parallel(),
    )(r, w1, b1, w3, b3)


def c4c5(r, x2, w4, b4, w5a, w5b, b5):
    """Fused c4 + concat-free c5; f32 output (module boundary)."""
    M, C = r.shape
    N = w5a.shape[1]
    tm = _pick_tm(M)
    return pl.pallas_call(
        _c4c5_kernel,
        out_shape=jax.ShapeDtypeStruct((M, N), jnp.float32),
        grid_spec=pltpu.PrefetchScalarGridSpec(
            num_scalar_prefetch=0,
            grid=(M // tm,),
            in_specs=[
                pl.BlockSpec((tm, C), lambda i: (i, 0)),
                pl.BlockSpec((tm, C), lambda i: (i, 0)),
                pl.BlockSpec((C, C), lambda i: (0, 0)),
                pl.BlockSpec((1, C), lambda i: (0, 0)),
                pl.BlockSpec((C, N), lambda i: (0, 0)),
                pl.BlockSpec((C, N), lambda i: (0, 0)),
                pl.BlockSpec((1, N), lambda i: (0, 0)),
            ],
            out_specs=pl.BlockSpec((tm, N), lambda i: (i, 0)),
        ),
        compiler_params=_parallel(),
    )(r, x2, w4, b4, w5a, w5b, b5)


# ----------------------------------------------------------------------------
# DownSample4 parameters
# ----------------------------------------------------------------------------
NUM_RES_BLOCKS = 8

CONV_DEFS = [("c1", 512, 256, 3), ("c2", 256, 512, 1), ("c3", 256, 512, 1)]
for _i in range(NUM_RES_BLOCKS):
    CONV_DEFS += [(f"res{_i}_0", 256, 256, 1), (f"res{_i}_1", 256, 256, 3)]
CONV_DEFS += [("c4", 256, 256, 1), ("c5", 512, 512, 1)]


def init_params(key):
    params = {}
    keys = jax.random.split(key, len(CONV_DEFS))
    for k, (name, cout, cin, ks) in zip(keys, CONV_DEFS):
        kw_, kg, kb, km, kv = jax.random.split(k, 5)
        fan_in = float(cin * ks * ks)
        w = jax.random.normal(kw_, (cout, cin, ks, ks), jnp.float32) / (fan_in ** 0.5)
        gamma = 1.0 + 0.1 * jax.random.normal(kg, (cout,), jnp.float32)
        beta = 0.1 * jax.random.normal(kb, (cout,), jnp.float32)
        rmean = 0.1 * jax.random.normal(km, (cout,), jnp.float32)
        rvar = jax.random.uniform(kv, (cout,), jnp.float32, minval=0.5, maxval=1.5)
        scale = gamma / jnp.sqrt(rvar + 1e-5)
        bias = beta - rmean * scale
        params[name] = (w, scale, bias)
    return params


def _fold(w, scale):
    # TODO(synk): eval-mode (running-stats) BatchNorm fold only.
    return (w * scale[:, None, None, None]).astype(jnp.bfloat16)


def prepare_params(params):
    """BN fold + bf16 cast + matmul layout, done ONCE outside the forward jit."""
    prep = {}
    w, s, b = params["c1"]
    wf = _fold(w, s)                                          # (512,256,3,3)
    prep["c1_w"] = jnp.transpose(wf, (2, 3, 1, 0)).reshape(9 * 256, 512)
    prep["c1_b"] = b.reshape(1, -1)
    for nm in ("c2", "c3", "c4"):
        w, s, b = params[nm]
        prep[nm + "_w"] = jnp.transpose(_fold(w, s)[:, :, 0, 0], (1, 0))
        prep[nm + "_b"] = b.reshape(1, -1)
    for i in range(NUM_RES_BLOCKS):
        w, s, b = params[f"res{i}_0"]
        prep[f"res{i}_w1"] = jnp.transpose(_fold(w, s)[:, :, 0, 0], (1, 0))
        prep[f"res{i}_b1"] = b.reshape(1, -1)
        w, s, b = params[f"res{i}_1"]
        prep[f"res{i}_w3"] = jnp.transpose(_fold(w, s), (2, 3, 1, 0)).reshape(9, 256, 256)
        prep[f"res{i}_b3"] = b.reshape(1, -1)
    w, s, b = params["c5"]
    w5 = jnp.transpose(_fold(w, s)[:, :, 0, 0], (1, 0))        # (512 in, 512 out)
    prep["c5_wa"] = w5[:256]                                   # applied to x4
    prep["c5_wb"] = w5[256:]                                   # applied to x2
    prep["c5_b"] = b.reshape(1, -1)
    return prep


# ----------------------------------------------------------------------------
# Forward
# ----------------------------------------------------------------------------
@jax.jit
def downsample4_forward(x_nchw, prep):
    N, Cin, Hin, Win = x_nchw.shape
    x = jnp.transpose(x_nchw, (0, 2, 3, 1)).astype(jnp.bfloat16)   # NHWC bf16

    # ---- c1: 3x3 stride-2 conv via XLA-side bf16 im2col + fused matmul kernel.
    # TODO(synk): stride-2 in-kernel shifted-tap version not implemented.
    Ho, Wo = (Hin + 2 - 3) // 2 + 1, (Win + 2 - 3) // 2 + 1
    xp = jnp.pad(x, ((0, 0), (1, 1), (1, 1), (0, 0)))
    patches = [xp[:, dh:dh + 2 * Ho:2, dw:dw + 2 * Wo:2, :]
               for dh in range(3) for dw in range(3)]
    cols = jnp.concatenate(patches, axis=-1).reshape(N * Ho * Wo, 9 * Cin)
    x1 = matmul_bias_mish(cols, prep["c1_w"], prep["c1_b"])        # (M,512) bf16
    M = N * Ho * Wo

    # ---- c2 + c3 fused (single read of x1, two bf16 outputs).
    x2, x3 = matmul_dual_bias_mish(x1, prep["c2_w"], prep["c2_b"],
                                   prep["c3_w"], prep["c3_b"])     # (M,256) each

    # ---- 8 fused res blocks: 1x1 -> 3x3 -> +residual, one call per block.
    r = x3.reshape(N, Ho * Wo, 256)
    for i in range(NUM_RES_BLOCKS):
        r = resblock(r, prep[f"res{i}_w1"], prep[f"res{i}_b1"],
                     prep[f"res{i}_w3"], prep[f"res{i}_b3"], H=Ho, W=Wo)
    r = r.reshape(M, 256)

    # ---- c4 folded into the concat-free c5 kernel; f32 at the module boundary.
    x5 = c4c5(r, x2, prep["c4_w"], prep["c4_b"],
              prep["c5_wa"], prep["c5_wb"], prep["c5_b"])          # (M,512) f32
    return jnp.transpose(x5.reshape(N, Ho, Wo, 512), (0, 3, 1, 2))  # NCHW


# ----------------------------------------------------------------------------
# Pure-JAX reference (mirrors the kernel's bf16 rounding points, exact Mish)
# ----------------------------------------------------------------------------
def _round_bf16(x):
    return x.astype(jnp.bfloat16).astype(jnp.float32)


def _ref_conv_mish(x, wf, bias, *, stride, pad):
    wr = jnp.transpose(wf.astype(jnp.float32), (2, 3, 1, 0))      # HWIO
    y = jax.lax.conv_general_dilated(
        x, wr, window_strides=(stride, stride),
        padding=[(pad, pad), (pad, pad)],
        dimension_numbers=("NHWC", "HWIO", "NHWC"),
        precision=jax.lax.Precision.HIGHEST)
    y = y + bias
    return y * jnp.tanh(jax.nn.softplus(y))


def downsample4_ref(x_nchw, params):
    folded = {name: (_fold(w, s), b) for name, (w, s, b) in params.items()}
    x = _round_bf16(jnp.transpose(x_nchw, (0, 2, 3, 1)))
    x1 = _round_bf16(_ref_conv_mish(x, *folded["c1"], stride=2, pad=1))
    x2 = _round_bf16(_ref_conv_mish(x1, *folded["c2"], stride=1, pad=0))
    x3 = _round_bf16(_ref_conv_mish(x1, *folded["c3"], stride=1, pad=0))
    r = x3
    for i in range(NUM_RES_BLOCKS):
        h = _round_bf16(_ref_conv_mish(r, *folded[f"res{i}_0"], stride=1, pad=0))
        r = _round_bf16(_ref_conv_mish(h, *folded[f"res{i}_1"], stride=1, pad=1) + r)
    x4 = _round_bf16(_ref_conv_mish(r, *folded["c4"], stride=1, pad=0))
    cat = jnp.concatenate([x4, x2], axis=-1)
    x5 = _ref_conv_mish(cat, *folded["c5"], stride=1, pad=0)
    return jnp.transpose(x5, (0, 3, 1, 2))


if __name__ == "__main__":
    key = jax.random.PRNGKey(0)
    kx, kp = jax.random.split(key)
    # Small but consistent with the module: Cin=256 required by c1; spatial 16.
    x = jax.random.normal(kx, (2, 256, 16, 16), jnp.float32)
    params = init_params(kp)
    prep = prepare_params(params)            # BN fold / layout hoisted out of jit

    out = jax.block_until_ready(downsample4_forward(x, prep))
    assert out.shape == (2, 512, 8, 8), out.shape

    ref = jax.block_until_ready(downsample4_ref(x, params))
    err = float(jnp.max(jnp.abs(out - ref)))
    # bf16 activations/matmuls + approximate-reciprocal Mish across 21 layers.
    tol = 5e-2 * (1.0 + float(jnp.max(jnp.abs(ref))))
    assert err < tol, (err, tol)

    print("KERNEL_OK")
</pallas_src>

<mosaic_0001>
module attributes {stable_mosaic.version = 11 : i64} {
  func.func @_mm_bias_mish_kernel(%arg0: i32, %arg1: memref<64x2304xbf16, #tpu.memory_space<vmem>>, %arg2: memref<2304x512xbf16, #tpu.memory_space<vmem>>, %arg3: memref<1x512xf32, #tpu.memory_space<vmem>>, %arg4: memref<64x512xbf16, #tpu.memory_space<vmem>>) attributes {dimension_semantics = [#tpu.dimension_semantics<parallel>], iteration_bounds = array<i64: 2>, scalar_prefetch = 0 : i64, scratch_operands = 0 : i64, tpu.core_type = #tpu.core_type<tc>, window_params = [{transform_indices = @transform_0, window_bounds = array<i64: 64, 2304>}, {pipeline_mode = #tpu.pipeline_mode<synchronous>, transform_indices = @transform_1, window_bounds = array<i64: 2304, 512>}, {pipeline_mode = #tpu.pipeline_mode<synchronous>, transform_indices = @transform_2, window_bounds = array<i64: 1, 512>}, {transform_indices = @transform_3, window_bounds = array<i64: 64, 512>}]} {
    %c0 = arith.constant 0 : index
    %c0_0 = arith.constant 0 : index
    %0 = vector.load %arg1[%c0, %c0_0] : memref<64x2304xbf16, #tpu.memory_space<vmem>>, vector<64x2304xbf16>
    %c0_1 = arith.constant 0 : index
    %c0_2 = arith.constant 0 : index
    %1 = vector.load %arg2[%c0_1, %c0_2] : memref<2304x512xbf16, #tpu.memory_space<vmem>>, vector<2304x512xbf16>
    %cst = arith.constant dense<0.000000e+00> : vector<64x512xf32>
    %2 = tpu.matmul %0, %1, %cst {dimension_numbers = #tpu.dot_dimension_numbers<[1], [0], [0], [1], [0, 0, 1, 1], [], []>} : vector<64x2304xbf16>, vector<2304x512xbf16>, vector<64x512xf32> -> vector<64x512xf32>
    %c0_3 = arith.constant 0 : index
    %c0_4 = arith.constant 0 : index
    %3 = vector.load %arg3[%c0_3, %c0_4] : memref<1x512xf32, #tpu.memory_space<vmem>>, vector<1x512xf32>
    %4 = vector.broadcast %3 : vector<1x512xf32> to vector<64x512xf32>
    %5 = arith.addf %2, %4 : vector<64x512xf32>
    %cst_5 = arith.constant 2.000000e+01 : f32
    %6 = vector.broadcast %cst_5 : f32 to vector<64x512xf32>
    %7 = arith.minimumf %5, %6 : vector<64x512xf32>
    %8 = math.exp %7 : vector<64x512xf32>
    %cst_6 = arith.constant 2.000000e+00 : f32
    %9 = vector.broadcast %cst_6 : f32 to vector<64x512xf32>
    %10 = arith.addf %8, %9 : vector<64x512xf32>
    %11 = arith.mulf %8, %10 : vector<64x512xf32>
    %cst_7 = arith.constant 2.000000e+00 : f32
    %12 = vector.broadcast %cst_7 : f32 to vector<64x512xf32>
    %13 = arith.addf %11, %12 : vector<64x512xf32>
    %14 = tpu.reciprocal %13 {approx = true} : vector<64x512xf32> -> vector<64x512xf32>
    %cst_8 = arith.constant 2.000000e+00 : f32
    %15 = vector.broadcast %cst_8 : f32 to vector<64x512xf32>
    %16 = arith.mulf %15, %14 : vector<64x512xf32>
    %cst_9 = arith.constant 1.000000e+00 : f32
    %17 = vector.broadcast %cst_9 : f32 to vector<64x512xf32>
    %18 = arith.subf %17, %16 : vector<64x512xf32>
    %19 = arith.mulf %5, %18 : vector<64x512xf32>
    %20 = arith.truncf %19 : vector<64x512xf32> to vector<64x512xbf16>
    %c0_10 = arith.constant 0 : index
    %c0_11 = arith.constant 0 : index
    %21 = vector.load %arg4[%c0_10, %c0_11] : memref<64x512xbf16, #tpu.memory_space<vmem>>, vector<64x512xbf16>
    tpu.vector_store %arg4[%c0_10, %c0_11], %20 {strides = array<i32>} : memref<64x512xbf16, #tpu.memory_space<vmem>>, vector<64x512xbf16>,
    return
  }
  func.func @transform_0(%arg0: i32) -> (i32, i32) {
    %c0_i32 = arith.constant 0 : i32
    %c0_i32_0 = arith.constant 0 : i32
    return %arg0, %c0_i32 : i32, i32
  }
  func.func @transform_1(%arg0: i32) -> (i32, i32) {
    %c0_i32 = arith.constant 0 : i32
    %c0_i32_0 = arith.constant 0 : i32
    %c0_i32_1 = arith.constant 0 : i32
    return %c0_i32, %c0_i32_0 : i32, i32
  }
  func.func @transform_2(%arg0: i32) -> (i32, i32) {
    %c0_i32 = arith.constant 0 : i32
    %c0_i32_0 = arith.constant 0 : i32
    %c0_i32_1 = arith.constant 0 : i32
    return %c0_i32, %c0_i32_0 : i32, i32
  }
  func.func @transform_3(%arg0: i32) -> (i32, i32) {
    %c0_i32 = arith.constant 0 : i32
    %c0_i32_0 = arith.constant 0 : i32
    return %arg0, %c0_i32 : i32, i32
  }
}

module attributes {stable_mosaic.version = 11 : i64} {
  func.func @_mm_dual_bias_mish_kernel(%arg0: i32, %arg1: memref<64x512xbf16, #tpu.memory_space<vmem>>, %arg2: memref<512x256xbf16, #tpu.memory_space<vmem>>, %arg3: memref<1x256xf32, #tpu.memory_space<vmem>>, %arg4: memref<512x256xbf16, #tpu.memory_space<vmem>>, %arg5: memref<1x256xf32, #tpu.memory_space<vmem>>, %arg6: memref<64x256xbf16, #tpu.memory_space<vmem>>, %arg7: memref<64x256xbf16, #tpu.memory_space<vmem>>) attributes {dimension_semantics = [#tpu.dimension_semantics<parallel>], iteration_bounds = array<i64: 2>, scalar_prefetch = 0 : i64, scratch_operands = 0 : i64, tpu.core_type = #tpu.core_type<tc>, window_params = [{transform_indices = @transform_0, window_bounds = array<i64: 64, 512>}, {pipeline_mode = #tpu.pipeline_mode<synchronous>, transform_indices = @transform_1, window_bounds = array<i64: 512, 256>}, {pipeline_mode = #tpu.pipeline_mode<synchronous>, transform_indices = @transform_2, window_bounds = array<i64: 1, 256>}, {pipeline_mode = #tpu.pipeline_mode<synchronous>, transform_indices = @transform_3, window_bounds = array<i64: 512, 256>}, {pipeline_mode = #tpu.pipeline_mode<synchronous>, transform_indices = @transform_4, window_bounds = array<i64: 1, 256>}, {transform_indices = @transform_5, window_bounds = array<i64: 64, 256>}, {transform_indices = @transform_6, window_bounds = array<i64: 64, 256>}]} {
    %c0 = arith.constant 0 : index
    %c0_0 = arith.constant 0 : index
    %0 = vector.load %arg1[%c0, %c0_0] : memref<64x512xbf16, #tpu.memory_space<vmem>>, vector<64x512xbf16>
    %c0_1 = arith.constant 0 : index
    %c0_2 = arith.constant 0 : index
    %1 = vector.load %arg2[%c0_1, %c0_2] : memref<512x256xbf16, #tpu.memory_space<vmem>>, vector<512x256xbf16>
    %cst = arith.constant dense<0.000000e+00> : vector<64x256xf32>
    %2 = tpu.matmul %0, %1, %cst {dimension_numbers = #tpu.dot_dimension_numbers<[1], [0], [0], [1], [0, 0, 1, 1], [], []>} : vector<64x512xbf16>, vector<512x256xbf16>, vector<64x256xf32> -> vector<64x256xf32>
    %c0_3 = arith.constant 0 : index
    %c0_4 = arith.constant 0 : index
    %3 = vector.load %arg3[%c0_3, %c0_4] : memref<1x256xf32, #tpu.memory_space<vmem>>, vector<1x256xf32>
    %4 = vector.broadcast %3 : vector<1x256xf32> to vector<64x256xf32>
    %5 = arith.addf %2, %4 : vector<64x256xf32>
    %cst_5 = arith.constant 2.000000e+01 : f32
    %6 = vector.broadcast %cst_5 : f32 to vector<64x256xf32>
    %7 = arith.minimumf %5, %6 : vector<64x256xf32>
    %8 = math.exp %7 : vector<64x256xf32>
    %cst_6 = arith.constant 2.000000e+00 : f32
    %9 = vector.broadcast %cst_6 : f32 to vector<64x256xf32>
    %10 = arith.addf %8, %9 : vector<64x256xf32>
    %11 = arith.mulf %8, %10 : vector<64x256xf32>
    %cst_7 = arith.constant 2.000000e+00 : f32
    %12 = vector.broadcast %cst_7 : f32 to vector<64x256xf32>
    %13 = arith.addf %11, %12 : vector<64x256xf32>
    %14 = tpu.reciprocal %13 {approx = true} : vector<64x256xf32> -> vector<64x256xf32>
    %cst_8 = arith.constant 2.000000e+00 : f32
    %15 = vector.broadcast %cst_8 : f32 to vector<64x256xf32>
    %16 = arith.mulf %15, %14 : vector<64x256xf32>
    %cst_9 = arith.constant 1.000000e+00 : f32
    %17 = vector.broadcast %cst_9 : f32 to vector<64x256xf32>
    %18 = arith.subf %17, %16 : vector<64x256xf32>
    %19 = arith.mulf %5, %18 : vector<64x256xf32>
    %20 = arith.truncf %19 : vector<64x256xf32> to vector<64x256xbf16>
    %c0_10 = arith.constant 0 : index
    %c0_11 = arith.constant 0 : index
    %21 = vector.load %arg6[%c0_10, %c0_11] : memref<64x256xbf16, #tpu.memory_space<vmem>>, vector<64x256xbf16>
    tpu.vector_store %arg6[%c0_10, %c0_11], %20 {strides = array<i32>} : memref<64x256xbf16, #tpu.memory_space<vmem>>, vector<64x256xbf16>,
    %c0_12 = arith.constant 0 : index
    %c0_13 = arith.constant 0 : index
    %22 = vector.load %arg4[%c0_12, %c0_13] : memref<512x256xbf16, #tpu.memory_space<vmem>>, vector<512x256xbf16>
    %cst_14 = arith.constant dense<0.000000e+00> : vector<64x256xf32>
    %23 = tpu.matmul %0, %22, %cst_14 {dimension_numbers = #tpu.dot_dimension_numbers<[1], [0], [0], [1], [0, 0, 1, 1], [], []>} : vector<64x512xbf16>, vector<512x256xbf16>, vector<64x256xf32> -> vector<64x256xf32>
    %c0_15 = arith.constant 0 : index
    %c0_16 = arith.constant 0 : index
    %24 = vector.load %arg5[%c0_15, %c0_16] : memref<1x256xf32, #tpu.memory_space<vmem>>, vector<1x256xf32>
    %25 = vector.broadcast %24 : vector<1x256xf32> to vector<64x256xf32>
    %26 = arith.addf %23, %25 : vector<64x256xf32>
    %cst_17 = arith.constant 2.000000e+01 : f32
    %27 = vector.broadcast %cst_17 : f32 to vector<64x256xf32>
    %28 = arith.minimumf %26, %27 : vector<64x256xf32>
    %29 = math.exp %28 : vector<64x256xf32>
    %cst_18 = arith.constant 2.000000e+00 : f32
    %30 = vector.broadcast %cst_18 : f32 to vector<64x256xf32>
    %31 = arith.addf %29, %30 : vector<64x256xf32>
    %32 = arith.mulf %29, %31 : vector<64x256xf32>
    %cst_19 = arith.constant 2.000000e+00 : f32
    %33 = vector.broadcast %cst_19 : f32 to vector<64x256xf32>
    %34 = arith.addf %32, %33 : vector<64x256xf32>
    %35 = tpu.reciprocal %34 {approx = true} : vector<64x256xf32> -> vector<64x256xf32>
    %cst_20 = arith.constant 2.000000e+00 : f32
    %36 = vector.broadcast %cst_20 : f32 to vector<64x256xf32>
    %37 = arith.mulf %36, %35 : vector<64x256xf32>
    %cst_21 = arith.constant 1.000000e+00 : f32
    %38 = vector.broadcast %cst_21 : f32 to vector<64x256xf32>
    %39 = arith.subf %38, %37 : vector<64x256xf32>
    %40 = arith.mulf %26, %39 : vector<64x256xf32>
    %41 = arith.truncf %40 : vector<64x256xf32> to vector<64x256xbf16>
    %c0_22 = arith.constant 0 : index
    %c0_23 = arith.constant 0 : index
    %42 = vector.load %arg7[%c0_22, %c0_23] : memref<64x256xbf16, #tpu.memory_space<vmem>>, vector<64x256xbf16>
    tpu.vector_store %arg7[%c0_22, %c0_23], %41 {strides = array<i32>} : memref<64x256xbf16, #tpu.memory_space<vmem>>, vector<64x256xbf16>,
    return
  }
  func.func @transform_0(%arg0: i32) -> (i32, i32) {
    %c0_i32 = arith.constant 0 : i32
    %c0_i32_0 = arith.constant 0 : i32
    return %arg0, %c0_i32 : i32, i32
  }
  func.func @transform_1(%arg0: i32) -> (i32, i32) {
    %c0_i32 = arith.constant 0 : i32
    %c0_i32_0 = arith.constant 0 : i32
    %c0_i32_1 = arith.constant 0 : i32
    return %c0_i32, %c0_i32_0 : i32, i32
  }
  func.func @transform_2(%arg0: i32) -> (i32, i32) {
    %c0_i32 = arith.constant 0 : i32
    %c0_i32_0 = arith.constant 0 : i32
    %c0_i32_1 = arith.constant 0 : i32
    return %c0_i32, %c0_i32_0 : i32, i32
  }
  func.func @transform_3(%arg0: i32) -> (i32, i32) {
    %c0_i32 = arith.constant 0 : i32
    %c0_i32_0 = arith.constant 0 : i32
    %c0_i32_1 = arith.constant 0 : i32
    return %c0_i32, %c0_i32_0 : i32, i32
  }
  func.func @transform_4(%arg0: i32) -> (i32, i32) {
    %c0_i32 = arith.constant 0 : i32
    %c0_i32_0 = arith.constant 0 : i32
    %c0_i32_1 = arith.constant 0 : i32
    return %c0_i32, %c0_i32_0 : i32, i32
  }
  func.func @transform_5(%arg0: i32) -> (i32, i32) {
    %c0_i32 = arith.constant 0 : i32
    %c0_i32_0 = arith.constant 0 : i32
    return %arg0, %c0_i32 : i32, i32
  }
  func.func @transform_6(%arg0: i32) -> (i32, i32) {
    %c0_i32 = arith.constant 0 : i32
    %c0_i32_0 = arith.constant 0 : i32
    return %arg0, %c0_i32 : i32, i32
  }
}

module attributes {stable_mosaic.version = 11 : i64} {
  func.func @_resblock_kernel(%arg0: i32, %arg1: memref<1x64x256xbf16, #tpu.memory_space<vmem>>, %arg2: memref<256x256xbf16, #tpu.memory_space<vmem>>, %arg3: memref<1x256xf32, #tpu.memory_space<vmem>>, %arg4: memref<9x256x256xbf16, #tpu.memory_space<vmem>>, %arg5: memref<1x256xf32, #tpu.memory_space<vmem>>, %arg6: memref<1x64x256xbf16, #tpu.memory_space<vmem>>, %arg7: memref<10x10x256xbf16, #tpu.memory_space<vmem>>) attributes {dimension_semantics = [#tpu.dimension_semantics<parallel>], iteration_bounds = array<i64: 2>, scalar_prefetch = 0 : i64, scratch_operands = 1 : i64, tpu.core_type = #tpu.core_type<tc>, window_params = [{transform_indices = @transform_0, window_bounds = array<i64: 1, 64, 256>}, {pipeline_mode = #tpu.pipeline_mode<synchronous>, transform_indices = @transform_1, window_bounds = array<i64: 256, 256>}, {pipeline_mode = #tpu.pipeline_mode<synchronous>, transform_indices = @transform_2, window_bounds = array<i64: 1, 256>}, {pipeline_mode = #tpu.pipeline_mode<synchronous>, transform_indices = @transform_3, window_bounds = array<i64: 9, 256, 256>}, {pipeline_mode = #tpu.pipeline_mode<synchronous>, transform_indices = @transform_4, window_bounds = array<i64: 1, 256>}, {transform_indices = @transform_5, window_bounds = array<i64: 1, 64, 256>}]} {
    %c0 = arith.constant 0 : index
    %c0_0 = arith.constant 0 : index
    %c0_1 = arith.constant 0 : index
    %0 = vector.load %arg1[%c0, %c0_0, %c0_1] : memref<1x64x256xbf16, #tpu.memory_space<vmem>>, vector<1x64x256xbf16>
    %1 = vector.shape_cast %0 : vector<1x64x256xbf16> to vector<64x256xbf16>
    %c0_2 = arith.constant 0 : index
    %c0_3 = arith.constant 0 : index
    %2 = vector.load %arg2[%c0_2, %c0_3] : memref<256x256xbf16, #tpu.memory_space<vmem>>, vector<256x256xbf16>
    %cst = arith.constant dense<0.000000e+00> : vector<64x256xf32>
    %3 = tpu.matmul %1, %2, %cst {dimension_numbers = #tpu.dot_dimension_numbers<[1], [0], [0], [1], [0, 0, 1, 1], [], []>} : vector<64x256xbf16>, vector<256x256xbf16>, vector<64x256xf32> -> vector<64x256xf32>
    %c0_4 = arith.constant 0 : index
    %c0_5 = arith.constant 0 : index
    %4 = vector.load %arg3[%c0_4, %c0_5] : memref<1x256xf32, #tpu.memory_space<vmem>>, vector<1x256xf32>
    %5 = vector.broadcast %4 : vector<1x256xf32> to vector<64x256xf32>
    %6 = arith.addf %3, %5 : vector<64x256xf32>
    %cst_6 = arith.constant 2.000000e+01 : f32
    %7 = vector.broadcast %cst_6 : f32 to vector<64x256xf32>
    %8 = arith.minimumf %6, %7 : vector<64x256xf32>
    %9 = math.exp %8 : vector<64x256xf32>
    %cst_7 = arith.constant 2.000000e+00 : f32
    %10 = vector.broadcast %cst_7 : f32 to vector<64x256xf32>
    %11 = arith.addf %9, %10 : vector<64x256xf32>
    %12 = arith.mulf %9, %11 : vector<64x256xf32>
    %cst_8 = arith.constant 2.000000e+00 : f32
    %13 = vector.broadcast %cst_8 : f32 to vector<64x256xf32>
    %14 = arith.addf %12, %13 : vector<64x256xf32>
    %15 = tpu.reciprocal %14 {approx = true} : vector<64x256xf32> -> vector<64x256xf32>
    %cst_9 = arith.constant 2.000000e+00 : f32
    %16 = vector.broadcast %cst_9 : f32 to vector<64x256xf32>
    %17 = arith.mulf %16, %15 : vector<64x256xf32>
    %cst_10 = arith.constant 1.000000e+00 : f32
    %18 = vector.broadcast %cst_10 : f32 to vector<64x256xf32>
    %19 = arith.subf %18, %17 : vector<64x256xf32>
    %20 = arith.mulf %6, %19 : vector<64x256xf32>
    %21 = arith.truncf %20 : vector<64x256xf32> to vector<64x256xbf16>
    %cst_11 = arith.constant 0.000000e+00 : bf16
    %22 = vector.broadcast %cst_11 : bf16 to vector<10x10x256xbf16>
    %c0_12 = arith.constant 0 : index
    %c0_13 = arith.constant 0 : index
    %c0_14 = arith.constant 0 : index
    %23 = vector.load %arg7[%c0_12, %c0_13, %c0_14] : memref<10x10x256xbf16, #tpu.memory_space<vmem>>, vector<10x10x256xbf16>
    tpu.vector_store %arg7[%c0_12, %c0_13, %c0_14], %22 {strides = array<i32>} : memref<10x10x256xbf16, #tpu.memory_space<vmem>>, vector<10x10x256xbf16>,
    %24 = vector.shape_cast %21 : vector<64x256xbf16> to vector<8x8x256xbf16>
    %c1 = arith.constant 1 : index
    %c1_15 = arith.constant 1 : index
    %c0_16 = arith.constant 0 : index
    %25 = vector.load %arg7[%c1, %c1_15, %c0_16] : memref<10x10x256xbf16, #tpu.memory_space<vmem>>, vector<8x8x256xbf16>
    tpu.vector_store %arg7[%c1, %c1_15, %c0_16], %24 {strides = array<i32>} : memref<10x10x256xbf16, #tpu.memory_space<vmem>>, vector<8x8x256xbf16>,
    %cst_17 = arith.constant 0.000000e+00 : f32
    %26 = vector.broadcast %cst_17 : f32 to vector<64x256xf32>
    %c0_18 = arith.constant 0 : index
    %c0_19 = arith.constant 0 : index
    %c0_20 = arith.constant 0 : index
    %27 = vector.load %arg7[%c0_18, %c0_19, %c0_20] : memref<10x10x256xbf16, #tpu.memory_space<vmem>>, vector<8x8x256xbf16>
    %28 = vector.shape_cast %27 : vector<8x8x256xbf16> to vector<64x256xbf16>
    %c0_21 = arith.constant 0 : index
    %c0_22 = arith.constant 0 : index
    %c0_23 = arith.constant 0 : index
    %29 = vector.load %arg4[%c0_21, %c0_22, %c0_23] : memref<9x256x256xbf16, #tpu.memory_space<vmem>>, vector<1x256x256xbf16>
    %30 = vector.shape_cast %29 : vector<1x256x256xbf16> to vector<256x256xbf16>
    %cst_24 = arith.constant dense<0.000000e+00> : vector<64x256xf32>
    %31 = tpu.matmul %28, %30, %cst_24 {dimension_numbers = #tpu.dot_dimension_numbers<[1], [0], [0], [1], [0, 0, 1, 1], [], []>} : vector<64x256xbf16>, vector<256x256xbf16>, vector<64x256xf32> -> vector<64x256xf32>
    %32 = arith.addf %26, %31 : vector<64x256xf32>
    %c0_25 = arith.constant 0 : index
    %c1_26 = arith.constant 1 : index
    %c0_27 = arith.constant 0 : index
    %33 = vector.load %arg7[%c0_25, %c1_26, %c0_27] : memref<10x10x256xbf16, #tpu.memory_space<vmem>>, vector<8x8x256xbf16>
    %34 = vector.shape_cast %33 : vector<8x8x256xbf16> to vector<64x256xbf16>
    %c1_28 = arith.constant 1 : index
    %c0_29 = arith.constant 0 : index
    %c0_30 = arith.constant 0 : index
    %35 = vector.load %arg4[%c1_28, %c0_29, %c0_30] : memref<9x256x256xbf16, #tpu.memory_space<vmem>>, vector<1x256x256xbf16>
    %36 = vector.shape_cast %35 : vector<1x256x256xbf16> to vector<256x256xbf16>
    %cst_31 = arith.constant dense<0.000000e+00> : vector<64x256xf32>
    %37 = tpu.matmul %34, %36, %cst_31 {dimension_numbers = #tpu.dot_dimension_numbers<[1], [0], [0], [1], [0, 0, 1, 1], [], []>} : vector<64x256xbf16>, vector<256x256xbf16>, vector<64x256xf32> -> vector<64x256xf32>
    %38 = arith.addf %32, %37 : vector<64x256xf32>
    %c0_32 = arith.constant 0 : index
    %c2 = arith.constant 2 : index
    %c0_33 = arith.constant 0 : index
    %39 = vector.load %arg7[%c0_32, %c2, %c0_33] : memref<10x10x256xbf16, #tpu.memory_space<vmem>>, vector<8x8x256xbf16>
    %40 = vector.shape_cast %39 : vector<8x8x256xbf16> to vector<64x256xbf16>
    %c2_34 = arith.constant 2 : index
    %c0_35 = arith.constant 0 : index
    %c0_36 = arith.constant 0 : index
    %41 = vector.load %arg4[%c2_34, %c0_35, %c0_36] : memref<9x256x256xbf16, #tpu.memory_space<vmem>>, vector<1x256x256xbf16>
    %42 = vector.shape_cast %41 : vector<1x256x256xbf16> to vector<256x256xbf16>
    %cst_37 = arith.constant dense<0.000000e+00> : vector<64x256xf32>
    %43 = tpu.matmul %40, %42, %cst_37 {dimension_numbers = #tpu.dot_dimension_numbers<[1], [0], [0], [1], [0, 0, 1, 1], [], []>} : vector<64x256xbf16>, vector<256x256xbf16>, vector<64x256xf32> -> vector<64x256xf32>
    %44 = arith.addf %38, %43 : vector<64x256xf32>
    %c1_38 = arith.constant 1 : index
    %c0_39 = arith.constant 0 : index
    %c0_40 = arith.constant 0 : index
    %45 = vector.load %arg7[%c1_38, %c0_39, %c0_40] : memref<10x10x256xbf16, #tpu.memory_space<vmem>>, vector<8x8x256xbf16>
    %46 = vector.shape_cast %45 : vector<8x8x256xbf16> to vector<64x256xbf16>
    %c3 = arith.constant 3 : index
    %c0_41 = arith.constant 0 : index
    %c0_42 = arith.constant 0 : index
    %47 = vector.load %arg4[%c3, %c0_41, %c0_42] : memref<9x256x256xbf16, #tpu.memory_space<vmem>>, vector<1x256x256xbf16>
    %48 = vector.shape_cast %47 : vector<1x256x256xbf16> to vector<256x256xbf16>
    %cst_43 = arith.constant dense<0.000000e+00> : vector<64x256xf32>
    %49 = tpu.matmul %46, %48, %cst_43 {dimension_numbers = #tpu.dot_dimension_numbers<[1], [0], [0], [1], [0, 0, 1, 1], [], []>} : vector<64x256xbf16>, vector<256x256xbf16>, vector<64x256xf32> -> vector<64x256xf32>
    %50 = arith.addf %44, %49 : vector<64x256xf32>
    %c1_44 = arith.constant 1 : index
    %c1_45 = arith.constant 1 : index
    %c0_46 = arith.constant 0 : index
    %51 = vector.load %arg7[%c1_44, %c1_45, %c0_46] : memref<10x10x256xbf16, #tpu.memory_space<vmem>>, vector<8x8x256xbf16>
    %52 = vector.shape_cast %51 : vector<8x8x256xbf16> to vector<64x256xbf16>
    %c4 = arith.constant 4 : index
    %c0_47 = arith.constant 0 : index
    %c0_48 = arith.constant 0 : index
    %53 = vector.load %arg4[%c4, %c0_47, %c0_48] : memref<9x256x256xbf16, #tpu.memory_space<vmem>>, vector<1x256x256xbf16>
    %54 = vector.shape_cast %53 : vector<1x256x256xbf16> to vector<256x256xbf16>
    %cst_49 = arith.constant dense<0.000000e+00> : vector<64x256xf32>
    %55 = tpu.matmul %52, %54, %cst_49 {dimension_numbers = #tpu.dot_dimension_numbers<[1], [0], [0], [1], [0, 0, 1, 1], [], []>} : vector<64x256xbf16>, vector<256x256xbf16>, vector<64x256xf32> -> vector<64x256xf32>
    %56 = arith.addf %50, %55 : vector<64x256xf32>
    %c1_50 = arith.constant 1 : index
    %c2_51 = arith.constant 2 : index
    %c0_52 = arith.constant 0 : index
    %57 = vector.load %arg7[%c1_50, %c2_51, %c0_52] : memref<10x10x256xbf16, #tpu.memory_space<vmem>>, vector<8x8x256xbf16>
    %58 = vector.shape_cast %57 : vector<8x8x256xbf16> to vector<64x256xbf16>
    %c5 = arith.constant 5 : index
    %c0_53 = arith.constant 0 : index
    %c0_54 = arith.constant 0 : index
    %59 = vector.load %arg4[%c5, %c0_53, %c0_54] : memref<9x256x256xbf16, #tpu.memory_space<vmem>>, vector<1x256x256xbf16>
    %60 = vector.shape_cast %59 : vector<1x256x256xbf16> to vector<256x256xbf16>
    %cst_55 = arith.constant dense<0.000000e+00> : vector<64x256xf32>
    %61 = tpu.matmul %58, %60, %cst_55 {dimension_numbers = #tpu.dot_dimension_numbers<[1], [0], [0], [1], [0, 0, 1, 1], [], []>} : vector<64x256xbf16>, vector<256x256xbf16>, vector<64x256xf32> -> vector<64x256xf32>
    %62 = arith.addf %56, %61 : vector<64x256xf32>
    %c2_56 = arith.constant 2 : index
    %c0_57 = arith.constant 0 : index
    %c0_58 = arith.constant 0 : index
    %63 = vector.load %arg7[%c2_56, %c0_57, %c0_58] : memref<10x10x256xbf16, #tpu.memory_space<vmem>>, vector<8x8x256xbf16>
    %64 = vector.shape_cast %63 : vector<8x8x256xbf16> to vector<64x256xbf16>
    %c6 = arith.constant 6 : index
    %c0_59 = arith.constant 0 : index
    %c0_60 = arith.constant 0 : index
    %65 = vector.load %arg4[%c6, %c0_59, %c0_60] : memref<9x256x256xbf16, #tpu.memory_space<vmem>>, vector<1x256x256xbf16>
    %66 = vector.shape_cast %65 : vector<1x256x256xbf16> to vector<256x256xbf16>
    %cst_61 = arith.constant dense<0.000000e+00> : vector<64x256xf32>
    %67 = tpu.matmul %64, %66, %cst_61 {dimension_numbers = #tpu.dot_dimension_numbers<[1], [0], [0], [1], [0, 0, 1, 1], [], []>} : vector<64x256xbf16>, vector<256x256xbf16>, vector<64x256xf32> -> vector<64x256xf32>
    %68 = arith.addf %62, %67 : vector<64x256xf32>
    %c2_62 = arith.constant 2 : index
    %c1_63 = arith.constant 1 : index
    %c0_64 = arith.constant 0 : index
    %69 = vector.load %arg7[%c2_62, %c1_63, %c0_64] : memref<10x10x256xbf16, #tpu.memory_space<vmem>>, vector<8x8x256xbf16>
    %70 = vector.shape_cast %69 : vector<8x8x256xbf16> to vector<64x256xbf16>
    %c7 = arith.constant 7 : index
    %c0_65 = arith.constant 0 : index
    %c0_66 = arith.constant 0 : index
    %71 = vector.load %arg4[%c7, %c0_65, %c0_66] : memref<9x256x256xbf16, #tpu.memory_space<vmem>>, vector<1x256x256xbf16>
    %72 = vector.shape_cast %71 : vector<1x256x256xbf16> to vector<256x256xbf16>
    %cst_67 = arith.constant dense<0.000000e+00> : vector<64x256xf32>
    %73 = tpu.matmul %70, %72, %cst_67 {dimension_numbers = #tpu.dot_dimension_numbers<[1], [0], [0], [1], [0, 0, 1, 1], [], []>} : vector<64x256xbf16>, vector<256x256xbf16>, vector<64x256xf32> -> vector<64x256xf32>
    %74 = arith.addf %68, %73 : vector<64x256xf32>
    %c2_68 = arith.constant 2 : index
    %c2_69 = arith.constant 2 : index
    %c0_70 = arith.constant 0 : index
    %75 = vector.load %arg7[%c2_68, %c2_69, %c0_70] : memref<10x10x256xbf16, #tpu.memory_space<vmem>>, vector<8x8x256xbf16>
    %76 = vector.shape_cast %75 : vector<8x8x256xbf16> to vector<64x256xbf16>
    %c8 = arith.constant 8 : index
    %c0_71 = arith.constant 0 : index
    %c0_72 = arith.constant 0 : index
    %77 = vector.load %arg4[%c8, %c0_71, %c0_72] : memref<9x256x256xbf16, #tpu.memory_space<vmem>>, vector<1x256x256xbf16>
    %78 = vector.shape_cast %77 : vector<1x256x256xbf16> to vector<256x256xbf16>
    %cst_73 = arith.constant dense<0.000000e+00> : vector<64x256xf32>
    %79 = tpu.matmul %76, %78, %cst_73 {dimension_numbers = #tpu.dot_dimension_numbers<[1], [0], [0], [1], [0, 0, 1, 1], [], []>} : vector<64x256xbf16>, vector<256x256xbf16>, vector<64x256xf32> -> vector<64x256xf32>
    %80 = arith.addf %74, %79 : vector<64x256xf32>
    %c0_74 = arith.constant 0 : index
    %c0_75 = arith.constant 0 : index
    %81 = vector.load %arg5[%c0_74, %c0_75] : memref<1x256xf32, #tpu.memory_space<vmem>>, vector<1x256xf32>
    %82 = vector.broadcast %81 : vector<1x256xf32> to vector<64x256xf32>
    %83 = arith.addf %80, %82 : vector<64x256xf32>
    %cst_76 = arith.constant 2.000000e+01 : f32
    %84 = vector.broadcast %cst_76 : f32 to vector<64x256xf32>
    %85 = arith.minimumf %83, %84 : vector<64x256xf32>
    %86 = math.exp %85 : vector<64x256xf32>
    %cst_77 = arith.constant 2.000000e+00 : f32
    %87 = vector.broadcast %cst_77 : f32 to vector<64x256xf32>
    %88 = arith.addf %86, %87 : vector<64x256xf32>
    %89 = arith.mulf %86, %88 : vector<64x256xf32>
    %cst_78 = arith.constant 2.000000e+00 : f32
    %90 = vector.broadcast %cst_78 : f32 to vector<64x256xf32>
    %91 = arith.addf %89, %90 : vector<64x256xf32>
    %92 = tpu.reciprocal %91 {approx = true} : vector<64x256xf32> -> vector<64x256xf32>
    %cst_79 = arith.constant 2.000000e+00 : f32
    %93 = vector.broadcast %cst_79 : f32 to vector<64x256xf32>
    %94 = arith.mulf %93, %92 : vector<64x256xf32>
    %cst_80 = arith.constant 1.000000e+00 : f32
    %95 = vector.broadcast %cst_80 : f32 to vector<64x256xf32>
    %96 = arith.subf %95, %94 : vector<64x256xf32>
    %97 = arith.mulf %83, %96 : vector<64x256xf32>
    %98 = arith.extf %1 : vector<64x256xbf16> to vector<64x256xf32>
    %99 = arith.addf %97, %98 : vector<64x256xf32>
    %100 = arith.truncf %99 : vector<64x256xf32> to vector<64x256xbf16>
    %c0_81 = arith.constant 0 : index
    %c0_82 = arith.constant 0 : index
    %c0_83 = arith.constant 0 : index
    %101 = vector.load %arg6[%c0_81, %c0_82, %c0_83] : memref<1x64x256xbf16, #tpu.memory_space<vmem>>, vector<1x64x256xbf16>
    %102 = vector.shape_cast %101 : vector<1x64x256xbf16> to vector<64x256xbf16>
    %103 = vector.shape_cast %100 : vector<64x256xbf16> to vector<1x64x256xbf16>
    tpu.vector_store %arg6[%c0_81, %c0_82, %c0_83], %103 {strides = array<i32>} : memref<1x64x256xbf16, #tpu.memory_space<vmem>>, vector<1x64x256xbf16>,
    return
  }
  func.func @transform_0(%arg0: i32) -> (i32, i32, i32) {
    %c0_i32 = arith.constant 0 : i32
    %c0_i32_0 = arith.constant 0 : i32
    %c0_i32_1 = arith.constant 0 : i32
    return %arg0, %c0_i32, %c0_i32_0 : i32, i32, i32
  }
  func.func @transform_1(%arg0: i32) -> (i32, i32) {
    %c0_i32 = arith.constant 0 : i32
    %c0_i32_0 = arith.constant 0 : i32
    %c0_i32_1 = arith.constant 0 : i32
    return %c0_i32, %c0_i32_0 : i32, i32
  }
  func.func @transform_2(%arg0: i32) -> (i32, i32) {
    %c0_i32 = arith.constant 0 : i32
    %c0_i32_0 = arith.constant 0 : i32
    %c0_i32_1 = arith.constant 0 : i32
    return %c0_i32, %c0_i32_0 : i32, i32
  }
  func.func @transform_3(%arg0: i32) -> (i32, i32, i32) {
    %c0_i32 = arith.constant 0 : i32
    %c0_i32_0 = arith.constant 0 : i32
    %c0_i32_1 = arith.constant 0 : i32
    %c0_i32_2 = arith.constant 0 : i32
    return %c0_i32, %c0_i32_0, %c0_i32_1 : i32, i32, i32
  }
  func.func @transform_4(%arg0: i32) -> (i32, i32) {
    %c0_i32 = arith.constant 0 : i32
    %c0_i32_0 = arith.constant 0 : i32
    %c0_i32_1 = arith.constant 0 : i32
    return %c0_i32, %c0_i32_0 : i32, i32
  }
  func.func @transform_5(%arg0: i32) -> (i32, i32, i32) {
    %c0_i32 = arith.constant 0 : i32
    %c0_i32_0 = arith.constant 0 : i32
    %c0_i32_1 = arith.constant 0 : i32
    return %arg0, %c0_i32, %c0_i32_0 : i32, i32, i32
  }
}

module attributes {stable_mosaic.version = 11 : i64} {
  func.func @_c4c5_kernel(%arg0: i32, %arg1: memref<64x256xbf16, #tpu.memory_space<vmem>>, %arg2: memref<64x256xbf16, #tpu.memory_space<vmem>>, %arg3: memref<256x256xbf16, #tpu.memory_space<vmem>>, %arg4: memref<1x256xf32, #tpu.memory_space<vmem>>, %arg5: memref<256x512xbf16, #tpu.memory_space<vmem>>, %arg6: memref<256x512xbf16, #tpu.memory_space<vmem>>, %arg7: memref<1x512xf32, #tpu.memory_space<vmem>>, %arg8: memref<64x512xf32, #tpu.memory_space<vmem>>) attributes {dimension_semantics = [#tpu.dimension_semantics<parallel>], iteration_bounds = array<i64: 2>, scalar_prefetch = 0 : i64, scratch_operands = 0 : i64, tpu.core_type = #tpu.core_type<tc>, window_params = [{transform_indices = @transform_0, window_bounds = array<i64: 64, 256>}, {transform_indices = @transform_1, window_bounds = array<i64: 64, 256>}, {pipeline_mode = #tpu.pipeline_mode<synchronous>, transform_indices = @transform_2, window_bounds = array<i64: 256, 256>}, {pipeline_mode = #tpu.pipeline_mode<synchronous>, transform_indices = @transform_3, window_bounds = array<i64: 1, 256>}, {pipeline_mode = #tpu.pipeline_mode<synchronous>, transform_indices = @transform_4, window_bounds = array<i64: 256, 512>}, {pipeline_mode = #tpu.pipeline_mode<synchronous>, transform_indices = @transform_5, window_bounds = array<i64: 256, 512>}, {pipeline_mode = #tpu.pipeline_mode<synchronous>, transform_indices = @transform_6, window_bounds = array<i64: 1, 512>}, {transform_indices = @transform_7, window_bounds = array<i64: 64, 512>}]} {
    %c0 = arith.constant 0 : index
    %c0_0 = arith.constant 0 : index
    %0 = vector.load %arg1[%c0, %c0_0] : memref<64x256xbf16, #tpu.memory_space<vmem>>, vector<64x256xbf16>
    %c0_1 = arith.constant 0 : index
    %c0_2 = arith.constant 0 : index
    %1 = vector.load %arg3[%c0_1, %c0_2] : memref<256x256xbf16, #tpu.memory_space<vmem>>, vector<256x256xbf16>
    %cst = arith.constant dense<0.000000e+00> : vector<64x256xf32>
    %2 = tpu.matmul %0, %1, %cst {dimension_numbers = #tpu.dot_dimension_numbers<[1], [0], [0], [1], [0, 0, 1, 1], [], []>} : vector<64x256xbf16>, vector<256x256xbf16>, vector<64x256xf32> -> vector<64x256xf32>
    %c0_3 = arith.constant 0 : index
    %c0_4 = arith.constant 0 : index
    %3 = vector.load %arg4[%c0_3, %c0_4] : memref<1x256xf32, #tpu.memory_space<vmem>>, vector<1x256xf32>
    %4 = vector.broadcast %3 : vector<1x256xf32> to vector<64x256xf32>
    %5 = arith.addf %2, %4 : vector<64x256xf32>
    %cst_5 = arith.constant 2.000000e+01 : f32
    %6 = vector.broadcast %cst_5 : f32 to vector<64x256xf32>
    %7 = arith.minimumf %5, %6 : vector<64x256xf32>
    %8 = math.exp %7 : vector<64x256xf32>
    %cst_6 = arith.constant 2.000000e+00 : f32
    %9 = vector.broadcast %cst_6 : f32 to vector<64x256xf32>
    %10 = arith.addf %8, %9 : vector<64x256xf32>
    %11 = arith.mulf %8, %10 : vector<64x256xf32>
    %cst_7 = arith.constant 2.000000e+00 : f32
    %12 = vector.broadcast %cst_7 : f32 to vector<64x256xf32>
    %13 = arith.addf %11, %12 : vector<64x256xf32>
    %14 = tpu.reciprocal %13 {approx = true} : vector<64x256xf32> -> vector<64x256xf32>
    %cst_8 = arith.constant 2.000000e+00 : f32
    %15 = vector.broadcast %cst_8 : f32 to vector<64x256xf32>
    %16 = arith.mulf %15, %14 : vector<64x256xf32>
    %cst_9 = arith.constant 1.000000e+00 : f32
    %17 = vector.broadcast %cst_9 : f32 to vector<64x256xf32>
    %18 = arith.subf %17, %16 : vector<64x256xf32>
    %19 = arith.mulf %5, %18 : vector<64x256xf32>
    %20 = arith.truncf %19 : vector<64x256xf32> to vector<64x256xbf16>
    %c0_10 = arith.constant 0 : index
    %c0_11 = arith.constant 0 : index
    %21 = vector.load %arg5[%c0_10, %c0_11] : memref<256x512xbf16, #tpu.memory_space<vmem>>, vector<256x512xbf16>
    %cst_12 = arith.constant dense<0.000000e+00> : vector<64x512xf32>
    %22 = tpu.matmul %20, %21, %cst_12 {dimension_numbers = #tpu.dot_dimension_numbers<[1], [0], [0], [1], [0, 0, 1, 1], [], []>} : vector<64x256xbf16>, vector<256x512xbf16>, vector<64x512xf32> -> vector<64x512xf32>
    %c0_13 = arith.constant 0 : index
    %c0_14 = arith.constant 0 : index
    %23 = vector.load %arg2[%c0_13, %c0_14] : memref<64x256xbf16, #tpu.memory_space<vmem>>, vector<64x256xbf16>
    %c0_15 = arith.constant 0 : index
    %c0_16 = arith.constant 0 : index
    %24 = vector.load %arg6[%c0_15, %c0_16] : memref<256x512xbf16, #tpu.memory_space<vmem>>, vector<256x512xbf16>
    %cst_17 = arith.constant dense<0.000000e+00> : vector<64x512xf32>
    %25 = tpu.matmul %23, %24, %cst_17 {dimension_numbers = #tpu.dot_dimension_numbers<[1], [0], [0], [1], [0, 0, 1, 1], [], []>} : vector<64x256xbf16>, vector<256x512xbf16>, vector<64x512xf32> -> vector<64x512xf32>
    %26 = arith.addf %22, %25 : vector<64x512xf32>
    %c0_18 = arith.constant 0 : index
    %c0_19 = arith.constant 0 : index
    %27 = vector.load %arg7[%c0_18, %c0_19] : memref<1x512xf32, #tpu.memory_space<vmem>>, vector<1x512xf32>
    %28 = vector.broadcast %27 : vector<1x512xf32> to vector<64x512xf32>
    %29 = arith.addf %26, %28 : vector<64x512xf32>
    %cst_20 = arith.constant 2.000000e+01 : f32
    %30 = vector.broadcast %cst_20 : f32 to vector<64x512xf32>
    %31 = arith.minimumf %29, %30 : vector<64x512xf32>
    %32 = math.exp %31 : vector<64x512xf32>
    %cst_21 = arith.constant 2.000000e+00 : f32
    %33 = vector.broadcast %cst_21 : f32 to vector<64x512xf32>
    %34 = arith.addf %32, %33 : vector<64x512xf32>
    %35 = arith.mulf %32, %34 : vector<64x512xf32>
    %cst_22 = arith.constant 2.000000e+00 : f32
    %36 = vector.broadcast %cst_22 : f32 to vector<64x512xf32>
    %37 = arith.addf %35, %36 : vector<64x512xf32>
    %38 = tpu.reciprocal %37 {approx = true} : vector<64x512xf32> -> vector<64x512xf32>
    %cst_23 = arith.constant 2.000000e+00 : f32
    %39 = vector.broadcast %cst_23 : f32 to vector<64x512xf32>
    %40 = arith.mulf %39, %38 : vector<64x512xf32>
    %cst_24 = arith.constant 1.000000e+00 : f32
    %41 = vector.broadcast %cst_24 : f32 to vector<64x512xf32>
    %42 = arith.subf %41, %40 : vector<64x512xf32>
    %43 = arith.mulf %29, %42 : vector<64x512xf32>
    %c0_25 = arith.constant 0 : index
    %c0_26 = arith.constant 0 : index
    %44 = vector.load %arg8[%c0_25, %c0_26] : memref<64x512xf32, #tpu.memory_space<vmem>>, vector<64x512xf32>
    tpu.vector_store %arg8[%c0_25, %c0_26], %43 {strides = array<i32>} : memref<64x512xf32, #tpu.memory_space<vmem>>, vector<64x512xf32>,
    return
  }
  func.func @transform_0(%arg0: i32) -> (i32, i32) {
    %c0_i32 = arith.constant 0 : i32
    %c0_i32_0 = arith.constant 0 : i32
    return %arg0, %c0_i32 : i32, i32
  }
  func.func @transform_1(%arg0: i32) -> (i32, i32) {
    %c0_i32 = arith.constant 0 : i32
    %c0_i32_0 = arith.constant 0 : i32
    return %arg0, %c0_i32 : i32, i32
  }
  func.func @transform_2(%arg0: i32) -> (i32, i32) {
    %c0_i32 = arith.constant 0 : i32
    %c0_i32_0 = arith.constant 0 : i32
    %c0_i32_1 = arith.constant 0 : i32
    return %c0_i32, %c0_i32_0 : i32, i32
  }
  func.func @transform_3(%arg0: i32) -> (i32, i32) {
    %c0_i32 = arith.constant 0 : i32
    %c0_i32_0 = arith.constant 0 : i32
    %c0_i32_1 = arith.constant 0 : i32
    return %c0_i32, %c0_i32_0 : i32, i32
  }
  func.func @transform_4(%arg0: i32) -> (i32, i32) {
    %c0_i32 = arith.constant 0 : i32
    %c0_i32_0 = arith.constant 0 : i32
    %c0_i32_1 = arith.constant 0 : i32
    return %c0_i32, %c0_i32_0 : i32, i32
  }
  func.func @transform_5(%arg0: i32) -> (i32, i32) {
    %c0_i32 = arith.constant 0 : i32
    %c0_i32_0 = arith.constant 0 : i32
    %c0_i32_1 = arith.constant 0 : i32
    return %c0_i32, %c0_i32_0 : i32, i32
  }
  func.func @transform_6(%arg0: i32) -> (i32, i32) {
    %c0_i32 = arith.constant 0 : i32
    %c0_i32_0 = arith.constant 0 : i32
    %c0_i32_1 = arith.constant 0 : i32
    return %c0_i32, %c0_i32_0 : i32, i32
  }
  func.func @transform_7(%arg0: i32) -> (i32, i32) {
    %c0_i32 = arith.constant 0 : i32
    %c0_i32_0 = arith.constant 0 : i32
    return %arg0, %c0_i32 : i32, i32
  }
}

</mosaic_0001>

<bundles_post_ra>
// kernel: downsample4_forward.12
= control target key start
LH: loop header
LB: loop body
LE: loop exit
PB: predicated region body
PF: predicated region fallthrough
CT: control target
= control target key end

     0   :  { %s2572_s21 = smov 0   ;;  %s3274_s0 = inlined_call_operand.vmem [shape: bf16[128,512], index: 0, kind: input, shape index: {}]   ;;  %s3275_s1 = inlined_call_operand.vmem [shape: bf16[512,256], index: 1, kind: input, shape index: {}]   ;;  %s3276_s2 = inlined_call_operand.vmem [shape: f32[1,256], index: 2, kind: input, shape index: {}]   ;;  %s3277_s3 = inlined_call_operand.vmem [shape: bf16[512,256], index: 3, kind: input, shape index: {}]   ;;  %s3278_s4 = inlined_call_operand.vmem [shape: f32[1,256], index: 4, kind: input, shape index: {}]   ;;  %s3279_s5 = inlined_call_operand.vmem [shape: bf16[128,256], index: 5, kind: output, shape index: {0}]   ;;  %s3280_s6 = inlined_call_operand.vmem [shape: bf16[128,256], index: 6, kind: output, shape index: {1}]  }
   0x1 LB: > { %s1982_s22 = sadd.s32 4294967295, %s2535_s21   ;;  %p1986_p0 = scmp.ge.s32.totalorder %s2535_s21, 1  ;;  %s2535_s21 = sphi %s2572_s21, %s17_s21  }
   0x2   : > { %p217_p1 = scmp.lt.s32.totalorder %s2535_s21, 3 }
   0x4   : > { %p218_p2 = pnand %p1986_p0, %p217_p1 }
   0x5   : > { %s1987_s15 = sshll.u32 (!%p218_p2), %s1982_s22, 3 }
   0x6   : > { %221 = sbr.rel (%p218_p2) target bundleno = 417 (0x1a1), region = 40  ;;  %p256_p3 = scmp.lt.s32.totalorder (!%p218_p2), %s1987_s15, 15 }
   0xb   : > { %v2185_v0 = vld [vmem:[%s3275_s1 + $0x74] ss:$8 sps:$4 sm:$0xff]   ;;  %v2189_v2 = vld [vmem:[%s3275_s1 + $0x70] ss:$8 sps:$4 sm:$0xff]   ;;  %v2191_v4 = vld [vmem:[%s3275_s1 + $0x64] ss:$8 sps:$4 sm:$0xff]  }
   0xc   : > { %v2187_v1 = vld [vmem:[%s3275_s1 + $0x174] ss:$8 sps:$4 sm:$0xff]   ;;  %768 = vmatprep.subr.bf16.mxu0 %v2185_v0  ;;  %v2190_v3 = vld [vmem:[%s3275_s1 + $0x170] ss:$8 sps:$4 sm:$0xff]   ;;  %v2193_v5 = vld [vmem:[%s3275_s1 + $0x164] ss:$8 sps:$4 sm:$0xff]  }
   0xd   : > { %841 = vmatprep.subr.bf16.mxu1 %v2187_v1  ;;  %769 = vmatpush1.bf16.msra.mxu0 %v2189_v2  ;;  %v2195_v6 = vld [vmem:[%s3275_s1 + $0x60] ss:$8 sps:$4 sm:$0xff]   ;;  %v2197_v8 = vld [vmem:[%s3275_s1 + $0x54] ss:$8 sps:$4 sm:$0xff]   ;;  %v2201_v10 = vld [vmem:[%s3275_s1 + $0x50] ss:$8 sps:$4 sm:$0xff]  }
   0xe   : > { %842 = vmatpush1.bf16.msra.mxu1 %v2190_v3  ;;  %770 = vmatprep.subr.bf16.mxu0 %v2191_v4  ;;  %v2196_v7 = vld [vmem:[%s3275_s1 + $0x160] ss:$8 sps:$4 sm:$0xff]   ;;  %v2199_v9 = vld [vmem:[%s3275_s1 + $0x154] ss:$8 sps:$4 sm:$0xff]   ;;  %v2202_v11 = vld [vmem:[%s3275_s1 + $0x150] ss:$8 sps:$4 sm:$0xff]  }
   0xf   : > { %843 = vmatprep.subr.bf16.mxu1 %v2193_v5  ;;  %v2203_v12 = vld [vmem:[%s3275_s1 + $0x44] ss:$8 sps:$4 sm:$0xff]   ;;  %v2207_v14 = vld [vmem:[%s3275_s1 + $0x40] ss:$8 sps:$4 sm:$0xff]   ;;  %v2209_v16 = vld [vmem:[%s3275_s1 + $0x34] ss:$8 sps:$4 sm:$0xff]  }
  0x10   : > { %v2205_v13 = vld [vmem:[%s3275_s1 + $0x144] ss:$8 sps:$4 sm:$0xff]   ;;  %v2208_v15 = vld [vmem:[%s3275_s1 + $0x140] ss:$8 sps:$4 sm:$0xff]   ;;  %v2211_v17 = vld [vmem:[%s3275_s1 + $0x134] ss:$8 sps:$4 sm:$0xff]  }
  0x11   : > { %771 = vmatpush1.bf16.msra.mxu0 %v2195_v6  ;;  %v2213_v18 = vld [vmem:[%s3275_s1 + $0x30] ss:$8 sps:$4 sm:$0xff]   ;;  %v2215_v20 = vld [vmem:[%s3275_s1 + $0x24] ss:$8 sps:$4 sm:$0xff]   ;;  %v2219_v22 = vld [vmem:[%s3275_s1 + $0x20] ss:$8 sps:$4 sm:$0xff]  }
  0x12   : > { %844 = vmatpush1.bf16.msra.mxu1 %v2196_v7  ;;  %772 = vmatprep.subr.bf16.mxu0 %v2197_v8  ;;  %v2214_v19 = vld [vmem:[%s3275_s1 + $0x130] ss:$8 sps:$4 sm:$0xff]   ;;  %v2217_v21 = vld [vmem:[%s3275_s1 + $0x124] ss:$8 sps:$4 sm:$0xff]   ;;  %v2220_v23 = vld [vmem:[%s3275_s1 + $0x120] ss:$8 sps:$4 sm:$0xff]  }
  0x13   : > { %845 = vmatprep.subr.bf16.mxu1 %v2199_v9  ;;  %v2221_v24 = vld [vmem:[%s3275_s1 + $0x14] ss:$8 sps:$4 sm:$0xff]   ;;  %v2225_v26 = vld [vmem:[%s3275_s1 + $0x10] ss:$8 sps:$4 sm:$0xff]   ;;  %v2227_v28 = vld [vmem:[%s3275_s1 + $0x4] ss:$8 sps:$4 sm:$0xff]  }
  0x14   : > { %v2223_v25 = vld [vmem:[%s3275_s1 + $0x114] ss:$8 sps:$4 sm:$0xff]   ;;  %v2226_v27 = vld [vmem:[%s3275_s1 + $0x110] ss:$8 sps:$4 sm:$0xff]   ;;  %v2229_v29 = vld [vmem:[%s3275_s1 + $0x104] ss:$8 sps:$4 sm:$0xff]  }
  0x15   : > { %773 = vmatpush1.bf16.msra.mxu0 %v2201_v10  ;;  %v2231_v30 = vld [vmem:[%s3275_s1] ss:$8 sps:$4 sm:$0xff]   ;;  %v2233_v32 = vld [vmem:[%s3275_s1 + $0xf4] ss:$8 sps:$4 sm:$0xff]   ;;  %v2237_v34 = vld [vmem:[%s3275_s1 + $0xf0] ss:$8 sps:$4 sm:$0xff]  }
  0x16   : > { %846 = vmatpush1.bf16.msra.mxu1 %v2202_v11  ;;  %774 = vmatprep.subr.bf16.mxu0 %v2203_v12  ;;  %v2232_v31 = vld [vmem:[%s3275_s1 + $0x100] ss:$8 sps:$4 sm:$0xff]   ;;  %v2235_v33 = vld [vmem:[%s3275_s1 + $0x1f4] ss:$8 sps:$4 sm:$0xff]   ;;  %v2238_v35 = vld [vmem:[%s3275_s1 + $0x1f0] ss:$8 sps:$4 sm:$0xff]  }
  0x17   : > { %847 = vmatprep.subr.bf16.mxu1 %v2205_v13  ;;  %v2239_v36 = vld [vmem:[%s3275_s1 + $0xe4] ss:$8 sps:$4 sm:$0xff]   ;;  %s3282_s15 = smov (!%p256_p3, %s1987_s15), 15  ;;  %v2243_v38 = vld [vmem:[%s3275_s1 + $0xe0] ss:$8 sps:$4 sm:$0xff]  }
  0x18   : > { %v2241_v37 = vld [vmem:[%s3275_s1 + $0x1e4] ss:$8 sps:$4 sm:$0xff]   ;;  %v2244_v39 = vld [vmem:[%s3275_s1 + $0x1e0] ss:$8 sps:$4 sm:$0xff]   ;;  %v2245_v40 = vld [vmem:[%s3275_s1 + $0xd4] ss:$8 sps:$4 sm:$0xff]  }
  0x19   : > { %775 = vmatpush1.bf16.msra.mxu0 %v2207_v14  ;;  %v2247_v41 = vld [vmem:[%s3275_s1 + $0x1d4] ss:$8 sps:$4 sm:$0xff]   ;;  %s2158_s18 = sshll.u32 %s3282_s15, 4  ;;  %v2249_v42 = vld [vmem:[%s3275_s1 + $0xd0] ss:$8 sps:$4 sm:$0xff]   ;;  %s2159_s25 = sshll.u32 %s3282_s15, 3 }
  0x1a   : > { %848 = vmatpush1.bf16.msra.mxu1 %v2208_v15  ;;  %776 = vmatprep.subr.bf16.mxu0 %v2209_v16  ;;  %v2250_v43 = vld [vmem:[%s3275_s1 + $0x1d0] ss:$8 sps:$4 sm:$0xff]   ;;  %v2251_v44 = vld [vmem:[%s3275_s1 + $0xc4] ss:$8 sps:$4 sm:$0xff]   ;;  %s2723_s28 = scalar_lea.vmem %s3274_s0, %s2158_s18  ;;  %v2255_v46 = vld [vmem:[%s3275_s1 + $0xc0] ss:$8 sps:$4 sm:$0xff]   ;;  %s3141_s27 = scalar_lea.vmem %s3279_s5, %s2159_s25 }
  0x1b   : > { %849 = vmatprep.subr.bf16.mxu1 %v2211_v17  ;;  %v2253_v45 = vld [vmem:[%s3275_s1 + $0x1c4] ss:$8 sps:$4 sm:$0xff]   ;;  %v2256_v47 = vld [vmem:[%s3275_s1 + $0x1c0] ss:$8 sps:$4 sm:$0xff]   ;;  %v2257_v48 = vld [vmem:[%s3275_s1 + $0xb4] ss:$8 sps:$4 sm:$0xff]   ;;  %s3247_s9 = scalar_lea.vmem %s3280_s6, %s2159_s25 }
  0x1c   : > { %v2738_v49 = vld [vmem:[%s2723_s28 + $0x4] ss:$16 sps:$4 sm:$0xff]   ;;  %v2744_v51 = vld [vmem:[%s2723_s28 + $0xc] ss:$16 sps:$4 sm:$0xff]   ;;  %v2261_v52 = vld [vmem:[%s3275_s1 + $0xb0] ss:$8 sps:$4 sm:$0xff]  }
  0x1d   : > { %777 = vmatpush1.bf16.msra.mxu0 %v2213_v18  ;;  %v2259_v50 = vld [vmem:[%s3275_s1 + $0x1b4] ss:$8 sps:$4 sm:$0xff]   ;;  %800 = vmatprep.mubr.bf16.mxu0 %v2738_v49  ;;  %v2262_v53 = vld [vmem:[%s3275_s1 + $0x1b0] ss:$8 sps:$4 sm:$0xff]   ;;  %v2263_v54 = vld [vmem:[%s3275_s1 + $0xa4] ss:$8 sps:$4 sm:$0xff]  }
  0x1e   : > { %850 = vmatpush1.bf16.msra.mxu1 %v2214_v19  ;;  %778 = vmatprep.subr.bf16.mxu0 %v2215_v20  ;;  %v2265_v55 = vld [vmem:[%s3275_s1 + $0x1a4] ss:$8 sps:$4 sm:$0xff]   ;;  %v2267_v56 = vld [vmem:[%s3275_s1 + $0xa0] ss:$8 sps:$4 sm:$0xff]   ;;  %v2269_v58 = vld [vmem:[%s3275_s1 + $0x94] ss:$8 sps:$4 sm:$0xff]  }
  0x1f   : > { %851 = vmatprep.subr.bf16.mxu1 %v2217_v21  ;;  %873 = vmatprep.mubr.bf16.mxu1 %v2744_v51  ;;  %v2268_v57 = vld [vmem:[%s3275_s1 + $0x1a0] ss:$8 sps:$4 sm:$0xff]   ;;  %v2271_v59 = vld [vmem:[%s3275_s1 + $0x194] ss:$8 sps:$4 sm:$0xff]   ;;  %v2273_v60 = vld [vmem:[%s3275_s1 + $0x90] ss:$8 sps:$4 sm:$0xff]  }
  0x20   : > { %v2274_v61 = vld [vmem:[%s3275_s1 + $0x190] ss:$8 sps:$4 sm:$0xff]   ;;  %v2275_v62 = vld [vmem:[%s3275_s1 + $0x84] ss:$8 sps:$4 sm:$0xff]   ;;  %v2279_v0 = vld [vmem:[%s3275_s1 + $0x80] ss:$8 sps:$4 sm:$0xff]  }
  0x21   : > { %779 = vmatpush1.bf16.msra.mxu0 %v2219_v22  ;;  %v2277_v63 = vld [vmem:[%s3275_s1 + $0x184] ss:$8 sps:$4 sm:$0xff]   ;;  %v2280_v1 = vld [vmem:[%s3275_s1 + $0x180] ss:$8 sps:$4 sm:$0xff]   ;;  %v2289_v2 = vld [vmem:[%s3277_s3 + $0x74] ss:$8 sps:$4 sm:$0xff]  }
  0x22   : > { %852 = vmatpush1.bf16.msra.mxu1 %v2220_v23  ;;  %780 = vmatprep.subr.bf16.mxu0 %v2221_v24  ;;  %v2292_v3 = vld [vmem:[%s3277_s3 + $0x174] ss:$8 sps:$4 sm:$0xff]   ;;  %v2797_v4 = vld [vmem:[%s2723_s28] ss:$16 sps:$4 sm:$0xff]   ;;  %v2800_v5 = vld [vmem:[%s2723_s28 + $0x8] ss:$16 sps:$4 sm:$0xff]  }
  0x23   : > { %853 = vmatprep.subr.bf16.mxu1 %v2223_v25  ;;  %v2287_v6 = vld [vmem:[%s3277_s3 + $0x70] ss:$8 sps:$4 sm:$0xff]   ;;  %v2295_v8 = vld [vmem:[%s3277_s3 + $0x64] ss:$8 sps:$4 sm:$0xff]   ;;  %v2293_v12 = vld [vmem:[%s3277_s3 + $0x60] ss:$8 sps:$4 sm:$0xff]  }
  0x24   : > { %v2290_v7 = vld [vmem:[%s3277_s3 + $0x170] ss:$8 sps:$4 sm:$0xff]   ;;  %v2298_v9 = vld [vmem:[%s3277_s3 + $0x164] ss:$8 sps:$4 sm:$0xff]   ;;  %v2296_v13 = vld [vmem:[%s3277_s3 + $0x160] ss:$8 sps:$4 sm:$0xff]  }
  0x25   : > { %781 = vmatpush1.bf16.msra.mxu0 %v2225_v26  ;;  %v2815_v10 = vld [vmem:[%s2723_s28 + $0x24] ss:$16 sps:$4 sm:$0xff]   ;;  %v2818_v11 = vld [vmem:[%s2723_s28 + $0x2c] ss:$16 sps:$4 sm:$0xff]   ;;  %v2836_v16 = vld [vmem:[%s2723_s28 + $0x20] ss:$16 sps:$4 sm:$0xff]  }
  0x26   : > { %854 = vmatpush1.bf16.msra.mxu1 %v2226_v27  ;;  %782 = vmatprep.subr.bf16.mxu0 %v2227_v28  ;;  %v2304_v14 = vld [vmem:[%s3277_s3 + $0x54] ss:$8 sps:$4 sm:$0xff]   ;;  %v2302_v17 = vld [vmem:[%s3277_s3 + $0x50] ss:$8 sps:$4 sm:$0xff]   ;;  %v2313_v20 = vld [vmem:[%s3277_s3 + $0x44] ss:$8 sps:$4 sm:$0xff]  }
  0x27   : > { %855 = vmatprep.subr.bf16.mxu1 %v2229_v29  ;;  %v2307_v15 = vld [vmem:[%s3277_s3 + $0x154] ss:$8 sps:$4 sm:$0xff]   ;;  %v2305_v18 = vld [vmem:[%s3277_s3 + $0x150] ss:$8 sps:$4 sm:$0xff]   ;;  %v2316_v21 = vld [vmem:[%s3277_s3 + $0x144] ss:$8 sps:$4 sm:$0xff]  }
  0x28   : > { %v2846_v19 = vld [vmem:[%s2723_s28 + $0x28] ss:$16 sps:$4 sm:$0xff]   ;;  %v2855_v22 = vld [vmem:[%s2723_s28 + $0x44] ss:$16 sps:$4 sm:$0xff]   ;;  %v2858_v23 = vld [vmem:[%s2723_s28 + $0x4c] ss:$16 sps:$4 sm:$0xff]  }
  0x29   : > { %783 = vmatpush1.bf16.msra.mxu0 %v2231_v30  ;;  %v2311_v24 = vld [vmem:[%s3277_s3 + $0x40] ss:$8 sps:$4 sm:$0xff]   ;;  %v2322_v26 = vld [vmem:[%s3277_s3 + $0x34] ss:$8 sps:$4 sm:$0xff]   ;;  %v2320_v29 = vld [vmem:[%s3277_s3 + $0x30] ss:$8 sps:$4 sm:$0xff]  }
  0x2a   : > { %856 = vmatpush1.bf16.msra.mxu1 %v2232_v31  ;;  %784 = vmatprep.subr.bf16.mxu0 %v2233_v32  ;;  %v2314_v25 = vld [vmem:[%s3277_s3 + $0x140] ss:$8 sps:$4 sm:$0xff]   ;;  %v2325_v27 = vld [vmem:[%s3277_s3 + $0x134] ss:$8 sps:$4 sm:$0xff]   ;;  %v2323_v30 = vld [vmem:[%s3277_s3 + $0x130] ss:$8 sps:$4 sm:$0xff]  }
  0x2b   : > { %857 = vmatprep.subr.bf16.mxu1 %v2235_v33  ;;  %v2876_v28 = vld [vmem:[%s2723_s28 + $0x40] ss:$16 sps:$4 sm:$0xff]   ;;  %v2886_v31 = vld [vmem:[%s2723_s28 + $0x48] ss:$16 sps:$4 sm:$0xff]   ;;  %v2331_v32 = vld [vmem:[%s3277_s3 + $0x24] ss:$8 sps:$4 sm:$0xff]  }
  0x2c   : > { %v2334_v33 = vld [vmem:[%s3277_s3 + $0x124] ss:$8 sps:$4 sm:$0xff]  }
  0x2d   : > { %785 = vmatpush2.bf16.msra.mxu0 %v2237_v34  ;;  %v2895_v34 = vld [vmem:[%s2723_s28 + $0x64] ss:$16 sps:$4 sm:$0xff]  }
  0x2e   : > { %858 = vmatpush2.bf16.msra.mxu1 %v2238_v35  ;;  %786 = vmatprep.subr.bf16.mxu0 %v2239_v36  ;;  %v2898_v35 = vld [vmem:[%s2723_s28 + $0x6c] ss:$16 sps:$4 sm:$0xff]   ;;  %v2329_v36 = vld [vmem:[%s3277_s3 + $0x20] ss:$8 sps:$4 sm:$0xff]  }
  0x2f   : > { %859 = vmatprep.subr.bf16.mxu1 %v2241_v37  ;;  %v2332_v37 = vld [vmem:[%s3277_s3 + $0x120] ss:$8 sps:$4 sm:$0xff]  }
  0x31   : > { %787 = vmatpush2.bf16.msra.mxu0 %v2243_v38  ;;  %v2340_v38 = vld [vmem:[%s3277_s3 + $0x14] ss:$8 sps:$4 sm:$0xff]  }
  0x32   : > { %860 = vmatpush2.bf16.msra.mxu1 %v2244_v39  ;;  %788 = vmatprep.subr.bf16.mxu0 %v2245_v40  ;;  %v2343_v39 = vld [vmem:[%s3277_s3 + $0x114] ss:$8 sps:$4 sm:$0xff]   ;;  %v2916_v40 = vld [vmem:[%s2723_s28 + $0x60] ss:$16 sps:$4 sm:$0xff]  }
  0x33   : > { %861 = vmatprep.subr.bf16.mxu1 %v2247_v41  ;;  %v2338_v41 = vld [vmem:[%s3277_s3 + $0x10] ss:$8 sps:$4 sm:$0xff]  }
  0x35   : > { %789 = vmatpush2.bf16.msra.mxu0 %v2249_v42  ;;  %v2341_v42 = vld [vmem:[%s3277_s3 + $0x110] ss:$8 sps:$4 sm:$0xff]  }
  0x36   : > { %862 = vmatpush2.bf16.msra.mxu1 %v2250_v43  ;;  %790 = vmatprep.subr.bf16.mxu0 %v2251_v44  ;;  %v2926_v43 = vld [vmem:[%s2723_s28 + $0x68] ss:$16 sps:$4 sm:$0xff]   ;;  %v2349_v44 = vld [vmem:[%s3277_s3 + $0x4] ss:$8 sps:$4 sm:$0xff]  }
  0x37   : > { %863 = vmatprep.subr.bf16.mxu1 %v2253_v45  ;;  %v2352_v45 = vld [vmem:[%s3277_s3 + $0x104] ss:$8 sps:$4 sm:$0xff]  }
  0x39   : > { %791 = vmatpush2.bf16.msra.mxu0 %v2255_v46  ;;  %v2347_v46 = vld [vmem:[%s3277_s3] ss:$8 sps:$4 sm:$0xff]  }
  0x3a   : > { %864 = vmatpush2.bf16.msra.mxu1 %v2256_v47  ;;  %792 = vmatprep.subr.bf16.mxu0 %v2257_v48  ;;  %v2350_v47 = vld [vmem:[%s3277_s3 + $0x100] ss:$8 sps:$4 sm:$0xff]   ;;  %v2355_v48 = vld [vmem:[%s3277_s3 + $0xf4] ss:$8 sps:$4 sm:$0xff]  }
  0x3b   : > { %865 = vmatprep.subr.bf16.mxu1 %v2259_v50  ;;  %v2358_v50 = vld [vmem:[%s3277_s3 + $0x1f4] ss:$8 sps:$4 sm:$0xff]  }
  0x3d   : > { %793 = vmatpush2.bf16.msra.mxu0 %v2261_v52  ;;  %v2353_v52 = vld [vmem:[%s3277_s3 + $0xf0] ss:$8 sps:$4 sm:$0xff]  }
  0x3e   : > { %866 = vmatpush2.bf16.msra.mxu1 %v2262_v53  ;;  %794 = vmatprep.subr.bf16.mxu0 %v2263_v54  ;;  %v2356_v53 = vld [vmem:[%s3277_s3 + $0x1f0] ss:$8 sps:$4 sm:$0xff]   ;;  %v2361_v54 = vld [vmem:[%s3277_s3 + $0xe4] ss:$8 sps:$4 sm:$0xff]  }
  0x3f   : > { %867 = vmatprep.subr.bf16.mxu1 %v2265_v55  ;;  %v2362_v55 = vld [vmem:[%s3277_s3 + $0x1e0] ss:$8 sps:$4 sm:$0xff]  }
  0x41   : > { %795 = vmatpush2.bf16.msra.mxu0 %v2267_v56  ;;  %v2367_v56 = vld [vmem:[%s3277_s3 + $0xd4] ss:$8 sps:$4 sm:$0xff]  }
  0x42   : > { %868 = vmatpush2.bf16.msra.mxu1 %v2268_v57  ;;  %796 = vmatprep.subr.bf16.mxu0 %v2269_v58  ;;  %v2370_v57 = vld [vmem:[%s3277_s3 + $0x1d4] ss:$8 sps:$4 sm:$0xff]   ;;  %v2365_v58 = vld [vmem:[%s3277_s3 + $0xd0] ss:$8 sps:$4 sm:$0xff]  }
  0x43   : > { %869 = vmatprep.subr.bf16.mxu1 %v2271_v59  ;;  %v2368_v59 = vld [vmem:[%s3277_s3 + $0x1d0] ss:$8 sps:$4 sm:$0xff]  }
  0x45   : > { %797 = vmatpush2.bf16.msra.mxu0 %v2273_v60  ;;  %v2373_v60 = vld [vmem:[%s3277_s3 + $0xc4] ss:$8 sps:$4 sm:$0xff]  }
  0x46   : > { %870 = vmatpush2.bf16.msra.mxu1 %v2274_v61  ;;  %798 = vmatprep.subr.bf16.mxu0 %v2275_v62  ;;  %v2376_v61 = vld [vmem:[%s3277_s3 + $0x1c4] ss:$8 sps:$4 sm:$0xff]   ;;  %v2371_v62 = vld [vmem:[%s3277_s3 + $0xc0] ss:$8 sps:$4 sm:$0xff]  }
  0x47   : > { %871 = vmatprep.subr.bf16.mxu1 %v2277_v63  ;;  %v2374_v63 = vld [vmem:[%s3277_s3 + $0x1c0] ss:$8 sps:$4 sm:$0xff]  }
  0x49   : > { %799 = vmatpush2.bf16.msra.mxu0 %v2279_v0  ;;  %v2379_v0 = vld [vmem:[%s3277_s3 + $0xb4] ss:$8 sps:$4 sm:$0xff]  }
  0x4a   : > { %872 = vmatpush2.bf16.msra.mxu1 %v2280_v1  ;;  %1526 = vmatprep.subr.bf16.mxu0 %v2289_v2  ;;  %v2382_v1 = vld [vmem:[%s3277_s3 + $0x1b4] ss:$8 sps:$4 sm:$0xff]   ;;  %v2377_v2 = vld [vmem:[%s3277_s3 + $0xb0] ss:$8 sps:$4 sm:$0xff]  }
  0x4b   : > { %1599 = vmatprep.subr.bf16.mxu1 %v2292_v3  ;;  %v2380_v3 = vld [vmem:[%s3277_s3 + $0x1b0] ss:$8 sps:$4 sm:$0xff]  }
  0x4c   : > { %801 = vmatmul.mubr.bf16.vlgmr.msra.gmra.mxu0 %v2797_v4 }
  0x4d   : > { %874 = vmatmul.mubr.bf16.vlgmr.msra.gmra.mxu1 %v2800_v5  ;;  %1527 = vmatpush1.bf16.msra.mxu0 %v2287_v6  ;;  %v2385_v6 = vld [vmem:[%s3277_s3 + $0xa4] ss:$8 sps:$4 sm:$0xff]  }
  0x4e   : > { %1600 = vmatpush1.bf16.msra.mxu1 %v2290_v7  ;;  %1528 = vmatprep.subr.bf16.mxu0 %v2295_v8  ;;  %v2388_v7 = vld [vmem:[%s3277_s3 + $0x1a4] ss:$8 sps:$4 sm:$0xff]   ;;  %v2383_v8 = vld [vmem:[%s3277_s3 + $0xa0] ss:$8 sps:$4 sm:$0xff]  }
  0x4f   : > { %1601 = vmatprep.subr.bf16.mxu1 %v2298_v9  ;;  %810 = vmatprep.mubr.bf16.mxu0 %v2815_v10  ;;  %v2386_v9 = vld [vmem:[%s3277_s3 + $0x1a0] ss:$8 sps:$4 sm:$0xff]  }
  0x50   : > { %883 = vmatprep.mubr.bf16.mxu1 %v2818_v11 }
  0x51   : > { %1529 = vmatpush1.bf16.msra.mxu0 %v2293_v12  ;;  %v2391_v12 = vld [vmem:[%s3277_s3 + $0x94] ss:$8 sps:$4 sm:$0xff]  }
  0x52   : > { %1602 = vmatpush1.bf16.msra.mxu1 %v2296_v13  ;;  %1530 = vmatprep.subr.bf16.mxu0 %v2304_v14  ;;  %v2394_v13 = vld [vmem:[%s3277_s3 + $0x194] ss:$8 sps:$4 sm:$0xff]   ;;  %v2389_v14 = vld [vmem:[%s3277_s3 + $0x90] ss:$8 sps:$4 sm:$0xff]  }
  0x53   : > { %1603 = vmatprep.subr.bf16.mxu1 %v2307_v15  ;;  %v2392_v15 = vld [vmem:[%s3277_s3 + $0x190] ss:$8 sps:$4 sm:$0xff]  }
  0x54   : > { %811 = vmatmul.mubr.bf16.gmra.mxu0 %v2836_v16 }
  0x55   : > { %884 = vmatmul.mubr.bf16.gmra.mxu1 %v2846_v19  ;;  %1531 = vmatpush1.bf16.msra.mxu0 %v2302_v17  ;;  %v2397_v17 = vld [vmem:[%s3277_s3 + $0x84] ss:$8 sps:$4 sm:$0xff]  }
  0x56   : > { %1604 = vmatpush1.bf16.msra.mxu1 %v2305_v18  ;;  %1532 = vmatprep.subr.bf16.mxu0 %v2313_v20  ;;  %v2400_v18 = vld [vmem:[%s3277_s3 + $0x184] ss:$8 sps:$4 sm:$0xff]   ;;  %v2395_v20 = vld [vmem:[%s3277_s3 + $0x80] ss:$8 sps:$4 sm:$0xff]  }
  0x57   : > { %1605 = vmatprep.subr.bf16.mxu1 %v2316_v21  ;;  %820 = vmatprep.mubr.bf16.mxu0 %v2855_v22  ;;  %v2398_v21 = vld [vmem:[%s3277_s3 + $0x180] ss:$8 sps:$4 sm:$0xff]  }
  0x58   : > { %893 = vmatprep.mubr.bf16.mxu1 %v2858_v23 }
  0x59   : > { %1533 = vmatpush1.bf16.msra.mxu0 %v2311_v24 }
  0x5a   : > { %1606 = vmatpush1.bf16.msra.mxu1 %v2314_v25  ;;  %1534 = vmatprep.subr.bf16.mxu0 %v2322_v26 }
  0x5b   : > { %1607 = vmatprep.subr.bf16.mxu1 %v2325_v27 }
  0x5c   : > { %821 = vmatmul.mubr.bf16.gmra.mxu0 %v2876_v28 }
  0x5d   : > { %894 = vmatmul.mubr.bf16.gmra.mxu1 %v2886_v31  ;;  %1535 = vmatpush1.bf16.msra.mxu0 %v2320_v29 }
  0x5e   : > { %1608 = vmatpush1.bf16.msra.mxu1 %v2323_v30  ;;  %1536 = vmatprep.subr.bf16.mxu0 %v2331_v32 }
  0x5f   : > { %1609 = vmatprep.subr.bf16.mxu1 %v2334_v33  ;;  %830 = vmatprep.mubr.bf16.mxu0 %v2895_v34 }
  0x60   : > { %903 = vmatprep.mubr.bf16.mxu1 %v2898_v35 }
  0x61   : > { %1537 = vmatpush1.bf16.msra.mxu0 %v2329_v36 }
  0x62   : > { %1610 = vmatpush1.bf16.msra.mxu1 %v2332_v37  ;;  %1538 = vmatprep.subr.bf16.mxu0 %v2340_v38 }
  0x63   : > { %1611 = vmatprep.subr.bf16.mxu1 %v2343_v39 }
  0x64   : > { %831 = vmatmul.mubr.bf16.gmra.mxu0 %v2916_v40 }
  0x65   : > { %904 = vmatmul.mubr.bf16.gmra.mxu1 %v2926_v43  ;;  %1539 = vmatpush1.bf16.msra.mxu0 %v2338_v41 }
  0x66   : > { %1612 = vmatpush1.bf16.msra.mxu1 %v2341_v42  ;;  %1540 = vmatprep.subr.bf16.mxu0 %v2349_v44 }
  0x67   : > { %1613 = vmatprep.subr.bf16.mxu1 %v2352_v45  ;;  %1558 = vmatprep.mubr.bf16.mxu0 %v2738_v49  ;;  %v2364_v49 = vld [vmem:[%s3277_s3 + $0x1e4] ss:$8 sps:$4 sm:$0xff]  }
  0x68   : > { %1631 = vmatprep.mubr.bf16.mxu1 %v2744_v51  ;;  %v2359_v51 = vld [vmem:[%s3277_s3 + $0xe0] ss:$8 sps:$4 sm:$0xff]  }
  0x69   : > { %1541 = vmatpush1.bf16.msra.mxu0 %v2347_v46 }
  0x6a   : > { %1614 = vmatpush1.bf16.msra.mxu1 %v2350_v47  ;;  %1542 = vmatprep.subr.bf16.mxu0 %v2355_v48 }
  0x6b   : > { %1615 = vmatprep.subr.bf16.mxu1 %v2358_v50 }
  0x6d   : > { %1543 = vmatpush2.bf16.msra.mxu0 %v2353_v52 }
  0x6e   : > { %1616 = vmatpush2.bf16.msra.mxu1 %v2356_v53  ;;  %1544 = vmatprep.subr.bf16.mxu0 %v2361_v54 }
  0x6f   : > { %1617 = vmatprep.subr.bf16.mxu1 %v2364_v49 }
  0x71   : > { %1545 = vmatpush2.bf16.msra.mxu0 %v2359_v51 }
  0x72   : > { %1618 = vmatpush2.bf16.msra.mxu1 %v2362_v55  ;;  %1546 = vmatprep.subr.bf16.mxu0 %v2367_v56 }
  0x73   : > { %1619 = vmatprep.subr.bf16.mxu1 %v2370_v57 }
  0x75   : > { %1547 = vmatpush2.bf16.msra.mxu0 %v2365_v58 }
  0x76   : > { %1620 = vmatpush2.bf16.msra.mxu1 %v2368_v59  ;;  %1548 = vmatprep.subr.bf16.mxu0 %v2373_v60 }
  0x77   : > { %1621 = vmatprep.subr.bf16.mxu1 %v2376_v61 }
  0x79   : > { %1549 = vmatpush2.bf16.msra.mxu0 %v2371_v62 }
  0x7a   : > { %1622 = vmatpush2.bf16.msra.mxu1 %v2374_v63  ;;  %1550 = vmatprep.subr.bf16.mxu0 %v2379_v0 }
  0x7b   : > { %1623 = vmatprep.subr.bf16.mxu1 %v2382_v1 }
  0x7d   : > { %1551 = vmatpush2.bf16.msra.mxu0 %v2377_v2 }
  0x7e   : > { %1624 = vmatpush2.bf16.msra.mxu1 %v2380_v3  ;;  %1552 = vmatprep.subr.bf16.mxu0 %v2385_v6 }
  0x7f   : > { %1625 = vmatprep.subr.bf16.mxu1 %v2388_v7 }
  0x81   : > { %1553 = vmatpush2.bf16.msra.mxu0 %v2383_v8 }
  0x82   : > { %1626 = vmatpush2.bf16.msra.mxu1 %v2386_v9  ;;  %1554 = vmatprep.subr.bf16.mxu0 %v2391_v12 }
  0x83   : > { %1627 = vmatprep.subr.bf16.mxu1 %v2394_v13 }
  0x85   : > { %1555 = vmatpush2.bf16.msra.mxu0 %v2389_v14 }
  0x86   : > { %1628 = vmatpush2.bf16.msra.mxu1 %v2392_v15  ;;  %1556 = vmatprep.subr.bf16.mxu0 %v2397_v17 }
  0x87   : > { %1629 = vmatprep.subr.bf16.mxu1 %v2400_v18 }
  0x89   : > { %1557 = vmatpush2.bf16.msra.mxu0 %v2395_v20 }
  0x8a   : > { %1630 = vmatpush2.bf16.msra.mxu1 %v2398_v21 }
  0x8c   : > { %1559 = vmatmul.mubr.bf16.vlgmr.msra.gmra.mxu0 %v2797_v4  ;;  %v358_v4 = vlaneseq }
  0x8d   : > { %1632 = vmatmul.mubr.bf16.vlgmr.msra.gmra.mxu1 %v2800_v5  ;;  %1568 = vmatprep.mubr.bf16.mxu0 %v2815_v10 }
  0x8e   : > { %1641 = vmatprep.mubr.bf16.mxu1 %v2818_v11  ;;  %v3054_v5 = vshrl.u32 %v358_v4, 7  ;;  %v356_v11 = vld [vmem:[%s3276_s2] sm:$0x3] }
  0x90   : > { %v360_v10 = vsub.s32 0, %v3054_v5 }
  0x94   : > { %1569 = vmatmul.mubr.bf16.gmra.mxu0 %v2836_v16  ;;  %v364_v16 = vsub.s32 1, %v3054_v5 }
  0x95   : > { %1642 = vmatmul.mubr.bf16.gmra.mxu1 %v2846_v19  ;;  %1578 = vmatprep.mubr.bf16.mxu0 %v2855_v22  ;;  %v3063_v19 = vrot.slane %v356_v11, %v360_v10 }
  0x96   : > { %1651 = vmatprep.mubr.bf16.mxu1 %v2858_v23  ;;  %v3067_v22 = vrot.slane %v356_v11, %v364_v16 }
  0x9c   : > { %1579 = vmatmul.mubr.bf16.gmra.mxu0 %v2876_v28 }
  0x9d   : > { %1652 = vmatmul.mubr.bf16.gmra.mxu1 %v2886_v31  ;;  %1588 = vmatprep.mubr.bf16.mxu0 %v2895_v34 }
  0x9e   : > { %1661 = vmatprep.mubr.bf16.mxu1 %v2898_v35 }
  0xa4   : > { %1589 = vmatmul.mubr.bf16.gmra.mxu0 %v2916_v40 }
  0xa5   : > { %1662 = vmatmul.mubr.bf16.gmra.mxu1 %v2926_v43 }
 0x10c   : > { %v802_v23 = vpop.f32.mrf.mxu0 }
 0x10d   : > { %v875_v24 = vpop.f32.mrf.mxu1  ;;  %v803_v25 = vadd.f32 %v802_v23, %v3063_v19 }
 0x10e   : > { %v804_v26 = vpop.f32.mrf.mxu0 }
 0x10f   : > { %v877_v27 = vpop.f32.mrf.mxu1  ;;  %v3070_v28 = vadd.f32 %v875_v24, %v803_v25  ;;  %v805_v29 = vadd.f32 %v804_v26, %v3067_v22 }
 0x110   : > { %v806_v30 = vpop.f32.mrf.mxu0 }
 0x111   : > { %v879_v31 = vpop.f32.mrf.mxu1  ;;  %v914_v32 = vmin.f32 %v3070_v28, 20.0  ;;  %v3074_v33 = vadd.f32 %v877_v27, %v805_v29  ;;  %v807_v34 = vadd.f32 %v806_v30, %v3063_v19 }
 0x112   : > { %v808_v35 = vpop.f32.mrf.mxu0 }
 0x113   : > { %v881_v36 = vpop.f32.mrf.mxu1  ;;  %v930_v37 = vmul.f32 1.442695, %v914_v32  ;;  %v915_v38 = vmin.f32 %v3074_v33, 20.0  ;;  %v3078_v39 = vadd.f32 %v879_v31, %v807_v34  ;;  %v809_v40 = vadd.f32 %v808_v35, %v3067_v22 }
 0x114   : > { %v812_v41 = vpop.f32.mrf.mxu0 }
 0x115   : > { %v885_v42 = vpop.f32.mrf.mxu1  ;;  %2401 = vpow2.f32 %v930_v37  ;;  %v932_v43 = vmul.f32 1.442695, %v915_v38  ;;  %v916_v44 = vmin.f32 %v3078_v39, 20.0  ;;  %v3082_v45 = vadd.f32 %v881_v36, %v809_v40 }
 0x116   : > { %v813_v46 = vadd.f32 %v812_v41, %v3063_v19  ;;  %v814_v47 = vpop.f32.mrf.mxu0 }
 0x117   : > { %v887_v48 = vpop.f32.mrf.mxu1  ;;  %2403 = vpow2.f32 %v932_v43  ;;  %v934_v50 = vmul.f32 1.442695, %v916_v44  ;;  %v917_v52 = vmin.f32 %v3082_v45, 20.0  ;;  %v815_v53 = vadd.f32 %v814_v47, %v3067_v22 }
 0x118   : > { %v3087_v54 = vadd.f32 %v885_v42, %v813_v46  ;;  %v816_v49 = vpop.f32.mrf.mxu0 }
 0x119   : > { %v889_v51 = vpop.f32.mrf.mxu1  ;;  %2405 = vpow2.f32 %v934_v50  ;;  %v936_v55 = vmul.f32 1.442695, %v917_v52  ;;  %v817_v56 = vadd.f32 %v816_v49, %v3063_v19  ;;  %v3090_v57 = vadd.f32 %v887_v48, %v815_v53 }
 0x11a   : > { %v918_v58 = vmin.f32 %v3087_v54, 20.0  ;;  %v818_v59 = vpop.f32.mrf.mxu0 }
 0x11b   : > { %v891_v60 = vpop.f32.mrf.mxu1  ;;  %2407 = vpow2.f32 %v936_v55  ;;  %v919_v61 = vmin.f32 %v3090_v57, 20.0  ;;  %v819_v62 = vadd.f32 %v818_v59, %v3067_v22  ;;  %v3095_v63 = vadd.f32 %v889_v51, %v817_v56 }
 0x11c   : > { %v938_v0 = vmul.f32 1.442695, %v918_v58  ;;  %v822_v1 = vpop.f32.mrf.mxu0 }
 0x11d   : > { %v895_v2 = vpop.f32.mrf.mxu1  ;;  %v940_v3 = vmul.f32 1.442695, %v919_v61  ;;  %v920_v6 = vmin.f32 %v3095_v63, 20.0  ;;  %v823_v7 = vadd.f32 %v822_v1, %v3063_v19  ;;  %v3099_v8 = vadd.f32 %v891_v60, %v819_v62 }
 0x11e   : > { %2409 = vpow2.f32 %v938_v0  ;;  %v824_v9 = vpop.f32.mrf.mxu0 }
 0x11f   : > { %v897_v12 = vpop.f32.mrf.mxu1  ;;  %2411 = vpow2.f32 %v940_v3  ;;  %v942_v13 = vmul.f32 1.442695, %v920_v6  ;;  %v921_v14 = vmin.f32 %v3099_v8, 20.0  ;;  %v825_v15 = vadd.f32 %v824_v9, %v3067_v22 }
 0x120   : > { %v3103_v17 = vadd.f32 %v895_v2, %v823_v7  ;;  %v826_v18 = vpop.f32.mrf.mxu0 }
 0x121   : > { %v899_v20 = vpop.f32.mrf.mxu1  ;;  %2413 = vpow2.f32 %v942_v13  ;;  %v944_v21 = vmul.f32 1.442695, %v921_v14  ;;  %v827_v4 = vadd.f32 %v826_v18, %v3063_v19  ;;  %v3106_v11 = vadd.f32 %v897_v12, %v825_v15 }
 0x122   : > { %v2402_v23 = vpop.eup %2401  ;;  %v922_v24 = vmin.f32 %v3103_v17, 20.0  ;;  %v828_v25 = vpop.f32.mrf.mxu0 }
 0x123   : > { %v901_v26 = vpop.f32.mrf.mxu1  ;;  %v962_v27 = vadd.f32 2.0, %v2402_v23  ;;  %2415 = vpow2.f32 %v944_v21  ;;  %v923_v29 = vmin.f32 %v3106_v11, 20.0  ;;  %v829_v30 = vadd.f32 %v828_v25, %v3067_v22 }
 0x124   : > { %v2404_v31 = vpop.eup %2403  ;;  %v946_v32 = vmul.f32 1.442695, %v922_v24  ;;  %v3111_v34 = vadd.f32 %v899_v20, %v827_v4  ;;  %v832_v35 = vpop.f32.mrf.mxu0 }
 0x125   : > { %v905_v36 = vpop.f32.mrf.mxu1  ;;  %v978_v37 = vmul.f32 %v2402_v23, %v962_v27  ;;  %v963_v38 = vadd.f32 2.0, %v2404_v31  ;;  %v948_v40 = vmul.f32 1.442695, %v923_v29  ;;  %v833_v41 = vadd.f32 %v832_v35, %v3063_v19 }
 0x126   : > { %v2406_v42 = vpop.eup %2405  ;;  %2417 = vpow2.f32 %v946_v32  ;;  %v924_v43 = vmin.f32 %v3111_v34, 20.0  ;;  %v3115_v44 = vadd.f32 %v901_v26, %v829_v30  ;;  %v834_v46 = vpop.f32.mrf.mxu0 }
 0x127   : > { %v907_v47 = vpop.f32.mrf.mxu1  ;;  %v994_v48 = vadd.f32 2.0, %v978_v37  ;;  %v979_v50 = vmul.f32 %v2404_v31, %v963_v38  ;;  %v964_v52 = vadd.f32 2.0, %v2406_v42  ;;  %2419 = vpow2.f32 %v948_v40 }
 0x128   : > { %v2408_v53 = vpop.eup %2407  ;;  %v950_v49 = vmul.f32 1.442695, %v924_v43  ;;  %v925_v51 = vmin.f32 %v3115_v44, 20.0  ;;  %v835_v55 = vadd.f32 %v834_v46, %v3067_v22  ;;  %v3119_v56 = vadd.f32 %v905_v36, %v833_v41  ;;  %v836_v58 = vpop.f32.mrf.mxu0 }
 0x129   : > { %v909_v59 = vpop.f32.mrf.mxu1  ;;  %2421 = vrcp.f32 %v994_v48  ;;  %v995_v60 = vadd.f32 2.0, %v979_v50  ;;  %v980_v61 = vmul.f32 %v2406_v42, %v964_v52  ;;  %v965_v62 = vadd.f32 2.0, %v2408_v53 }
 0x12a   : > { %2423 = vpow2.f32 %v950_v49  ;;  %v952_v0 = vmul.f32 1.442695, %v925_v51  ;;  %v926_v1 = vmin.f32 %v3119_v56, 20.0  ;;  %v837_v2 = vadd.f32 %v836_v58, %v3063_v19  ;;  %v838_v3 = vpop.f32.mrf.mxu0 }
 0x12b   : > { %v2410_v6 = vpop.eup %2409  ;;  %2425 = vrcp.f32 %v995_v60  ;;  %v996_v7 = vadd.f32 2.0, %v980_v61  ;;  %v981_v9 = vmul.f32 %v2408_v53, %v965_v62  ;;  %v3123_v12 = vadd.f32 %v907_v47, %v835_v55  ;;  %v911_v13 = vpop.f32.mrf.mxu1 }
 0x12c   : > { %v2412_v14 = vpop.eup %2411  ;;  %v966_v15 = vadd.f32 2.0, %v2410_v6  ;;  %2427 = vpow2.f32 %v952_v0  ;;  %v954_v18 = vmul.f32 1.442695, %v926_v1  ;;  %v839_v20 = vadd.f32 %v838_v3, %v3067_v22 }
 0x12d   : > { %2429 = vrcp.f32 %v996_v7  ;;  %v997_v21 = vadd.f32 2.0, %v981_v9  ;;  %v967_v4 = vadd.f32 2.0, %v2412_v14  ;;  %v927_v23 = vmin.f32 %v3123_v12, 20.0 }
 0x12e   : > { %v2414_v19 = vpop.eup %2413  ;;  %v982_v24 = vmul.f32 %v2410_v6, %v966_v15  ;;  %2431 = vpow2.f32 %v954_v18  ;;  %v3127_v25 = vadd.f32 %v909_v59, %v837_v2  ;;  %v3129_v26 = vadd.f32 %v911_v13, %v839_v20 }
 0x12f   : > { %2433 = vrcp.f32 %v997_v21  ;;  %v983_v27 = vmul.f32 %v2412_v14, %v967_v4  ;;  %v968_v29 = vadd.f32 2.0, %v2414_v19  ;;  %v956_v30 = vmul.f32 1.442695, %v927_v23 }
 0x130   : > { %v2416_v31 = vpop.eup %2415  ;;  %v998_v32 = vadd.f32 2.0, %v982_v24  ;;  %v928_v22 = vmin.f32 %v3127_v25, 20.0  ;;  %v929_v35 = vmin.f32 %v3129_v26, 20.0 }
 0x131   : > { %v999_v36 = vadd.f32 2.0, %v983_v27  ;;  %v984_v37 = vmul.f32 %v2414_v19, %v968_v29  ;;  %v969_v38 = vadd.f32 2.0, %v2416_v31  ;;  %2435 = vpow2.f32 %v956_v30 }
 0x132   : > { %2437 = vrcp.f32 %v998_v32  ;;  %v958_v40 = vmul.f32 1.442695, %v928_v22  ;;  %v960_v41 = vmul.f32 1.442695, %v929_v35 }
 0x133   : > { %v2418_v42 = vpop.eup %2417  ;;  %2439 = vrcp.f32 %v999_v36  ;;  %v1000_v43 = vadd.f32 2.0, %v984_v37  ;;  %v985_v46 = vmul.f32 %v2416_v31, %v969_v38 }
 0x134   : > { %v2420_v47 = vpop.eup %2419  ;;  %v970_v48 = vadd.f32 2.0, %v2418_v42  ;;  %2441 = vpow2.f32 %v958_v40 }
 0x135   : > { %2443 = vrcp.f32 %v1000_v43  ;;  %v1001_v50 = vadd.f32 2.0, %v985_v46  ;;  %v971_v52 = vadd.f32 2.0, %v2420_v47 }
 0x136   : > { %v2422_v53 = vpop.eup %2421  ;;  %v986_v49 = vmul.f32 %v2418_v42, %v970_v48  ;;  %2445 = vpow2.f32 %v960_v41 }
 0x137   : > { %v2424_v51 = vpop.eup %2423  ;;  %v1026_v55 = vmul.f32 2.0, %v2422_v53  ;;  %2447 = vrcp.f32 %v1001_v50  ;;  %v987_v58 = vmul.f32 %v2420_v47, %v971_v52 }
 0x138   : > { %v2426_v59 = vpop.eup %2425  ;;  %v1002_v60 = vadd.f32 2.0, %v986_v49  ;;  %v972_v61 = vadd.f32 2.0, %v2424_v51 }
 0x139   : > { %v2428_v62 = vpop.eup %2427  ;;  %v1042_v0 = vsub.f32 1.0, %v1026_v55  ;;  %v1027_v1 = vmul.f32 2.0, %v2426_v59  ;;  %v1003_v2 = vadd.f32 2.0, %v987_v58 }
 0x13a   : > { %v2430_v3 = vpop.eup %2429  ;;  %2449 = vrcp.f32 %v1002_v60  ;;  %v988_v6 = vmul.f32 %v2424_v51, %v972_v61  ;;  %v973_v7 = vadd.f32 2.0, %v2428_v62 }
 0x13b   : > { %v2432_v9 = vpop.eup %2431  ;;  %v1043_v13 = vsub.f32 1.0, %v1027_v1  ;;  %v1028_v14 = vmul.f32 2.0, %v2430_v3  ;;  %2451 = vrcp.f32 %v1003_v2  ;;  %v1058_v4 = vmul.f32 %v1042_v0, %v3070_v28  ;;  %v1194_v0 = vld [vmem:[%s3278_s4] sm:$0x3] }
 0x13c   : > { %v2434_v15 = vpop.eup %2433  ;;  %v1004_v18 = vadd.f32 2.0, %v988_v6  ;;  %v989_v20 = vmul.f32 %v2428_v62, %v973_v7  ;;  %v974_v21 = vadd.f32 2.0, %v2432_v9 }
 0x13d   : > { %v1059_v23 = vmul.f32 %v1043_v13, %v3074_v33  ;;  %v1044_v19 = vsub.f32 1.0, %v1028_v14  ;;  %v1029_v24 = vmul.f32 2.0, %v2434_v15  ;;  %v3157_v14 = vrot.slane %v1194_v0, %v360_v10 }
 0x13e   : > { %v2436_v27 = vpop.eup %2435  ;;  %2453 = vrcp.f32 %v1004_v18  ;;  %v1005_v29 = vadd.f32 2.0, %v989_v20  ;;  %v990_v30 = vmul.f32 %v2432_v9, %v974_v21 }
 0x13f   : > { %v2438_v31 = vpop.eup %2437  ;;  %v2161_v32 = vpack.c.bf16 %v1059_v23, %v1058_v4  ;;  %v1045_v22 = vsub.f32 1.0, %v1029_v24  ;;  %v975_v35 = vadd.f32 2.0, %v2436_v27  ;;  %v1060_v38 = vmul.f32 %v1044_v19, %v3078_v39 }
 0x140   : > { %v2440_v28 = vpop.eup %2439  ;;  %v1030_v36 = vmul.f32 2.0, %v2438_v31  ;;  %2455 = vrcp.f32 %v1005_v29  ;;  %v1006_v33 = vadd.f32 2.0, %v990_v30  ;;  %v3161_v4 = vrot.slane %v1194_v0, %v364_v16 }
 0x141   : > { %v2442_v37 = vpop.eup %2441  ;;  %1122 = vst [vmem:[%s3141_s27] sm:$0xff] %v2161_v32  ;;  %v1061_v40 = vmul.f32 %v1045_v22, %v3082_v45  ;;  %v1031_v41 = vmul.f32 2.0, %v2440_v28  ;;  %v991_v42 = vmul.f32 %v2436_v27, %v975_v35 }
 0x142   : > { %v2444_v43 = vpop.eup %2443  ;;  %v1046_v46 = vsub.f32 1.0, %v1030_v36  ;;  %2457 = vrcp.f32 %v1006_v33  ;;  %v976_v47 = vadd.f32 2.0, %v2442_v37 }
 0x143   : > { %v2446_v48 = vpop.eup %2445  ;;  %v2162_v50 = vpack.c.bf16 %v1061_v40, %v1060_v38  ;;  %v1047_v52 = vsub.f32 1.0, %v1031_v41  ;;  %v1032_v53 = vmul.f32 2.0, %v2444_v43  ;;  %v1007_v49 = vadd.f32 2.0, %v991_v42 }
 0x144   : > { %v2448_v51 = vpop.eup %2447  ;;  %v1062_v55 = vmul.f32 %v1046_v46, %v3087_v54  ;;  %v992_v58 = vmul.f32 %v2442_v37, %v976_v47  ;;  %v977_v59 = vadd.f32 2.0, %v2446_v48 }
 0x145   : > { %1123 = vst [vmem:[%s3141_s27 + $0x8] sm:$0xff] %v2162_v50  ;;  %v1063_v39 = vmul.f32 %v1047_v52, %v3090_v57  ;;  %v1048_v45 = vsub.f32 1.0, %v1032_v53  ;;  %v1033_v60 = vmul.f32 2.0, %v2448_v51  ;;  %2459 = vrcp.f32 %v1007_v49 }
 0x146   : > { %v1008_v61 = vadd.f32 2.0, %v992_v58  ;;  %v993_v62 = vmul.f32 %v2446_v48, %v977_v59 }
 0x147   : > { %v2450_v1 = vpop.eup %2449  ;;  %v2163_v2 = vpack.c.bf16 %v1063_v39, %v1062_v55  ;;  %v1049_v3 = vsub.f32 1.0, %v1033_v60  ;;  %v1064_v57 = vmul.f32 %v1048_v45, %v3095_v63 }
 0x148   : > { %v2452_v6 = vpop.eup %2451  ;;  %v1034_v54 = vmul.f32 2.0, %v2450_v1  ;;  %2461 = vrcp.f32 %v1008_v61  ;;  %v1009_v7 = vadd.f32 2.0, %v993_v62 }
 0x149   : > { %1124 = vst [vmem:[%s3141_s27 + $0x10] sm:$0xff] %v2163_v2  ;;  %v1065_v9 = vmul.f32 %v1049_v3, %v3099_v8  ;;  %v1035_v13 = vmul.f32 2.0, %v2452_v6 }
 0x14a   : > { %v1050_v15 = vsub.f32 1.0, %v1034_v54  ;;  %2463 = vrcp.f32 %v1009_v7 }
 0x14b   : > { %v2454_v18 = vpop.eup %2453  ;;  %v2164_v20 = vpack.c.bf16 %v1065_v9, %v1064_v57  ;;  %v1051_v21 = vsub.f32 1.0, %v1035_v13 }
 0x14c   : > { %v1036_v23 = vmul.f32 2.0, %v2454_v18  ;;  %v1560_v19 = vpop.f32.mrf.mxu0  ;;  %v1066_v8 = vmul.f32 %v1050_v15, %v3103_v17 }
 0x14d   : > { %v1633_v24 = vpop.f32.mrf.mxu1  ;;  %v2456_v63 = vpop.eup %2455  ;;  %1125 = vst [vmem:[%s3141_s27 + $0x18] sm:$0xff] %v2164_v20  ;;  %v1067_v10 = vmul.f32 %v1051_v21, %v3106_v11  ;;  %v1561_v27 = vadd.f32 %v1560_v19, %v3157_v14 }
 0x14e   : > { %v1052_v29 = vsub.f32 1.0, %v1036_v23  ;;  %v1037_v30 = vmul.f32 2.0, %v2456_v63  ;;  %v1562_v31 = vpop.f32.mrf.mxu0 }
 0x14f   : > { %v1635_v32 = vpop.f32.mrf.mxu1  ;;  %v2458_v22 = vpop.eup %2457  ;;  %v2165_v5 = vpack.c.bf16 %v1067_v10, %v1066_v8  ;;  %v3167_v16 = vadd.f32 %v1633_v24, %v1561_v27  ;;  %v1563_v35 = vadd.f32 %v1562_v31, %v3161_v4 }
 0x150   : > { %v1053_v28 = vsub.f32 1.0, %v1037_v30  ;;  %v1038_v36 = vmul.f32 2.0, %v2458_v22  ;;  %v1564_v33 = vpop.f32.mrf.mxu0  ;;  %v1068_v41 = vmul.f32 %v1052_v29, %v3111_v34 }
 0x151   : > { %v1637_v37 = vpop.f32.mrf.mxu1  ;;  %1126 = vst [vmem:[%s3141_s27 + $0x20] sm:$0xff] %v2165_v5  ;;  %v1672_v17 = vmin.f32 %v3167_v16, 20.0  ;;  %v3172_v11 = vadd.f32 %v1635_v32, %v1563_v35  ;;  %v1565_v38 = vadd.f32 %v1564_v33, %v3157_v14 }
 0x152   : > { %v2460_v40 = vpop.eup %2459  ;;  %v1069_v42 = vmul.f32 %v1053_v28, %v3115_v44  ;;  %v1054_v43 = vsub.f32 1.0, %v1038_v36  ;;  %v1566_v46 = vpop.f32.mrf.mxu0 }
 0x153   : > { %v1639_v47 = vpop.f32.mrf.mxu1  ;;  %v1039_v48 = vmul.f32 2.0, %v2460_v40  ;;  %v1688_v50 = vmul.f32 1.442695, %v1672_v17  ;;  %v1673_v52 = vmin.f32 %v3172_v11, 20.0  ;;  %v3178_v53 = vadd.f32 %v1637_v37, %v1565_v38 }
 0x154   : > { %v2166_v49 = vpack.c.bf16 %v1069_v42, %v1068_v41  ;;  %v1567_v51 = vadd.f32 %v1566_v46, %v3161_v4  ;;  %v1570_v55 = vpop.f32.mrf.mxu0  ;;  %v1070_v45 = vmul.f32 %v1054_v43, %v3119_v56 }
 0x155   : > { %v1643_v58 = vpop.f32.mrf.mxu1  ;;  %v2462_v59 = vpop.eup %2461  ;;  %v1055_v39 = vsub.f32 1.0, %v1039_v48  ;;  %2465 = vpow2.f32 %v1688_v50  ;;  %v1690_v34 = vmul.f32 1.442695, %v1673_v52  ;;  %v1674_v44 = vmin.f32 %v3178_v53, 20.0 }
 0x156   : > { %1127 = vst [vmem:[%s3141_s27 + $0x28] sm:$0xff] %v2166_v49  ;;  %v1040_v60 = vmul.f32 2.0, %v2462_v59  ;;  %v3184_v61 = vadd.f32 %v1639_v47, %v1567_v51  ;;  %v1571_v62 = vadd.f32 %v1570_v55, %v3157_v14  ;;  %v1572_v0 = vpop.f32.mrf.mxu0 }
 0x157   : > { %v1645_v1 = vpop.f32.mrf.mxu1  ;;  %v2464_v2 = vpop.eup %2463  ;;  %v1071_v3 = vmul.f32 %v1055_v39, %v3123_v12  ;;  %2467 = vpow2.f32 %v1690_v34  ;;  %v1692_v6 = vmul.f32 1.442695, %v1674_v44  ;;  %v1573_v54 = vadd.f32 %v1572_v0, %v3161_v4 }
 0x158   : > { %v1056_v7 = vsub.f32 1.0, %v1040_v60  ;;  %v1041_v57 = vmul.f32 2.0, %v2464_v2  ;;  %v1675_v9 = vmin.f32 %v3184_v61, 20.0  ;;  %v3190_v56 = vadd.f32 %v1643_v58, %v1571_v62  ;;  %v1574_v13 = vpop.f32.mrf.mxu0 }
 0x159   : > { %v1647_v15 = vpop.f32.mrf.mxu1  ;;  %v2167_v18 = vpack.c.bf16 %v1071_v3, %v1070_v45  ;;  %2469 = vpow2.f32 %v1692_v6  ;;  %v3192_v20 = vadd.f32 %v1645_v1, %v1573_v54  ;;  %v1575_v21 = vadd.f32 %v1574_v13, %v3157_v14 }
 0x15a   : > { %v1057_v12 = vsub.f32 1.0, %v1041_v57  ;;  %v1694_v23 = vmul.f32 1.442695, %v1675_v9  ;;  %v1676_v19 = vmin.f32 %v3190_v56, 20.0  ;;  %v1576_v24 = vpop.f32.mrf.mxu0  ;;  %v1072_v29 = vmul.f32 %v1056_v7, %v3127_v25 }
 0x15b   : > { %v1649_v63 = vpop.f32.mrf.mxu1  ;;  %1128 = vst [vmem:[%s3141_s27 + $0x30] sm:$0xff] %v2167_v18  ;;  %v1677_v8 = vmin.f32 %v3192_v20, 20.0  ;;  %v3198_v10 = vadd.f32 %v1647_v15, %v1575_v21  ;;  %v1577_v27 = vadd.f32 %v1576_v24, %v3161_v4 }
 0x15c   : > { %v1073_v30 = vmul.f32 %v1057_v12, %v3129_v26  ;;  %2471 = vpow2.f32 %v1694_v23  ;;  %v1696_v31 = vmul.f32 1.442695, %v1676_v19  ;;  %v1580_v32 = vpop.f32.mrf.mxu0 }
 0x15d   : > { %v1653_v22 = vpop.f32.mrf.mxu1  ;;  %v1698_v5 = vmul.f32 1.442695, %v1677_v8  ;;  %v1678_v35 = vmin.f32 %v3198_v10, 20.0  ;;  %v3204_v28 = vadd.f32 %v1649_v63, %v1577_v27  ;;  %v1581_v36 = vadd.f32 %v1580_v32, %v3157_v14 }
 0x15e   : > { %v2168_v33 = vpack.c.bf16 %v1073_v30, %v1072_v29  ;;  %2473 = vpow2.f32 %v1696_v31  ;;  %v1582_v37 = vpop.f32.mrf.mxu0 }
 0x15f   : > { %v1655_v17 = vpop.f32.mrf.mxu1  ;;  %2475 = vpow2.f32 %v1698_v5  ;;  %v1700_v25 = vmul.f32 1.442695, %v1678_v35  ;;  %v1679_v26 = vmin.f32 %v3204_v28, 20.0  ;;  %v3208_v38 = vadd.f32 %v1653_v22, %v1581_v36 }
 0x160   : > { %1129 = vst [vmem:[%s3141_s27 + $0x38] sm:$0xff] %v2168_v33  ;;  %v1583_v40 = vadd.f32 %v1582_v37, %v3161_v4  ;;  %v1584_v41 = vpop.f32.mrf.mxu0 }
 0x161   : > { %v1657_v42 = vpop.f32.mrf.mxu1  ;;  %2477 = vpow2.f32 %v1700_v25  ;;  %v1702_v43 = vmul.f32 1.442695, %v1679_v26  ;;  %v1680_v46 = vmin.f32 %v3208_v38, 20.0  ;;  %v1585_v47 = vadd.f32 %v1584_v41, %v3157_v14 }
 0x162   : > { %v2466_v48 = vpop.eup %2465  ;;  %v3214_v50 = vadd.f32 %v1655_v17, %v1583_v40  ;;  %v1586_v52 = vpop.f32.mrf.mxu0 }
 0x163   : > { %v1659_v49 = vpop.f32.mrf.mxu1  ;;  %v1720_v51 = vadd.f32 2.0, %v2466_v48  ;;  %2479 = vpow2.f32 %v1702_v43  ;;  %v1704_v55 = vmul.f32 1.442695, %v1680_v46  ;;  %v3216_v58 = vadd.f32 %v1657_v42, %v1585_v47 }
 0x164   : > { %v2468_v59 = vpop.eup %2467  ;;  %v1681_v39 = vmin.f32 %v3214_v50, 20.0  ;;  %v1587_v34 = vadd.f32 %v1586_v52, %v3161_v4  ;;  %v1590_v44 = vpop.f32.mrf.mxu0 }
 0x165   : > { %v1663_v45 = vpop.f32.mrf.mxu1  ;;  %v1736_v60 = vmul.f32 %v2466_v48, %v1720_v51  ;;  %v1721_v62 = vadd.f32 2.0, %v2468_v59  ;;  %2481 = vpow2.f32 %v1704_v55  ;;  %v1682_v0 = vmin.f32 %v3216_v58, 20.0 }
 0x166   : > { %v2470_v1 = vpop.eup %2469  ;;  %v1706_v2 = vmul.f32 1.442695, %v1681_v39  ;;  %v3221_v3 = vadd.f32 %v1659_v49, %v1587_v34  ;;  %v1591_v6 = vadd.f32 %v1590_v44, %v3157_v14  ;;  %v1592_v54 = vpop.f32.mrf.mxu0 }
 0x167   : > { %v1665_v7 = vpop.f32.mrf.mxu1  ;;  %v1752_v57 = vadd.f32 2.0, %v1736_v60  ;;  %v1737_v9 = vmul.f32 %v2468_v59, %v1721_v62  ;;  %v1722_v13 = vadd.f32 2.0, %v2470_v1  ;;  %v1708_v15 = vmul.f32 1.442695, %v1682_v0 }
 0x168   : > { %2483 = vpow2.f32 %v1706_v2  ;;  %v1683_v18 = vmin.f32 %v3221_v3, 20.0  ;;  %v3225_v21 = vadd.f32 %v1663_v45, %v1591_v6  ;;  %v1593_v12 = vadd.f32 %v1592_v54, %v3161_v4  ;;  %v1594_v23 = vpop.f32.mrf.mxu0 }
 0x169   : > { %v2472_v19 = vpop.eup %2471  ;;  %2485 = vrcp.f32 %v1752_v57  ;;  %v1753_v24 = vadd.f32 2.0, %v1737_v9  ;;  %v1738_v63 = vmul.f32 %v2470_v1, %v1722_v13  ;;  %v1595_v8 = vadd.f32 %v1594_v23, %v3157_v14  ;;  %v1667_v31 = vpop.f32.mrf.mxu1 }
 0x16a   : > { %v1723_v27 = vadd.f32 2.0, %v2472_v19  ;;  %2487 = vpow2.f32 %v1708_v15  ;;  %v1710_v29 = vmul.f32 1.442695, %v1683_v18  ;;  %v1684_v30 = vmin.f32 %v3225_v21, 20.0  ;;  %v1596_v36 = vpop.f32.mrf.mxu0 }
 0x16b   : > { %v2474_v32 = vpop.eup %2473  ;;  %2489 = vrcp.f32 %v1753_v24  ;;  %v1754_v22 = vadd.f32 2.0, %v1738_v63  ;;  %v3230_v5 = vadd.f32 %v1665_v7, %v1593_v12  ;;  %v3232_v35 = vadd.f32 %v1667_v31, %v1595_v8  ;;  %v1669_v49 = vpop.f32.mrf.mxu1 }
 0x16c   : > { %v2476_v33 = vpop.eup %2475  ;;  %v1739_v37 = vmul.f32 %v2472_v19, %v1723_v27  ;;  %v1724_v17 = vadd.f32 2.0, %v2474_v32  ;;  %2491 = vpow2.f32 %v1710_v29  ;;  %v1712_v25 = vmul.f32 1.442695, %v1684_v30 }
 0x16d   : > { %2493 = vrcp.f32 %v1754_v22  ;;  %v1725_v14 = vadd.f32 2.0, %v2476_v33  ;;  %v1685_v26 = vmin.f32 %v3230_v5, 20.0  ;;  %v1686_v40 = vmin.f32 %v3232_v35, 20.0 }
 0x16e   : > { %v2478_v41 = vpop.eup %2477  ;;  %v1755_v42 = vadd.f32 2.0, %v1739_v37  ;;  %v1740_v43 = vmul.f32 %v2474_v32, %v1724_v17  ;;  %2495 = vpow2.f32 %v1712_v25  ;;  %v1597_v46 = vadd.f32 %v1596_v36, %v3161_v4 }
 0x16f   : > { %v1741_v47 = vmul.f32 %v2476_v33, %v1725_v14  ;;  %v1726_v48 = vadd.f32 2.0, %v2478_v41  ;;  %v1714_v52 = vmul.f32 1.442695, %v1685_v26  ;;  %v1716_v59 = vmul.f32 1.442695, %v1686_v40 }
 0x170   : > { %v2480_v51 = vpop.eup %2479  ;;  %2497 = vrcp.f32 %v1755_v42  ;;  %v1756_v55 = vadd.f32 2.0, %v1740_v43  ;;  %v3237_v39 = vadd.f32 %v1669_v49, %v1597_v46 }
 0x171   : > { %v1757_v34 = vadd.f32 2.0, %v1741_v47  ;;  %v1742_v44 = vmul.f32 %v2478_v41, %v1726_v48  ;;  %v1727_v45 = vadd.f32 2.0, %v2480_v51  ;;  %2499 = vpow2.f32 %v1714_v52 }
 0x172   : > { %v2482_v60 = vpop.eup %2481  ;;  %2501 = vrcp.f32 %v1756_v55  ;;  %v1687_v62 = vmin.f32 %v3237_v39, 20.0 }
 0x173   : > { %2503 = vrcp.f32 %v1757_v34  ;;  %v1758_v4 = vadd.f32 2.0, %v1742_v44  ;;  %v1743_v0 = vmul.f32 %v2480_v51, %v1727_v45  ;;  %v1728_v1 = vadd.f32 2.0, %v2482_v60 }
 0x174   : > { %2505 = vpow2.f32 %v1716_v59  ;;  %v1718_v2 = vmul.f32 1.442695, %v1687_v62 }
 0x175   : > { %v2484_v6 = vpop.eup %2483  ;;  %2507 = vrcp.f32 %v1758_v4  ;;  %v1759_v54 = vadd.f32 2.0, %v1743_v0  ;;  %v1744_v7 = vmul.f32 %v2482_v60, %v1728_v1 }
 0x176   : > { %v2486_v57 = vpop.eup %2485  ;;  %v1729_v9 = vadd.f32 2.0, %v2484_v6  ;;  %2509 = vpow2.f32 %v1718_v2 }
 0x177   : > { %v2488_v13 = vpop.eup %2487  ;;  %v1784_v15 = vmul.f32 2.0, %v2486_v57  ;;  %2511 = vrcp.f32 %v1759_v54  ;;  %v1760_v18 = vadd.f32 2.0, %v1744_v7 }
 0x178   : > { %v2490_v12 = vpop.eup %2489  ;;  %v1745_v23 = vmul.f32 %v2484_v6, %v1729_v9  ;;  %v1730_v19 = vadd.f32 2.0, %v2488_v13 }
 0x179   : > { %v2492_v24 = vpop.eup %2491  ;;  %v1800_v63 = vsub.f32 1.0, %v1784_v15  ;;  %v1785_v8 = vmul.f32 2.0, %v2490_v12  ;;  %2513 = vrcp.f32 %v1760_v18 }
 0x17a   : > { %v2494_v27 = vpop.eup %2493  ;;  %v1761_v29 = vadd.f32 2.0, %v1745_v23  ;;  %v1746_v30 = vmul.f32 %v2488_v13, %v1730_v19  ;;  %v1731_v31 = vadd.f32 2.0, %v2492_v24 }
 0x17b   : > { %v2496_v32 = vpop.eup %2495  ;;  %v1801_v22 = vsub.f32 1.0, %v1785_v8  ;;  %v1786_v36 = vmul.f32 2.0, %v2494_v27  ;;  %v1816_v14 = vmul.f32 %v1800_v63, %v3167_v16 }
 0x17c   : > { %2515 = vrcp.f32 %v1761_v29  ;;  %v1762_v33 = vadd.f32 2.0, %v1746_v30  ;;  %v1747_v37 = vmul.f32 %v2492_v24, %v1731_v31  ;;  %v1732_v17 = vadd.f32 2.0, %v2496_v32 }
 0x17d   : > { %v2498_v25 = vpop.eup %2497  ;;  %v1817_v26 = vmul.f32 %v1801_v22, %v3172_v11  ;;  %v1802_v40 = vsub.f32 1.0, %v1786_v36 }
 0x17e   : > { %v2500_v41 = vpop.eup %2499  ;;  %v1787_v42 = vmul.f32 2.0, %v2498_v25  ;;  %2517 = vrcp.f32 %v1762_v33  ;;  %v1763_v43 = vadd.f32 2.0, %v1747_v37  ;;  %v1748_v46 = vmul.f32 %v2496_v32, %v1732_v17 }
 0x17f   : > { %v2502_v47 = vpop.eup %2501  ;;  %v2169_v48 = vpack.c.bf16 %v1817_v26, %v1816_v14  ;;  %v1733_v52 = vadd.f32 2.0, %v2500_v41  ;;  %v1818_v59 = vmul.f32 %v1802_v40, %v3178_v53 }
 0x180   : > { %v2504_v49 = vpop.eup %2503  ;;  %v1803_v16 = vsub.f32 1.0, %v1787_v42  ;;  %v1788_v51 = vmul.f32 2.0, %v2502_v47  ;;  %2519 = vrcp.f32 %v1763_v43  ;;  %v1764_v11 = vadd.f32 2.0, %v1748_v46 }
 0x181   : > { %v2506_v55 = vpop.eup %2505  ;;  %1880 = vst [vmem:[%s3247_s9] sm:$0xff] %v2169_v48  ;;  %v1789_v34 = vmul.f32 2.0, %v2504_v49  ;;  %v1749_v44 = vmul.f32 %v2500_v41, %v1733_v52 }
 0x182   : > { %v2508_v45 = vpop.eup %2507  ;;  %v1819_v60 = vmul.f32 %v1803_v16, %v3184_v61  ;;  %v1804_v62 = vsub.f32 1.0, %v1788_v51  ;;  %2521 = vrcp.f32 %v1764_v11  ;;  %v1734_v4 = vadd.f32 2.0, %v2506_v55 }
 0x183   : > { %v2510_v0 = vpop.eup %2509  ;;  %v1805_v1 = vsub.f32 1.0, %v1789_v34  ;;  %v1790_v2 = vmul.f32 2.0, %v2508_v45  ;;  %v1765_v6 = vadd.f32 2.0, %v1749_v44 }
 0x184   : > { %v2512_v54 = vpop.eup %2511  ;;  %v2170_v7 = vpack.c.bf16 %v1819_v60, %v1818_v59  ;;  %v1820_v57 = vmul.f32 %v1804_v62, %v3190_v56  ;;  %v1750_v9 = vmul.f32 %v2506_v55, %v1734_v4  ;;  %v1735_v53 = vadd.f32 2.0, %v2510_v0 }
 0x185   : > { %v1821_v13 = vmul.f32 %v1805_v1, %v3192_v20  ;;  %v1806_v15 = vsub.f32 1.0, %v1790_v2  ;;  %v1791_v18 = vmul.f32 2.0, %v2512_v54  ;;  %2523 = vrcp.f32 %v1765_v6 }
 0x186   : > { %v2514_v61 = vpop.eup %2513  ;;  %1881 = vst [vmem:[%s3247_s9 + $0x8] sm:$0xff] %v2170_v7  ;;  %v1766_v12 = vadd.f32 2.0, %v1750_v9  ;;  %v1751_v23 = vmul.f32 %v2510_v0, %v1735_v53 }
 0x187   : > { %v2171_v19 = vpack.c.bf16 %v1821_v13, %v1820_v57  ;;  %v1807_v24 = vsub.f32 1.0, %v1791_v18  ;;  %v1792_v63 = vmul.f32 2.0, %v2514_v61  ;;  %v1822_v56 = vmul.f32 %v1806_v15, %v3198_v10 }
 0x188   : > { %2525 = vrcp.f32 %v1766_v12  ;;  %v1767_v8 = vadd.f32 2.0, %v1751_v23 }
 0x189   : > { %v2516_v27 = vpop.eup %2515  ;;  %1882 = vst [vmem:[%s3247_s9 + $0x10] sm:$0xff] %v2171_v19  ;;  %v1823_v29 = vmul.f32 %v1807_v24, %v3204_v28  ;;  %v1808_v20 = vsub.f32 1.0, %v1792_v63 }
 0x18a   : > { %v1793_v30 = vmul.f32 2.0, %v2516_v27  ;;  %2527 = vrcp.f32 %v1767_v8 }
 0x18b   : > { %v2518_v31 = vpop.eup %2517  ;;  %v2172_v32 = vpack.c.bf16 %v1823_v29, %v1822_v56  ;;  %v1824_v37 = vmul.f32 %v1808_v20, %v3208_v38 }
 0x18c   : > { %v1809_v22 = vsub.f32 1.0, %v1793_v30  ;;  %v1794_v36 = vmul.f32 2.0, %v2518_v31 }
 0x18d   : > { %v2520_v33 = vpop.eup %2519  ;;  %1883 = vst [vmem:[%s3247_s9 + $0x18] sm:$0xff] %v2172_v32 }
 0x18e   : > { %v1825_v17 = vmul.f32 %v1809_v22, %v3214_v50  ;;  %v1810_v25 = vsub.f32 1.0, %v1794_v36  ;;  %v1795_v14 = vmul.f32 2.0, %v2520_v33 }
 0x18f   : > { %v2522_v10 = vpop.eup %2521 }
 0x190   : > { %v2173_v26 = vpack.c.bf16 %v1825_v17, %v1824_v37  ;;  %v1811_v28 = vsub.f32 1.0, %v1795_v14  ;;  %v1796_v40 = vmul.f32 2.0, %v2522_v10  ;;  %v1826_v42 = vmul.f32 %v1810_v25, %v3216_v58 }
 0x192   : > { %v2524_v41 = vpop.eup %2523  ;;  %1884 = vst [vmem:[%s3247_s9 + $0x20] sm:$0xff] %v2173_v26  ;;  %v1827_v43 = vmul.f32 %v1811_v28, %v3221_v3  ;;  %v1812_v46 = vsub.f32 1.0, %v1796_v40 }
 0x193   : > { %v1797_v47 = vmul.f32 2.0, %v2524_v41 }
 0x194   : > { %v2174_v48 = vpack.c.bf16 %v1827_v43, %v1826_v42  ;;  %v1828_v16 = vmul.f32 %v1812_v46, %v3225_v21 }
 0x195   : > { %v2526_v38 = vpop.eup %2525  ;;  %v1813_v50 = vsub.f32 1.0, %v1797_v47 }
 0x196   : > { %1885 = vst [vmem:[%s3247_s9 + $0x28] sm:$0xff] %v2174_v48  ;;  %v1798_v52 = vmul.f32 2.0, %v2526_v38 }
 0x197   : > { %v2528_v49 = vpop.eup %2527  ;;  %v1829_v51 = vmul.f32 %v1813_v50, %v3230_v5 }
 0x198   : > { %v1814_v11 = vsub.f32 1.0, %v1798_v52  ;;  %v1799_v55 = vmul.f32 2.0, %v2528_v49 }
 0x199   : > { %v2175_v59 = vpack.c.bf16 %v1829_v51, %v1828_v16 }
 0x19a   : > { %v1815_v58 = vsub.f32 1.0, %v1799_v55  ;;  %v1830_v3 = vmul.f32 %v1814_v11, %v3232_v35 }
 0x19b   : > { %1886 = vst [vmem:[%s3247_s9 + $0x30] sm:$0xff] %v2175_v59 }
 0x19c   : > { %v1831_v34 = vmul.f32 %v1815_v58, %v3237_v39 }
 0x19e   : > { %v2176_v44 = vpack.c.bf16 %v1831_v34, %v1830_v3 }
 0x1a0   : > { %1887 = vst [vmem:[%s3247_s9 + $0x38] sm:$0xff] %v2176_v44 }
 0x1a1 PF: > { %s17_s21 = sadd.s32 1, %s2535_s21  }
 0x1a2   : > { %p14_p4 = scmp.ge.s32.totalorder %s17_s21, 4  }
 0x1a4   :  { %16 = sbr.rel (!%p14_p4) target bundleno = 1 (0x1), region = 82 }

// kernel: downsample4_forward.21
= control target key start
LH: loop header
LB: loop body
LE: loop exit
PB: predicated region body
PF: predicated region fallthrough
CT: control target
= control target key end

     0   :  { %12 = vsyncpa [#allocation3], 0  ;;  %s4360_s0 = inlined_call_operand.vmem [shape: bf16[128,256], index: 0, kind: input, shape index: {}]   ;;  %s4361_s1 = inlined_call_operand.vmem [shape: bf16[128,256], index: 1, kind: input, shape index: {}]   ;;  %s4362_s2 = inlined_call_operand.vmem [shape: bf16[256,256], index: 2, kind: input, shape index: {}]   ;;  %s4363_s3 = inlined_call_operand.vmem [shape: f32[1,256], index: 3, kind: input, shape index: {}]   ;;  %s4364_s4 = inlined_call_operand.vmem [shape: bf16[256,512], index: 4, kind: input, shape index: {}]   ;;  %s4365_s5 = inlined_call_operand.vmem [shape: bf16[256,512], index: 5, kind: input, shape index: {}]   ;;  %s4366_s6 = inlined_call_operand.vmem [shape: f32[1,512], index: 6, kind: input, shape index: {}]   ;;  %s4367_s7 = inlined_call_operand.hbm [shape: f32[128,512], index: 7, kind: output, shape index: {}]  }
   0x1   :  { %14 = vsyncpa [#allocation3 + $0x1], 0  ;;  %s3235_s24 = smov 0   ;;  %s3237_s25 = smov 0  }
   0x2   :  { %s3239_s26 = smov 0   ;;  %s3241_s27 = smov 0  }
   0x3 LB: > { %s3256_s28 = sadd.s32 4294967295, %s3190_s27   ;;  %s2404_s29 = sadd.s32 4294967294, %s3190_s27   ;;  %s3190_s27 = sphi %s3241_s27, %s4408_s27   ;;  %s3186_s26 = sphi %s3239_s26, %s4407_s26   ;;  %s3182_s25 = sphi %s3237_s25, %s4406_s25   ;;  %s3178_s24 = sphi %s3235_s24, %s4405_s24  }
   0x4   : > { %s3260_s30 = sadd.s32 1, %s3190_s27   ;;  %s184_s8 = sadd.s32 1, %s3186_s26 }
   0x5   : > { %s181_s9 = ssub.s32 %s3190_s27, %s3260_s30  ;;  %p194_p0 = scmp.ne.s32.totalorder %s3186_s26, %s3182_s25 }
   0x6   : > { %p182_p1 = scmp.eq.s32.totalorder %s181_s9, 0  ;;  %p195_p2 = scmp.eq.s32.totalorder %s3256_s28, 1 }
   0x7   : > { %p200_p3 = scmp.ne.s32.totalorder %s3182_s25, %s3178_s24  ;;  %p201_p4 = scmp.eq.s32.totalorder %s2404_s29, 1 }
   0x8   : > { %s3271_s10 = scalar_select %p182_p1, %s3186_s26, %s184_s8  }
   0x9   : > { %p3273_p5 = por %p195_p2, %p194_p0  ;;  %p3277_p6 = por %p201_p4, %p200_p3 }
   0xa   : > { %p2407_p7 = scmp.ge.s32.totalorder %s3190_s27, 1  ;;  %p254_p8 = scmp.lt.s32.totalorder %s3190_s27, 3 }
   0xc   : > { %p255_p9 = pnand %p2407_p7, %p254_p8 }
   0xe   : > { %258 = sbr.rel (%p255_p9) target bundleno = 667 (0x29b), region = 48 }
  0x13   : > { %v2674_v0 = vld [vmem:[%s4362_s2 + $0x74] ss:$8 sps:$4 sm:$0xff]   ;;  %v2676_v1 = vld [vmem:[%s4362_s2 + $0x70] ss:$8 sps:$4 sm:$0xff]   ;;  %v2677_v2 = vld [vmem:[%s4362_s2 + $0x64] ss:$8 sps:$4 sm:$0xff]  }
  0x14   : > { %560 = vmatprep.subr.bf16.mxu0 %v2674_v0  ;;  %v2679_v3 = vld [vmem:[%s4362_s2 + $0x60] ss:$8 sps:$4 sm:$0xff]   ;;  %v2680_v4 = vld [vmem:[%s4362_s2 + $0x54] ss:$8 sps:$4 sm:$0xff]   ;;  %s2409_s23 = sshll.u32 %s3256_s28, 3  ;;  %s290_s8 = sand.u32 1, %s3182_s25  }
  0x15   : > { %561 = vmatpush1.bf16.msra.mxu0 %v2676_v1  ;;  %v2682_v5 = vld [vmem:[%s4362_s2 + $0x50] ss:$8 sps:$4 sm:$0xff]   ;;  %v2683_v6 = vld [vmem:[%s4362_s2 + $0x44] ss:$8 sps:$4 sm:$0xff]   ;;  %p294_p10 = scmp.lt.s32.totalorder %s2409_s23, 15  ;;  %s4181_s9 = sshll.u32 %s290_s8, 8 }
  0x16   : > { %562 = vmatprep.subr.bf16.mxu0 %v2677_v2  ;;  %v2685_v7 = vld [vmem:[%s4362_s2 + $0x40] ss:$8 sps:$4 sm:$0xff]   ;;  %v2686_v8 = vld [vmem:[%s4362_s2 + $0x34] ss:$8 sps:$4 sm:$0xff]   ;;  %v2688_v9 = vld [vmem:[%s4362_s2 + $0x30] ss:$8 sps:$4 sm:$0xff]  }
  0x17   : > { %s4410_s23 = smov (!%p294_p10, %s2409_s23), 15  ;;  %v2689_v10 = vld [vmem:[%s4362_s2 + $0x24] ss:$8 sps:$4 sm:$0xff]   ;;  %v2691_v11 = vld [vmem:[%s4362_s2 + $0x20] ss:$8 sps:$4 sm:$0xff]   ;;  %s3192_s17 = smov [#allocation2]  }
  0x18   : > { %s2597_s22 = sshll.u32 %s4410_s23, 3  ;;  %v2692_v12 = vld [vmem:[%s4362_s2 + $0x14] ss:$8 sps:$4 sm:$0xff]   ;;  %v2694_v14 = vld [vmem:[%s4362_s2 + $0x10] ss:$8 sps:$4 sm:$0xff]   ;;  %s2600_s23 = sshll.u32 %s3256_s28, 12 }
  0x19   : > { %563 = vmatpush1.bf16.msra.mxu0 %v2679_v3  ;;  %s3328_s14 = scalar_lea.vmem %s4360_s0, %s2597_s22  ;;  %v2695_v15 = vld [vmem:[%s4362_s2 + $0x4] ss:$8 sps:$4 sm:$0xff]   ;;  %v2697_v16 = vld [vmem:[%s4362_s2] ss:$8 sps:$4 sm:$0xff]   ;;  %v2698_v17 = vld [vmem:[%s4362_s2 + $0xf4] ss:$8 sps:$4 sm:$0xff]   ;;  %s3473_s19 = scalar_lea.vmem %s4361_s1, %s2597_s22 }
  0x1a   : > { %564 = vmatprep.subr.bf16.mxu0 %v2680_v4  ;;  %v2724_v13 = vld [vmem:[%s3328_s14 + $0x4] ss:$8 sps:$4 sm:$0xff]   ;;  %v2736_v19 = vld [vmem:[%s4365_s5 + $0xe0] ss:$16 sps:$4 sm:$0xff]   ;;  %v2704_v28 = vld [vmem:[%s4362_s2 + $0xd4] ss:$8 sps:$4 sm:$0xff]   ;;  %s4311_s16 = scalar_lea.hbm %s4367_s7, %s2600_s23 }
  0x1b   : > { %592 = vmatprep.mubr.bf16.mxu0 %v2724_v13  ;;  %v2734_v18 = vld [vmem:[%s4365_s5 + $0xe4] ss:$16 sps:$4 sm:$0xff]   ;;  %v2739_v21 = vld [vmem:[%s4365_s5 + $0xc0] ss:$16 sps:$4 sm:$0xff]   ;;  %v2742_v52 = vld [vmem:[%s4365_s5 + $0xec] ss:$16 sps:$4 sm:$0xff]  }
  0x1c   : > { %v2737_v20 = vld [vmem:[%s4365_s5 + $0xc4] ss:$16 sps:$4 sm:$0xff]   ;;  %1297 = vmatprep.subr.bf16.mxu1 %v2734_v18  ;;  %v2700_v22 = vld [vmem:[%s4362_s2 + $0xf0] ss:$8 sps:$4 sm:$0xff]   ;;  %v2703_v26 = vld [vmem:[%s4362_s2 + $0xe0] ss:$8 sps:$4 sm:$0xff]  }
  0x1d   : > { %565 = vmatpush1.bf16.msra.mxu0 %v2682_v5  ;;  %1298 = vmatpush1.bf16.msra.mxu1 %v2736_v19  ;;  %v2743_v23 = vld [vmem:[%s4365_s5 + $0xa4] ss:$16 sps:$4 sm:$0xff]   ;;  %v2745_v25 = vld [vmem:[%s4365_s5 + $0xa0] ss:$16 sps:$4 sm:$0xff]   ;;  %v2740_v56 = vld [vmem:[%s4365_s5 + $0xe8] ss:$16 sps:$4 sm:$0xff]  }
  0x1e   : > { %566 = vmatprep.subr.bf16.mxu0 %v2683_v6  ;;  %1299 = vmatprep.subr.bf16.mxu1 %v2737_v20  ;;  %v2701_v24 = vld [vmem:[%s4362_s2 + $0xe4] ss:$8 sps:$4 sm:$0xff]   ;;  %v2751_v29 = vld [vmem:[%s4365_s5 + $0x80] ss:$16 sps:$4 sm:$0xff]   ;;  %v2710_v36 = vld [vmem:[%s4362_s2 + $0xb4] ss:$8 sps:$4 sm:$0xff]  }
  0x1f   : > { %v2749_v27 = vld [vmem:[%s4365_s5 + $0x84] ss:$16 sps:$4 sm:$0xff]   ;;  %v2706_v30 = vld [vmem:[%s4362_s2 + $0xd0] ss:$8 sps:$4 sm:$0xff]   ;;  %v2709_v34 = vld [vmem:[%s4362_s2 + $0xc0] ss:$8 sps:$4 sm:$0xff]  }
  0x20   : > { %v2755_v31 = vld [vmem:[%s4365_s5 + $0x64] ss:$16 sps:$4 sm:$0xff]   ;;  %v2757_v33 = vld [vmem:[%s4365_s5 + $0x60] ss:$16 sps:$4 sm:$0xff]   ;;  %v2748_v57 = vld [vmem:[%s4365_s5 + $0xcc] ss:$16 sps:$4 sm:$0xff]  }
  0x21   : > { %567 = vmatpush1.bf16.msra.mxu0 %v2685_v7  ;;  %1300 = vmatpush1.bf16.msra.mxu1 %v2739_v21  ;;  %v2707_v32 = vld [vmem:[%s4362_s2 + $0xc4] ss:$8 sps:$4 sm:$0xff]   ;;  %v2763_v37 = vld [vmem:[%s4365_s5 + $0x40] ss:$16 sps:$4 sm:$0xff]   ;;  %v2716_v44 = vld [vmem:[%s4362_s2 + $0x94] ss:$8 sps:$4 sm:$0xff]  }
  0x22   : > { %568 = vmatprep.subr.bf16.mxu0 %v2686_v8  ;;  %1301 = vmatprep.subr.bf16.mxu1 %v2743_v23  ;;  %v2761_v35 = vld [vmem:[%s4365_s5 + $0x44] ss:$16 sps:$4 sm:$0xff]   ;;  %v2712_v38 = vld [vmem:[%s4362_s2 + $0xb0] ss:$8 sps:$4 sm:$0xff]   ;;  %v2715_v42 = vld [vmem:[%s4362_s2 + $0xa0] ss:$8 sps:$4 sm:$0xff]  }
  0x23   : > { %v2767_v39 = vld [vmem:[%s4365_s5 + $0x24] ss:$16 sps:$4 sm:$0xff]   ;;  %v2769_v41 = vld [vmem:[%s4365_s5 + $0x20] ss:$16 sps:$4 sm:$0xff]   ;;  %v2746_v60 = vld [vmem:[%s4365_s5 + $0xc8] ss:$16 sps:$4 sm:$0xff]  }
  0x24   : > { %v2713_v40 = vld [vmem:[%s4362_s2 + $0xa4] ss:$8 sps:$4 sm:$0xff]   ;;  %v2775_v45 = vld [vmem:[%s4365_s5] ss:$16 sps:$4 sm:$0xff]   ;;  %v2725_v54 = vld [vmem:[%s3328_s14 + $0x14] ss:$8 sps:$4 sm:$0xff]  }
  0x25   : > { %569 = vmatpush1.bf16.msra.mxu0 %v2688_v9  ;;  %1302 = vmatpush1.bf16.msra.mxu1 %v2745_v25  ;;  %v2773_v43 = vld [vmem:[%s4365_s5 + $0x4] ss:$16 sps:$4 sm:$0xff]   ;;  %v2718_v46 = vld [vmem:[%s4362_s2 + $0x90] ss:$8 sps:$4 sm:$0xff]   ;;  %v2721_v50 = vld [vmem:[%s4362_s2 + $0x80] ss:$8 sps:$4 sm:$0xff]  }
  0x26   : > { %570 = vmatprep.subr.bf16.mxu0 %v2689_v10  ;;  %1303 = vmatprep.subr.bf16.mxu1 %v2749_v27  ;;  %v2779_v47 = vld [vmem:[%s4365_s5 + $0x1e4] ss:$16 sps:$4 sm:$0xff]   ;;  %v2781_v49 = vld [vmem:[%s4365_s5 + $0x1e0] ss:$16 sps:$4 sm:$0xff]   ;;  %v2754_v63 = vld [vmem:[%s4365_s5 + $0xac] ss:$16 sps:$4 sm:$0xff]  }
  0x27   : > { %v2719_v48 = vld [vmem:[%s4362_s2 + $0x84] ss:$8 sps:$4 sm:$0xff]   ;;  %v2722_v53 = vld [vmem:[%s3328_s14] ss:$8 sps:$4 sm:$0xff]   ;;  %v2727_v62 = vld [vmem:[%s3328_s14 + $0x10] ss:$8 sps:$4 sm:$0xff]  }
  0x28   : > { %v2785_v51 = vld [vmem:[%s4365_s5 + $0x1c4] ss:$16 sps:$4 sm:$0xff]   ;;  %v2787_v55 = vld [vmem:[%s4365_s5 + $0x1c0] ss:$16 sps:$4 sm:$0xff]   ;;  %v2752_v3 = vld [vmem:[%s4365_s5 + $0xa8] ss:$16 sps:$4 sm:$0xff]  }
  0x29   : > { %571 = vmatpush1.bf16.msra.mxu0 %v2691_v11  ;;  %1304 = vmatpush1.bf16.msra.mxu1 %v2751_v29  ;;  %v2791_v58 = vld [vmem:[%s4365_s5 + $0x1a4] ss:$16 sps:$4 sm:$0xff]   ;;  %v2793_v59 = vld [vmem:[%s4365_s5 + $0x1a0] ss:$16 sps:$4 sm:$0xff]   ;;  %v2760_v4 = vld [vmem:[%s4365_s5 + $0x8c] ss:$16 sps:$4 sm:$0xff]  }
  0x2a   : > { %572 = vmatprep.subr.bf16.mxu0 %v2692_v12  ;;  %1305 = vmatprep.subr.bf16.mxu1 %v2755_v31  ;;  %v2797_v61 = vld [vmem:[%s4365_s5 + $0x184] ss:$16 sps:$4 sm:$0xff]   ;;  %v2799_v2 = vld [vmem:[%s4365_s5 + $0x180] ss:$16 sps:$4 sm:$0xff]   ;;  %v2758_v7 = vld [vmem:[%s4365_s5 + $0x88] ss:$16 sps:$4 sm:$0xff]  }
  0x2b   : > { %v2829_v0 = vld [vmem:[%s3473_s19 + $0x4] ss:$8 sps:$4 sm:$0xff]   ;;  %v2805_v6 = vld [vmem:[%s4365_s5 + $0x160] ss:$16 sps:$4 sm:$0xff]   ;;  %v2731_v11 = vld [vmem:[%s3328_s14 + $0x34] ss:$8 sps:$4 sm:$0xff]  }
  0x2c   : > { %v2728_v1 = vld [vmem:[%s3328_s14 + $0x24] ss:$8 sps:$4 sm:$0xff]   ;;  %1329 = vmatprep.mubr.bf16.mxu1 %v2829_v0  ;;  %v2730_v9 = vld [vmem:[%s3328_s14 + $0x20] ss:$8 sps:$4 sm:$0xff]   ;;  %v2733_v20 = vld [vmem:[%s3328_s14 + $0x30] ss:$8 sps:$4 sm:$0xff]  }
  0x2d   : > { %573 = vmatpush1.bf16.msra.mxu0 %v2694_v14  ;;  %1306 = vmatpush1.bf16.msra.mxu1 %v2757_v33  ;;  %v2803_v5 = vld [vmem:[%s4365_s5 + $0x164] ss:$16 sps:$4 sm:$0xff]   ;;  %v2766_v10 = vld [vmem:[%s4365_s5 + $0x6c] ss:$16 sps:$4 sm:$0xff]   ;;  %v2764_v12 = vld [vmem:[%s4365_s5 + $0x68] ss:$16 sps:$4 sm:$0xff]  }
  0x2e   : > { %574 = vmatprep.subr.bf16.mxu0 %v2695_v15  ;;  %1307 = vmatprep.subr.bf16.mxu1 %v2761_v35  ;;  %v2809_v8 = vld [vmem:[%s4365_s5 + $0x144] ss:$16 sps:$4 sm:$0xff]   ;;  %v2811_v13 = vld [vmem:[%s4365_s5 + $0x140] ss:$16 sps:$4 sm:$0xff]   ;;  %v2772_v14 = vld [vmem:[%s4365_s5 + $0x4c] ss:$16 sps:$4 sm:$0xff]  }
  0x2f   : > { %v2815_v15 = vld [vmem:[%s4365_s5 + $0x124] ss:$16 sps:$4 sm:$0xff]   ;;  %v2778_v19 = vld [vmem:[%s4365_s5 + $0x2c] ss:$16 sps:$4 sm:$0xff]   ;;  %v2823_v21 = vld [vmem:[%s4365_s5 + $0x100] ss:$16 sps:$4 sm:$0xff]  }
  0x30   : > { %v2821_v18 = vld [vmem:[%s4365_s5 + $0x104] ss:$16 sps:$4 sm:$0xff]   ;;  %v2827_v25 = vld [vmem:[%s3473_s19] ss:$8 sps:$4 sm:$0xff]   ;;  %v2790_v29 = vld [vmem:[%s4365_s5 + $0x1ec] ss:$16 sps:$4 sm:$0xff]  }
  0x31   : > { %575 = vmatpush1.bf16.msra.mxu0 %v2697_v16  ;;  %1308 = vmatpush1.bf16.msra.mxu1 %v2763_v37  ;;  %v2817_v16 = vld [vmem:[%s4365_s5 + $0x120] ss:$16 sps:$4 sm:$0xff]   ;;  %v2835_v23 = vld [vmem:[%s4364_s4 + $0xe4] ss:$16 sps:$4 sm:$0xff]   ;;  %v2782_v27 = vld [vmem:[%s4365_s5 + $0x8] ss:$16 sps:$4 sm:$0xff]  }
  0x32   : > { %576 = vmatprep.subr.bf16.mxu0 %v2698_v17  ;;  %1309 = vmatprep.subr.bf16.mxu1 %v2767_v39  ;;  %v2770_v17 = vld [vmem:[%s4365_s5 + $0x48] ss:$16 sps:$4 sm:$0xff]   ;;  %v2796_v33 = vld [vmem:[%s4365_s5 + $0x1cc] ss:$16 sps:$4 sm:$0xff]   ;;  %s4320_s28 = scalar_lea.sflag [#allocation3], %s290_s8  ;;  %s3134_s18 = sshll.u32 %s3192_s17, 4  ;;  %s3135_s18 = int_to_ptr.vmem [resolvable:$false] %s3134_s18 }
  0x33   : > { %v2788_v31 = vld [vmem:[%s4365_s5 + $0x1e8] ss:$16 sps:$4 sm:$0xff]   ;;  %s3136_s20 = scalar_lea.vmem %s3135_s18, 8192 }
  0x34   : > { %v2794_v35 = vld [vmem:[%s4365_s5 + $0x1c8] ss:$16 sps:$4 sm:$0xff]  }
  0x35   : > { %577 = vmatpush2.bf16.msra.mxu0 %v2700_v22  ;;  %1310 = vmatpush1.bf16.msra.mxu1 %v2769_v41  ;;  %v2776_v22 = vld [vmem:[%s4365_s5 + $0x28] ss:$16 sps:$4 sm:$0xff]  }
  0x36   : > { %578 = vmatprep.subr.bf16.mxu0 %v2701_v24  ;;  %1311 = vmatprep.subr.bf16.mxu1 %v2773_v43  ;;  %v2784_v24 = vld [vmem:[%s4365_s5 + $0xc] ss:$16 sps:$4 sm:$0xff]   ;;  %v2800_v37 = vld [vmem:[%s4365_s5 + $0x1a8] ss:$16 sps:$4 sm:$0xff]  }
  0x37   : > { %v2806_v39 = vld [vmem:[%s4365_s5 + $0x188] ss:$16 sps:$4 sm:$0xff]  }
  0x38   : > { %v2812_v41 = vld [vmem:[%s4365_s5 + $0x168] ss:$16 sps:$4 sm:$0xff]  }
  0x39   : > { %579 = vmatpush2.bf16.msra.mxu0 %v2703_v26  ;;  %1312 = vmatpush1.bf16.msra.mxu1 %v2775_v45  ;;  %v2833_v26 = vld [vmem:[%s4364_s4 + $0xe0] ss:$16 sps:$4 sm:$0xff]   ;;  %v2818_v43 = vld [vmem:[%s4365_s5 + $0x148] ss:$16 sps:$4 sm:$0xff]  }
  0x3a   : > { %580 = vmatprep.subr.bf16.mxu0 %v2704_v28  ;;  %1313 = vmatprep.subr.bf16.mxu1 %v2779_v47  ;;  %v2841_v28 = vld [vmem:[%s4364_s4 + $0xc4] ss:$16 sps:$4 sm:$0xff]   ;;  %v2824_v45 = vld [vmem:[%s4365_s5 + $0x128] ss:$16 sps:$4 sm:$0xff]  }
  0x3b   : > { %v2830_v47 = vld [vmem:[%s4365_s5 + $0x108] ss:$16 sps:$4 sm:$0xff]  }
  0x3d   : > { %581 = vmatpush2.bf16.msra.mxu0 %v2706_v30  ;;  %1314 = vmatpush2.bf16.msra.mxu1 %v2781_v49  ;;  %v2839_v30 = vld [vmem:[%s4364_s4 + $0xc0] ss:$16 sps:$4 sm:$0xff]   ;;  %v3625_v49 = vld [vmem:[%s4364_s4 + $0xe8] ss:$16 sps:$4 sm:$0xff]  }
  0x3e   : > { %582 = vmatprep.subr.bf16.mxu0 %v2707_v32  ;;  %1315 = vmatprep.subr.bf16.mxu1 %v2785_v51  ;;  %v2847_v32 = vld [vmem:[%s4364_s4 + $0xa4] ss:$16 sps:$4 sm:$0xff]   ;;  %v3637_v51 = vld [vmem:[%s4364_s4 + $0xc8] ss:$16 sps:$4 sm:$0xff]  }
  0x41   : > { %583 = vmatpush2.bf16.msra.mxu0 %v2709_v34  ;;  %1316 = vmatpush2.bf16.msra.mxu1 %v2787_v55  ;;  %v2845_v34 = vld [vmem:[%s4364_s4 + $0xa0] ss:$16 sps:$4 sm:$0xff]   ;;  %v3655_v55 = vld [vmem:[%s4364_s4 + $0xa8] ss:$16 sps:$4 sm:$0xff]  }
  0x42   : > { %584 = vmatprep.subr.bf16.mxu0 %v2710_v36  ;;  %1317 = vmatprep.subr.bf16.mxu1 %v2791_v58  ;;  %v2802_v36 = vld [vmem:[%s4365_s5 + $0x1ac] ss:$16 sps:$4 sm:$0xff]   ;;  %v2857_v58 = vld [vmem:[%s4364_s4 + $0x60] ss:$16 sps:$4 sm:$0xff]  }
  0x45   : > { %585 = vmatpush2.bf16.msra.mxu0 %v2712_v38  ;;  %1318 = vmatpush2.bf16.msra.mxu1 %v2793_v59  ;;  %v2808_v38 = vld [vmem:[%s4365_s5 + $0x18c] ss:$16 sps:$4 sm:$0xff]   ;;  %v3673_v59 = vld [vmem:[%s4364_s4 + $0x88] ss:$16 sps:$4 sm:$0xff]  }
  0x46   : > { %586 = vmatprep.subr.bf16.mxu0 %v2713_v40  ;;  %1319 = vmatprep.subr.bf16.mxu1 %v2797_v61  ;;  %v2814_v40 = vld [vmem:[%s4365_s5 + $0x16c] ss:$16 sps:$4 sm:$0xff]  }
  0x47   : > { %v3682_v61 = vld [vmem:[%s4364_s4 + $0x6c] ss:$16 sps:$4 sm:$0xff]  }
  0x49   : > { %587 = vmatpush2.bf16.msra.mxu0 %v2715_v42  ;;  %1320 = vmatpush2.bf16.msra.mxu1 %v2799_v2  ;;  %v2820_v42 = vld [vmem:[%s4365_s5 + $0x14c] ss:$16 sps:$4 sm:$0xff]   ;;  %v2869_v2 = vld [vmem:[%s4364_s4 + $0x20] ss:$16 sps:$4 sm:$0xff]  }
  0x4a   : > { %588 = vmatprep.subr.bf16.mxu0 %v2716_v44  ;;  %1321 = vmatprep.subr.bf16.mxu1 %v2803_v5  ;;  %v2826_v44 = vld [vmem:[%s4365_s5 + $0x12c] ss:$16 sps:$4 sm:$0xff]  }
  0x4b   : > { %v3718_v5 = vld [vmem:[%s4364_s4 + $0x2c] ss:$16 sps:$4 sm:$0xff]  }
  0x4d   : > { %589 = vmatpush2.bf16.msra.mxu0 %v2718_v46  ;;  %1322 = vmatpush2.bf16.msra.mxu1 %v2805_v6  ;;  %v2832_v46 = vld [vmem:[%s4365_s5 + $0x10c] ss:$16 sps:$4 sm:$0xff]   ;;  %v2875_v6 = vld [vmem:[%s4364_s4] ss:$16 sps:$4 sm:$0xff]  }
  0x4e   : > { %590 = vmatprep.subr.bf16.mxu0 %v2719_v48  ;;  %1323 = vmatprep.subr.bf16.mxu1 %v2809_v8  ;;  %v3620_v48 = vld [vmem:[%s4364_s4 + $0xec] ss:$16 sps:$4 sm:$0xff]  }
  0x4f   : > { %v3733_v8 = vld [vmem:[%s4364_s4 + $0xc] ss:$16 sps:$4 sm:$0xff]  }
  0x51   : > { %591 = vmatpush2.bf16.msra.mxu0 %v2721_v50  ;;  %1324 = vmatpush2.bf16.msra.mxu1 %v2811_v13  ;;  %v3631_v50 = vld [vmem:[%s4364_s4 + $0xcc] ss:$16 sps:$4 sm:$0xff]   ;;  %v2889_v13 = vld [vmem:[%s3473_s19 + $0x10] ss:$8 sps:$4 sm:$0xff]  }
  0x52   : > { %1370 = vmatprep.subr.bf16.mxu0 %v2742_v52  ;;  %1325 = vmatprep.subr.bf16.mxu1 %v2815_v15  ;;  %v2853_v52 = vld [vmem:[%s4364_s4 + $0x84] ss:$16 sps:$4 sm:$0xff]  }
  0x53   : > { %v2892_v15 = vld [vmem:[%s4364_s4 + $0x1c4] ss:$16 sps:$4 sm:$0xff]  }
  0x54   : > { %593 = vmatmul.mubr.bf16.vlgmr.msra.gmra.mxu0 %v2722_v53  ;;  %v3646_v53 = vld [vmem:[%s4364_s4 + $0xac] ss:$16 sps:$4 sm:$0xff]  }
  0x55   : > { %602 = vmatprep.mubr.bf16.mxu0 %v2725_v54  ;;  %1371 = vmatpush1.bf16.msra.mxu0 %v2740_v56  ;;  %v2851_v54 = vld [vmem:[%s4364_s4 + $0x80] ss:$16 sps:$4 sm:$0xff]   ;;  %v2859_v56 = vld [vmem:[%s4364_s4 + $0x64] ss:$16 sps:$4 sm:$0xff]  }
  0x56   : > { %1372 = vmatprep.subr.bf16.mxu0 %v2748_v57  ;;  %1326 = vmatpush2.bf16.msra.mxu1 %v2817_v16  ;;  %v3664_v57 = vld [vmem:[%s4364_s4 + $0x8c] ss:$16 sps:$4 sm:$0xff]   ;;  %v2890_v16 = vld [vmem:[%s4364_s4 + $0x1c0] ss:$16 sps:$4 sm:$0xff]  }
  0x57   : > { %1327 = vmatprep.subr.bf16.mxu1 %v2821_v18  ;;  %v3771_v18 = vld [vmem:[%s4364_s4 + $0x1cc] ss:$16 sps:$4 sm:$0xff]  }
  0x59   : > { %1373 = vmatpush1.bf16.msra.mxu0 %v2746_v60  ;;  %v2865_v60 = vld [vmem:[%s4364_s4 + $0x44] ss:$16 sps:$4 sm:$0xff]  }
  0x5a   : > { %1374 = vmatprep.subr.bf16.mxu0 %v2754_v63  ;;  %1328 = vmatpush2.bf16.msra.mxu1 %v2823_v21  ;;  %v3691_v63 = vld [vmem:[%s4364_s4 + $0x68] ss:$16 sps:$4 sm:$0xff]   ;;  %v2902_v21 = vld [vmem:[%s3473_s19 + $0x24] ss:$8 sps:$4 sm:$0xff]  }
  0x5b   : > { %1763 = vmatprep.subr.bf16.mxu1 %v2835_v23  ;;  %v2904_v23 = vld [vmem:[%s3473_s19 + $0x20] ss:$8 sps:$4 sm:$0xff]  }
  0x5c   : > { %603 = vmatmul.mubr.bf16.gmra.mxu0 %v2727_v62  ;;  %v2863_v62 = vld [vmem:[%s4364_s4 + $0x40] ss:$16 sps:$4 sm:$0xff]  }
  0x5d   : > { %612 = vmatprep.mubr.bf16.mxu0 %v2728_v1  ;;  %1375 = vmatpush1.bf16.msra.mxu0 %v2752_v3  ;;  %v3700_v1 = vld [vmem:[%s4364_s4 + $0x4c] ss:$16 sps:$4 sm:$0xff]   ;;  %v3709_v3 = vld [vmem:[%s4364_s4 + $0x48] ss:$16 sps:$4 sm:$0xff]  }
  0x5e   : > { %1376 = vmatprep.subr.bf16.mxu0 %v2760_v4  ;;  %1330 = vmatmul.mubr.bf16.vlgmr.msra.gmra.mxu1 %v2827_v25  ;;  %v2877_v4 = vld [vmem:[%s4364_s4 + $0x4] ss:$16 sps:$4 sm:$0xff]  }
  0x5f   : > { %1764 = vmatpush1.bf16.msra.mxu1 %v2833_v26  ;;  %v2905_v26 = vld [vmem:[%s4364_s4 + $0x180] ss:$16 sps:$4 sm:$0xff]  }
  0x60   : > { %1765 = vmatprep.subr.bf16.mxu1 %v2841_v28  ;;  %v3809_v28 = vld [vmem:[%s4364_s4 + $0x18c] ss:$16 sps:$4 sm:$0xff]  }
  0x61   : > { %1377 = vmatpush1.bf16.msra.mxu0 %v2758_v7  ;;  %v3727_v7 = vld [vmem:[%s4364_s4 + $0x28] ss:$16 sps:$4 sm:$0xff]  }
  0x62   : > { %1378 = vmatprep.subr.bf16.mxu0 %v2766_v10  ;;  %v2881_v10 = vld [vmem:[%s4364_s4 + $0x1e0] ss:$16 sps:$4 sm:$0xff]  }
  0x63   : > { %1766 = vmatpush1.bf16.msra.mxu1 %v2839_v30  ;;  %v2911_v30 = vld [vmem:[%s4364_s4 + $0x160] ss:$16 sps:$4 sm:$0xff]  }
  0x64   : > { %613 = vmatmul.mubr.bf16.gmra.mxu0 %v2730_v9  ;;  %1767 = vmatprep.subr.bf16.mxu1 %v2847_v32  ;;  %v2883_v9 = vld [vmem:[%s4364_s4 + $0x1e4] ss:$16 sps:$4 sm:$0xff]   ;;  %v3822_v32 = vld [vmem:[%s4364_s4 + $0x188] ss:$16 sps:$4 sm:$0xff]  }
  0x65   : > { %622 = vmatprep.mubr.bf16.mxu0 %v2731_v11  ;;  %1379 = vmatpush1.bf16.msra.mxu0 %v2764_v12  ;;  %v2887_v11 = vld [vmem:[%s3473_s19 + $0x14] ss:$8 sps:$4 sm:$0xff]   ;;  %v3746_v12 = vld [vmem:[%s4364_s4 + $0x8] ss:$16 sps:$4 sm:$0xff]   ;;  %4383 = vst [vmem:[#allocation5_spill] sm:$0xff] %v3822_v32 }
  0x66   : > { %1380 = vmatprep.subr.bf16.mxu0 %v2772_v14  ;;  %v3753_v14 = vld [vmem:[%s4364_s4 + $0x1ec] ss:$16 sps:$4 sm:$0xff]   ;;  %1339 = vmatprep.mubr.bf16.mxu1 %v2887_v11 }
  0x67   : > { %1768 = vmatpush1.bf16.msra.mxu1 %v2845_v34  ;;  %v3829_v34 = vld [vmem:[%s4364_s4 + $0x16c] ss:$16 sps:$4 sm:$0xff]  }
  0x68   : > { %1769 = vmatprep.subr.bf16.mxu1 %v2853_v52  ;;  %1340 = vmatmul.mubr.bf16.gmra.mxu1 %v2889_v13  ;;  %4384 = vst [vmem:[#allocation6_spill] sm:$0xff] %v3829_v34  ;;  %v350_v52 = vlaneseq }
  0x69   : > { %1381 = vmatpush1.bf16.msra.mxu0 %v2770_v17  ;;  %v3765_v17 = vld [vmem:[%s4364_s4 + $0x1e8] ss:$16 sps:$4 sm:$0xff]   ;;  %1349 = vmatprep.mubr.bf16.mxu1 %v2902_v21 }
  0x6a   : > { %1382 = vmatprep.subr.bf16.mxu0 %v2778_v19  ;;  %v2898_v19 = vld [vmem:[%s4364_s4 + $0x1a4] ss:$16 sps:$4 sm:$0xff]  }
  0x6b   : > { %1770 = vmatpush1.bf16.msra.mxu1 %v2851_v54  ;;  %v3894_v54 = vshrl.u32 %v350_v52, 7 }
  0x6c   : > { %623 = vmatmul.mubr.bf16.gmra.mxu0 %v2733_v20  ;;  %1771 = vmatprep.subr.bf16.mxu1 %v2859_v56  ;;  %v2896_v20 = vld [vmem:[%s4364_s4 + $0x1a0] ss:$16 sps:$4 sm:$0xff]  }
  0x6d   : > { %1383 = vmatpush1.bf16.msra.mxu0 %v2776_v22  ;;  %1402 = vmatprep.mubr.bf16.mxu0 %v2829_v0  ;;  %v2871_v0 = vld [vmem:[%s4364_s4 + $0x24] ss:$16 sps:$4 sm:$0xff]   ;;  %v3784_v22 = vld [vmem:[%s4364_s4 + $0x1c8] ss:$16 sps:$4 sm:$0xff]   ;;  %4392 = vst [vmem:[#allocation14_spill] sm:$0xff] %v3894_v54  ;;  %v4369_v56 = vsub.s32 0, %v3894_v54 }
  0x6e   : > { %1384 = vmatprep.subr.bf16.mxu0 %v2784_v24  ;;  %v3791_v24 = vld [vmem:[%s4364_s4 + $0x1ac] ss:$16 sps:$4 sm:$0xff]  }
  0x6f   : > { %1772 = vmatpush1.bf16.msra.mxu1 %v2857_v58  ;;  %v4368_v58 = vsub.s32 1, %v3894_v54 }
  0x70   : > { %1773 = vmatprep.subr.bf16.mxu1 %v2865_v60  ;;  %1350 = vmatmul.mubr.bf16.gmra.mxu1 %v2904_v23 }
  0x71   : > { %1385 = vmatpush1.bf16.msra.mxu0 %v2782_v27  ;;  %v3803_v27 = vld [vmem:[%s4364_s4 + $0x1a8] ss:$16 sps:$4 sm:$0xff]  }
  0x72   : > { %1386 = vmatprep.subr.bf16.mxu0 %v2790_v29  ;;  %v2913_v29 = vld [vmem:[%s4364_s4 + $0x164] ss:$16 sps:$4 sm:$0xff]  }
  0x73   : > { %1774 = vmatpush1.bf16.msra.mxu1 %v2863_v62 }
  0x74   : > { %1775 = vmatprep.subr.bf16.mxu1 %v2871_v0 }
  0x75   : > { %1387 = vmatpush2.bf16.msra.mxu0 %v2788_v31  ;;  %v2917_v31 = vld [vmem:[%s3473_s19 + $0x34] ss:$8 sps:$4 sm:$0xff]  }
  0x76   : > { %1388 = vmatprep.subr.bf16.mxu0 %v2796_v33  ;;  %v2919_v33 = vld [vmem:[%s3473_s19 + $0x30] ss:$8 sps:$4 sm:$0xff]   ;;  %1359 = vmatprep.mubr.bf16.mxu1 %v2917_v31  ;;  %s4190_s19 = scalar_lea.vmem [#allocation2], %s4181_s9 }
  0x77   : > { %1776 = vmatpush1.bf16.msra.mxu1 %v2869_v2  ;;  %s2330_s22 = sshll.u32 %s4190_s19, 4  ;;  %s4313_s22 = int_to_ptr.vmem [resolvable:$true] %s2330_s22 }
  0x78   : > { %1777 = vmatprep.subr.bf16.mxu1 %v2877_v4  ;;  %1360 = vmatmul.mubr.bf16.gmra.mxu1 %v2919_v33  ;;  %s3130_s14 = scalar_lea.vmem %s4313_s22, 4096  ;;  %p3137_p0 = scmp.lt.s32.totalorder %s4313_s22, %s3135_s18 }
  0x79   : > { %1389 = vmatpush2.bf16.msra.mxu0 %v2794_v35  ;;  %v2922_v35 = vld [vmem:[%s4364_s4 + $0x144] ss:$16 sps:$4 sm:$0xff]   ;;  %p3131_p11 = scmp.ne.s32.totalorder %s4313_s22, %s3130_s14  ;;  %p3138_p1 = scmp.lt.s32.totalorder %s3136_s20, %s3130_s14 }
  0x7a   : > { %1390 = vmatprep.subr.bf16.mxu0 %v2802_v36  ;;  %v2920_v36 = vld [vmem:[%s4364_s4 + $0x140] ss:$16 sps:$4 sm:$0xff]  }
  0x7b   : > { %1778 = vmatpush1.bf16.msra.mxu1 %v2875_v6  ;;  %p3132_p12 = pnand %p3131_p11, %p3273_p5  ;;  %p3139_p2 = por %p3138_p1, %p3137_p0 }
  0x7c   : > { %1779 = vmatprep.subr.bf16.mxu1 %v2883_v9 }
  0x7d   : > { %1391 = vmatpush2.bf16.msra.mxu0 %v2800_v37  ;;  %v3841_v37 = vld [vmem:[%s4364_s4 + $0x168] ss:$16 sps:$4 sm:$0xff]   ;;  %p3133_p13 = pneg %p3132_p12 }
  0x7e   : > { %1392 = vmatprep.subr.bf16.mxu0 %v2808_v38  ;;  %4385 = vst [vmem:[#allocation7_spill] sm:$0xff] %v3841_v37  ;;  %v3847_v38 = vld [vmem:[%s4364_s4 + $0x14c] ss:$16 sps:$4 sm:$0xff]  }
  0x7f   : > { %1780 = vmatpush2.bf16.msra.mxu1 %v2881_v10  ;;  %4386 = vst [vmem:[#allocation8_spill] sm:$0xff] %v3847_v38  ;;  %p3140_p3 = pnand %p3139_p2, %p3133_p13 }
  0x80   : > { %1781 = vmatprep.subr.bf16.mxu1 %v2892_v15 }
  0x81   : > { %1393 = vmatpush2.bf16.msra.mxu0 %v2806_v39  ;;  %v2928_v39 = vld [vmem:[%s4364_s4 + $0x124] ss:$16 sps:$4 sm:$0xff]  }
  0x82   : > { %1394 = vmatprep.subr.bf16.mxu0 %v2814_v40  ;;  %v2926_v40 = vld [vmem:[%s4364_s4 + $0x120] ss:$16 sps:$4 sm:$0xff]  }
  0x83   : > { %1782 = vmatpush2.bf16.msra.mxu1 %v2890_v16 }
  0x84   : > { %1783 = vmatprep.subr.bf16.mxu1 %v2898_v19 }
  0x85   : > { %1395 = vmatpush2.bf16.msra.mxu0 %v2812_v41  ;;  %v3859_v41 = vld [vmem:[%s4364_s4 + $0x148] ss:$16 sps:$4 sm:$0xff]  }
  0x86   : > { %1396 = vmatprep.subr.bf16.mxu0 %v2820_v42  ;;  %4387 = vst [vmem:[#allocation9_spill] sm:$0xff] %v3859_v41  ;;  %v3865_v42 = vld [vmem:[%s4364_s4 + $0x12c] ss:$16 sps:$4 sm:$0xff]  }
  0x87   : > { %1784 = vmatpush2.bf16.msra.mxu1 %v2896_v20  ;;  %4388 = vst [vmem:[#allocation10_spill] sm:$0xff] %v3865_v42 }
  0x89   : > { %1397 = vmatpush2.bf16.msra.mxu0 %v2818_v43  ;;  %v2934_v43 = vld [vmem:[%s4364_s4 + $0x104] ss:$16 sps:$4 sm:$0xff]  }
  0x8a   : > { %1398 = vmatprep.subr.bf16.mxu0 %v2826_v44  ;;  %v2932_v44 = vld [vmem:[%s4364_s4 + $0x100] ss:$16 sps:$4 sm:$0xff]  }
  0x8d   : > { %1399 = vmatpush2.bf16.msra.mxu0 %v2824_v45  ;;  %v3877_v45 = vld [vmem:[%s4364_s4 + $0x128] ss:$16 sps:$4 sm:$0xff]  }
  0x8e   : > { %1400 = vmatprep.subr.bf16.mxu0 %v2832_v46  ;;  %4389 = vst [vmem:[#allocation11_spill] sm:$0xff] %v3877_v45  ;;  %v3883_v46 = vld [vmem:[%s4364_s4 + $0x10c] ss:$16 sps:$4 sm:$0xff]  }
  0x8f   : > { %4390 = vst [vmem:[#allocation12_spill] sm:$0xff] %v3883_v46 }
  0x91   : > { %1401 = vmatpush2.bf16.msra.mxu0 %v2830_v47  ;;  %v3890_v47 = vld [vmem:[%s4364_s4 + $0x108] ss:$16 sps:$4 sm:$0xff]  }
  0x92   : > { %1836 = vmatprep.subr.bf16.mxu0 %v3620_v48  ;;  %4391 = vst [vmem:[#allocation13_spill] sm:$0xff] %v3890_v47 }
  0x94   : > { %1403 = vmatmul.mubr.bf16.vlgmr.msra.gmra.mxu0 %v2827_v25  ;;  %v2907_v25 = vld [vmem:[%s4364_s4 + $0x184] ss:$16 sps:$4 sm:$0xff]  }
  0x95   : > { %1837 = vmatpush1.bf16.msra.mxu0 %v3625_v49  ;;  %1412 = vmatprep.mubr.bf16.mxu0 %v2887_v11 }
  0x96   : > { %1838 = vmatprep.subr.bf16.mxu0 %v3631_v50  ;;  %1785 = vmatprep.subr.bf16.mxu1 %v2907_v25 }
  0x97   : > { %1786 = vmatpush2.bf16.msra.mxu1 %v2905_v26 }
  0x98   : > { %1787 = vmatprep.subr.bf16.mxu1 %v2913_v29 }
  0x99   : > { %1839 = vmatpush1.bf16.msra.mxu0 %v3637_v51 }
  0x9a   : > { %1840 = vmatprep.subr.bf16.mxu0 %v3646_v53 }
  0x9b   : > { %1788 = vmatpush2.bf16.msra.mxu1 %v2911_v30 }
  0x9c   : > { %1413 = vmatmul.mubr.bf16.gmra.mxu0 %v2889_v13  ;;  %1789 = vmatprep.subr.bf16.mxu1 %v2922_v35 }
  0x9d   : > { %1841 = vmatpush1.bf16.msra.mxu0 %v3655_v55  ;;  %1422 = vmatprep.mubr.bf16.mxu0 %v2902_v21 }
  0x9e   : > { %1842 = vmatprep.subr.bf16.mxu0 %v3664_v57 }
  0x9f   : > { %1790 = vmatpush2.bf16.msra.mxu1 %v2920_v36 }
  0xa0   : > { %1791 = vmatprep.subr.bf16.mxu1 %v2928_v39 }
  0xa1   : > { %1843 = vmatpush1.bf16.msra.mxu0 %v3673_v59 }
  0xa2   : > { %1844 = vmatprep.subr.bf16.mxu0 %v3682_v61 }
  0xa3   : > { %1792 = vmatpush2.bf16.msra.mxu1 %v2926_v40 }
  0xa4   : > { %1423 = vmatmul.mubr.bf16.gmra.mxu0 %v2904_v23  ;;  %1793 = vmatprep.subr.bf16.mxu1 %v2934_v43 }
  0xa5   : > { %1845 = vmatpush1.bf16.msra.mxu0 %v3691_v63  ;;  %1432 = vmatprep.mubr.bf16.mxu0 %v2917_v31 }
  0xa6   : > { %1846 = vmatprep.subr.bf16.mxu0 %v3700_v1 }
  0xa7   : > { %1794 = vmatpush2.bf16.msra.mxu1 %v2932_v44 }
  0xa8   : > { %2601 = vmatprep.subr.bf16.mxu1 %v3620_v48  ;;  %v348_v48 = vld [vmem:[%s4363_s3] sm:$0x3] }
  0xa9   : > { %1847 = vmatpush1.bf16.msra.mxu0 %v3709_v3  ;;  %v3903_v60 = vrot.slane %v348_v48, %v4369_v56  ;;  %v3907_v62 = vrot.slane %v348_v48, %v4368_v58 }
  0xaa   : > { %1848 = vmatprep.subr.bf16.mxu0 %v3718_v5 }
  0xac   : > { %1433 = vmatmul.mubr.bf16.gmra.mxu0 %v2919_v33 }
  0xad   : > { %1849 = vmatpush1.bf16.msra.mxu0 %v3727_v7 }
  0xae   : > { %1850 = vmatprep.subr.bf16.mxu0 %v3733_v8 }
  0xb1   : > { %1851 = vmatpush1.bf16.msra.mxu0 %v3746_v12 }
  0xb2   : > { %1852 = vmatprep.subr.bf16.mxu0 %v3753_v14 }
  0xb5   : > { %1853 = vmatpush2.bf16.msra.mxu0 %v3765_v17 }
  0xb6   : > { %1854 = vmatprep.subr.bf16.mxu0 %v3771_v18 }
  0xb9   : > { %1855 = vmatpush2.bf16.msra.mxu0 %v3784_v22 }
  0xba   : > { %1856 = vmatprep.subr.bf16.mxu0 %v3791_v24 }
  0xbd   : > { %1857 = vmatpush2.bf16.msra.mxu0 %v3803_v27 }
  0xbe   : > { %1858 = vmatprep.subr.bf16.mxu0 %v3809_v28 }
  0xc1   : > { %1859 = vmatpush2.bf16.msra.mxu0 %v3822_v32 }
  0xc2   : > { %1860 = vmatprep.subr.bf16.mxu0 %v3829_v34 }
  0xc5   : > { %1861 = vmatpush2.bf16.msra.mxu0 %v3841_v37 }
  0xc6   : > { %1862 = vmatprep.subr.bf16.mxu0 %v3847_v38 }
  0xc9   : > { %1863 = vmatpush2.bf16.msra.mxu0 %v3859_v41 }
  0xca   : > { %1864 = vmatprep.subr.bf16.mxu0 %v3865_v42 }
  0xcd   : > { %1865 = vmatpush2.bf16.msra.mxu0 %v3877_v45 }
  0xce   : > { %1866 = vmatprep.subr.bf16.mxu0 %v3883_v46 }
  0xd1   : > { %1867 = vmatpush2.bf16.msra.mxu0 %v3890_v47 }
 0x114   : > { %v594_v0 = vpop.f32.mrf.mxu0 }
 0x115   : > { %v3910_v2 = vadd.f32 %v594_v0, %v3903_v60 }
 0x116   : > { %v596_v4 = vpop.f32.mrf.mxu0 }
 0x117   : > { %v633_v6 = vmin.f32 %v3910_v2, 20.0  ;;  %v3914_v9 = vadd.f32 %v596_v4, %v3907_v62 }
 0x118   : > { %v598_v10 = vpop.f32.mrf.mxu0 }
 0x119   : > { %v649_v11 = vmul.f32 1.442695, %v633_v6  ;;  %v634_v13 = vmin.f32 %v3914_v9, 20.0  ;;  %v3918_v15 = vadd.f32 %v598_v10, %v3903_v60 }
 0x11a   : > { %v600_v16 = vpop.f32.mrf.mxu0 }
 0x11b   : > { %2938 = vpow2.f32 %v649_v11  ;;  %v651_v19 = vmul.f32 1.442695, %v634_v13  ;;  %v635_v20 = vmin.f32 %v3918_v15, 20.0  ;;  %v3922_v21 = vadd.f32 %v600_v16, %v3907_v62 }
 0x11c   : > { %v604_v23 = vpop.f32.mrf.mxu0 }
 0x11d   : > { %2940 = vpow2.f32 %v651_v19  ;;  %v653_v25 = vmul.f32 1.442695, %v635_v20  ;;  %v636_v26 = vmin.f32 %v3922_v21, 20.0  ;;  %v3926_v29 = vadd.f32 %v604_v23, %v3903_v60 }
 0x11e   : > { %v606_v30 = vpop.f32.mrf.mxu0 }
 0x11f   : > { %2942 = vpow2.f32 %v653_v25  ;;  %v655_v31 = vmul.f32 1.442695, %v636_v26  ;;  %v637_v33 = vmin.f32 %v3926_v29, 20.0  ;;  %v3930_v35 = vadd.f32 %v606_v30, %v3907_v62 }
 0x120   : > { %v608_v36 = vpop.f32.mrf.mxu0 }
 0x121   : > { %2944 = vpow2.f32 %v655_v31  ;;  %v657_v39 = vmul.f32 1.442695, %v637_v33  ;;  %v638_v40 = vmin.f32 %v3930_v35, 20.0  ;;  %v3934_v43 = vadd.f32 %v608_v36, %v3903_v60 }
 0x122   : > { %v610_v44 = vpop.f32.mrf.mxu0 }
 0x123   : > { %2946 = vpow2.f32 %v657_v39  ;;  %v659_v52 = vmul.f32 1.442695, %v638_v40  ;;  %v639_v48 = vmin.f32 %v3934_v43, 20.0  ;;  %v3938_v0 = vadd.f32 %v610_v44, %v3907_v62 }
 0x124   : > { %v614_v4 = vpop.f32.mrf.mxu0 }
 0x125   : > { %2948 = vpow2.f32 %v659_v52  ;;  %v661_v6 = vmul.f32 1.442695, %v639_v48  ;;  %v640_v10 = vmin.f32 %v3938_v0, 20.0  ;;  %v3942_v11 = vadd.f32 %v614_v4, %v3903_v60 }
 0x126   : > { %v616_v13 = vpop.f32.mrf.mxu0 }
 0x127   : > { %2950 = vpow2.f32 %v661_v6  ;;  %v663_v16 = vmul.f32 1.442695, %v640_v10  ;;  %v641_v19 = vmin.f32 %v3942_v11, 20.0  ;;  %v3946_v20 = vadd.f32 %v616_v13, %v3907_v62 }
 0x128   : > { %v2939_v23 = vpop.eup %2938  ;;  %v618_v25 = vpop.f32.mrf.mxu0 }
 0x129   : > { %v681_v26 = vadd.f32 2.0, %v2939_v23  ;;  %2952 = vpow2.f32 %v663_v16  ;;  %v665_v30 = vmul.f32 1.442695, %v641_v19  ;;  %v642_v31 = vmin.f32 %v3946_v20, 20.0 }
 0x12a   : > { %v2941_v33 = vpop.eup %2940  ;;  %v3950_v36 = vadd.f32 %v618_v25, %v3903_v60  ;;  %v620_v39 = vpop.f32.mrf.mxu0 }
 0x12b   : > { %v697_v40 = vmul.f32 %v2939_v23, %v681_v26  ;;  %v682_v44 = vadd.f32 2.0, %v2941_v33  ;;  %2954 = vpow2.f32 %v665_v30  ;;  %v667_v52 = vmul.f32 1.442695, %v642_v31 }
 0x12c   : > { %v2943_v48 = vpop.eup %2942  ;;  %v643_v4 = vmin.f32 %v3950_v36, 20.0  ;;  %v3954_v6 = vadd.f32 %v620_v39, %v3907_v62  ;;  %v624_v10 = vpop.f32.mrf.mxu0 }
 0x12d   : > { %v713_v13 = vadd.f32 2.0, %v697_v40  ;;  %v698_v16 = vmul.f32 %v2941_v33, %v682_v44  ;;  %v683_v19 = vadd.f32 2.0, %v2943_v48  ;;  %2956 = vpow2.f32 %v667_v52 }
 0x12e   : > { %v2945_v58 = vpop.eup %2944  ;;  %v669_v56 = vmul.f32 1.442695, %v643_v4  ;;  %v644_v25 = vmin.f32 %v3954_v6, 20.0  ;;  %v3958_v23 = vadd.f32 %v624_v10, %v3903_v60  ;;  %v626_v26 = vpop.f32.mrf.mxu0 }
 0x12f   : > { %2958 = vrcp.f32 %v713_v13  ;;  %v714_v30 = vadd.f32 2.0, %v698_v16  ;;  %v699_v31 = vmul.f32 %v2943_v48, %v683_v19  ;;  %v684_v54 = vadd.f32 2.0, %v2945_v58 }
 0x130   : > { %v2947_v47 = vpop.eup %2946  ;;  %2960 = vpow2.f32 %v669_v56  ;;  %v671_v39 = vmul.f32 1.442695, %v644_v25  ;;  %v645_v40 = vmin.f32 %v3958_v23, 20.0  ;;  %v3962_v33 = vadd.f32 %v626_v26, %v3907_v62  ;;  %v628_v44 = vpop.f32.mrf.mxu0 }
 0x131   : > { %2962 = vrcp.f32 %v714_v30  ;;  %v715_v52 = vadd.f32 2.0, %v699_v31  ;;  %v700_v4 = vmul.f32 %v2945_v58, %v684_v54  ;;  %v685_v46 = vadd.f32 2.0, %v2947_v47 }
 0x132   : > { %v2949_v10 = vpop.eup %2948  ;;  %2964 = vpow2.f32 %v671_v39  ;;  %v673_v45 = vmul.f32 1.442695, %v645_v40  ;;  %v646_v13 = vmin.f32 %v3962_v33, 20.0  ;;  %v3966_v48 = vadd.f32 %v628_v44, %v3903_v60  ;;  %v630_v56 = vpop.f32.mrf.mxu0 }
 0x133   : > { %2966 = vrcp.f32 %v715_v52  ;;  %v716_v16 = vadd.f32 2.0, %v700_v4  ;;  %v701_v19 = vmul.f32 %v2947_v47, %v685_v46  ;;  %v686_v25 = vadd.f32 2.0, %v2949_v10 }
 0x134   : > { %v2951_v26 = vpop.eup %2950  ;;  %2968 = vpow2.f32 %v673_v45  ;;  %v675_v42 = vmul.f32 1.442695, %v646_v13  ;;  %v647_v30 = vmin.f32 %v3966_v48, 20.0  ;;  %v3970_v54 = vadd.f32 %v630_v56, %v3907_v62 }
 0x135   : > { %2970 = vrcp.f32 %v716_v16  ;;  %v717_v58 = vadd.f32 2.0, %v701_v19  ;;  %v702_v31 = vmul.f32 %v2949_v10, %v686_v25  ;;  %v687_v39 = vadd.f32 2.0, %v2951_v26 }
 0x136   : > { %v2953_v40 = vpop.eup %2952  ;;  %2972 = vpow2.f32 %v675_v42  ;;  %v677_v60 = vmul.f32 1.442695, %v647_v30  ;;  %v648_v44 = vmin.f32 %v3970_v54, 20.0 }
 0x137   : > { %2974 = vrcp.f32 %v717_v58  ;;  %v718_v46 = vadd.f32 2.0, %v702_v31  ;;  %v703_v47 = vmul.f32 %v2951_v26, %v687_v39  ;;  %v688_v52 = vadd.f32 2.0, %v2953_v40 }
 0x138   : > { %v2955_v45 = vpop.eup %2954  ;;  %2976 = vpow2.f32 %v677_v60  ;;  %v679_v4 = vmul.f32 1.442695, %v648_v44 }
 0x139   : > { %2978 = vrcp.f32 %v718_v46  ;;  %v719_v13 = vadd.f32 2.0, %v703_v47  ;;  %v704_v62 = vmul.f32 %v2953_v40, %v688_v52  ;;  %v689_v56 = vadd.f32 2.0, %v2955_v45 }
 0x13a   : > { %v2957_v16 = vpop.eup %2956  ;;  %2980 = vpow2.f32 %v679_v4 }
 0x13b   : > { %2982 = vrcp.f32 %v719_v13  ;;  %v720_v10 = vadd.f32 2.0, %v704_v62  ;;  %v705_v19 = vmul.f32 %v2955_v45, %v689_v56  ;;  %v690_v42 = vadd.f32 2.0, %v2957_v16 }
 0x13c   : > { %v2959_v25 = vpop.eup %2958 }
 0x13d   : > { %v2961_v30 = vpop.eup %2960  ;;  %2984 = vrcp.f32 %v720_v10  ;;  %v721_v58 = vadd.f32 2.0, %v705_v19  ;;  %v706_v31 = vmul.f32 %v2957_v16, %v690_v42  ;;  %v745_v60 = vmul.f32 2.0, %v2959_v25 }
 0x13e   : > { %v2963_v26 = vpop.eup %2962  ;;  %v691_v39 = vadd.f32 2.0, %v2961_v30 }
 0x13f   : > { %v2965_v41 = vpop.eup %2964  ;;  %v746_v44 = vmul.f32 2.0, %v2963_v26  ;;  %v722_v46 = vadd.f32 2.0, %v706_v31  ;;  %2986 = vrcp.f32 %v721_v58  ;;  %v761_v19 = vsub.f32 1.0, %v745_v60 }
 0x140   : > { %v2967_v47 = vpop.eup %2966  ;;  %v707_v40 = vmul.f32 %v2961_v30, %v691_v39  ;;  %v692_v52 = vadd.f32 2.0, %v2965_v41 }
 0x141   : > { %v2969_v4 = vpop.eup %2968  ;;  %v747_v13 = vmul.f32 2.0, %v2967_v47  ;;  %2988 = vrcp.f32 %v722_v46  ;;  %v762_v16 = vsub.f32 1.0, %v746_v44  ;;  %v777_v60 = vmul.f32 %v761_v19, %v3910_v2 }
 0x142   : > { %v2971_v45 = vpop.eup %2970  ;;  %v723_v62 = vadd.f32 2.0, %v707_v40  ;;  %v708_v56 = vmul.f32 %v2965_v41, %v692_v52  ;;  %v693_v38 = vadd.f32 2.0, %v2969_v4 }
 0x143   : > { %v2973_v10 = vpop.eup %2972  ;;  %v763_v42 = vsub.f32 1.0, %v747_v13  ;;  %v748_v37 = vmul.f32 2.0, %v2971_v45  ;;  %v778_v44 = vmul.f32 %v762_v16, %v3914_v9 }
 0x144   : > { %v2975_v34 = vpop.eup %2974  ;;  %2990 = vrcp.f32 %v723_v62  ;;  %v724_v25 = vadd.f32 2.0, %v708_v56  ;;  %v709_v31 = vmul.f32 %v2969_v4, %v693_v38  ;;  %v694_v26 = vadd.f32 2.0, %v2973_v10 }
 0x145   : > { %v2977_v58 = vpop.eup %2976  ;;  %v779_v30 = vmul.f32 %v763_v42, %v3918_v15  ;;  %v764_v39 = vsub.f32 1.0, %v748_v37  ;;  %v749_v38 = vmul.f32 2.0, %v2975_v34 }
 0x146   : > { %v2979_v47 = vpop.eup %2978  ;;  %2992 = vrcp.f32 %v724_v25  ;;  %v725_v46 = vadd.f32 2.0, %v709_v31  ;;  %v710_v40 = vmul.f32 %v2973_v10, %v694_v26  ;;  %v695_v41 = vadd.f32 2.0, %v2977_v58 }
 0x147   : > { %v2981_v52 = vpop.eup %2980  ;;  %v780_v13 = vmul.f32 %v764_v39, %v3922_v21  ;;  %v750_v45 = vmul.f32 2.0, %v2979_v47  ;;  %v793_v25 = vpack.c.bf16 %v779_v30, %v777_v60  ;;  %v765_v9 = vsub.f32 1.0, %v749_v38 }
 0x148   : > { %v2983_v62 = vpop.eup %2982  ;;  %v726_v4 = vadd.f32 2.0, %v710_v40  ;;  %v711_v56 = vmul.f32 %v2977_v58, %v695_v41  ;;  %v696_v32 = vadd.f32 2.0, %v2981_v52  ;;  %2994 = vrcp.f32 %v725_v46 }
 0x149   : > { %v751_v15 = vmul.f32 2.0, %v2983_v62  ;;  %v794_v37 = vpack.c.bf16 %v780_v13, %v778_v44  ;;  %v766_v26 = vsub.f32 1.0, %v750_v45  ;;  %v781_v47 = vmul.f32 %v765_v9, %v3926_v29 }
 0x14a   : > { %v2985_v42 = vpop.eup %2984  ;;  %2996 = vrcp.f32 %v726_v4  ;;  %v727_v10 = vadd.f32 2.0, %v711_v56  ;;  %v712_v31 = vmul.f32 %v2981_v52, %v696_v32 }
 0x14b   : > { %v767_v2 = vsub.f32 1.0, %v751_v15  ;;  %v752_v19 = vmul.f32 2.0, %v2985_v42  ;;  %1795 = vmatprep.mubr.bf16.mxu1 %v794_v37  ;;  %1868 = vmatprep.mubr.bf16.mxu0 %v794_v37  ;;  %v782_v32 = vmul.f32 %v766_v26, %v3930_v35 }
 0x14c   : > { %2998 = vrcp.f32 %v727_v10  ;;  %v728_v21 = vadd.f32 2.0, %v712_v31  ;;  %1796 = vmatmul.mubr.bf16.vlgmr.msra.gmra.mxu1 %v793_v25  ;;  %1869 = vmatmul.mubr.bf16.vlgmr.msra.gmra.mxu0 %v793_v25  ;;  %v2987_v34 = vpop.eup %2986 }
 0x14d   : > { %v768_v16 = vsub.f32 1.0, %v752_v19  ;;  %2617 = vmatpush1.bf16.msra.mxu1 %v3625_v49  ;;  %v783_v30 = vmul.f32 %v767_v2, %v3934_v43  ;;  %v753_v41 = vmul.f32 2.0, %v2987_v34 }
 0x14e   : > { %v2989_v58 = vpop.eup %2988  ;;  %3000 = vrcp.f32 %v728_v21  ;;  %2602 = vmatprep.subr.bf16.mxu1 %v3631_v50 }
 0x14f   : > { %v784_v39 = vmul.f32 %v768_v16, %v3938_v0  ;;  %v754_v46 = vmul.f32 2.0, %v2989_v58  ;;  %v795_v49 = vpack.c.bf16 %v783_v30, %v781_v47  ;;  %v769_v0 = vsub.f32 1.0, %v753_v41 }
 0x151   : > { %v2991_v40 = vpop.eup %2990  ;;  %2618 = vmatpush1.bf16.msra.mxu1 %v3637_v51  ;;  %v796_v52 = vpack.c.bf16 %v784_v39, %v782_v32  ;;  %v770_v50 = vsub.f32 1.0, %v754_v46  ;;  %v785_v56 = vmul.f32 %v769_v0, %v3942_v11 }
 0x152   : > { %v755_v60 = vmul.f32 2.0, %v2991_v40  ;;  %2603 = vmatprep.subr.bf16.mxu1 %v3646_v53 }
 0x153   : > { %v2993_v43 = vpop.eup %2992  ;;  %1805 = vmatprep.mubr.bf16.mxu1 %v796_v52  ;;  %1878 = vmatprep.mubr.bf16.mxu0 %v796_v52  ;;  %v786_v53 = vmul.f32 %v770_v50, %v3946_v20 }
 0x154   : > { %v771_v44 = vsub.f32 1.0, %v755_v60  ;;  %v756_v35 = vmul.f32 2.0, %v2993_v43  ;;  %1806 = vmatmul.mubr.bf16.gmra.mxu1 %v795_v49  ;;  %1879 = vmatmul.mubr.bf16.gmra.mxu0 %v795_v49 }
 0x155   : > { %2619 = vmatpush1.bf16.msra.mxu1 %v3655_v55  ;;  %v2995_v29 = vpop.eup %2994 }
 0x156   : > { %v772_v13 = vsub.f32 1.0, %v756_v35  ;;  %2604 = vmatprep.subr.bf16.mxu1 %v3664_v57  ;;  %v787_v45 = vmul.f32 %v771_v44, %v3950_v36  ;;  %v757_v15 = vmul.f32 2.0, %v2995_v29  ;;  %v4402_v29 = vld [vmem:[#allocation14_spill] sm:$0xff] }
 0x157   : > { %v2997_v51 = vpop.eup %2996 }
 0x158   : > { %v788_v62 = vmul.f32 %v772_v13, %v3954_v6  ;;  %v758_v38 = vmul.f32 2.0, %v2997_v51  ;;  %v797_v57 = vpack.c.bf16 %v787_v45, %v785_v56  ;;  %v773_v20 = vsub.f32 1.0, %v757_v15  ;;  %v1909_v45 = vld [vmem:[%s4366_s6] sm:$0xf] }
 0x159   : > { %v2999_v4 = vpop.eup %2998  ;;  %2620 = vmatpush1.bf16.msra.mxu1 %v3673_v59  ;;  %v1921_v13 = vsub.s32 2, %v4402_v29 }
 0x15a   : > { %v759_v37 = vmul.f32 2.0, %v2999_v4  ;;  %v798_v55 = vpack.c.bf16 %v788_v62, %v786_v53  ;;  %2605 = vmatprep.subr.bf16.mxu1 %v3682_v61  ;;  %v774_v25 = vsub.f32 1.0, %v758_v38  ;;  %v789_v61 = vmul.f32 %v773_v20, %v3958_v23 }
 0x15b   : > { %v3001_v42 = vpop.eup %3000  ;;  %v1925_v53 = vsub.s32 3, %v4402_v29  ;;  %v4403_v38 = vsub.s32 0, %v4402_v29  ;;  %v4077_v56 = vrot.slane %v1909_v45, %v1921_v13 }
 0x15c   : > { %v775_v10 = vsub.f32 1.0, %v759_v37  ;;  %v760_v36 = vmul.f32 2.0, %v3001_v42  ;;  %1815 = vmatprep.mubr.bf16.mxu1 %v798_v55  ;;  %v790_v59 = vmul.f32 %v774_v25, %v3962_v33 }
 0x15d   : > { %1816 = vmatmul.mubr.bf16.gmra.mxu1 %v797_v57  ;;  %v4075_v4 = vrot.slane %v1909_v45, %v4403_v38 }
 0x15e   : > { %v776_v6 = vsub.f32 1.0, %v760_v36  ;;  %2621 = vmatpush1.bf16.msra.mxu1 %v3691_v63  ;;  %v791_v11 = vmul.f32 %v775_v10, %v3966_v48  ;;  %v4393_v63 = vld [vmem:[#allocation5_spill] sm:$0xff]  ;;  %v4083_v10 = vrot.slane %v1909_v45, %v1925_v53 }
 0x15f   : > { %2606 = vmatprep.subr.bf16.mxu1 %v3700_v1  ;;  %v4394_v1 = vld [vmem:[#allocation6_spill] sm:$0xff] }
 0x160   : > { %v792_v31 = vmul.f32 %v776_v6, %v3970_v54  ;;  %v799_v2 = vpack.c.bf16 %v791_v11, %v789_v61 }
 0x162   : > { %2622 = vmatpush1.bf16.msra.mxu1 %v3709_v3  ;;  %v800_v26 = vpack.c.bf16 %v792_v31, %v790_v59  ;;  %v4395_v3 = vld [vmem:[#allocation7_spill] sm:$0xff] }
 0x163   : > { %2607 = vmatprep.subr.bf16.mxu1 %v3718_v5  ;;  %v4396_v5 = vld [vmem:[#allocation8_spill] sm:$0xff] }
 0x164   : > { %1825 = vmatprep.mubr.bf16.mxu1 %v800_v26 }
 0x165   : > { %1826 = vmatmul.mubr.bf16.gmra.mxu1 %v799_v2 }
 0x166   : > { %2623 = vmatpush1.bf16.msra.mxu1 %v3727_v7  ;;  %1888 = vmatprep.mubr.bf16.mxu1 %v798_v55  ;;  %v4397_v7 = vld [vmem:[#allocation9_spill] sm:$0xff] }
 0x167   : > { %2608 = vmatprep.subr.bf16.mxu1 %v3733_v8  ;;  %v4398_v8 = vld [vmem:[#allocation10_spill] sm:$0xff] }
 0x16a   : > { %2624 = vmatpush1.bf16.msra.mxu1 %v3746_v12  ;;  %v4399_v12 = vld [vmem:[#allocation11_spill] sm:$0xff] }
 0x16b   : > { %2609 = vmatprep.subr.bf16.mxu1 %v3753_v14  ;;  %v4400_v14 = vld [vmem:[#allocation12_spill] sm:$0xff] }
 0x16e   : > { %2625 = vmatpush2.bf16.msra.mxu1 %v3765_v17  ;;  %v4401_v17 = vld [vmem:[#allocation13_spill] sm:$0xff] }
 0x16f   : > { %2610 = vmatprep.subr.bf16.mxu1 %v3771_v18  ;;  %v1404_v18 = vpop.f32.mrf.mxu0 }
 0x172   : > { %2626 = vmatpush2.bf16.msra.mxu1 %v3784_v22  ;;  %v1331_v22 = vpop.f32.mrf.mxu1 }
 0x173   : > { %2611 = vmatprep.subr.bf16.mxu1 %v3791_v24  ;;  %v1406_v24 = vpop.f32.mrf.mxu0 }
 0x176   : > { %2627 = vmatpush2.bf16.msra.mxu1 %v3803_v27  ;;  %v1333_v27 = vpop.f32.mrf.mxu1 }
 0x177   : > { %2612 = vmatprep.subr.bf16.mxu1 %v3809_v28  ;;  %v1408_v28 = vpop.f32.mrf.mxu0 }
 0x178   : > { %v1335_v23 = vpop.f32.mrf.mxu1 }
 0x179   : > { %v1410_v33 = vpop.f32.mrf.mxu0 }
 0x17a   : > { %2628 = vmatpush2.bf16.msra.mxu1 %v4393_v63  ;;  %v1337_v48 = vpop.f32.mrf.mxu1 }
 0x17b   : > { %2613 = vmatprep.subr.bf16.mxu1 %v4394_v1  ;;  %v4020_v54 = vpop.f32.mrf.mxu0 }
 0x17c   : > { %v4022_v19 = vpop.f32.mrf.mxu1 }
 0x17d   : > { %v4024_v9 = vpop.f32.mrf.mxu0 }
 0x17e   : > { %2629 = vmatpush2.bf16.msra.mxu1 %v4395_v3  ;;  %v4026_v21 = vpop.f32.mrf.mxu1 }
 0x17f   : > { %2614 = vmatprep.subr.bf16.mxu1 %v4396_v5  ;;  %v4028_v34 = vpop.f32.mrf.mxu0 }
 0x180   : > { %v4030_v16 = vpop.f32.mrf.mxu1 }
 0x181   : > { %v4032_v58 = vpop.f32.mrf.mxu0 }
 0x182   : > { %2630 = vmatpush2.bf16.msra.mxu1 %v4397_v7  ;;  %v4034_v30 = vpop.f32.mrf.mxu1 }
 0x183   : > { %2615 = vmatprep.subr.bf16.mxu1 %v4398_v8  ;;  %v4036_v32 = vpop.f32.mrf.mxu0 }
 0x184   : > { %v4038_v39 = vpop.f32.mrf.mxu1 }
 0x185   : > { %v4040_v47 = vpop.f32.mrf.mxu0 }
 0x186   : > { %2631 = vmatpush2.bf16.msra.mxu1 %v4399_v12  ;;  %v4042_v46 = vpop.f32.mrf.mxu1 }
 0x187   : > { %2616 = vmatprep.subr.bf16.mxu1 %v4400_v14  ;;  %v4044_v40 = vpop.f32.mrf.mxu0 }
 0x188   : > { %v4046_v41 = vpop.f32.mrf.mxu1 }
 0x189   : > { %v4048_v52 = vpop.f32.mrf.mxu0 }
 0x18a   : > { %2632 = vmatpush2.bf16.msra.mxu1 %v4401_v17  ;;  %v4050_v60 = vpop.f32.mrf.mxu1 }
 0x18b   : > { %v4052_v49 = vpop.f32.mrf.mxu0 }
 0x18c   : > { %v4054_v43 = vpop.f32.mrf.mxu1 }
 0x18d   : > { %1889 = vmatmul.mubr.bf16.vlgmr.msra.gmra.mxu1 %v797_v57  ;;  %v4056_v50 = vpop.f32.mrf.mxu0  ;;  %v4404_v57 = vsub.s32 1, %v4402_v29 }
 0x18e   : > { %1898 = vmatprep.mubr.bf16.mxu1 %v800_v26  ;;  %v4058_v44 = vpop.f32.mrf.mxu1 }
 0x18f   : > { %v4060_v35 = vpop.f32.mrf.mxu0  ;;  %v4081_v25 = vrot.slane %v1909_v45, %v4404_v57 }
 0x190   : > { %v4062_v0 = vpop.f32.mrf.mxu1 }
 0x191   : > { %v4065_v51 = vpop.f32.mrf.mxu0 }
 0x192   : > { %v4071_v62 = vpop.f32.mrf.mxu1 }
 0x195   : > { %1899 = vmatmul.mubr.bf16.gmra.mxu1 %v799_v2 }
 0x20c   : > { %v1797_v15 = vpop.f32.mrf.mxu1  ;;  %v1870_v37 = vpop.f32.mrf.mxu0 }
 0x20d   : > { %v1798_v55 = vadd.f32 %v1797_v15, %v1331_v22  ;;  %v1871_v42 = vadd.f32 %v1870_v37, %v1404_v18 }
 0x20e   : > { %v1799_v36 = vpop.f32.mrf.mxu1  ;;  %v1872_v20 = vpop.f32.mrf.mxu0 }
 0x20f   : > { %v4086_v6 = vadd.f32 %v4075_v4, %v1798_v55  ;;  %v4089_v11 = vadd.f32 %v4077_v56, %v1871_v42  ;;  %v1800_v59 = vadd.f32 %v1799_v36, %v1333_v27  ;;  %v1873_v31 = vadd.f32 %v1872_v20, %v1406_v24 }
 0x210   : > { %v1801_v61 = vpop.f32.mrf.mxu1  ;;  %v1874_v26 = vpop.f32.mrf.mxu0 }
 0x211   : > { %v1963_v2 = vmin.f32 %v4086_v6, 20.0  ;;  %v1965_v63 = vmin.f32 %v4089_v11, 20.0  ;;  %v4094_v1 = vadd.f32 %v4081_v25, %v1800_v59  ;;  %v4097_v3 = vadd.f32 %v4083_v10, %v1873_v31 }
 0x212   : > { %v1802_v5 = vadd.f32 %v1801_v61, %v1335_v23  ;;  %v1875_v7 = vadd.f32 %v1874_v26, %v1408_v28  ;;  %v1803_v8 = vpop.f32.mrf.mxu1  ;;  %v1876_v12 = vpop.f32.mrf.mxu0 }
 0x213   : > { %v1995_v14 = vmul.f32 1.442695, %v1963_v2  ;;  %v1999_v17 = vmul.f32 1.442695, %v1965_v63  ;;  %v1964_v18 = vmin.f32 %v4094_v1, 20.0  ;;  %v1966_v22 = vmin.f32 %v4097_v3, 20.0 }
 0x214   : > { %v4102_v24 = vadd.f32 %v4075_v4, %v1802_v5  ;;  %v4105_v27 = vadd.f32 %v4077_v56, %v1875_v7  ;;  %v1804_v29 = vadd.f32 %v1803_v8, %v1337_v48  ;;  %v1877_v13 = vadd.f32 %v1876_v12, %v1410_v33  ;;  %v1807_v45 = vpop.f32.mrf.mxu1  ;;  %v1880_v53 = vpop.f32.mrf.mxu0 }
 0x215   : > { %3002 = vpow2.f32 %v1995_v14  ;;  %v1997_v28 = vmul.f32 1.442695, %v1964_v18  ;;  %v2001_v23 = vmul.f32 1.442695, %v1966_v22  ;;  %v1808_v38 = vadd.f32 %v1807_v45, %v4022_v19 }
 0x216   : > { %3004 = vpow2.f32 %v1999_v17  ;;  %v1967_v15 = vmin.f32 %v4102_v24, 20.0  ;;  %v1969_v37 = vmin.f32 %v4105_v27, 20.0  ;;  %v4111_v55 = vadd.f32 %v4081_v25, %v1804_v29  ;;  %v1809_v42 = vpop.f32.mrf.mxu1  ;;  %v1882_v57 = vpop.f32.mrf.mxu0 }
 0x217   : > { %3006 = vpow2.f32 %v1997_v28  ;;  %v4114_v33 = vadd.f32 %v4083_v10, %v1877_v13  ;;  %v4117_v48 = vadd.f32 %v4075_v4, %v1808_v38  ;;  %v1881_v36 = vadd.f32 %v1880_v53, %v4020_v54 }
 0x218   : > { %3008 = vpow2.f32 %v2001_v23  ;;  %v2003_v19 = vmul.f32 1.442695, %v1967_v15  ;;  %v2007_v20 = vmul.f32 1.442695, %v1969_v37  ;;  %v1968_v59 = vmin.f32 %v4111_v55, 20.0  ;;  %v1811_v31 = vpop.f32.mrf.mxu1  ;;  %v1884_v61 = vpop.f32.mrf.mxu0 }
 0x219   : > { %v1970_v26 = vmin.f32 %v4114_v33, 20.0  ;;  %v1971_v2 = vmin.f32 %v4117_v48, 20.0  ;;  %v4124_v63 = vadd.f32 %v4077_v56, %v1881_v36  ;;  %v1810_v5 = vadd.f32 %v1809_v42, %v4026_v21 }
 0x21a   : > { %3010 = vpow2.f32 %v2003_v19  ;;  %v2005_v7 = vmul.f32 1.442695, %v1968_v59  ;;  %v1883_v54 = vadd.f32 %v1882_v57, %v4024_v9  ;;  %v1812_v8 = vadd.f32 %v1811_v31, %v4030_v16  ;;  %v1813_v12 = vpop.f32.mrf.mxu1  ;;  %v1886_v13 = vpop.f32.mrf.mxu0 }
 0x21b   : > { %3012 = vpow2.f32 %v2007_v20  ;;  %v2009_v14 = vmul.f32 1.442695, %v1970_v26  ;;  %v2011_v17 = vmul.f32 1.442695, %v1971_v2  ;;  %v1973_v18 = vmin.f32 %v4124_v63, 20.0 }
 0x21c   : > { %3014 = vpow2.f32 %v2005_v7  ;;  %v4131_v22 = vadd.f32 %v4081_v25, %v1810_v5  ;;  %v4134_v29 = vadd.f32 %v4083_v10, %v1883_v54  ;;  %v4137_v21 = vadd.f32 %v4075_v4, %v1812_v8 }
 0x21d   : > { %3016 = vpow2.f32 %v2009_v14  ;;  %v2015_v9 = vmul.f32 1.442695, %v1973_v18  ;;  %v1885_v16 = vadd.f32 %v1884_v61, %v4028_v34  ;;  %v1814_v45 = vadd.f32 %v1813_v12, %v4034_v30  ;;  %v1817_v53 = vpop.f32.mrf.mxu1 }
 0x21e   : > { %3018 = vpow2.f32 %v2011_v17  ;;  %v1972_v28 = vmin.f32 %v4131_v22, 20.0  ;;  %v1974_v23 = vmin.f32 %v4134_v29, 20.0  ;;  %v1975_v38 = vmin.f32 %v4137_v21, 20.0 }
 0x21f   : > { %3020 = vpow2.f32 %v2015_v9  ;;  %v4145_v15 = vadd.f32 %v4077_v56, %v1885_v16  ;;  %v4148_v37 = vadd.f32 %v4081_v25, %v1814_v45  ;;  %v1887_v42 = vadd.f32 %v1886_v13, %v4032_v58  ;;  %v1819_v34 = vpop.f32.mrf.mxu1 }
 0x220   : > { %v2013_v57 = vmul.f32 1.442695, %v1972_v28  ;;  %v2017_v30 = vmul.f32 1.442695, %v1974_v23  ;;  %v2019_v36 = vmul.f32 1.442695, %v1975_v38  ;;  %v1818_v19 = vadd.f32 %v1817_v53, %v4038_v39 }
 0x221   : > { %v1977_v20 = vmin.f32 %v4145_v15, 20.0  ;;  %v1976_v59 = vmin.f32 %v4148_v37, 20.0  ;;  %v4155_v31 = vadd.f32 %v4083_v10, %v1887_v42  ;;  %v1820_v61 = vadd.f32 %v1819_v34, %v4042_v46  ;;  %v1821_v26 = vpop.f32.mrf.mxu1 }
 0x222   : > { %v3003_v2 = vpop.eup %3002  ;;  %3022 = vpow2.f32 %v2013_v57  ;;  %v4159_v58 = vadd.f32 %v4075_v4, %v1818_v19  ;;  %v1822_v5 = vadd.f32 %v1821_v26, %v4046_v41 }
 0x223   : > { %v3005_v7 = vpop.eup %3004  ;;  %v2059_v54 = vadd.f32 2.0, %v3003_v2  ;;  %3024 = vpow2.f32 %v2017_v30  ;;  %v2023_v39 = vmul.f32 1.442695, %v1977_v20  ;;  %v2021_v8 = vmul.f32 1.442695, %v1976_v59 }
 0x224   : > { %v3007_v12 = vpop.eup %3006  ;;  %v2061_v14 = vadd.f32 2.0, %v3005_v7  ;;  %3026 = vpow2.f32 %v2019_v36  ;;  %v1978_v17 = vmin.f32 %v4155_v31, 20.0  ;;  %v1979_v46 = vmin.f32 %v4159_v58, 20.0 }
 0x225   : > { %v3009_v18 = vpop.eup %3008  ;;  %v2091_v13 = vmul.f32 %v3003_v2, %v2059_v54  ;;  %v2060_v9 = vadd.f32 2.0, %v3007_v12  ;;  %3028 = vpow2.f32 %v2023_v39  ;;  %v4165_v16 = vadd.f32 %v4081_v25, %v1820_v61 }
 0x226   : > { %v2093_v41 = vmul.f32 %v3005_v7, %v2061_v14  ;;  %v2062_v45 = vadd.f32 2.0, %v3009_v18  ;;  %3030 = vpow2.f32 %v2021_v8  ;;  %v2025_v53 = vmul.f32 1.442695, %v1978_v17 }
 0x227   : > { %v3011_v28 = vpop.eup %3010  ;;  %v2123_v23 = vadd.f32 2.0, %v2091_v13  ;;  %v2092_v38 = vmul.f32 %v3007_v12, %v2060_v9  ;;  %v2027_v42 = vmul.f32 1.442695, %v1979_v46  ;;  %v1980_v34 = vmin.f32 %v4165_v16, 20.0  ;;  %v1823_v46 = vpop.f32.mrf.mxu1 }
 0x228   : > { %v3013_v57 = vpop.eup %3012  ;;  %v2125_v30 = vadd.f32 2.0, %v2093_v41  ;;  %v2094_v36 = vmul.f32 %v3009_v18, %v2062_v45  ;;  %v2063_v19 = vadd.f32 2.0, %v3011_v28  ;;  %3032 = vpow2.f32 %v2025_v53 }
 0x229   : > { %v3015_v20 = vpop.eup %3014  ;;  %3034 = vrcp.f32 %v2123_v23  ;;  %v2124_v59 = vadd.f32 2.0, %v2092_v38  ;;  %v2065_v61 = vadd.f32 2.0, %v3013_v57  ;;  %v2029_v26 = vmul.f32 1.442695, %v1980_v34 }
 0x22a   : > { %v3017_v2 = vpop.eup %3016  ;;  %3036 = vrcp.f32 %v2125_v30  ;;  %v2126_v7 = vadd.f32 2.0, %v2094_v36  ;;  %v2095_v54 = vmul.f32 %v3011_v28, %v2063_v19  ;;  %v2064_v39 = vadd.f32 2.0, %v3015_v20  ;;  %v1827_v19 = vpop.f32.mrf.mxu1 }
 0x22b   : > { %v3019_v8 = vpop.eup %3018  ;;  %3038 = vrcp.f32 %v2124_v59  ;;  %v2097_v12 = vmul.f32 %v3013_v57, %v2065_v61  ;;  %v2066_v14 = vadd.f32 2.0, %v3017_v2  ;;  %v4169_v17 = vadd.f32 %v4075_v4, %v1822_v5 }
 0x22c   : > { %v3021_v18 = vpop.eup %3020  ;;  %3040 = vrcp.f32 %v2126_v7  ;;  %v2127_v13 = vadd.f32 2.0, %v2095_v54  ;;  %v2096_v9 = vmul.f32 %v3015_v20, %v2064_v39  ;;  %v2067_v41 = vadd.f32 2.0, %v3019_v8 }
 0x22d   : > { %v2129_v45 = vadd.f32 2.0, %v2097_v12  ;;  %v2098_v53 = vmul.f32 %v3017_v2, %v2066_v14  ;;  %v2069_v23 = vadd.f32 2.0, %v3021_v18  ;;  %3042 = vpow2.f32 %v2027_v42 }
 0x22e   : > { %3044 = vrcp.f32 %v2127_v13  ;;  %v2128_v28 = vadd.f32 2.0, %v2096_v9  ;;  %v2099_v38 = vmul.f32 %v3019_v8, %v2067_v41  ;;  %v1983_v34 = vmin.f32 %v4169_v17, 20.0 }
 0x22f   : > { %v3023_v57 = vpop.eup %3022  ;;  %3046 = vrcp.f32 %v2129_v45  ;;  %v2130_v30 = vadd.f32 2.0, %v2098_v53  ;;  %v2101_v5 = vmul.f32 %v3021_v18, %v2069_v23  ;;  %v1824_v36 = vadd.f32 %v1823_v46, %v4050_v60 }
 0x230   : > { %v3025_v59 = vpop.eup %3024  ;;  %3048 = vrcp.f32 %v2128_v28  ;;  %v2131_v20 = vadd.f32 2.0, %v2099_v38  ;;  %v2068_v61 = vadd.f32 2.0, %v3023_v57  ;;  %v2035_v7 = vmul.f32 1.442695, %v1983_v34 }
 0x231   : > { %v3027_v2 = vpop.eup %3026  ;;  %3050 = vrcp.f32 %v2130_v30  ;;  %v2133_v42 = vadd.f32 2.0, %v2101_v5  ;;  %v2070_v54 = vadd.f32 2.0, %v3025_v59  ;;  %v4174_v39 = vadd.f32 %v4081_v25, %v1824_v36 }
 0x232   : > { %v3029_v8 = vpop.eup %3028  ;;  %3052 = vrcp.f32 %v2131_v20  ;;  %v2100_v12 = vmul.f32 %v3023_v57, %v2068_v61  ;;  %v2071_v14 = vadd.f32 2.0, %v3027_v2  ;;  %v1828_v60 = vadd.f32 %v1827_v19, %v4054_v43 }
 0x233   : > { %v3031_v46 = vpop.eup %3030  ;;  %3054 = vrcp.f32 %v2133_v42  ;;  %v2102_v18 = vmul.f32 %v3025_v59, %v2070_v54  ;;  %v2073_v13 = vadd.f32 2.0, %v3029_v8  ;;  %v1984_v9 = vmin.f32 %v4174_v39, 20.0 }
 0x234   : > { %v2132_v41 = vadd.f32 2.0, %v2100_v12  ;;  %v2103_v45 = vmul.f32 %v3027_v2, %v2071_v14  ;;  %v2072_v53 = vadd.f32 2.0, %v3031_v46  ;;  %3056 = vpow2.f32 %v2029_v26 }
 0x235   : > { %v3033_v23 = vpop.eup %3032  ;;  %v2134_v28 = vadd.f32 2.0, %v2102_v18  ;;  %v2105_v38 = vmul.f32 %v3029_v8, %v2073_v13  ;;  %3058 = vpow2.f32 %v2035_v7  ;;  %v2037_v34 = vmul.f32 1.442695, %v1984_v9 }
 0x236   : > { %v3035_v57 = vpop.eup %3034  ;;  %3060 = vrcp.f32 %v2132_v41  ;;  %v2135_v43 = vadd.f32 2.0, %v2103_v45  ;;  %v2104_v30 = vmul.f32 %v3031_v46, %v2072_v53  ;;  %v2074_v5 = vadd.f32 2.0, %v3033_v23  ;;  %v1829_v53 = vpop.f32.mrf.mxu1 }
 0x237   : > { %v3037_v36 = vpop.eup %3036  ;;  %v2187_v19 = vmul.f32 2.0, %v3035_v57  ;;  %3062 = vrcp.f32 %v2134_v28  ;;  %v2137_v59 = vadd.f32 2.0, %v2105_v38  ;;  %v4184_v20 = vadd.f32 %v4075_v4, %v1828_v60 }
 0x238   : > { %v3039_v26 = vpop.eup %3038  ;;  %v2189_v61 = vmul.f32 2.0, %v3037_v36  ;;  %3064 = vrcp.f32 %v2135_v43  ;;  %v2136_v7 = vadd.f32 2.0, %v2104_v30  ;;  %v2106_v2 = vmul.f32 %v3033_v23, %v2074_v5 }
 0x239   : > { %v3041_v42 = vpop.eup %3040  ;;  %v2219_v54 = vsub.f32 1.0, %v2187_v19  ;;  %v2188_v8 = vmul.f32 2.0, %v3039_v26  ;;  %3066 = vrcp.f32 %v2137_v59  ;;  %v1987_v12 = vmin.f32 %v4184_v20, 20.0 }
 0x23a   : > { %v3043_v14 = vpop.eup %3042  ;;  %v2221_v46 = vsub.f32 1.0, %v2189_v61  ;;  %v2190_v18 = vmul.f32 2.0, %v3041_v42  ;;  %3068 = vrcp.f32 %v2136_v7  ;;  %v2138_v13 = vadd.f32 2.0, %v2106_v2 }
 0x23b   : > { %v3045_v9 = vpop.eup %3044  ;;  %v2251_v60 = vmul.f32 %v2219_v54, %v4086_v6  ;;  %v2220_v41 = vsub.f32 1.0, %v2188_v8  ;;  %v2075_v45 = vadd.f32 2.0, %v3043_v14  ;;  %3070 = vpow2.f32 %v2037_v34 }
 0x23c   : > { %v3047_v23 = vpop.eup %3046  ;;  %v2253_v28 = vmul.f32 %v2221_v46, %v4089_v11  ;;  %v2222_v38 = vsub.f32 1.0, %v2190_v18  ;;  %v2191_v57 = vmul.f32 2.0, %v3045_v9  ;;  %3072 = vrcp.f32 %v2138_v13 }
 0x23d   : > { %v3049_v43 = vpop.eup %3048  ;;  %2283 = vst [vmem:[%s4190_s19] sm:$0xff] %v2251_v60  ;;  %v2252_v30 = vmul.f32 %v2220_v41, %v4094_v1  ;;  %v2193_v6 = vmul.f32 2.0, %v3047_v23  ;;  %v2107_v5 = vmul.f32 %v3043_v14, %v2075_v45  ;;  %v2043_v34 = vmul.f32 1.442695, %v1987_v12  ;;  %v1831_v14 = vpop.f32.mrf.mxu1 }
 0x23e   : > { %v3051_v36 = vpop.eup %3050  ;;  %2285 = vst [vmem:[%s4190_s19 + $0x10] sm:$0xff] %v2253_v28  ;;  %v2254_v11 = vmul.f32 %v2222_v38, %v4097_v3  ;;  %v2223_v19 = vsub.f32 1.0, %v2191_v57  ;;  %v2192_v59 = vmul.f32 2.0, %v3049_v43  ;;  %v1830_v26 = vadd.f32 %v1829_v53, %v4058_v44 }
 0x23f   : > { %v3053_v61 = vpop.eup %3052  ;;  %2284 = vst [vmem:[%s4190_s19 + $0x8] sm:$0xff] %v2252_v30  ;;  %v2225_v7 = vsub.f32 1.0, %v2193_v6  ;;  %v2194_v2 = vmul.f32 2.0, %v3051_v36  ;;  %v2139_v42 = vadd.f32 2.0, %v2107_v5  ;;  %3074 = vpow2.f32 %v2043_v34 }
 0x240   : > { %v3055_v1 = vpop.eup %3054  ;;  %2286 = vst [vmem:[%s4190_s19 + $0x18] sm:$0xff] %v2254_v11  ;;  %v2255_v54 = vmul.f32 %v2223_v19, %v4102_v24  ;;  %v2224_v8 = vsub.f32 1.0, %v2192_v59  ;;  %v2195_v12 = vmul.f32 2.0, %v3053_v61  ;;  %v4201_v3 = vadd.f32 %v4081_v25, %v1830_v26 }
 0x241   : > { %v3057_v46 = vpop.eup %3056  ;;  %v2257_v44 = vmul.f32 %v2225_v7, %v4105_v27  ;;  %v2226_v18 = vsub.f32 1.0, %v2194_v2  ;;  %v2197_v13 = vmul.f32 2.0, %v3055_v1  ;;  %3076 = vrcp.f32 %v2139_v42 }
 0x242   : > { %v3059_v9 = vpop.eup %3058  ;;  %2287 = vst [vmem:[%s4190_s19 + $0x20] sm:$0xff] %v2255_v54  ;;  %v2256_v60 = vmul.f32 %v2224_v8, %v4111_v55  ;;  %v2227_v41 = vsub.f32 1.0, %v2195_v12  ;;  %v2076_v24 = vadd.f32 2.0, %v3057_v46  ;;  %v1988_v45 = vmin.f32 %v4201_v3, 20.0  ;;  %v1833_v8 = vpop.f32.mrf.mxu1 }
 0x243   : > { %v3061_v53 = vpop.eup %3060  ;;  %2289 = vst [vmem:[%s4190_s19 + $0x30] sm:$0xff] %v2257_v44  ;;  %v2258_v23 = vmul.f32 %v2226_v18, %v4114_v33  ;;  %v2229_v28 = vsub.f32 1.0, %v2197_v13  ;;  %v2079_v27 = vadd.f32 2.0, %v3059_v9  ;;  %v1832_v38 = vadd.f32 %v1831_v14, %v4062_v0 }
 0x244   : > { %v3063_v57 = vpop.eup %3062  ;;  %2288 = vst [vmem:[%s4190_s19 + $0x28] sm:$0xff] %v2256_v60  ;;  %v2259_v43 = vmul.f32 %v2227_v41, %v4117_v48  ;;  %v2196_v30 = vmul.f32 2.0, %v3061_v53  ;;  %v2108_v55 = vmul.f32 %v3057_v46, %v2076_v24  ;;  %v2045_v6 = vmul.f32 1.442695, %v1988_v45 }
 0x245   : > { %v3065_v5 = vpop.eup %3064  ;;  %2290 = vst [vmem:[%s4190_s19 + $0x38] sm:$0xff] %v2258_v23  ;;  %v2261_v34 = vmul.f32 %v2229_v28, %v4124_v63  ;;  %v2198_v36 = vmul.f32 2.0, %v3063_v57  ;;  %v2111_v11 = vmul.f32 %v3059_v9, %v2079_v27  ;;  %v4215_v33 = vadd.f32 %v4075_v4, %v1832_v38 }
 0x246   : > { %v3067_v19 = vpop.eup %3066  ;;  %2291 = vst [vmem:[%s4190_s19 + $0x40] sm:$0xff] %v2259_v43  ;;  %v2228_v0 = vsub.f32 1.0, %v2196_v30  ;;  %v2199_v59 = vmul.f32 2.0, %v3065_v5  ;;  %v2140_v26 = vadd.f32 2.0, %v2108_v55  ;;  %3078 = vpow2.f32 %v2045_v6 }
 0x247   : > { %v3069_v48 = vpop.eup %3068  ;;  %2293 = vst [vmem:[%s4190_s19 + $0x50] sm:$0xff] %v2261_v34  ;;  %v2230_v61 = vsub.f32 1.0, %v2198_v36  ;;  %v2201_v7 = vmul.f32 2.0, %v3067_v19  ;;  %v2143_v2 = vadd.f32 2.0, %v2111_v11  ;;  %v1991_v42 = vmin.f32 %v4215_v33, 20.0 }
 0x248   : > { %v3071_v63 = vpop.eup %3070  ;;  %v2260_v1 = vmul.f32 %v2228_v0, %v4131_v22  ;;  %v2231_v4 = vsub.f32 1.0, %v2199_v59  ;;  %v2200_v54 = vmul.f32 2.0, %v3069_v48  ;;  %3080 = vrcp.f32 %v2140_v26 }
 0x249   : > { %v3073_v12 = vpop.eup %3072  ;;  %v2262_v14 = vmul.f32 %v2230_v61, %v4134_v29  ;;  %v2233_v46 = vsub.f32 1.0, %v2201_v7  ;;  %3082 = vrcp.f32 %v2143_v2  ;;  %v2080_v44 = vadd.f32 2.0, %v3071_v63 }
 0x24a   : > { %2292 = vst [vmem:[%s4190_s19 + $0x48] sm:$0xff] %v2260_v1  ;;  %v2263_v18 = vmul.f32 %v2231_v4, %v4137_v21  ;;  %v2232_v13 = vsub.f32 1.0, %v2200_v54  ;;  %v2202_v9 = vmul.f32 2.0, %v3073_v12  ;;  %v2051_v60 = vmul.f32 1.442695, %v1991_v42 }
 0x24b   : > { %2294 = vst [vmem:[%s4190_s19 + $0x58] sm:$0xff] %v2262_v14  ;;  %v2265_v22 = vmul.f32 %v2233_v46, %v4145_v15  ;;  %v2112_v41 = vmul.f32 %v3071_v63, %v2080_v44  ;;  %v1834_v24 = vadd.f32 %v1833_v8, %v4071_v62 }
 0x24c   : > { %v3075_v45 = vpop.eup %3074  ;;  %2295 = vst [vmem:[%s4190_s19 + $0x60] sm:$0xff] %v2263_v18  ;;  %v2264_v29 = vmul.f32 %v2232_v13, %v4148_v37  ;;  %v2234_v53 = vsub.f32 1.0, %v2202_v9  ;;  %3084 = vpow2.f32 %v2051_v60 }
 0x24d   : > { %2297 = vst [vmem:[%s4190_s19 + $0x70] sm:$0xff] %v2265_v22  ;;  %v2144_v23 = vadd.f32 2.0, %v2112_v41  ;;  %v2083_v21 = vadd.f32 2.0, %v3075_v45  ;;  %v4231_v28 = vadd.f32 %v4081_v25, %v1834_v24  ;;  %v1890_v27 = vpop.f32.mrf.mxu1 }
 0x24e   : > { %v3077_v38 = vpop.eup %3076  ;;  %2296 = vst [vmem:[%s4190_s19 + $0x68] sm:$0xff] %v2264_v29  ;;  %v2266_v15 = vmul.f32 %v2234_v53, %v4155_v31  ;;  %v1891_v62 = vadd.f32 %v1890_v27, %v4036_v32 }
 0x24f   : > { %v2203_v57 = vmul.f32 2.0, %v3077_v38  ;;  %3086 = vrcp.f32 %v2144_v23  ;;  %v2115_v43 = vmul.f32 %v3075_v45, %v2083_v21  ;;  %v1992_v37 = vmin.f32 %v4231_v28, 20.0  ;;  %v1892_v30 = vpop.f32.mrf.mxu1 }
 0x250   : > { %2298 = vst [vmem:[%s4190_s19 + $0x78] sm:$0xff] %v2266_v15  ;;  %v4239_v55 = vadd.f32 %v4077_v56, %v1891_v62  ;;  %v1893_v25 = vadd.f32 %v1892_v30, %v4040_v47 }
 0x251   : > { %v2235_v6 = vsub.f32 1.0, %v2203_v57  ;;  %v2147_v5 = vadd.f32 2.0, %v2115_v43  ;;  %v2053_v34 = vmul.f32 1.442695, %v1992_v37  ;;  %v1894_v36 = vpop.f32.mrf.mxu1 }
 0x252   : > { %v1981_v31 = vmin.f32 %v4239_v55, 20.0  ;;  %v4244_v32 = vadd.f32 %v4083_v10, %v1893_v25  ;;  %v1895_v11 = vadd.f32 %v1894_v36, %v4044_v40 }
 0x253   : > { %v3079_v19 = vpop.eup %3078  ;;  %v2267_v0 = vmul.f32 %v2235_v6, %v4159_v58  ;;  %3088 = vrcp.f32 %v2147_v5  ;;  %v1896_v59 = vpop.f32.mrf.mxu1 }
 0x254   : > { %v2084_v26 = vadd.f32 2.0, %v3079_v19  ;;  %3090 = vpow2.f32 %v2053_v34  ;;  %v2031_v47 = vmul.f32 1.442695, %v1981_v31  ;;  %v1982_v48 = vmin.f32 %v4244_v32, 20.0 }
 0x255   : > { %v3081_v61 = vpop.eup %3080  ;;  %2299 = vst [vmem:[%s4190_s19 + $0x80] sm:$0xff] %v2267_v0  ;;  %v4251_v7 = vadd.f32 %v4077_v56, %v1895_v11  ;;  %v1897_v2 = vadd.f32 %v1896_v59, %v4048_v52  ;;  %v1900_v42 = vpop.f32.mrf.mxu1 }
 0x256   : > { %v3083_v63 = vpop.eup %3082  ;;  %v2204_v40 = vmul.f32 2.0, %v3081_v61  ;;  %v2116_v1 = vmul.f32 %v3079_v19, %v2084_v26  ;;  %3092 = vpow2.f32 %v2031_v47  ;;  %v2033_v58 = vmul.f32 1.442695, %v1982_v48 }
 0x257   : > { %v2207_v4 = vmul.f32 2.0, %v3083_v63  ;;  %v1985_v54 = vmin.f32 %v4251_v7, 20.0  ;;  %v4256_v8 = vadd.f32 %v4083_v10, %v1897_v2  ;;  %v1901_v12 = vadd.f32 %v1900_v42, %v4052_v49  ;;  %v1902_v14 = vpop.f32.mrf.mxu1 }
 0x258   : > { %v2236_v46 = vsub.f32 1.0, %v2204_v40  ;;  %v2148_v44 = vadd.f32 2.0, %v2116_v1  ;;  %3094 = vpow2.f32 %v2033_v58  ;;  %v1903_v52 = vadd.f32 %v1902_v14, %v4056_v50 }
 0x259   : > { %v3085_v18 = vpop.eup %3084  ;;  %v2239_v13 = vsub.f32 1.0, %v2207_v4  ;;  %v2039_v9 = vmul.f32 1.442695, %v1985_v54  ;;  %v1986_v60 = vmin.f32 %v4256_v8, 20.0  ;;  %v4262_v22 = vadd.f32 %v4077_v56, %v1901_v12  ;;  %v1904_v41 = vpop.f32.mrf.mxu1 }
 0x25a   : > { %v2268_v24 = vmul.f32 %v2236_v46, %v4165_v16  ;;  %3096 = vrcp.f32 %v2148_v44  ;;  %v2087_v49 = vadd.f32 2.0, %v3085_v18  ;;  %v4266_v45 = vadd.f32 %v4083_v10, %v1903_v52 }
 0x25b   : > { %v2271_v50 = vmul.f32 %v2239_v13, %v4169_v17  ;;  %3098 = vpow2.f32 %v2039_v9  ;;  %v2041_v29 = vmul.f32 1.442695, %v1986_v60  ;;  %v1989_v53 = vmin.f32 %v4262_v22, 20.0  ;;  %v1906_v23 = vpop.f32.mrf.mxu1 }
 0x25c   : > { %v3087_v21 = vpop.eup %3086  ;;  %2300 = vst [vmem:[%s4190_s19 + $0x88] sm:$0xff] %v2268_v24  ;;  %v2119_v27 = vmul.f32 %v3085_v18, %v2087_v49  ;;  %v1990_v38 = vmin.f32 %v4266_v45, 20.0  ;;  %v1905_v15 = vadd.f32 %v1904_v41, %v4060_v35  ;;  %v1907_v16 = vadd.f32 %v1906_v23, %v4065_v51 }
 0x25d   : > { %2303 = vst [vmem:[%s4190_s19 + $0xa0] sm:$0xff] %v2271_v50  ;;  %v2208_v62 = vmul.f32 2.0, %v3087_v21  ;;  %3100 = vpow2.f32 %v2041_v29  ;;  %v2047_v57 = vmul.f32 1.442695, %v1989_v53 }
 0x25e   : > { %v2151_v43 = vadd.f32 2.0, %v2119_v27  ;;  %v2049_v17 = vmul.f32 1.442695, %v1990_v38  ;;  %v4276_v37 = vadd.f32 %v4077_v56, %v1905_v15  ;;  %v4279_v30 = vadd.f32 %v4083_v10, %v1907_v16 }
 0x25f   : > { %v2240_v25 = vsub.f32 1.0, %v2208_v62  ;;  %3102 = vpow2.f32 %v2047_v57 }
 0x260   : > { %v3089_v6 = vpop.eup %3088  ;;  %3104 = vrcp.f32 %v2151_v43  ;;  %v1993_v35 = vmin.f32 %v4276_v37, 20.0  ;;  %v1994_v51 = vmin.f32 %v4279_v30, 20.0 }
 0x261   : > { %v3091_v5 = vpop.eup %3090  ;;  %v2272_v34 = vmul.f32 %v2240_v25, %v4174_v39  ;;  %v2211_v36 = vmul.f32 2.0, %v3089_v6  ;;  %3106 = vpow2.f32 %v2049_v17 }
 0x262   : > { %v2088_v31 = vadd.f32 2.0, %v3091_v5  ;;  %v2055_v56 = vmul.f32 1.442695, %v1993_v35  ;;  %v2057_v11 = vmul.f32 1.442695, %v1994_v51 }
 0x263   : > { %v3093_v19 = vpop.eup %3092  ;;  %2304 = vst [vmem:[%s4190_s19 + $0xa8] sm:$0xff] %v2272_v34  ;;  %v2243_v10 = vsub.f32 1.0, %v2211_v36 }
 0x264   : > { %v2120_v0 = vmul.f32 %v3091_v5, %v2088_v31  ;;  %v2077_v59 = vadd.f32 2.0, %v3093_v19  ;;  %3108 = vpow2.f32 %v2055_v56 }
 0x265   : > { %v3095_v26 = vpop.eup %3094  ;;  %v2275_v47 = vmul.f32 %v2243_v10, %v4184_v20  ;;  %3110 = vpow2.f32 %v2057_v11 }
 0x266   : > { %v2152_v48 = vadd.f32 2.0, %v2120_v0  ;;  %v2109_v61 = vmul.f32 %v3093_v19, %v2077_v59  ;;  %v2078_v2 = vadd.f32 2.0, %v3095_v26 }
 0x267   : > { %v3097_v39 = vpop.eup %3096  ;;  %2307 = vst [vmem:[%s4190_s19 + $0xc0] sm:$0xff] %v2275_v47 }
 0x268   : > { %v3099_v42 = vpop.eup %3098  ;;  %v2212_v63 = vmul.f32 2.0, %v3097_v39  ;;  %3112 = vrcp.f32 %v2152_v48  ;;  %v2141_v40 = vadd.f32 2.0, %v2109_v61  ;;  %v2110_v1 = vmul.f32 %v3095_v26, %v2078_v2 }
 0x269   : > { %v2081_v58 = vadd.f32 2.0, %v3099_v42 }
 0x26a   : > { %v3101_v4 = vpop.eup %3100  ;;  %v2244_v54 = vsub.f32 1.0, %v2212_v63  ;;  %3114 = vrcp.f32 %v2141_v40  ;;  %v2142_v12 = vadd.f32 2.0, %v2110_v1 }
 0x26b   : > { %v2113_v14 = vmul.f32 %v3099_v42, %v2081_v58  ;;  %v2082_v46 = vadd.f32 2.0, %v3101_v4 }
 0x26c   : > { %v3103_v20 = vpop.eup %3102  ;;  %v2276_v44 = vmul.f32 %v2244_v54, %v4201_v3  ;;  %3116 = vrcp.f32 %v2142_v12 }
 0x26d   : > { %v3105_v52 = vpop.eup %3104  ;;  %v2145_v18 = vadd.f32 2.0, %v2113_v14  ;;  %v2114_v13 = vmul.f32 %v3101_v4, %v2082_v46  ;;  %v2085_v9 = vadd.f32 2.0, %v3103_v20 }
 0x26e   : > { %v3107_v60 = vpop.eup %3106  ;;  %2308 = vst [vmem:[%s4190_s19 + $0xc8] sm:$0xff] %v2276_v44  ;;  %v2215_v41 = vmul.f32 2.0, %v3105_v52 }
 0x26f   : > { %3118 = vrcp.f32 %v2145_v18  ;;  %v2146_v24 = vadd.f32 2.0, %v2114_v13  ;;  %v2117_v49 = vmul.f32 %v3103_v20, %v2085_v9  ;;  %v2086_v50 = vadd.f32 2.0, %v3107_v60 }
 0x270   : > { %v2247_v29 = vsub.f32 1.0, %v2215_v41 }
 0x271   : > { %v3109_v53 = vpop.eup %3108  ;;  %3120 = vrcp.f32 %v2146_v24  ;;  %v2149_v23 = vadd.f32 2.0, %v2117_v49  ;;  %v2118_v21 = vmul.f32 %v3107_v60, %v2086_v50 }
 0x272   : > { %v3111_v27 = vpop.eup %3110  ;;  %v2279_v3 = vmul.f32 %v2247_v29, %v4215_v33  ;;  %v2089_v38 = vadd.f32 2.0, %v3109_v53 }
 0x273   : > { %3122 = vrcp.f32 %v2149_v23  ;;  %v2150_v15 = vadd.f32 2.0, %v2118_v21  ;;  %v2090_v16 = vadd.f32 2.0, %v3111_v27 }
 0x274   : > { %2311 = vst [vmem:[%s4190_s19 + $0xe0] sm:$0xff] %v2279_v3  ;;  %v2121_v62 = vmul.f32 %v3109_v53, %v2089_v38 }
 0x275   : > { %v3113_v57 = vpop.eup %3112  ;;  %3124 = vrcp.f32 %v2150_v15  ;;  %v2122_v43 = vmul.f32 %v3111_v27, %v2090_v16 }
 0x276   : > { %v2216_v17 = vmul.f32 2.0, %v3113_v57  ;;  %v2153_v25 = vadd.f32 2.0, %v2121_v62 }
 0x277   : > { %v3115_v6 = vpop.eup %3114  ;;  %v2154_v35 = vadd.f32 2.0, %v2122_v43 }
 0x278   : > { %v2248_v51 = vsub.f32 1.0, %v2216_v17  ;;  %v2205_v5 = vmul.f32 2.0, %v3115_v6  ;;  %3126 = vrcp.f32 %v2153_v25 }
 0x279   : > { %v3117_v34 = vpop.eup %3116  ;;  %3128 = vrcp.f32 %v2154_v35 }
 0x27a   : > { %v2280_v33 = vmul.f32 %v2248_v51, %v4231_v28  ;;  %v2237_v36 = vsub.f32 1.0, %v2205_v5  ;;  %v2206_v31 = vmul.f32 2.0, %v3117_v34 }
 0x27c   : > { %v3119_v56 = vpop.eup %3118  ;;  %2312 = vst [vmem:[%s4190_s19 + $0xe8] sm:$0xff] %v2280_v33  ;;  %v2269_v11 = vmul.f32 %v2237_v36, %v4239_v55  ;;  %v2238_v19 = vsub.f32 1.0, %v2206_v31 }
 0x27d   : > { %v2209_v10 = vmul.f32 2.0, %v3119_v56 }
 0x27e   : > { %v3121_v0 = vpop.eup %3120  ;;  %2301 = vst [vmem:[%s4190_s19 + $0x90] sm:$0xff] %v2269_v11  ;;  %v2270_v59 = vmul.f32 %v2238_v19, %v4244_v32 }
 0x27f   : > { %v2241_v26 = vsub.f32 1.0, %v2209_v10  ;;  %v2210_v47 = vmul.f32 2.0, %v3121_v0 }
 0x280   : > { %v3123_v48 = vpop.eup %3122  ;;  %2302 = vst [vmem:[%s4190_s19 + $0x98] sm:$0xff] %v2270_v59 }
 0x281   : > { %v2273_v28 = vmul.f32 %v2241_v26, %v4251_v7  ;;  %v2242_v61 = vsub.f32 1.0, %v2210_v47  ;;  %v2213_v2 = vmul.f32 2.0, %v3123_v48 }
 0x282   : > { %v3125_v39 = vpop.eup %3124 }
 0x283   : > { %2305 = vst [vmem:[%s4190_s19 + $0xb0] sm:$0xff] %v2273_v28  ;;  %v2274_v55 = vmul.f32 %v2242_v61, %v4256_v8  ;;  %v2245_v42 = vsub.f32 1.0, %v2213_v2  ;;  %v2214_v63 = vmul.f32 2.0, %v3125_v39 }
 0x285   : > { %v3127_v40 = vpop.eup %3126  ;;  %2306 = vst [vmem:[%s4190_s19 + $0xb8] sm:$0xff] %v2274_v55  ;;  %v2277_v32 = vmul.f32 %v2245_v42, %v4262_v22  ;;  %v2246_v1 = vsub.f32 1.0, %v2214_v63 }
 0x286   : > { %v3129_v58 = vpop.eup %3128  ;;  %v2217_v7 = vmul.f32 2.0, %v3127_v40 }
 0x287   : > { %2309 = vst [vmem:[%s4190_s19 + $0xd0] sm:$0xff] %v2277_v32  ;;  %v2278_v4 = vmul.f32 %v2246_v1, %v4266_v45  ;;  %v2218_v54 = vmul.f32 2.0, %v3129_v58 }
 0x288   : > { %v2249_v8 = vsub.f32 1.0, %v2217_v7 }
 0x289   : > { %2310 = vst [vmem:[%s4190_s19 + $0xd8] sm:$0xff] %v2278_v4  ;;  %v2250_v12 = vsub.f32 1.0, %v2218_v54 }
 0x28a   : > { %v2281_v14 = vmul.f32 %v2249_v8, %v4276_v37 }
 0x28b   : > { %v2282_v22 = vmul.f32 %v2250_v12, %v4279_v30 }
 0x28c   : > { %2313 = vst [vmem:[%s4190_s19 + $0xf0] sm:$0xff] %v2281_v14 }
 0x28d   : > { %2314 = vst [vmem:[%s4190_s19 + $0xf8] sm:$0xff] %v2282_v22 }
 0x28e   : > { %3143 = shalt.err (!%p3140_p3)
}
 0x28f   : > { %s3144_s21 = scalar_lea.hbm %s4311_s16, 4096  ;;  %s3148_s9 = scalar_lea.hbm %s4367_s7, 8192 }
 0x290   : > { %p3145_p4 = scmp.ne.s32.totalorder %s4311_s16, %s3144_s21  ;;  %p3149_p9 = scmp.lt.s32.totalorder %s4311_s16, %s4367_s7 }
 0x291   : > { %p3150_p10 = scmp.lt.s32.totalorder %s3148_s9, %s3144_s21 }
 0x292   : > { %p3146_p7 = pnand %p3145_p4, %p3273_p5 }
 0x293   : > { %p3151_p11 = por %p3150_p10, %p3149_p9 }
 0x294   : > { %p3147_p8 = pneg %p3146_p7 }
 0x296   : > { %p3152_p12 = pnand %p3151_p11, %p3147_p8 }
 0x298   : > { %3155 = shalt.err (!%p3152_p12)
}
 0x299   : > { %s3193_s13 = smov 512   ;;  %s3194_s15 = smov 32  }
 0x29a   : > { %2633 = dma.vmem_to_hbm [thread:$0]  (%p3273_p5), %s4313_s22, 4096, %s4311_s16, %s4320_s28, %s3193_s13, %s3193_s13, %s3194_s15  }
 0x29b PF: > { %p2639_p13 = scmp.ge.s32.totalorder %s3190_s27, 2  ;;  %s2345_s14 = sand.u32 1, %s3178_s24  }
 0x29c   : > { %s2346_s17 = scalar_lea.sflag [#allocation3], %s2345_s14 }
 0x29d   : > { %p2636_p0 = pnand %p2639_p13, %p3277_p6 }
 0x29f   : > { %p2637_p1 = pneg %p2636_p0 }
 0x2a1   : > { %3173 = dma.done.wait (%p2637_p1), %s2346_s17, 4096  }
 0x2a2   : > { %3175 = vsyncadd (%p2637_p1), %s2346_s17, 4294963200  ;;  %p17_p2 = scmp.ge.s32.totalorder %s3260_s30, 4   ;;  %s4405_s24 = smov %s3182_s25 }
 0x2a3   : > { %s4406_s25 = smov %s3186_s26  ;;  %s4407_s26 = smov %s3271_s10 }
 0x2a4   : > { %s4408_s27 = smov %s3260_s30  ;;  %19 = sbr.rel (!%p17_p2) target bundleno = 3 (0x3), region = 86 }
 0x2a9   :  { %2351 = vsyncpa [#allocation3], 1 }
 0x2aa   :  { %2353 = vsyncpa [#allocation3 + $0x1], 1 }

// kernel: downsample4_forward.13
= control target key start
LH: loop header
LB: loop body
LE: loop exit
PB: predicated region body
PF: predicated region fallthrough
CT: control target
= control target key end

     0   :  { %s6043_s18 = smov 0   ;;  %s8152_s0 = inlined_call_operand.vmem [shape: bf16[2,64,256], index: 0, kind: input, shape index: {}]   ;;  %s8153_s1 = inlined_call_operand.vmem [shape: bf16[256,256], index: 1, kind: input, shape index: {}]   ;;  %s8154_s2 = inlined_call_operand.vmem [shape: f32[1,256], index: 2, kind: input, shape index: {}]   ;;  %s8155_s3 = inlined_call_operand.vmem [shape: bf16[9,256,256], index: 3, kind: input, shape index: {}]   ;;  %s8156_s4 = inlined_call_operand.vmem [shape: f32[1,256], index: 4, kind: input, shape index: {}]   ;;  %s8157_s5 = inlined_call_operand.vmem [shape: bf16[2,64,256], index: 5, kind: output, shape index: {}]  }
   0x1 LB: > { %s4637_s19 = sadd.s32 4294967295, %s6010_s18   ;;  %p4641_p0 = scmp.ge.s32.totalorder %s6010_s18, 1  ;;  %s6010_s18 = sphi %s6043_s18, %s15_s18  }
   0x2   : > { %p187_p1 = scmp.lt.s32.totalorder %s6010_s18, 3 }
   0x4   : > { %p188_p2 = pnand %p4641_p0, %p187_p1 }
   0x6   : > { %191 = sbr.rel (%p188_p2) target bundleno = 889 (0x379), region = 40 }
   0xb   : > { %v5371_v0 = vld [vmem:[%s8153_s1 + $0x74] ss:$8 sps:$4 sm:$0xff]   ;;  %v5373_v1 = vld [vmem:[%s8153_s1 + $0x70] ss:$8 sps:$4 sm:$0xff]   ;;  %v5374_v2 = vld [vmem:[%s8153_s1 + $0x64] ss:$8 sps:$4 sm:$0xff]  }
   0xc   : > { %478 = vmatprep.subr.bf16.mxu0 %v5371_v0  ;;  %v5376_v3 = vld [vmem:[%s8153_s1 + $0x60] ss:$8 sps:$4 sm:$0xff]   ;;  %v5377_v4 = vld [vmem:[%s8153_s1 + $0x54] ss:$8 sps:$4 sm:$0xff]   ;;  %v5379_v5 = vld [vmem:[%s8153_s1 + $0x50] ss:$8 sps:$4 sm:$0xff]  }
   0xd   : > { %479 = vmatpush1.bf16.msra.mxu0 %v5373_v1  ;;  %p215_p3 = scmp.lt.s32.totalorder %s4637_s19, 1  ;;  %v5380_v6 = vld [vmem:[%s8153_s1 + $0x44] ss:$8 sps:$4 sm:$0xff]   ;;  %v5382_v7 = vld [vmem:[%s8153_s1 + $0x40] ss:$8 sps:$4 sm:$0xff]   ;;  %vm852_vm0 = vcmask 1043456  }
   0xe   : > { %480 = vmatprep.subr.bf16.mxu0 %v5374_v2  ;;  %v5383_v8 = vld [vmem:[%s8153_s1 + $0x34] ss:$8 sps:$4 sm:$0xff]   ;;  %v5385_v9 = vld [vmem:[%s8153_s1 + $0x30] ss:$8 sps:$4 sm:$0xff]   ;;  %v5386_v10 = vld [vmem:[%s8153_s1 + $0x24] ss:$8 sps:$4 sm:$0xff]  }
   0xf   : > { %s8241_s19 = smov (!%p215_p3, %s4637_s19), 1  ;;  %v5388_v11 = vld [vmem:[%s8153_s1 + $0x20] ss:$8 sps:$4 sm:$0xff]   ;;  %v5389_v12 = vld [vmem:[%s8153_s1 + $0x14] ss:$8 sps:$4 sm:$0xff]   ;;  %vm855_vm2 = vcmask 1047556  }
  0x10   : > { %s5344_s15 = sshll.u32 %s8241_s19, 6  ;;  %v5391_v16 = vld [vmem:[%s8153_s1 + $0x10] ss:$8 sps:$4 sm:$0xff]   ;;  %v5392_v17 = vld [vmem:[%s8153_s1 + $0x4] ss:$8 sps:$4 sm:$0xff]   ;;  %vm862_vm4 = vcmask 1040384  }
  0x11   : > { %481 = vmatpush1.bf16.msra.mxu0 %v5376_v3  ;;  %s6092_s22 = scalar_lea.vmem %s8152_s0, %s5344_s15  ;;  %v5394_v18 = vld [vmem:[%s8153_s1] ss:$8 sps:$4 sm:$0xff]   ;;  %v5395_v19 = vld [vmem:[%s8153_s1 + $0xf4] ss:$8 sps:$4 sm:$0xff]   ;;  %v5397_v20 = vld [vmem:[%s8153_s1 + $0xf0] ss:$8 sps:$4 sm:$0xff]   ;;  %s8121_s13 = scalar_lea.vmem %s8157_s5, %s5344_s15 }
  0x12   : > { %482 = vmatprep.subr.bf16.mxu0 %v5377_v4  ;;  %v226_v13 = vld [vmem:[%s6092_s22] sm:$0xff]  ;;  %v227_v14 = vld [vmem:[%s6092_s22 + $0x8] sm:$0xff]  ;;  %v5401_v23 = vld [vmem:[%s8153_s1 + $0xd4] ss:$8 sps:$4 sm:$0xff]   ;;  %vm853_vm1 = vsmask.f32 7938 }
  0x13   : > { %v4647_v15 = vcombine.high %v226_v13, %v227_v14  ;;  %v5398_v21 = vld [vmem:[%s8153_s1 + $0xe4] ss:$8 sps:$4 sm:$0xff]   ;;  %v5400_v22 = vld [vmem:[%s8153_s1 + $0xe0] ss:$8 sps:$4 sm:$0xff]   ;;  %v5403_v24 = vld [vmem:[%s8153_s1 + $0xd0] ss:$8 sps:$4 sm:$0xff]   ;;  %v4646_v37 = vcombine.low %v226_v13, %v227_v14 }
  0x14   : > { %v5404_v25 = vld [vmem:[%s8153_s1 + $0xc4] ss:$8 sps:$4 sm:$0xff]   ;;  %v5406_v26 = vld [vmem:[%s8153_s1 + $0xc0] ss:$8 sps:$4 sm:$0xff]   ;;  %v5407_v27 = vld [vmem:[%s8153_s1 + $0xb4] ss:$8 sps:$4 sm:$0xff]  }
  0x15   : > { %483 = vmatpush1.bf16.msra.mxu0 %v5379_v5  ;;  %510 = vmatprep.mubr.bf16.mxu0 %v4647_v15  ;;  %v5409_v28 = vld [vmem:[%s8153_s1 + $0xb0] ss:$8 sps:$4 sm:$0xff]   ;;  %v5410_v29 = vld [vmem:[%s8153_s1 + $0xa4] ss:$8 sps:$4 sm:$0xff]   ;;  %v5412_v30 = vld [vmem:[%s8153_s1 + $0xa0] ss:$8 sps:$4 sm:$0xff]  }
  0x16   : > { %484 = vmatprep.subr.bf16.mxu0 %v5380_v6  ;;  %v5413_v31 = vld [vmem:[%s8153_s1 + $0x94] ss:$8 sps:$4 sm:$0xff]   ;;  %v5415_v32 = vld [vmem:[%s8153_s1 + $0x90] ss:$8 sps:$4 sm:$0xff]   ;;  %v5416_v33 = vld [vmem:[%s8153_s1 + $0x84] ss:$8 sps:$4 sm:$0xff]  }
  0x17   : > { %v5418_v34 = vld [vmem:[%s8153_s1 + $0x80] ss:$8 sps:$4 sm:$0xff]   ;;  %v228_v35 = vld [vmem:[%s6092_s22 + $0x10] sm:$0xff]  ;;  %v229_v36 = vld [vmem:[%s6092_s22 + $0x18] sm:$0xff]  ;;  %vm856_vm3 = vsmask.f32 7954 }
  0x18   : > { %v4649_v38 = vcombine.high %v228_v35, %v229_v36  ;;  %v230_v39 = vld [vmem:[%s6092_s22 + $0x20] sm:$0xff]  ;;  %v231_v40 = vld [vmem:[%s6092_s22 + $0x28] sm:$0xff]  ;;  %v4648_v41 = vcombine.low %v228_v35, %v229_v36  ;;  %v232_v43 = vld [vmem:[%s6092_s22 + $0x30] sm:$0xff]  ;;  %vm863_vm5 = vsmask.f32 256  ;;  %vm865_vm6 = vcmask 1044484  }
  0x19   : > { %485 = vmatpush1.bf16.msra.mxu0 %v5382_v7  ;;  %v4651_v42 = vcombine.high %v230_v39, %v231_v40  ;;  %v233_v44 = vld [vmem:[%s6092_s22 + $0x38] sm:$0xff]  ;;  %v4650_v45 = vcombine.low %v230_v39, %v231_v40  ;;  %v5432_v50 = vld [vmem:[%s8155_s3 + $0x64] ss:$8 sps:$4 sm:$0xff]   ;;  %v5430_v51 = vld [vmem:[%s8155_s3 + $0x60] ss:$8 sps:$4 sm:$0xff]  }
  0x1a   : > { %486 = vmatprep.subr.bf16.mxu0 %v5383_v8  ;;  %v4653_v46 = vcombine.high %v232_v43, %v233_v44  ;;  %v4652_v47 = vcombine.low %v232_v43, %v233_v44  ;;  %v5429_v48 = vld [vmem:[%s8155_s3 + $0x74] ss:$8 sps:$4 sm:$0xff]   ;;  %v5427_v49 = vld [vmem:[%s8155_s3 + $0x70] ss:$8 sps:$4 sm:$0xff]   ;;  %v5441_v54 = vld [vmem:[%s8155_s3 + $0x44] ss:$8 sps:$4 sm:$0xff]  }
  0x1b   : > { %v5435_v52 = vld [vmem:[%s8155_s3 + $0x54] ss:$8 sps:$4 sm:$0xff]   ;;  %v5433_v53 = vld [vmem:[%s8155_s3 + $0x50] ss:$8 sps:$4 sm:$0xff]   ;;  %v5439_v56 = vld [vmem:[%s8155_s3 + $0x40] ss:$8 sps:$4 sm:$0xff]  }
  0x1c   : > { %v5436_v55 = vld [vmem:[%s8155_s3 + $0x174] ss:$8 sps:$4 sm:$0xff]   ;;  %v5438_v57 = vld [vmem:[%s8155_s3 + $0x170] ss:$8 sps:$4 sm:$0xff]   ;;  %v5442_v58 = vld [vmem:[%s8155_s3 + $0x164] ss:$8 sps:$4 sm:$0xff]  }
  0x1d   : > { %487 = vmatpush1.bf16.msra.mxu0 %v5385_v9  ;;  %1302 = vmatprep.subr.bf16.mxu1 %v5436_v55  ;;  %v5447_v59 = vld [vmem:[%s8155_s3 + $0x34] ss:$8 sps:$4 sm:$0xff]   ;;  %v5444_v60 = vld [vmem:[%s8155_s3 + $0x160] ss:$8 sps:$4 sm:$0xff]   ;;  %v5445_v61 = vld [vmem:[%s8155_s3 + $0x30] ss:$8 sps:$4 sm:$0xff]  }
  0x1e   : > { %488 = vmatprep.subr.bf16.mxu0 %v5386_v10  ;;  %1303 = vmatpush1.bf16.msra.mxu1 %v5438_v57  ;;  %v5453_v62 = vld [vmem:[%s8155_s3 + $0x24] ss:$8 sps:$4 sm:$0xff]   ;;  %v5448_v63 = vld [vmem:[%s8155_s3 + $0x154] ss:$8 sps:$4 sm:$0xff]   ;;  %v5451_v0 = vld [vmem:[%s8155_s3 + $0x20] ss:$8 sps:$4 sm:$0xff]  }
  0x1f   : > { %1304 = vmatprep.subr.bf16.mxu1 %v5442_v58  ;;  %v5450_v1 = vld [vmem:[%s8155_s3 + $0x150] ss:$8 sps:$4 sm:$0xff]   ;;  %v5454_v2 = vld [vmem:[%s8155_s3 + $0x144] ss:$8 sps:$4 sm:$0xff]   ;;  %v5459_v3 = vld [vmem:[%s8155_s3 + $0x14] ss:$8 sps:$4 sm:$0xff]  }
  0x20   : > { %v5456_v4 = vld [vmem:[%s8155_s3 + $0x140] ss:$8 sps:$4 sm:$0xff]   ;;  %v5457_v5 = vld [vmem:[%s8155_s3 + $0x10] ss:$8 sps:$4 sm:$0xff]   ;;  %v5460_v6 = vld [vmem:[%s8155_s3 + $0x134] ss:$8 sps:$4 sm:$0xff]  }
  0x21   : > { %489 = vmatpush1.bf16.msra.mxu0 %v5388_v11  ;;  %v5465_v7 = vld [vmem:[%s8155_s3 + $0x4] ss:$8 sps:$4 sm:$0xff]   ;;  %v5463_v8 = vld [vmem:[%s8155_s3] ss:$8 sps:$4 sm:$0xff]   ;;  %v5462_v9 = vld [vmem:[%s8155_s3 + $0x130] ss:$8 sps:$4 sm:$0xff]  }
  0x22   : > { %490 = vmatprep.subr.bf16.mxu0 %v5389_v12  ;;  %1305 = vmatpush1.bf16.msra.mxu1 %v5444_v60  ;;  %v5471_v10 = vld [vmem:[%s8155_s3 + $0xf4] ss:$8 sps:$4 sm:$0xff]   ;;  %v5466_v11 = vld [vmem:[%s8155_s3 + $0x124] ss:$8 sps:$4 sm:$0xff]   ;;  %v5469_v12 = vld [vmem:[%s8155_s3 + $0xf0] ss:$8 sps:$4 sm:$0xff]  }
  0x23   : > { %1306 = vmatprep.subr.bf16.mxu1 %v5448_v63  ;;  %v5468_v13 = vld [vmem:[%s8155_s3 + $0x120] ss:$8 sps:$4 sm:$0xff]   ;;  %v5477_v14 = vld [vmem:[%s8155_s3 + $0xe4] ss:$8 sps:$4 sm:$0xff]   ;;  %v5472_v15 = vld [vmem:[%s8155_s3 + $0x114] ss:$8 sps:$4 sm:$0xff]  }
  0x24   : > { %v5502_v35 = vld [vmem:[%s8155_s3 + $0x1c4] ss:$8 sps:$4 sm:$0xff]   ;;  %v5504_v36 = vld [vmem:[%s8155_s3 + $0x1c0] ss:$8 sps:$4 sm:$0xff]   ;;  %v5508_v40 = vld [vmem:[%s8155_s3 + $0x1b4] ss:$8 sps:$4 sm:$0xff]  }
  0x25   : > { %491 = vmatpush1.bf16.msra.mxu0 %v5391_v16  ;;  %v5475_v16 = vld [vmem:[%s8155_s3 + $0xe0] ss:$8 sps:$4 sm:$0xff]   ;;  %v5513_v39 = vld [vmem:[%s8155_s3 + $0x84] ss:$8 sps:$4 sm:$0xff]   ;;  %v5519_v43 = vld [vmem:[%s8155_s3 + $0x374] ss:$8 sps:$4 sm:$0xff]  }
  0x26   : > { %492 = vmatprep.subr.bf16.mxu0 %v5392_v17  ;;  %1307 = vmatpush1.bf16.msra.mxu1 %v5450_v1  ;;  %v5474_v17 = vld [vmem:[%s8155_s3 + $0x110] ss:$8 sps:$4 sm:$0xff]   ;;  %v5514_v44 = vld [vmem:[%s8155_s3 + $0x1a4] ss:$8 sps:$4 sm:$0xff]   ;;  %vm866_vm7 = vsmask.f32 4352  ;;  %vm6467_vm10 = vmand %vm852_vm0, %vm853_vm1 }
  0x27   : > { %1308 = vmatprep.subr.bf16.mxu1 %v5454_v2  ;;  %vm962_vm8 = vsmask.f32 3328  ;;  %vm963_vm9 = vsmask.f32 7440  ;;  %vm6473_vm11 = vmand %vm855_vm2, %vm856_vm3  ;;  %vm1672_vm1 = vcmask 1042432   ;;  %vm1673_vm2 = vcmask 1046532  }
  0x28   : > { %vm6480_vm12 = vmand %vm862_vm4, %vm863_vm5 }
  0x29   : > { %493 = vmatpush1.bf16.msra.mxu0 %v5394_v18  ;;  %v5483_v18 = vld [vmem:[%s8155_s3 + $0xd4] ss:$8 sps:$4 sm:$0xff]   ;;  %vm867_vm13 = vmand %vm865_vm6, %vm866_vm7 }
  0x2a   : > { %494 = vmatprep.subr.bf16.mxu0 %v5395_v19  ;;  %1309 = vmatpush1.bf16.msra.mxu1 %v5456_v4  ;;  %v5478_v19 = vld [vmem:[%s8155_s3 + $0x104] ss:$8 sps:$4 sm:$0xff]   ;;  %vm6491_vm14 = vmor %vm6473_vm11, %vm6467_vm10 }
  0x2b   : > { %1310 = vmatprep.subr.bf16.mxu1 %v5460_v6  ;;  %vm6498_vm15 = vmor %vm867_vm13, %vm6480_vm12 }
  0x2c   : > { %vm6504_vm0 = vmor %vm962_vm8, %vm963_vm9 }
  0x2d   : > { %495 = vmatpush2.bf16.msra.mxu0 %v5397_v20  ;;  %v5481_v20 = vld [vmem:[%s8155_s3 + $0xd0] ss:$8 sps:$4 sm:$0xff]   ;;  %vm6754_vm3 = vmor %vm1672_vm1, %vm1673_vm2 }
  0x2e   : > { %496 = vmatprep.subr.bf16.mxu0 %v5398_v21  ;;  %1311 = vmatpush1.bf16.msra.mxu1 %v5462_v9  ;;  %v5480_v21 = vld [vmem:[%s8155_s3 + $0x100] ss:$8 sps:$4 sm:$0xff]  }
  0x2f   : > { %1312 = vmatprep.subr.bf16.mxu1 %v5466_v11 }
  0x31   : > { %497 = vmatpush2.bf16.msra.mxu0 %v5400_v22  ;;  %v5489_v22 = vld [vmem:[%s8155_s3 + $0xc4] ss:$8 sps:$4 sm:$0xff]  }
  0x32   : > { %498 = vmatprep.subr.bf16.mxu0 %v5401_v23  ;;  %1313 = vmatpush1.bf16.msra.mxu1 %v5468_v13  ;;  %v5484_v23 = vld [vmem:[%s8155_s3 + $0x1f4] ss:$8 sps:$4 sm:$0xff]  }
  0x33   : > { %1314 = vmatprep.subr.bf16.mxu1 %v5472_v15 }
  0x35   : > { %499 = vmatpush2.bf16.msra.mxu0 %v5403_v24  ;;  %v5487_v24 = vld [vmem:[%s8155_s3 + $0xc0] ss:$8 sps:$4 sm:$0xff]  }
  0x36   : > { %500 = vmatprep.subr.bf16.mxu0 %v5404_v25  ;;  %1315 = vmatpush1.bf16.msra.mxu1 %v5474_v17  ;;  %v5486_v25 = vld [vmem:[%s8155_s3 + $0x1f0] ss:$8 sps:$4 sm:$0xff]  }
  0x37   : > { %1316 = vmatprep.subr.bf16.mxu1 %v5478_v19 }
  0x39   : > { %501 = vmatpush2.bf16.msra.mxu0 %v5406_v26  ;;  %v5495_v26 = vld [vmem:[%s8155_s3 + $0xb4] ss:$8 sps:$4 sm:$0xff]  }
  0x3a   : > { %502 = vmatprep.subr.bf16.mxu0 %v5407_v27  ;;  %1317 = vmatpush1.bf16.msra.mxu1 %v5480_v21  ;;  %v6012_v27 = vmov 0  }
  0x3b   : > { %1318 = vmatprep.subr.bf16.mxu1 %v5484_v23  ;;  %722 = vst [vmem:[#allocation2 + $0x18] sm:$0x11] %v6012_v27  ;;  %719 = vst [vmem:[#allocation2] sm:$0xff] %v6012_v27 }
  0x3c   : > { %720 = vst [vmem:[#allocation2 + $0x38] sm:$0x11] %v6012_v27  ;;  %724 = vst [vmem:[#allocation2 + $0x68] sm:$0x11] %v6012_v27 }
  0x3d   : > { %503 = vmatpush2.bf16.msra.mxu0 %v5409_v28  ;;  %726 = vst [vmem:[#allocation2 + $0x80] sm:$0x11] %v6012_v27  ;;  %728 = vst [vmem:[#allocation2 + $0x88] sm:$0x11] %v6012_v27  ;;  %v5490_v28 = vld [vmem:[%s8155_s3 + $0x1e4] ss:$8 sps:$4 sm:$0xff]  }
  0x3e   : > { %504 = vmatprep.subr.bf16.mxu0 %v5410_v29  ;;  %1319 = vmatpush2.bf16.msra.mxu1 %v5486_v25  ;;  %730 = vst [vmem:[#allocation2 + $0x40] sm:$0x11] %v6012_v27  ;;  %732 = vst [vmem:[#allocation2 + $0x10] sm:$0x11] %v6012_v27  ;;  %v5493_v29 = vld [vmem:[%s8155_s3 + $0xb0] ss:$8 sps:$4 sm:$0xff]  }
  0x3f   : > { %734 = vst [vmem:[#allocation2 + $0x60] sm:$0x11] %v6012_v27  ;;  %736 = vst [vmem:[#allocation2 + $0x48] sm:$0x11] %v6012_v27  ;;  %1320 = vmatprep.subr.bf16.mxu1 %v5490_v28 }
  0x40   : > { %737 = vst [vmem:[#allocation2 + $0x70] sm:$0xff] %v6012_v27  ;;  %738 = vst [vmem:[#allocation2 + $0x90] sm:$0x11] %v6012_v27 }
  0x41   : > { %505 = vmatpush2.bf16.msra.mxu0 %v5412_v30  ;;  %v5492_v30 = vld [vmem:[%s8155_s3 + $0x1e0] ss:$8 sps:$4 sm:$0xff]  }
  0x42   : > { %506 = vmatprep.subr.bf16.mxu0 %v5413_v31  ;;  %1321 = vmatpush2.bf16.msra.mxu1 %v5492_v30  ;;  %v5501_v31 = vld [vmem:[%s8155_s3 + $0xa4] ss:$8 sps:$4 sm:$0xff]  }
  0x45   : > { %507 = vmatpush2.bf16.msra.mxu0 %v5415_v32  ;;  %v5496_v32 = vld [vmem:[%s8155_s3 + $0x1d4] ss:$8 sps:$4 sm:$0xff]  }
  0x46   : > { %508 = vmatprep.subr.bf16.mxu0 %v5416_v33  ;;  %v5499_v33 = vld [vmem:[%s8155_s3 + $0xa0] ss:$8 sps:$4 sm:$0xff]   ;;  %1322 = vmatprep.subr.bf16.mxu1 %v5496_v32 }
  0x49   : > { %509 = vmatpush2.bf16.msra.mxu0 %v5418_v34  ;;  %v5498_v34 = vld [vmem:[%s8155_s3 + $0x1d0] ss:$8 sps:$4 sm:$0xff]  }
  0x4a   : > { %1575 = vmatprep.subr.bf16.mxu0 %v5429_v48  ;;  %1323 = vmatpush2.bf16.msra.mxu1 %v5498_v34  ;;  %v5526_v48 = vld [vmem:[%s8155_s3 + $0x184] ss:$8 sps:$4 sm:$0xff]  }
  0x4b   : > { %1324 = vmatprep.subr.bf16.mxu1 %v5502_v35 }
  0x4c   : > { %511 = vmatmul.mubr.bf16.vlgmr.msra.gmra.mxu0 %v4646_v37  ;;  %v5505_v37 = vld [vmem:[%s8155_s3 + $0x90] ss:$8 sps:$4 sm:$0xff]  }
  0x4d   : > { %520 = vmatprep.mubr.bf16.mxu0 %v4649_v38  ;;  %1576 = vmatpush1.bf16.msra.mxu0 %v5427_v49  ;;  %v5507_v38 = vld [vmem:[%s8155_s3 + $0x94] ss:$8 sps:$4 sm:$0xff]   ;;  %v5528_v49 = vld [vmem:[%s8155_s3 + $0x180] ss:$8 sps:$4 sm:$0xff]  }
  0x4e   : > { %1577 = vmatprep.subr.bf16.mxu0 %v5432_v50  ;;  %1325 = vmatpush2.bf16.msra.mxu1 %v5504_v36  ;;  %v5534_v50 = vld [vmem:[%s8155_s3 + $0x274] ss:$8 sps:$4 sm:$0xff]  }
  0x4f   : > { %1326 = vmatprep.subr.bf16.mxu1 %v5508_v40 }
  0x51   : > { %1578 = vmatpush1.bf16.msra.mxu0 %v5430_v51  ;;  %v268_v51 = vlaneseq }
  0x52   : > { %1579 = vmatprep.subr.bf16.mxu0 %v5435_v52 }
  0x53   : > { %v6375_v52 = vshrl.u32 %v268_v51, 7 }
  0x54   : > { %521 = vmatmul.mubr.bf16.gmra.mxu0 %v4648_v41  ;;  %v5510_v41 = vld [vmem:[%s8155_s3 + $0x1b0] ss:$8 sps:$4 sm:$0xff]  }
  0x55   : > { %530 = vmatprep.mubr.bf16.mxu0 %v4651_v42  ;;  %1580 = vmatpush1.bf16.msra.mxu0 %v5433_v53  ;;  %v5511_v42 = vld [vmem:[%s8155_s3 + $0x80] ss:$8 sps:$4 sm:$0xff]   ;;  %v8159_v53 = vsub.s32 0, %v6375_v52  ;;  %v8158_v55 = vsub.s32 1, %v6375_v52 }
  0x56   : > { %1581 = vmatprep.subr.bf16.mxu0 %v5441_v54  ;;  %1327 = vmatpush2.bf16.msra.mxu1 %v5510_v41  ;;  %v266_v54 = vld [vmem:[%s8154_s2] sm:$0x3] }
  0x57   : > { %1328 = vmatprep.subr.bf16.mxu1 %v5514_v44  ;;  %v6388_v57 = vrot.slane %v266_v54, %v8158_v55 }
  0x59   : > { %1582 = vmatpush1.bf16.msra.mxu0 %v5439_v56  ;;  %v6384_v56 = vrot.slane %v266_v54, %v8159_v53 }
  0x5a   : > { %1583 = vmatprep.subr.bf16.mxu0 %v5447_v59 }
  0x5c   : > { %531 = vmatmul.mubr.bf16.gmra.mxu0 %v4650_v45  ;;  %v5516_v45 = vld [vmem:[%s8155_s3 + $0x1a0] ss:$8 sps:$4 sm:$0xff]  }
  0x5d   : > { %540 = vmatprep.mubr.bf16.mxu0 %v4653_v46  ;;  %1584 = vmatpush1.bf16.msra.mxu0 %v5445_v61  ;;  %v5520_v46 = vld [vmem:[%s8155_s3 + $0x194] ss:$8 sps:$4 sm:$0xff]  }
  0x5e   : > { %1585 = vmatprep.subr.bf16.mxu0 %v5453_v62  ;;  %1329 = vmatpush2.bf16.msra.mxu1 %v5516_v45 }
  0x5f   : > { %1330 = vmatprep.subr.bf16.mxu1 %v5520_v46 }
  0x61   : > { %1586 = vmatpush1.bf16.msra.mxu0 %v5451_v0 }
  0x62   : > { %1587 = vmatprep.subr.bf16.mxu0 %v5459_v3 }
  0x64   : > { %541 = vmatmul.mubr.bf16.gmra.mxu0 %v4652_v47  ;;  %v5522_v47 = vld [vmem:[%s8155_s3 + $0x190] ss:$8 sps:$4 sm:$0xff]  }
  0x65   : > { %1588 = vmatpush1.bf16.msra.mxu0 %v5457_v5  ;;  %1331 = vmatpush2.bf16.msra.mxu1 %v5522_v47 }
  0x66   : > { %1589 = vmatprep.subr.bf16.mxu0 %v5465_v7  ;;  %1332 = vmatprep.subr.bf16.mxu1 %v5526_v48 }
  0x69   : > { %1590 = vmatpush1.bf16.msra.mxu0 %v5463_v8  ;;  %1333 = vmatpush2.bf16.msra.mxu1 %v5528_v49 }
  0x6a   : > { %1591 = vmatprep.subr.bf16.mxu0 %v5471_v10  ;;  %1932 = vmatprep.subr.bf16.mxu1 %v5534_v50 }
  0x6d   : > { %1592 = vmatpush2.bf16.msra.mxu0 %v5469_v12 }
  0x6e   : > { %1593 = vmatprep.subr.bf16.mxu0 %v5477_v14 }
  0x71   : > { %1594 = vmatpush2.bf16.msra.mxu0 %v5475_v16 }
  0x72   : > { %1595 = vmatprep.subr.bf16.mxu0 %v5483_v18 }
  0x75   : > { %1596 = vmatpush2.bf16.msra.mxu0 %v5481_v20 }
  0x76   : > { %1597 = vmatprep.subr.bf16.mxu0 %v5489_v22 }
  0x79   : > { %1598 = vmatpush2.bf16.msra.mxu0 %v5487_v24 }
  0x7a   : > { %1599 = vmatprep.subr.bf16.mxu0 %v5495_v26 }
  0x7d   : > { %1600 = vmatpush2.bf16.msra.mxu0 %v5493_v29 }
  0x7e   : > { %1601 = vmatprep.subr.bf16.mxu0 %v5501_v31 }
  0x81   : > { %1602 = vmatpush2.bf16.msra.mxu0 %v5499_v33 }
  0x82   : > { %1603 = vmatprep.subr.bf16.mxu0 %v5507_v38 }
  0x85   : > { %1604 = vmatpush2.bf16.msra.mxu0 %v5505_v37 }
  0x86   : > { %1605 = vmatprep.subr.bf16.mxu0 %v5513_v39 }
  0x89   : > { %1606 = vmatpush2.bf16.msra.mxu0 %v5511_v42 }
  0x8a   : > { %2262 = vmatprep.subr.bf16.mxu0 %v5519_v43 }
 0x10c   : > { %v512_v58 = vpop.f32.mrf.mxu0 }
 0x10d   : > { %v6391_v59 = vadd.f32 %v512_v58, %v6384_v56 }
 0x10e   : > { %v514_v60 = vpop.f32.mrf.mxu0 }
 0x10f   : > { %v551_v61 = vmin.f32 %v6391_v59, 20.0  ;;  %v6395_v62 = vadd.f32 %v514_v60, %v6388_v57 }
 0x110   : > { %v516_v63 = vpop.f32.mrf.mxu0 }
 0x111   : > { %v567_v0 = vmul.f32 1.442695, %v551_v61  ;;  %v552_v1 = vmin.f32 %v6395_v62, 20.0  ;;  %v6399_v2 = vadd.f32 %v516_v63, %v6384_v56 }
 0x112   : > { %v518_v3 = vpop.f32.mrf.mxu0 }
 0x113   : > { %5867 = vpow2.f32 %v567_v0  ;;  %v569_v4 = vmul.f32 1.442695, %v552_v1  ;;  %v553_v5 = vmin.f32 %v6399_v2, 20.0  ;;  %v6403_v6 = vadd.f32 %v518_v3, %v6388_v57 }
 0x114   : > { %v522_v7 = vpop.f32.mrf.mxu0 }
 0x115   : > { %5869 = vpow2.f32 %v569_v4  ;;  %v571_v8 = vmul.f32 1.442695, %v553_v5  ;;  %v554_v9 = vmin.f32 %v6403_v6, 20.0  ;;  %v6407_v10 = vadd.f32 %v522_v7, %v6384_v56 }
 0x116   : > { %v524_v11 = vpop.f32.mrf.mxu0 }
 0x117   : > { %5871 = vpow2.f32 %v571_v8  ;;  %v573_v12 = vmul.f32 1.442695, %v554_v9  ;;  %v555_v13 = vmin.f32 %v6407_v10, 20.0  ;;  %v6411_v14 = vadd.f32 %v524_v11, %v6388_v57 }
 0x118   : > { %v526_v15 = vpop.f32.mrf.mxu0 }
 0x119   : > { %5873 = vpow2.f32 %v573_v12  ;;  %v575_v16 = vmul.f32 1.442695, %v555_v13  ;;  %v556_v17 = vmin.f32 %v6411_v14, 20.0  ;;  %v6415_v18 = vadd.f32 %v526_v15, %v6384_v56 }
 0x11a   : > { %v528_v19 = vpop.f32.mrf.mxu0 }
 0x11b   : > { %5875 = vpow2.f32 %v575_v16  ;;  %v577_v20 = vmul.f32 1.442695, %v556_v17  ;;  %v557_v21 = vmin.f32 %v6415_v18, 20.0  ;;  %v6419_v22 = vadd.f32 %v528_v19, %v6388_v57 }
 0x11c   : > { %v532_v23 = vpop.f32.mrf.mxu0 }
 0x11d   : > { %5877 = vpow2.f32 %v577_v20  ;;  %v579_v24 = vmul.f32 1.442695, %v557_v21  ;;  %v558_v25 = vmin.f32 %v6419_v22, 20.0  ;;  %v6423_v26 = vadd.f32 %v532_v23, %v6384_v56 }
 0x11e   : > { %v534_v28 = vpop.f32.mrf.mxu0 }
 0x11f   : > { %5879 = vpow2.f32 %v579_v24  ;;  %v581_v29 = vmul.f32 1.442695, %v558_v25  ;;  %v559_v30 = vmin.f32 %v6423_v26, 20.0  ;;  %v6427_v31 = vadd.f32 %v534_v28, %v6388_v57 }
 0x120   : > { %v5868_v32 = vpop.eup %5867  ;;  %v536_v33 = vpop.f32.mrf.mxu0 }
 0x121   : > { %v599_v34 = vadd.f32 2.0, %v5868_v32  ;;  %5881 = vpow2.f32 %v581_v29  ;;  %v583_v35 = vmul.f32 1.442695, %v559_v30  ;;  %v560_v36 = vmin.f32 %v6427_v31, 20.0 }
 0x122   : > { %v5870_v37 = vpop.eup %5869  ;;  %v6431_v38 = vadd.f32 %v536_v33, %v6384_v56  ;;  %v538_v39 = vpop.f32.mrf.mxu0 }
 0x123   : > { %v615_v40 = vmul.f32 %v5868_v32, %v599_v34  ;;  %v600_v41 = vadd.f32 2.0, %v5870_v37  ;;  %5883 = vpow2.f32 %v583_v35  ;;  %v585_v42 = vmul.f32 1.442695, %v560_v36 }
 0x124   : > { %v5872_v43 = vpop.eup %5871  ;;  %v561_v44 = vmin.f32 %v6431_v38, 20.0  ;;  %v6435_v45 = vadd.f32 %v538_v39, %v6388_v57  ;;  %v542_v46 = vpop.f32.mrf.mxu0 }
 0x125   : > { %v631_v47 = vadd.f32 2.0, %v615_v40  ;;  %v616_v48 = vmul.f32 %v5870_v37, %v600_v41  ;;  %v601_v49 = vadd.f32 2.0, %v5872_v43  ;;  %5885 = vpow2.f32 %v585_v42 }
 0x126   : > { %v5874_v50 = vpop.eup %5873  ;;  %v587_v51 = vmul.f32 1.442695, %v561_v44  ;;  %v562_v54 = vmin.f32 %v6435_v45, 20.0  ;;  %v6439_v58 = vadd.f32 %v542_v46, %v6384_v56  ;;  %v544_v60 = vpop.f32.mrf.mxu0  ;;  %v968_v41 = vrot.slane %v6012_v27, 4 }
 0x127   : > { %5887 = vrcp.f32 %v631_v47  ;;  %v632_v61 = vadd.f32 2.0, %v616_v48  ;;  %v617_v63 = vmul.f32 %v5872_v43, %v601_v49  ;;  %v602_v0 = vadd.f32 2.0, %v5874_v50 }
 0x128   : > { %v5876_v1 = vpop.eup %5875  ;;  %5889 = vpow2.f32 %v587_v51  ;;  %v589_v3 = vmul.f32 1.442695, %v562_v54  ;;  %v563_v4 = vmin.f32 %v6439_v58, 20.0  ;;  %v6443_v5 = vadd.f32 %v544_v60, %v6388_v57  ;;  %v546_v7 = vpop.f32.mrf.mxu0 }
 0x129   : > { %5891 = vrcp.f32 %v632_v61  ;;  %v633_v8 = vadd.f32 2.0, %v617_v63  ;;  %v618_v9 = vmul.f32 %v5874_v50, %v602_v0  ;;  %v603_v11 = vadd.f32 2.0, %v5876_v1  ;;  %v6456_v50 = vld [vmem:[#allocation2 + $0x38] sm:$0x11] }
 0x12a   : > { %v5878_v12 = vpop.eup %5877  ;;  %5893 = vpow2.f32 %v589_v3  ;;  %v591_v13 = vmul.f32 1.442695, %v563_v4  ;;  %v564_v15 = vmin.f32 %v6443_v5, 20.0  ;;  %v6447_v16 = vadd.f32 %v546_v7, %v6384_v56  ;;  %v548_v17 = vpop.f32.mrf.mxu0 }
 0x12b   : > { %5895 = vrcp.f32 %v633_v8  ;;  %v634_v19 = vadd.f32 2.0, %v618_v9  ;;  %v619_v20 = vmul.f32 %v5876_v1, %v603_v11  ;;  %v604_v21 = vadd.f32 2.0, %v5878_v12 }
 0x12c   : > { %v5880_v23 = vpop.eup %5879  ;;  %5897 = vpow2.f32 %v591_v13  ;;  %v593_v24 = vmul.f32 1.442695, %v564_v15  ;;  %v565_v25 = vmin.f32 %v6447_v16, 20.0  ;;  %v6451_v28 = vadd.f32 %v548_v17, %v6388_v57 }
 0x12d   : > { %5899 = vrcp.f32 %v634_v19  ;;  %v635_v29 = vadd.f32 2.0, %v619_v20  ;;  %v620_v30 = vmul.f32 %v5878_v12, %v604_v21  ;;  %v605_v32 = vadd.f32 2.0, %v5880_v23 }
 0x12e   : > { %v5882_v33 = vpop.eup %5881  ;;  %5901 = vpow2.f32 %v593_v24  ;;  %v595_v56 = vmul.f32 1.442695, %v565_v25  ;;  %v566_v34 = vmin.f32 %v6451_v28, 20.0  ;;  %v971_v57 = vrot.slane %v6012_v27, 5 }
 0x12f   : > { %5903 = vrcp.f32 %v635_v29  ;;  %v636_v35 = vadd.f32 2.0, %v620_v30  ;;  %v621_v36 = vmul.f32 %v5880_v23, %v605_v32  ;;  %v606_v37 = vadd.f32 2.0, %v5882_v33 }
 0x130   : > { %v5884_v39 = vpop.eup %5883  ;;  %5905 = vpow2.f32 %v595_v56  ;;  %v597_v40 = vmul.f32 1.442695, %v566_v34  ;;  %v972_v54 = vor.u32 %v971_v57, %v968_v41  ;;  %v975_v4 = vshll.u32 %v6456_v50, 16 }
 0x131   : > { %5907 = vrcp.f32 %v636_v35  ;;  %v637_v42 = vadd.f32 2.0, %v621_v36  ;;  %v622_v43 = vmul.f32 %v5882_v33, %v606_v37  ;;  %v607_v44 = vadd.f32 2.0, %v5884_v39 }
 0x132   : > { %v5886_v46 = vpop.eup %5885  ;;  %5909 = vpow2.f32 %v597_v40  ;;  %v6459_v21 = vrot.slane %v972_v54, 4  ;;  %v6461_v30 = vrot.slane %v975_v4, 5 }
 0x133   : > { %5911 = vrcp.f32 %v637_v42  ;;  %v638_v47 = vadd.f32 2.0, %v622_v43  ;;  %v623_v48 = vmul.f32 %v5884_v39, %v607_v44  ;;  %v608_v49 = vadd.f32 2.0, %v5886_v46 }
 0x134   : > { %v5888_v51 = vpop.eup %5887 }
 0x135   : > { %v5890_v60 = vpop.eup %5889  ;;  %v663_v61 = vmul.f32 2.0, %v5888_v51  ;;  %5913 = vrcp.f32 %v638_v47  ;;  %v639_v63 = vadd.f32 2.0, %v623_v48  ;;  %v624_v0 = vmul.f32 %v5886_v46, %v608_v49 }
 0x136   : > { %v5892_v1 = vpop.eup %5891  ;;  %v609_v3 = vadd.f32 2.0, %v5890_v60 }
 0x137   : > { %v5894_v7 = vpop.eup %5893  ;;  %v679_v8 = vsub.f32 1.0, %v663_v61  ;;  %v664_v9 = vmul.f32 2.0, %v5892_v1  ;;  %5915 = vrcp.f32 %v639_v63  ;;  %v640_v11 = vadd.f32 2.0, %v624_v0 }
 0x138   : > { %v5896_v12 = vpop.eup %5895  ;;  %v625_v13 = vmul.f32 %v5890_v60, %v609_v3  ;;  %v610_v15 = vadd.f32 2.0, %v5894_v7 }
 0x139   : > { %v5898_v17 = vpop.eup %5897  ;;  %v680_v19 = vsub.f32 1.0, %v664_v9  ;;  %v665_v20 = vmul.f32 2.0, %v5896_v12  ;;  %5917 = vrcp.f32 %v640_v11  ;;  %v695_v33 = vmul.f32 %v679_v8, %v6391_v59 }
 0x13a   : > { %v5900_v23 = vpop.eup %5899  ;;  %v641_v24 = vadd.f32 2.0, %v625_v13  ;;  %v626_v25 = vmul.f32 %v5894_v7, %v610_v15  ;;  %v611_v29 = vadd.f32 2.0, %v5898_v17  ;;  %v869_v15 = vld [vmem:[#allocation2 + $0x18] sm:$0x11]  ;;  %v6520_v59 = vsel %vm6504_vm0, %v6459_v21, %v6461_v30  ;;  %v5552_v13 = vld [vmem:[%s8155_s3 + $0x244] ss:$8 sps:$4 sm:$0xff]  }
 0x13b   : > { %v5902_v32 = vpop.eup %5901  ;;  %v696_v56 = vmul.f32 %v680_v19, %v6395_v62  ;;  %v681_v34 = vsub.f32 1.0, %v665_v20  ;;  %v666_v35 = vmul.f32 2.0, %v5900_v23 }
 0x13c   : > { %v5904_v36 = vpop.eup %5903  ;;  %5919 = vrcp.f32 %v641_v24  ;;  %v642_v39 = vadd.f32 2.0, %v626_v25  ;;  %v627_v40 = vmul.f32 %v5898_v17, %v611_v29  ;;  %v612_v41 = vadd.f32 2.0, %v5902_v32 }
 0x13d   : > { %v5906_v57 = vpop.eup %5905  ;;  %v5346_v42 = vpack.c.bf16 %v696_v56, %v695_v33  ;;  %v697_v62 = vmul.f32 %v681_v34, %v6399_v2  ;;  %v682_v43 = vsub.f32 1.0, %v666_v35  ;;  %v667_v44 = vmul.f32 2.0, %v5904_v36 }
 0x13e   : > { %v5908_v46 = vpop.eup %5907  ;;  %5921 = vrcp.f32 %v642_v39  ;;  %v643_v48 = vadd.f32 2.0, %v627_v40  ;;  %v628_v49 = vmul.f32 %v5902_v32, %v612_v41  ;;  %v613_v51 = vadd.f32 2.0, %v5906_v57  ;;  %v875_v41 = vld [vmem:[#allocation2 + $0x68] sm:$0x11] }
 0x13f   : > { %v5910_v54 = vpop.eup %5909  ;;  %v772_v60 = vshrl.u32 %v5346_v42, 16  ;;  %v775_v61 = vshll.u32 %v5346_v42, 16  ;;  %v698_v2 = vmul.f32 %v682_v43, %v6403_v6  ;;  %v683_v63 = vsub.f32 1.0, %v667_v44 }
 0x140   : > { %v5912_v0 = vpop.eup %5911  ;;  %v668_v1 = vmul.f32 2.0, %v5908_v46  ;;  %5923 = vrcp.f32 %v643_v48  ;;  %v644_v3 = vadd.f32 2.0, %v628_v49  ;;  %v629_v4 = vmul.f32 %v5906_v57, %v613_v51 }
 0x141   : > { %v774_v7 = vrot.slane %v772_v60, 7  ;;  %v5347_v9 = vpack.c.bf16 %v698_v2, %v697_v62  ;;  %v699_v11 = vmul.f32 %v683_v63, %v6407_v10  ;;  %v669_v12 = vmul.f32 2.0, %v5912_v0 }
 0x142   : > { %v5914_v6 = vpop.eup %5913  ;;  %v684_v17 = vsub.f32 1.0, %v668_v1  ;;  %5925 = vrcp.f32 %v644_v3  ;;  %v645_v19 = vadd.f32 2.0, %v629_v4  ;;  %v614_v20 = vadd.f32 2.0, %v5910_v54 }
 0x143   : > { %v777_v23 = vor.u32 %v775_v61, %v774_v7  ;;  %v778_v24 = vrot.slane %v774_v7, 4  ;;  %v780_v25 = vshrl.u32 %v5347_v9, 16  ;;  %v783_v29 = vshll.u32 %v5347_v9, 16  ;;  %v5517_v7 = vld [vmem:[%s8155_s3 + $0x370] ss:$8 sps:$4 sm:$0xff]  }
 0x144   : > { %v5916_v32 = vpop.eup %5915  ;;  %v700_v33 = vmul.f32 %v684_v17, %v6411_v14  ;;  %v685_v56 = vsub.f32 1.0, %v669_v12  ;;  %v670_v34 = vmul.f32 2.0, %v5914_v6  ;;  %5927 = vrcp.f32 %v645_v19 }
 0x145   : > { %v6511_v35 = vsel %vm6491_vm14, %v777_v23, 0  ;;  %v870_v36 = vsel %vm6498_vm15, %v778_v24, %v869_v15  ;;  %v782_v37 = vrot.slane %v780_v25, 7  ;;  %v671_v39 = vmul.f32 2.0, %v5916_v32  ;;  %v5525_v15 = vld [vmem:[%s8155_s3 + $0x364] ss:$8 sps:$4 sm:$0xff]  }
 0x146   : > { %v5918_v40 = vpop.eup %5917  ;;  %861 = vst [vmem:[#allocation2 + $0x50] sm:$0xff] %v6511_v35  ;;  %871 = vst [vmem:[#allocation2 + $0x18] sm:$0x11] %v870_v36  ;;  %v5348_v57 = vpack.c.bf16 %v700_v33, %v699_v11  ;;  %v686_v42 = vsub.f32 1.0, %v670_v34  ;;  %v630_v14 = vmul.f32 %v5910_v54, %v614_v20  ;;  %v701_v48 = vmul.f32 %v685_v56, %v6415_v18 }
 0x147   : > { %v785_v62 = vor.u32 %v783_v29, %v782_v37  ;;  %v786_v43 = vrot.slane %v782_v37, 4  ;;  %v687_v44 = vsub.f32 1.0, %v671_v39  ;;  %v672_v46 = vmul.f32 2.0, %v5918_v40  ;;  %v887_v29 = vld [vmem:[#allocation2 + $0x88] sm:$0x11] }
 0x148   : > { %v788_v47 = vshrl.u32 %v5348_v57, 16  ;;  %v702_v49 = vmul.f32 %v686_v42, %v6419_v22  ;;  %v646_v51 = vadd.f32 2.0, %v630_v14  ;;  %v791_v21 = vshll.u32 %v5348_v57, 16  ;;  %v881_v22 = vld [vmem:[#allocation2 + $0x80] sm:$0x11] }
 0x149   : > { %v5920_v60 = vpop.eup %5919  ;;  %v6526_v54 = vsel %vm6491_vm14, %v785_v62, 0  ;;  %v876_v61 = vsel %vm6498_vm15, %v786_v43, %v875_v41  ;;  %v688_v30 = vsub.f32 1.0, %v672_v46  ;;  %v703_v1 = vmul.f32 %v687_v44, %v6423_v26  ;;  %v5523_v37 = vld [vmem:[%s8155_s3 + $0x360] ss:$8 sps:$4 sm:$0xff]   ;;  %v5531_v14 = vld [vmem:[%s8155_s3 + $0x354] ss:$8 sps:$4 sm:$0xff]  }
 0x14a   : > { %874 = vst [vmem:[#allocation2 + $0x30] sm:$0xff] %v6526_v54  ;;  %877 = vst [vmem:[#allocation2 + $0x68] sm:$0x11] %v876_v61  ;;  %v790_v2 = vrot.slane %v788_v47, 7  ;;  %v5349_v63 = vpack.c.bf16 %v702_v49, %v701_v48  ;;  %v673_v0 = vmul.f32 2.0, %v5920_v60  ;;  %5929 = vrcp.f32 %v646_v51 }
 0x14b   : > { %v5922_v18 = vpop.eup %5921  ;;  %v704_v3 = vmul.f32 %v688_v30, %v6427_v31  ;;  %v4767_v4 = vcombine.high %v6012_v27, %v6511_v35  ;;  %v4766_v9 = vcombine.low %v6012_v27, %v6511_v35  ;;  %v994_v26 = vshrl.u32 %v6526_v54, 16  ;;  %v893_v51 = vld [vmem:[#allocation2 + $0x40] sm:$0x11] }
 0x14c   : > { %v793_v11 = vor.u32 %v791_v21, %v790_v2  ;;  %v794_v12 = vrot.slane %v790_v2, 4  ;;  %v796_v6 = vshrl.u32 %v5349_v63, 16  ;;  %v799_v17 = vshll.u32 %v5349_v63, 16  ;;  %v5529_v2 = vld [vmem:[%s8155_s3 + $0x350] ss:$8 sps:$4 sm:$0xff]  }
 0x14d   : > { %v5924_v31 = vpop.eup %5923  ;;  %v5350_v19 = vpack.c.bf16 %v704_v3, %v703_v1  ;;  %v689_v20 = vsub.f32 1.0, %v673_v0  ;;  %v674_v23 = vmul.f32 2.0, %v5922_v18  ;;  %1607 = vmatprep.mubr.bf16.mxu0 %v4767_v4  ;;  %v997_v39 = vshll.u32 %v6526_v54, 16  ;;  %v5537_v1 = vld [vmem:[%s8155_s3 + $0x344] ss:$8 sps:$4 sm:$0xff]  }
 0x14e   : > { %v6546_v24 = vsel %vm6491_vm14, %v793_v11, 0  ;;  %v882_v27 = vsel %vm6498_vm15, %v794_v12, %v881_v22  ;;  %v798_v25 = vrot.slane %v796_v6, 7  ;;  %v675_v32 = vmul.f32 2.0, %v5924_v31  ;;  %1608 = vmatmul.mubr.bf16.vlgmr.msra.gmra.mxu0 %v4766_v9  ;;  %v899_v9 = vld [vmem:[#allocation2 + $0x10] sm:$0x11] }
 0x14f   : > { %v5926_v33 = vpop.eup %5925  ;;  %880 = vst [vmem:[#allocation2 + $0x78] sm:$0xff] %v6546_v24  ;;  %883 = vst [vmem:[#allocation2 + $0x80] sm:$0x11] %v882_v27  ;;  %v804_v56 = vshrl.u32 %v5350_v19, 16  ;;  %v807_v34 = vshll.u32 %v5350_v19, 16  ;;  %v690_v36 = vsub.f32 1.0, %v674_v23  ;;  %2263 = vmatpush1.bf16.msra.mxu0 %v5517_v7  ;;  %v705_v44 = vmul.f32 %v689_v20, %v6431_v38 }
 0x150   : > { %v801_v40 = vor.u32 %v799_v17, %v798_v25  ;;  %v802_v41 = vrot.slane %v798_v25, 4  ;;  %v691_v57 = vsub.f32 1.0, %v675_v32  ;;  %v676_v42 = vmul.f32 2.0, %v5926_v33  ;;  %2264 = vmatprep.subr.bf16.mxu0 %v5525_v15  ;;  %v5535_v23 = vld [vmem:[%s8155_s3 + $0x340] ss:$8 sps:$4 sm:$0xff]  }
 0x151   : > { %v5928_v62 = vpop.eup %5927  ;;  %v806_v43 = vrot.slane %v804_v56, 7  ;;  %v706_v46 = vmul.f32 %v690_v36, %v6435_v45  ;;  %v1008_v47 = vshrl.u32 %v6546_v24, 16  ;;  %v4769_v0 = vcombine.high %v6526_v54, %v6546_v24  ;;  %v5543_v33 = vld [vmem:[%s8155_s3 + $0x334] ss:$8 sps:$4 sm:$0xff]  }
 0x152   : > { %v6563_v48 = vsel %vm6491_vm14, %v801_v40, 0  ;;  %v888_v49 = vsel %vm6498_vm15, %v802_v41, %v887_v29  ;;  %v707_v60 = vmul.f32 %v691_v57, %v6439_v58  ;;  %v692_v61 = vsub.f32 1.0, %v676_v42  ;;  %v6575_v58 = vld [vmem:[#allocation2 + $0x18] sm:$0x11] }
 0x153   : > { %886 = vst [vmem:[#allocation2 + $0x8] sm:$0xff] %v6563_v48  ;;  %889 = vst [vmem:[#allocation2 + $0x88] sm:$0x11] %v888_v49  ;;  %v809_v21 = vor.u32 %v807_v34, %v806_v43  ;;  %v810_v38 = vrot.slane %v806_v43, 4  ;;  %v5351_v30 = vpack.c.bf16 %v706_v46, %v705_v44  ;;  %v677_v45 = vmul.f32 2.0, %v5928_v62  ;;  %2265 = vmatpush1.bf16.msra.mxu0 %v5523_v37 }
 0x154   : > { %v708_v63 = vmul.f32 %v692_v61, %v6443_v5  ;;  %2266 = vmatprep.subr.bf16.mxu0 %v5531_v14  ;;  %v980_v18 = vshrl.u32 %v6511_v35, 16  ;;  %v983_v22 = vshll.u32 %v6511_v35, 16  ;;  %v1011_v7 = vshll.u32 %v6546_v24, 16  ;;  %1617 = vmatprep.mubr.bf16.mxu0 %v4769_v0  ;;  %v905_v62 = vld [vmem:[#allocation2 + $0x60] sm:$0x11] }
 0x155   : > { %v6584_v3 = vsel %vm6491_vm14, %v809_v21, 0  ;;  %v894_v5 = vsel %vm6498_vm15, %v810_v38, %v893_v51  ;;  %v812_v4 = vshrl.u32 %v5351_v30, 16  ;;  %v693_v35 = vsub.f32 1.0, %v677_v45  ;;  %v5541_v46 = vld [vmem:[%s8155_s3 + $0x330] ss:$8 sps:$4 sm:$0xff]  }
 0x156   : > { %892 = vst [vmem:[#allocation2 + $0x28] sm:$0xff] %v6584_v3  ;;  %895 = vst [vmem:[#allocation2 + $0x40] sm:$0x11] %v894_v5  ;;  %v5352_v11 = vpack.c.bf16 %v708_v63, %v707_v60  ;;  %v982_v12 = vrot.slane %v980_v18, 4  ;;  %v985_v6 = vrot.slane %v983_v22, 5  ;;  %v815_v17 = vshll.u32 %v5351_v30, 16 }
 0x157   : > { %v5930_v15 = vpop.eup %5929  ;;  %v814_v31 = vrot.slane %v812_v4, 7  ;;  %v989_v19 = vshll.u32 %v6575_v58, 16  ;;  %v4768_v20 = vcombine.low %v6526_v54, %v6546_v24  ;;  %2267 = vmatpush1.bf16.msra.mxu0 %v5529_v2  ;;  %v709_v29 = vmul.f32 %v693_v35, %v6447_v16  ;;  %v6615_v21 = vld [vmem:[#allocation2 + $0x68] sm:$0x11]  ;;  %v6624_v2 = vld [vmem:[#allocation2 + $0x80] sm:$0x11] }
 0x158   : > { %v820_v27 = vshrl.u32 %v5352_v11, 16  ;;  %v823_v25 = vshll.u32 %v5352_v11, 16  ;;  %v678_v32 = vmul.f32 2.0, %v5930_v15  ;;  %2268 = vmatprep.subr.bf16.mxu0 %v5537_v1  ;;  %v986_v36 = vor.u32 %v985_v6, %v982_v12  ;;  %v5549_v38 = vld [vmem:[%s8155_s3 + $0x324] ss:$8 sps:$4 sm:$0xff]  }
 0x159   : > { %v817_v56 = vor.u32 %v815_v17, %v814_v31  ;;  %v818_v34 = vrot.slane %v814_v31, 4  ;;  %v991_v37 = vrot.slane %v989_v19, 5  ;;  %1618 = vmatmul.mubr.bf16.gmra.mxu0 %v4768_v20  ;;  %v1022_v57 = vshrl.u32 %v6563_v48, 16  ;;  %v5532_v54 = vld [vmem:[%s8155_s3 + $0x270] ss:$8 sps:$4 sm:$0xff]  }
 0x15a   : > { %v822_v40 = vrot.slane %v820_v27, 7  ;;  %v694_v41 = vsub.f32 1.0, %v678_v32  ;;  %v1025_v42 = vshll.u32 %v6563_v48, 16  ;;  %v987_v43 = vrot.slane %v986_v36, 4  ;;  %v5547_v6 = vld [vmem:[%s8155_s3 + $0x320] ss:$8 sps:$4 sm:$0xff]  }
 0x15b   : > { %v6604_v16 = vsel %vm6491_vm14, %v817_v56, 0  ;;  %v900_v14 = vsel %vm6498_vm15, %v818_v34, %v899_v9  ;;  %2269 = vmatpush1.bf16.msra.mxu0 %v5535_v23  ;;  %v1036_v44 = vshrl.u32 %v6584_v3, 16  ;;  %v1039_v61 = vshll.u32 %v6584_v3, 16  ;;  %v911_v15 = vld [vmem:[#allocation2 + $0x48] sm:$0x11] }
 0x15c   : > { %898 = vst [vmem:[#allocation2 + $0x58] sm:$0xff] %v6604_v16  ;;  %901 = vst [vmem:[#allocation2 + $0x10] sm:$0x11] %v900_v14  ;;  %v825_v49 = vor.u32 %v823_v25, %v822_v40  ;;  %v826_v51 = vrot.slane %v822_v40, 4  ;;  %v710_v60 = vmul.f32 %v694_v41, %v6451_v28  ;;  %2270 = vmatprep.subr.bf16.mxu0 %v5543_v33  ;;  %v996_v28 = vrot.slane %v994_v26, 4 }
 0x15d   : > { %v992_v30 = vsel %vm6504_vm0, %v987_v43, %v991_v37  ;;  %v4771_v45 = vcombine.high %v6563_v48, %v6584_v3  ;;  %v999_v63 = vrot.slane %v997_v39, 5  ;;  %v5540_v26 = vld [vmem:[%s8155_s3 + $0x264] ss:$8 sps:$4 sm:$0xff]   ;;  %v1003_v4 = vshll.u32 %v6615_v21, 16  ;;  %v5538_v31 = vld [vmem:[%s8155_s3 + $0x260] ss:$8 sps:$4 sm:$0xff]  }
 0x15e   : > { %v6632_v0 = vsel %vm6491_vm14, %v825_v49, 0  ;;  %v906_v18 = vsel %vm6498_vm15, %v826_v51, %v905_v62  ;;  %v5353_v22 = vpack.c.bf16 %v710_v60, %v709_v29  ;;  %v4726_v1 = vcombine.low %v6520_v59, %v992_v30  ;;  %v6664_v29 = vld [vmem:[#allocation2 + $0x88] sm:$0x11]  ;;  %v5546_v33 = vld [vmem:[%s8155_s3 + $0x254] ss:$8 sps:$4 sm:$0xff]  }
 0x15f   : > { %904 = vst [vmem:[#allocation2 + $0x98] sm:$0xff] %v6632_v0  ;;  %907 = vst [vmem:[#allocation2 + $0x60] sm:$0x11] %v906_v18  ;;  %v4727_v5 = vcombine.high %v6520_v59, %v992_v30  ;;  %1627 = vmatprep.mubr.bf16.mxu0 %v4771_v45  ;;  %v1000_v39 = vor.u32 %v999_v63, %v996_v28  ;;  %v1010_v9 = vrot.slane %v1008_v47, 4  ;;  %2271 = vmatpush1.bf16.msra.mxu0 %v5541_v46  ;;  %v6675_v37 = vld [vmem:[#allocation2 + $0x40] sm:$0x11] }
 0x160   : > { %v828_v11 = vshrl.u32 %v5353_v22, 16  ;;  %v831_v35 = vshll.u32 %v5353_v22, 16  ;;  %v1013_v59 = vrot.slane %v1011_v7, 5  ;;  %v1017_v12 = vshll.u32 %v6624_v2, 16  ;;  %2272 = vmatprep.subr.bf16.mxu0 %v5549_v38  ;;  %v5555_v7 = vld [vmem:[%s8155_s3 + $0x314] ss:$8 sps:$4 sm:$0xff]  }
 0x161   : > { %1334 = vmatprep.mubr.bf16.mxu1 %v4727_v5  ;;  %v1001_v47 = vrot.slane %v1000_v39, 4  ;;  %v1005_v17 = vrot.slane %v1003_v4, 5  ;;  %v4770_v19 = vcombine.low %v6563_v48, %v6584_v3  ;;  %v1050_v24 = vshrl.u32 %v6604_v16, 16  ;;  %v5553_v62 = vld [vmem:[%s8155_s3 + $0x310] ss:$8 sps:$4 sm:$0xff]  }
 0x162   : > { %v830_v20 = vrot.slane %v828_v11, 7  ;;  %1335 = vmatmul.mubr.bf16.vlgmr.msra.gmra.mxu1 %v4726_v1  ;;  %v1014_v23 = vor.u32 %v1013_v59, %v1010_v9  ;;  %v1019_v27 = vrot.slane %v1017_v12, 5  ;;  %v1053_v25 = vshll.u32 %v6604_v16, 16  ;;  %v5561_v38 = vld [vmem:[%s8155_s3 + $0x304] ss:$8 sps:$4 sm:$0xff]   ;;  %v6697_v45 = vld [vmem:[#allocation2 + $0x30] sm:$0xff] }
 0x163   : > { %1933 = vmatpush1.bf16.msra.mxu1 %v5532_v54  ;;  %v1006_v32 = vsel %vm6504_vm0, %v1001_v47, %v1005_v17  ;;  %1628 = vmatmul.mubr.bf16.gmra.mxu0 %v4770_v19  ;;  %v1064_v56 = vshrl.u32 %v6632_v0, 16  ;;  %v1067_v34 = vshll.u32 %v6632_v0, 16  ;;  %v4773_v36 = vcombine.high %v6604_v16, %v6632_v0  ;;  %v6705_v28 = vld [vmem:[#allocation2 + $0x10] sm:$0x11]  ;;  %v5559_v4 = vld [vmem:[%s8155_s3 + $0x300] ss:$8 sps:$4 sm:$0xff]  }
 0x164   : > { %v833_v40 = vor.u32 %v831_v35, %v830_v20  ;;  %v834_v41 = vrot.slane %v830_v20, 4  ;;  %1934 = vmatprep.subr.bf16.mxu1 %v5540_v26  ;;  %v1015_v14 = vrot.slane %v1014_v23, 4  ;;  %2273 = vmatpush1.bf16.msra.mxu0 %v5547_v6  ;;  %v1024_v43 = vrot.slane %v1022_v57, 4  ;;  %v6709_v5 = vld [vmem:[#allocation2 + $0x50] sm:$0xff]  ;;  %v5550_v6 = vld [vmem:[%s8155_s3 + $0x240] ss:$8 sps:$4 sm:$0xff]  }
 0x165   : > { %1637 = vmatprep.mubr.bf16.mxu0 %v4773_v36  ;;  %2274 = vmatprep.subr.bf16.mxu0 %v5555_v7  ;;  %v1027_v46 = vrot.slane %v1025_v42, 5  ;;  %v1031_v49 = vshll.u32 %v6664_v29, 16  ;;  %v1038_v51 = vrot.slane %v1036_v44, 4  ;;  %v1041_v60 = vrot.slane %v1039_v61, 5  ;;  %v5544_v44 = vld [vmem:[%s8155_s3 + $0x250] ss:$8 sps:$4 sm:$0xff]  }
 0x166   : > { %v909_v30 = vsel %vm6491_vm14, %v833_v40, 0  ;;  %v912_v57 = vsel %vm6498_vm15, %v834_v41, %v911_v15  ;;  %v1020_v48 = vsel %vm6504_vm0, %v1015_v14, %v1019_v27  ;;  %v1045_v42 = vshll.u32 %v6675_v37, 16  ;;  %v6711_v54 = vld [vmem:[#allocation2 + $0x60] sm:$0x11]  ;;  %v5558_v19 = vld [vmem:[%s8155_s3 + $0x234] ss:$8 sps:$4 sm:$0xff]  }
 0x167   : > { %910 = vst [vmem:[#allocation2 + $0x20] sm:$0xff] %v909_v30  ;;  %913 = vst [vmem:[#allocation2 + $0x48] sm:$0x11] %v912_v57  ;;  %1935 = vmatpush1.bf16.msra.mxu1 %v5538_v31  ;;  %v4729_v3 = vcombine.high %v1006_v32, %v1020_v48  ;;  %v4728_v8 = vcombine.low %v1006_v32, %v1020_v48  ;;  %v1028_v61 = vor.u32 %v1027_v46, %v1024_v43  ;;  %v5565_v23 = vld [vmem:[%s8155_s3 + $0x3f0] ss:$8 sps:$4 sm:$0xff]  }
 0x168   : > { %1936 = vmatprep.subr.bf16.mxu1 %v5546_v33  ;;  %v1033_v63 = vrot.slane %v1031_v49, 5  ;;  %v1042_v18 = vor.u32 %v1041_v60, %v1038_v51  ;;  %v1047_v22 = vrot.slane %v1045_v42, 5  ;;  %v4772_v1 = vcombine.low %v6604_v16, %v6632_v0  ;;  %2275 = vmatpush1.bf16.msra.mxu0 %v5553_v62  ;;  %v5567_v16 = vld [vmem:[%s8155_s3 + $0x3f4] ss:$8 sps:$4 sm:$0xff]   ;;  %v5573_v36 = vld [vmem:[%s8155_s3 + $0x3e4] ss:$8 sps:$4 sm:$0xff]  }
 0x169   : > { %1344 = vmatprep.mubr.bf16.mxu1 %v4729_v3  ;;  %v1029_v26 = vrot.slane %v1028_v61, 4  ;;  %v4919_v39 = vcombine.high %v6709_v5, %v6697_v45  ;;  %2276 = vmatprep.subr.bf16.mxu0 %v5561_v38  ;;  %v1052_v9 = vrot.slane %v1050_v24, 4  ;;  %v1055_v11 = vrot.slane %v1053_v25, 5  ;;  %v1648_v25 = vld [vmem:[#allocation2] sm:$0xee] }
 0x16a   : > { %1345 = vmatmul.mubr.bf16.gmra.mxu1 %v4728_v8  ;;  %v1043_v35 = vrot.slane %v1042_v18, 4  ;;  %v1059_v0 = vshll.u32 %v6705_v28, 16  ;;  %v1066_v59 = vrot.slane %v1064_v56, 4  ;;  %v1069_v12 = vrot.slane %v1067_v34, 5  ;;  %v1649_v34 = vld [vmem:[#allocation2 + $0x50] sm:$0xee] }
 0x16b   : > { %1937 = vmatpush1.bf16.msra.mxu1 %v5544_v44  ;;  %1638 = vmatmul.mubr.bf16.gmra.mxu0 %v4772_v1  ;;  %v1056_v15 = vor.u32 %v1055_v11, %v1052_v9  ;;  %v1073_v31 = vshll.u32 %v6711_v54, 16  ;;  %v1034_v47 = vsel %vm6504_vm0, %v1029_v26, %v1033_v63  ;;  %v5556_v40 = vld [vmem:[%s8155_s3 + $0x230] ss:$8 sps:$4 sm:$0xff]   ;;  %v1677_v41 = vrot.slane %v6456_v50, 5  ;;  %v5564_v14 = vld [vmem:[%s8155_s3 + $0x224] ss:$8 sps:$4 sm:$0xff]  }
 0x16c   : > { %1938 = vmatprep.subr.bf16.mxu1 %v5552_v13  ;;  %v1048_v17 = vsel %vm6504_vm0, %v1043_v35, %v1047_v22  ;;  %2294 = vmatprep.mubr.bf16.mxu0 %v4919_v39  ;;  %v1061_v24 = vrot.slane %v1059_v0, 5  ;;  %v1070_v7 = vor.u32 %v1069_v12, %v1066_v59  ;;  %v1681_v46 = vrot.slane %v6575_v58, 5  ;;  %v5571_v50 = vld [vmem:[%s8155_s3 + $0x3e0] ss:$8 sps:$4 sm:$0xff]   ;;  %v5579_v30 = vld [vmem:[%s8155_s3 + $0x3d4] ss:$8 sps:$4 sm:$0xff]  }
 0x16d   : > { %v4731_v20 = vcombine.high %v1034_v47, %v1048_v17  ;;  %2277 = vmatpush1.bf16.msra.mxu0 %v5559_v4  ;;  %v1075_v27 = vrot.slane %v1073_v31, 5  ;;  %v4730_v32 = vcombine.low %v1034_v47, %v1048_v17  ;;  %v1057_v33 = vrot.slane %v1056_v15, 4  ;;  %v1654_v57 = vld [vmem:[#allocation2 + $0x58] sm:$0xee]  ;;  %v5562_v58 = vld [vmem:[%s8155_s3 + $0x220] ss:$8 sps:$4 sm:$0xff]  }
 0x16e   : > { %2278 = vmatprep.subr.bf16.mxu0 %v5567_v16  ;;  %v1071_v56 = vrot.slane %v1070_v7, 4  ;;  %v4806_v51 = vrot.slane %v1648_v25, 9  ;;  %v4807_v60 = vrot.slane %v1649_v34, 9  ;;  %v5570_v48 = vld [vmem:[%s8155_s3 + $0x214] ss:$8 sps:$4 sm:$0xff]   ;;  %v4812_v13 = vrot.slane %v1654_v57, 9 }
 0x16f   : > { %1939 = vmatpush1.bf16.msra.mxu1 %v5550_v6  ;;  %1354 = vmatprep.mubr.bf16.mxu1 %v4731_v20  ;;  %v1062_v62 = vsel %vm6504_vm0, %v1057_v33, %v1061_v24  ;;  %v1655_v42 = vld [vmem:[#allocation2 + $0x98] sm:$0xee]  ;;  %v5585_v63 = vld [vmem:[%s8155_s3 + $0x3c4] ss:$8 sps:$4 sm:$0xff]   ;;  %v1701_v18 = vrot.slane %v6705_v28, 5  ;;  %v1705_v26 = vrot.slane %v6711_v54, 5 }
 0x170   : > { %1940 = vmatprep.subr.bf16.mxu1 %v5558_v19  ;;  %v1076_v43 = vsel %vm6504_vm0, %v1071_v56, %v1075_v27  ;;  %v6769_v3 = vsel %vm6754_vm3, %v4806_v51, %v1677_v41  ;;  %v6773_v44 = vsel %vm6754_vm3, %v4807_v60, %v1681_v46  ;;  %v5577_v8 = vld [vmem:[%s8155_s3 + $0x3d0] ss:$8 sps:$4 sm:$0xff]   ;;  %v4813_v1 = vrot.slane %v1655_v42, 9  ;;  %v5576_v9 = vld [vmem:[%s8155_s3 + $0x204] ss:$8 sps:$4 sm:$0xff]  }
 0x171   : > { %v4733_v49 = vcombine.high %v1062_v62, %v1076_v43  ;;  %2279 = vmatpush2.bf16.msra.mxu0 %v5565_v23  ;;  %v4732_v61 = vcombine.low %v1062_v62, %v1076_v43  ;;  %v5568_v22 = vld [vmem:[%s8155_s3 + $0x210] ss:$8 sps:$4 sm:$0xff]   ;;  %v2368_v39 = vshrl.u32 %v6709_v5, 16  ;;  %v4847_v4 = vcombine.high %v6769_v3, %v6773_v44  ;;  %v5583_v28 = vld [vmem:[%s8155_s3 + $0x3c0] ss:$8 sps:$4 sm:$0xff]  }
 0x172   : > { %1355 = vmatmul.mubr.bf16.gmra.mxu1 %v4730_v32  ;;  %2280 = vmatprep.subr.bf16.mxu0 %v5573_v36  ;;  %v2371_v11 = vshll.u32 %v6709_v5, 16  ;;  %v6796_v35 = vld [vmem:[#allocation2 + $0x18] sm:$0x11]  ;;  %v6798_v54 = vld [vmem:[#allocation2 + $0x68] sm:$0x11]  ;;  %v6802_v16 = vsel %vm6754_vm3, %v4812_v13, %v1701_v18  ;;  %v6806_v0 = vsel %vm6754_vm3, %v4813_v1, %v1705_v26  ;;  %v2382_v12 = vshrl.u32 %v6697_v45, 16 }
 0x173   : > { %1941 = vmatpush1.bf16.msra.mxu1 %v5556_v40  ;;  %1364 = vmatprep.mubr.bf16.mxu1 %v4733_v49  ;;  %v2370_v59 = vrot.slane %v2368_v39, 4  ;;  %v5591_v6 = vld [vmem:[%s8155_s3 + $0x3b4] ss:$8 sps:$4 sm:$0xff]   ;;  %v4853_v15 = vcombine.high %v6802_v16, %v6806_v0  ;;  %v4852_v31 = vcombine.low %v6802_v16, %v6806_v0  ;;  %v2385_v17 = vshll.u32 %v6697_v45, 16  ;;  %v5574_v19 = vld [vmem:[%s8155_s3 + $0x200] ss:$8 sps:$4 sm:$0xff]  }
 0x174   : > { %1942 = vmatprep.subr.bf16.mxu1 %v5564_v14  ;;  %v2373_v47 = vrot.slane %v2371_v11, 5  ;;  %v2384_v24 = vrot.slane %v2382_v12, 4  ;;  %v5582_v7 = vld [vmem:[%s8155_s3 + $0x2f4] ss:$8 sps:$4 sm:$0xff]   ;;  %v2377_v27 = vshll.u32 %v6796_v35, 16  ;;  %v2391_v32 = vshll.u32 %v6798_v54, 16 }
 0x175   : > { %2281 = vmatpush2.bf16.msra.mxu0 %v5571_v50  ;;  %v6823_v20 = vld [vmem:[#allocation2 + $0x78] sm:$0xff]  ;;  %v2387_v25 = vrot.slane %v2385_v17, 5  ;;  %v5597_v56 = vld [vmem:[%s8155_s3 + $0x3a4] ss:$8 sps:$4 sm:$0xff]   ;;  %v5595_v60 = vld [vmem:[%s8155_s3 + $0x3a0] ss:$8 sps:$4 sm:$0xff]  }
 0x176   : > { %2282 = vmatprep.subr.bf16.mxu0 %v5579_v30  ;;  %v2374_v23 = vor.u32 %v2373_v47, %v2370_v59  ;;  %v5589_v33 = vld [vmem:[%s8155_s3 + $0x3b0] ss:$8 sps:$4 sm:$0xff]   ;;  %v5588_v41 = vld [vmem:[%s8155_s3 + $0x2e4] ss:$8 sps:$4 sm:$0xff]   ;;  %v2396_v62 = vshrl.u32 %v6823_v20, 16  ;;  %v2379_v43 = vrot.slane %v2377_v27, 5 }
 0x177   : > { %1943 = vmatpush1.bf16.msra.mxu1 %v5562_v58  ;;  %v2388_v36 = vor.u32 %v2387_v25, %v2384_v24  ;;  %v5580_v40 = vld [vmem:[%s8155_s3 + $0x2f0] ss:$8 sps:$4 sm:$0xff]   ;;  %v6839_v14 = vld [vmem:[#allocation2 + $0x8] sm:$0xff]  ;;  %v2393_v49 = vrot.slane %v2391_v32, 5  ;;  %v6842_v51 = vld [vmem:[#allocation2 + $0x80] sm:$0x11] }
 0x178   : > { %1944 = vmatprep.subr.bf16.mxu1 %v5570_v48  ;;  %v2375_v34 = vrot.slane %v2374_v23, 4  ;;  %v6847_v50 = vld [vmem:[#allocation2 + $0x88] sm:$0x11]  ;;  %v2398_v30 = vrot.slane %v2396_v62, 4  ;;  %v2399_v57 = vshll.u32 %v6823_v20, 16  ;;  %v2413_v13 = vshll.u32 %v6839_v14, 16 }
 0x179   : > { %2283 = vmatpush2.bf16.msra.mxu0 %v5577_v8  ;;  %v2389_v46 = vrot.slane %v2388_v36, 4  ;;  %v5603_v58 = vld [vmem:[%s8155_s3 + $0x394] ss:$8 sps:$4 sm:$0xff]   ;;  %v2410_v8 = vshrl.u32 %v6839_v14, 16  ;;  %v2405_v26 = vshll.u32 %v6842_v51, 16 }
 0x17a   : > { %1365 = vmatmul.mubr.bf16.gmra.mxu1 %v4732_v61  ;;  %2284 = vmatprep.subr.bf16.mxu0 %v5585_v63  ;;  %v6855_v48 = vsel %vm6504_vm0, %v2375_v34, %v2379_v43  ;;  %v5586_v61 = vld [vmem:[%s8155_s3 + $0x2e0] ss:$8 sps:$4 sm:$0xff]   ;;  %v2401_v1 = vrot.slane %v2399_v57, 5  ;;  %v5594_v39 = vld [vmem:[%s8155_s3 + $0x2d4] ss:$8 sps:$4 sm:$0xff]  }
 0x17b   : > { %1945 = vmatpush1.bf16.msra.mxu1 %v5568_v22  ;;  %1964 = vmatprep.mubr.bf16.mxu1 %v4847_v4  ;;  %v6859_v42 = vsel %vm6504_vm0, %v2389_v46, %v2393_v49  ;;  %v6866_v63 = vld [vmem:[#allocation2 + $0x28] sm:$0xff]  ;;  %v2412_v4 = vrot.slane %v2410_v8, 4  ;;  %v5601_v11 = vld [vmem:[%s8155_s3 + $0x390] ss:$8 sps:$4 sm:$0xff]   ;;  %v2407_v23 = vrot.slane %v2405_v26, 5 }
 0x17c   : > { %1946 = vmatprep.subr.bf16.mxu1 %v5576_v9  ;;  %v4990_v18 = vcombine.low %v6855_v48, %v6859_v42  ;;  %v4991_v22 = vcombine.high %v6855_v48, %v6859_v42  ;;  %v2415_v9 = vrot.slane %v2413_v13, 5  ;;  %v6880_v59 = vld [vmem:[#allocation2 + $0x58] sm:$0xff]  ;;  %v2402_v12 = vor.u32 %v2401_v1, %v2398_v30  ;;  %v5609_v47 = vld [vmem:[%s8155_s3 + $0x384] ss:$8 sps:$4 sm:$0xff]   ;;  %v5607_v36 = vld [vmem:[%s8155_s3 + $0x380] ss:$8 sps:$4 sm:$0xff]  }
 0x17d   : > { %2285 = vmatpush2.bf16.msra.mxu0 %v5583_v28  ;;  %v2419_v28 = vshll.u32 %v6847_v50, 16  ;;  %v5600_v24 = vld [vmem:[%s8155_s3 + $0x2c4] ss:$8 sps:$4 sm:$0xff]   ;;  %v2427_v27 = vshll.u32 %v6866_v63, 16  ;;  %v2438_v34 = vshrl.u32 %v6880_v59, 16  ;;  %v6906_v43 = vld [vmem:[#allocation2 + $0x98] sm:$0xff] }
 0x17e   : > { %2286 = vmatprep.subr.bf16.mxu0 %v5591_v6  ;;  %v5592_v6 = vld [vmem:[%s8155_s3 + $0x2d0] ss:$8 sps:$4 sm:$0xff]   ;;  %v2416_v17 = vor.u32 %v2415_v9, %v2412_v4  ;;  %v6895_v25 = vld [vmem:[#allocation2 + $0x40] sm:$0x11]  ;;  %v5615_v62 = vld [vmem:[%s8155_s3 + $0x574] ss:$8 sps:$4 sm:$0xff]  }
 0x17f   : > { %1947 = vmatpush1.bf16.msra.mxu1 %v5574_v19  ;;  %v2424_v19 = vshrl.u32 %v6866_v63, 16  ;;  %v2441_v30 = vshll.u32 %v6880_v59, 16  ;;  %v5598_v57 = vld [vmem:[%s8155_s3 + $0x2c0] ss:$8 sps:$4 sm:$0xff]   ;;  %v5606_v1 = vld [vmem:[%s8155_s3 + $0x2b4] ss:$8 sps:$4 sm:$0xff]  }
 0x180   : > { %1948 = vmatprep.subr.bf16.mxu1 %v5582_v7  ;;  %v6892_v7 = vrot.slane %v2402_v12, 4  ;;  %v2417_v32 = vrot.slane %v2416_v17, 4  ;;  %v5613_v4 = vld [vmem:[%s8155_s3 + $0x570] ss:$8 sps:$4 sm:$0xff]   ;;  %v3938_v55 = vld [vmem:[#allocation2 + $0x8] sm:$0xee] }
 0x181   : > { %2287 = vmatpush2.bf16.msra.mxu0 %v5589_v33  ;;  %v2421_v33 = vrot.slane %v2419_v28, 5  ;;  %v2443_v26 = vrot.slane %v2441_v30, 5  ;;  %v2452_v28 = vshrl.u32 %v6906_v43, 16  ;;  %v5604_v12 = vld [vmem:[%s8155_s3 + $0x2b0] ss:$8 sps:$4 sm:$0xff]  }
 0x182   : > { %2288 = vmatprep.subr.bf16.mxu0 %v5597_v56  ;;  %v2426_v56 = vrot.slane %v2424_v19, 4  ;;  %v6911_v46 = vsel %vm6504_vm0, %v6892_v7, %v2407_v23  ;;  %v2455_v19 = vshll.u32 %v6906_v43, 16  ;;  %v6947_v23 = vld [vmem:[#allocation2 + $0x60] sm:$0x11]  ;;  %v5629_v30 = vld [vmem:[%s8155_s3 + $0x554] ss:$8 sps:$4 sm:$0xff]  }
 0x183   : > { %1949 = vmatpush2.bf16.msra.mxu1 %v5580_v40  ;;  %v6901_v40 = vld [vmem:[#allocation2 + $0x10] sm:$0x11]  ;;  %v6915_v49 = vsel %vm6504_vm0, %v2417_v32, %v2421_v33  ;;  %v5612_v32 = vld [vmem:[%s8155_s3 + $0x2a4] ss:$8 sps:$4 sm:$0xff]  }
 0x184   : > { %1950 = vmatprep.subr.bf16.mxu1 %v5588_v41  ;;  %v2429_v41 = vrot.slane %v2427_v27, 5  ;;  %v4992_v8 = vcombine.low %v6911_v46, %v6915_v49  ;;  %v2454_v27 = vrot.slane %v2452_v28, 4  ;;  %v3939_v53 = vld [vmem:[#allocation2 + $0x28] sm:$0xee]  ;;  %v5684_v16 = vld [vmem:[%s8155_s3 + $0x4f4] ss:$8 sps:$4 sm:$0xff]  }
 0x185   : > { %2289 = vmatpush2.bf16.msra.mxu0 %v5595_v60  ;;  %v2440_v60 = vrot.slane %v2438_v34, 4  ;;  %v2457_v34 = vrot.slane %v2455_v19, 5  ;;  %v5616_v19 = vld [vmem:[%s8155_s3 + $0x290] ss:$8 sps:$4 sm:$0xff]   ;;  %v5744_v48 = vld [vmem:[%s8155_s3 + $0x654] ss:$8 sps:$4 sm:$0xff]  }
 0x186   : > { %2290 = vmatprep.subr.bf16.mxu0 %v5603_v58  ;;  %v4993_v58 = vcombine.high %v6911_v46, %v6915_v49  ;;  %v2430_v13 = vor.u32 %v2429_v41, %v2426_v56  ;;  %v5691_v0 = vld [vmem:[%s8155_s3 + $0x5b0] ss:$8 sps:$4 sm:$0xff]   ;;  %v5756_v46 = vld [vmem:[%s8155_s3 + $0x634] ss:$8 sps:$4 sm:$0xff]  }
 0x187   : > { %1951 = vmatpush2.bf16.msra.mxu1 %v5586_v61  ;;  %v2433_v61 = vshll.u32 %v6895_v25, 16  ;;  %v2444_v17 = vor.u32 %v2443_v26, %v2440_v60  ;;  %v5610_v26 = vld [vmem:[%s8155_s3 + $0x2a0] ss:$8 sps:$4 sm:$0xff]   ;;  %v5763_v49 = vld [vmem:[%s8155_s3 + $0x7f0] ss:$8 sps:$4 sm:$0xff]  }
 0x188   : > { %1952 = vmatprep.subr.bf16.mxu1 %v5594_v39  ;;  %v2447_v39 = vshll.u32 %v6901_v40, 16  ;;  %v2431_v9 = vrot.slane %v2430_v13, 4  ;;  %v2458_v13 = vor.u32 %v2457_v34, %v2454_v27  ;;  %v4923_v27 = vcombine.high %v6866_v63, %v6880_v59 }
 0x189   : > { %2291 = vmatpush2.bf16.msra.mxu0 %v5601_v11  ;;  %v4918_v11 = vcombine.low %v6709_v5, %v6697_v45  ;;  %v6949_v45 = vld [vmem:[#allocation2 + $0x48] sm:$0x11]  ;;  %v2435_v5 = vrot.slane %v2433_v61, 5  ;;  %v2445_v33 = vrot.slane %v2444_v17, 4  ;;  %v2461_v61 = vshll.u32 %v6947_v23, 16 }
 0x18a   : > { %2292 = vmatprep.subr.bf16.mxu0 %v5609_v47  ;;  %v6942_v47 = vld [vmem:[#allocation2 + $0x20] sm:$0xff]  ;;  %v2449_v56 = vrot.slane %v2447_v39, 5 }
 0x18b   : > { %1953 = vmatpush2.bf16.msra.mxu1 %v5592_v6  ;;  %v5622_v6 = vld [vmem:[%s8155_s3 + $0x564] ss:$8 sps:$4 sm:$0xff]   ;;  %v6959_v41 = vsel %vm6504_vm0, %v2431_v9, %v2435_v5  ;;  %v2469_v60 = vshll.u32 %v6942_v47, 16 }
 0x18c   : > { %1954 = vmatprep.subr.bf16.mxu1 %v5600_v24  ;;  %v4921_v24 = vcombine.high %v6823_v20, %v6839_v14  ;;  %v5636_v5 = vld [vmem:[%s8155_s3 + $0x544] ss:$8 sps:$4 sm:$0xff]  }
 0x18d   : > { %2293 = vmatpush2.bf16.msra.mxu0 %v5607_v36  ;;  %v5620_v36 = vld [vmem:[%s8155_s3 + $0x560] ss:$8 sps:$4 sm:$0xff]   ;;  %v2471_v28 = vrot.slane %v2469_v60, 5 }
 0x18e   : > { %3074 = vmatprep.subr.bf16.mxu0 %v5615_v62  ;;  %v2466_v62 = vshrl.u32 %v6942_v47, 16 }
 0x18f   : > { %1955 = vmatpush2.bf16.msra.mxu1 %v5598_v57  ;;  %v6968_v57 = vsel %vm6504_vm0, %v2445_v33, %v2449_v56  ;;  %v2463_v33 = vrot.slane %v2461_v61, 5  ;;  %v5643_v61 = vld [vmem:[%s8155_s3 + $0x534] ss:$8 sps:$4 sm:$0xff]  }
 0x190   : > { %1956 = vmatprep.subr.bf16.mxu1 %v5606_v1  ;;  %2295 = vmatmul.mubr.bf16.vlgmr.msra.gmra.mxu0 %v4918_v11  ;;  %v2475_v1 = vshll.u32 %v6949_v45, 16  ;;  %v4995_v39 = vcombine.high %v6959_v41, %v6968_v57  ;;  %v2468_v9 = vrot.slane %v2466_v62, 4  ;;  %v5618_v11 = vld [vmem:[%s8155_s3 + $0x294] ss:$8 sps:$4 sm:$0xff]  }
 0x191   : > { %2304 = vmatprep.mubr.bf16.mxu0 %v4921_v24  ;;  %3075 = vmatpush1.bf16.msra.mxu0 %v5613_v4  ;;  %v4994_v4 = vcombine.low %v6959_v41, %v6968_v57  ;;  %v4920_v24 = vcombine.low %v6823_v20, %v6839_v14  ;;  %v1650_v20 = vld [vmem:[#allocation2 + $0x30] sm:$0xee]  ;;  %v5634_v14 = vld [vmem:[%s8155_s3 + $0x540] ss:$8 sps:$4 sm:$0xff]  }
 0x192   : > { %3076 = vmatprep.subr.bf16.mxu0 %v5622_v6  ;;  %v2459_v6 = vrot.slane %v2458_v13, 4  ;;  %v2472_v17 = vor.u32 %v2471_v28, %v2468_v9  ;;  %v2477_v34 = vrot.slane %v2475_v1, 5  ;;  %v1689_v13 = vrot.slane %v6624_v2, 5  ;;  %v5623_v9 = vld [vmem:[%s8155_s3 + $0x280] ss:$8 sps:$4 sm:$0xff]  }
 0x193   : > { %1957 = vmatpush2.bf16.msra.mxu1 %v5604_v12  ;;  %v5627_v12 = vld [vmem:[%s8155_s3 + $0x550] ss:$8 sps:$4 sm:$0xff]   ;;  %v5633_v2 = vld [vmem:[%s8155_s3 + $0x474] ss:$8 sps:$4 sm:$0xff]   ;;  %v4808_v28 = vrot.slane %v1650_v20, 9  ;;  %v5257_v1 = vrot.slane %v3939_v53, 9 }
 0x194   : > { %1958 = vmatprep.subr.bf16.mxu1 %v5612_v32  ;;  %v1651_v32 = vld [vmem:[#allocation2 + $0x78] sm:$0xee]  ;;  %v2473_v56 = vrot.slane %v2472_v17, 4  ;;  %v7003_v62 = vsel %vm6504_vm0, %v2459_v6, %v2463_v33  ;;  %v4925_v33 = vcombine.high %v6906_v43, %v6942_v47  ;;  %v3936_v20 = vld [vmem:[#allocation2 + $0x30] sm:$0xee] }
 0x195   : > { %3077 = vmatpush1.bf16.msra.mxu0 %v5620_v36  ;;  %v5625_v36 = vld [vmem:[%s8155_s3 + $0x284] ss:$8 sps:$4 sm:$0xff]   ;;  %v5631_v6 = vld [vmem:[%s8155_s3 + $0x470] ss:$8 sps:$4 sm:$0xff]   ;;  %v5768_v41 = vld [vmem:[%s8155_s3 + $0x614] ss:$8 sps:$4 sm:$0xff]  }
 0x196   : > { %3078 = vmatprep.subr.bf16.mxu0 %v5629_v30  ;;  %v7007_v60 = vsel %vm6504_vm0, %v2473_v56, %v2477_v34  ;;  %v4809_v30 = vrot.slane %v1651_v32, 9  ;;  %v5641_v17 = vld [vmem:[%s8155_s3 + $0x530] ss:$8 sps:$4 sm:$0xff]   ;;  %v7046_v56 = vld [vmem:[#allocation2 + $0x8] sm:$0xee] }
 0x197   : > { %1959 = vmatpush2.bf16.msra.mxu1 %v5610_v26  ;;  %v2793_v32 = vld [vmem:[#allocation2 + $0x50] sm:$0xee]  ;;  %v4924_v26 = vcombine.low %v6906_v43, %v6942_v47 }
 0x198   : > { %1960 = vmatprep.subr.bf16.mxu1 %v5618_v11  ;;  %2305 = vmatmul.mubr.bf16.gmra.mxu0 %v4920_v24  ;;  %v1685_v11 = vrot.slane %v6615_v21, 5  ;;  %v7034_v24 = vsel %vm6754_vm3, %v4809_v30, %v1689_v13  ;;  %v5639_v21 = vld [vmem:[%s8155_s3 + $0x464] ss:$8 sps:$4 sm:$0xff]   ;;  %v2823_v13 = vrot.slane %v6798_v54, 5  ;;  %v5647_v54 = vld [vmem:[%s8155_s3 + $0x454] ss:$8 sps:$4 sm:$0xff]  }
 0x199   : > { %2314 = vmatprep.mubr.bf16.mxu0 %v4923_v27  ;;  %3079 = vmatpush1.bf16.msra.mxu0 %v5627_v12  ;;  %v7024_v12 = vld [vmem:[#allocation2 + $0x28] sm:$0xee]  ;;  %v5645_v43 = vld [vmem:[%s8155_s3 + $0x450] ss:$8 sps:$4 sm:$0xff]  }
 0x19a   : > { %3080 = vmatprep.subr.bf16.mxu0 %v5636_v5  ;;  %v4922_v5 = vcombine.low %v6866_v63, %v6880_v59  ;;  %v5650_v27 = vld [vmem:[%s8155_s3 + $0x524] ss:$8 sps:$4 sm:$0xff]   ;;  %v4811_v34 = vrot.slane %v7024_v12, 9  ;;  %v4846_v63 = vcombine.low %v6769_v3, %v6773_v44  ;;  %v7056_v59 = vsel %vm6754_vm3, %v4808_v28, %v1685_v11  ;;  %v5637_v3 = vld [vmem:[%s8155_s3 + $0x460] ss:$8 sps:$4 sm:$0xff]  }
 0x19b   : > { %1961 = vmatpush2.bf16.msra.mxu1 %v5616_v19  ;;  %v2794_v19 = vld [vmem:[#allocation2 + $0x30] sm:$0xee]  ;;  %v4849_v12 = vcombine.high %v7056_v59, %v7034_v24  ;;  %v1697_v44 = vrot.slane %v6675_v37, 5  ;;  %v7070_v28 = vld [vmem:[#allocation2 + $0x80] sm:$0x11]  ;;  %v4810_v37 = vrot.slane %v7046_v56, 9 }
 0x19c   : > { %1962 = vmatprep.subr.bf16.mxu1 %v5625_v36  ;;  %v5648_v36 = vld [vmem:[%s8155_s3 + $0x520] ss:$8 sps:$4 sm:$0xff]   ;;  %v5031_v30 = vrot.slane %v2794_v19, 9  ;;  %v2819_v19 = vrot.slane %v6796_v35, 5  ;;  %v4848_v35 = vcombine.low %v7056_v59, %v7034_v24  ;;  %v7092_v56 = vld [vmem:[#allocation2 + $0x10] sm:$0x11] }
 0x19d   : > { %3081 = vmatpush1.bf16.msra.mxu0 %v5634_v14  ;;  %v5657_v14 = vld [vmem:[%s8155_s3 + $0x514] ss:$8 sps:$4 sm:$0xff]   ;;  %v7072_v11 = vld [vmem:[#allocation2 + $0x88] sm:$0x11]  ;;  %v5777_v57 = vld [vmem:[%s8155_s3 + $0x7d0] ss:$8 sps:$4 sm:$0xff]  }
 0x19e   : > { %3082 = vmatprep.subr.bf16.mxu0 %v5643_v61  ;;  %v7062_v61 = vld [vmem:[#allocation2 + $0x68] sm:$0x11]  ;;  %v3941_v24 = vld [vmem:[#allocation2 + $0x98] sm:$0xee] }
 0x19f   : > { %1963 = vmatpush2.bf16.msra.mxu1 %v5623_v9  ;;  %v3937_v9 = vld [vmem:[#allocation2 + $0x78] sm:$0xee] }
 0x1a0   : > { %2704 = vmatprep.subr.bf16.mxu1 %v5633_v2  ;;  %2315 = vmatmul.mubr.bf16.gmra.mxu0 %v4922_v5  ;;  %v5030_v2 = vrot.slane %v2793_v32, 9  ;;  %v5254_v5 = vrot.slane %v3936_v20, 9  ;;  %v7082_v32 = vld [vmem:[#allocation2 + $0x40] sm:$0x11]  ;;  %v3966_v20 = vrot.slane %v7070_v28, 5 }
 0x1a1   : > { %2324 = vmatprep.mubr.bf16.mxu0 %v4925_v33  ;;  %3083 = vmatpush1.bf16.msra.mxu0 %v5641_v17  ;;  %v5655_v17 = vld [vmem:[%s8155_s3 + $0x510] ss:$8 sps:$4 sm:$0xff]   ;;  %v3962_v33 = vrot.slane %v7062_v61, 5 }
 0x1a2   : > { %1965 = vmatmul.mubr.bf16.vlgmr.msra.gmra.mxu1 %v4846_v63  ;;  %3084 = vmatprep.subr.bf16.mxu0 %v5650_v27  ;;  %v5255_v63 = vrot.slane %v3937_v9, 9  ;;  %v1693_v27 = vrot.slane %v6664_v29, 5  ;;  %v5256_v9 = vrot.slane %v3938_v55, 9  ;;  %v1698_v29 = vsel %vm6754_vm3, %v4811_v34, %v1697_v44 }
 0x1a3   : > { %1974 = vmatprep.mubr.bf16.mxu1 %v4849_v12  ;;  %2705 = vmatpush1.bf16.msra.mxu1 %v5631_v6  ;;  %v7090_v6 = vsel %vm6754_vm3, %v5031_v30, %v2823_v13  ;;  %v3940_v12 = vld [vmem:[#allocation2 + $0x58] sm:$0xee]  ;;  %v7102_v59 = vsel %vm6754_vm3, %v5030_v2, %v2819_v19  ;;  %v7107_v30 = vld [vmem:[#allocation2 + $0x60] sm:$0x11]  ;;  %v7111_v55 = vsel %vm6754_vm3, %v5254_v5, %v3962_v33  ;;  %v3974_v13 = vrot.slane %v7082_v32, 5 }
 0x1a4   : > { %2706 = vmatprep.subr.bf16.mxu1 %v5639_v21  ;;  %v3970_v21 = vrot.slane %v7072_v11, 5  ;;  %v7115_v53 = vsel %vm6754_vm3, %v5255_v63, %v3966_v20  ;;  %v5071_v47 = vcombine.high %v7102_v59, %v7090_v6  ;;  %v1694_v44 = vsel %vm6754_vm3, %v4810_v37, %v1693_v27  ;;  %v5661_v63 = vld [vmem:[%s8155_s3 + $0x500] ss:$8 sps:$4 sm:$0xff]  }
 0x1a5   : > { %3085 = vmatpush1.bf16.msra.mxu0 %v5648_v36  ;;  %v5663_v36 = vld [vmem:[%s8155_s3 + $0x504] ss:$8 sps:$4 sm:$0xff]   ;;  %v5294_v34 = vcombine.low %v7111_v55, %v7115_v53  ;;  %v5258_v2 = vrot.slane %v3940_v12, 9  ;;  %v3978_v19 = vrot.slane %v7092_v56, 5  ;;  %v5259_v5 = vrot.slane %v3941_v24, 9 }
 0x1a6   : > { %3086 = vmatprep.subr.bf16.mxu0 %v5657_v14  ;;  %v5295_v14 = vcombine.high %v7111_v55, %v7115_v53  ;;  %v4851_v33 = vcombine.high %v1694_v44, %v1698_v29  ;;  %v7142_v37 = vsel %vm6754_vm3, %v5257_v1, %v3974_v13  ;;  %v5651_v1 = vld [vmem:[%s8155_s3 + $0x440] ss:$8 sps:$4 sm:$0xff]   ;;  %v4850_v13 = vcombine.low %v1694_v44, %v1698_v29  ;;  %v5672_v44 = vld [vmem:[%s8155_s3 + $0x414] ss:$8 sps:$4 sm:$0xff]  }
 0x1a7   : > { %2707 = vmatpush1.bf16.msra.mxu1 %v5637_v3  ;;  %v5653_v3 = vld [vmem:[%s8155_s3 + $0x444] ss:$8 sps:$4 sm:$0xff]   ;;  %v5664_v29 = vld [vmem:[%s8155_s3 + $0x420] ss:$8 sps:$4 sm:$0xff]  }
 0x1a8   : > { %2708 = vmatprep.subr.bf16.mxu1 %v5647_v54  ;;  %2325 = vmatmul.mubr.bf16.gmra.mxu0 %v4924_v26  ;;  %v7138_v54 = vsel %vm6754_vm3, %v5256_v9, %v3970_v21  ;;  %v3982_v26 = vrot.slane %v7107_v30, 5  ;;  %v5660_v9 = vld [vmem:[%s8155_s3 + $0x434] ss:$8 sps:$4 sm:$0xff]  }
 0x1a9   : > { %3087 = vmatpush1.bf16.msra.mxu0 %v5655_v17  ;;  %3106 = vmatprep.mubr.bf16.mxu0 %v5071_v47  ;;  %v5669_v17 = vld [vmem:[%s8155_s3 + $0x5f4] ss:$8 sps:$4 sm:$0xff]   ;;  %v5297_v27 = vcombine.high %v7138_v54, %v7142_v37  ;;  %v5296_v20 = vcombine.low %v7138_v54, %v7142_v37  ;;  %v5658_v47 = vld [vmem:[%s8155_s3 + $0x430] ss:$8 sps:$4 sm:$0xff]  }
 0x1aa   : > { %1975 = vmatmul.mubr.bf16.gmra.mxu1 %v4848_v35  ;;  %3088 = vmatprep.subr.bf16.mxu0 %v5663_v36  ;;  %v7157_v35 = vsel %vm6754_vm3, %v5258_v2, %v3978_v19  ;;  %v7161_v12 = vsel %vm6754_vm3, %v5259_v5, %v3982_v26  ;;  %v5667_v36 = vld [vmem:[%s8155_s3 + $0x5f0] ss:$8 sps:$4 sm:$0xff]   ;;  %v5673_v2 = vld [vmem:[%s8155_s3 + $0x5e0] ss:$8 sps:$4 sm:$0xff]   ;;  %v5681_v19 = vld [vmem:[%s8155_s3 + $0x5d4] ss:$8 sps:$4 sm:$0xff]  }
 0x1ab   : > { %1984 = vmatprep.mubr.bf16.mxu1 %v4851_v33  ;;  %2709 = vmatpush1.bf16.msra.mxu1 %v5645_v43  ;;  %v5299_v21 = vcombine.high %v7157_v35, %v7161_v12  ;;  %v5298_v24 = vcombine.low %v7157_v35, %v7161_v12  ;;  %v5675_v43 = vld [vmem:[%s8155_s3 + $0x5e4] ss:$8 sps:$4 sm:$0xff]   ;;  %v5679_v5 = vld [vmem:[%s8155_s3 + $0x5d0] ss:$8 sps:$4 sm:$0xff]   ;;  %v5685_v26 = vld [vmem:[%s8155_s3 + $0x5c0] ss:$8 sps:$4 sm:$0xff]  }
 0x1ac   : > { %2710 = vmatprep.subr.bf16.mxu1 %v5653_v3  ;;  %v5666_v3 = vld [vmem:[%s8155_s3 + $0x424] ss:$8 sps:$4 sm:$0xff]   ;;  %v5670_v33 = vld [vmem:[%s8155_s3 + $0x410] ss:$8 sps:$4 sm:$0xff]  }
 0x1ad   : > { %3089 = vmatpush1.bf16.msra.mxu0 %v5661_v63  ;;  %v5678_v63 = vld [vmem:[%s8155_s3 + $0x404] ss:$8 sps:$4 sm:$0xff]  }
 0x1ae   : > { %3090 = vmatprep.subr.bf16.mxu0 %v5669_v17  ;;  %v5693_v17 = vld [vmem:[%s8155_s3 + $0x5b4] ss:$8 sps:$4 sm:$0xff]  }
 0x1af   : > { %2711 = vmatpush1.bf16.msra.mxu1 %v5651_v1  ;;  %v5676_v1 = vld [vmem:[%s8155_s3 + $0x400] ss:$8 sps:$4 sm:$0xff]  }
 0x1b0   : > { %2712 = vmatprep.subr.bf16.mxu1 %v5660_v9  ;;  %v5690_v9 = vld [vmem:[%s8155_s3 + $0x4e4] ss:$8 sps:$4 sm:$0xff]  }
 0x1b1   : > { %3091 = vmatpush2.bf16.msra.mxu0 %v5667_v36  ;;  %v5697_v36 = vld [vmem:[%s8155_s3 + $0x5a0] ss:$8 sps:$4 sm:$0xff]  }
 0x1b2   : > { %1985 = vmatmul.mubr.bf16.gmra.mxu1 %v4850_v13  ;;  %3092 = vmatprep.subr.bf16.mxu0 %v5675_v43  ;;  %v5705_v43 = vld [vmem:[%s8155_s3 + $0x594] ss:$8 sps:$4 sm:$0xff]  }
 0x1b3   : > { %1994 = vmatprep.mubr.bf16.mxu1 %v4853_v15  ;;  %2713 = vmatpush1.bf16.msra.mxu1 %v5658_v47  ;;  %v5687_v15 = vld [vmem:[%s8155_s3 + $0x5c4] ss:$8 sps:$4 sm:$0xff]   ;;  %v5688_v47 = vld [vmem:[%s8155_s3 + $0x4e0] ss:$8 sps:$4 sm:$0xff]   ;;  %v5696_v13 = vld [vmem:[%s8155_s3 + $0x4d4] ss:$8 sps:$4 sm:$0xff]  }
 0x1b4   : > { %2714 = vmatprep.subr.bf16.mxu1 %v5666_v3  ;;  %v5703_v3 = vld [vmem:[%s8155_s3 + $0x590] ss:$8 sps:$4 sm:$0xff]  }
 0x1b5   : > { %3093 = vmatpush2.bf16.msra.mxu0 %v5673_v2  ;;  %v2796_v2 = vld [vmem:[#allocation2 + $0x8] sm:$0xee] }
 0x1b6   : > { %3094 = vmatprep.subr.bf16.mxu0 %v5681_v19  ;;  %v5711_v19 = vld [vmem:[%s8155_s3 + $0x584] ss:$8 sps:$4 sm:$0xff]  }
 0x1b7   : > { %2715 = vmatpush1.bf16.msra.mxu1 %v5664_v29  ;;  %v5694_v29 = vld [vmem:[%s8155_s3 + $0x4d0] ss:$8 sps:$4 sm:$0xff]  }
 0x1b8   : > { %2716 = vmatprep.subr.bf16.mxu1 %v5672_v44  ;;  %v2795_v44 = vld [vmem:[#allocation2 + $0x78] sm:$0xee] }
 0x1b9   : > { %3095 = vmatpush2.bf16.msra.mxu0 %v5679_v5  ;;  %v5702_v5 = vld [vmem:[%s8155_s3 + $0x4c4] ss:$8 sps:$4 sm:$0xff]  }
 0x1ba   : > { %1995 = vmatmul.mubr.bf16.gmra.mxu1 %v4852_v31  ;;  %3096 = vmatprep.subr.bf16.mxu0 %v5687_v15  ;;  %v5699_v31 = vld [vmem:[%s8155_s3 + $0x5a4] ss:$8 sps:$4 sm:$0xff]   ;;  %v5033_v15 = vrot.slane %v2796_v2, 9  ;;  %v5721_v2 = vld [vmem:[%s8155_s3 + $0x760] ss:$8 sps:$4 sm:$0xff]  }
 0x1bb   : > { %2717 = vmatpush1.bf16.msra.mxu1 %v5670_v33  ;;  %2736 = vmatprep.mubr.bf16.mxu1 %v4991_v22  ;;  %v5682_v22 = vld [vmem:[%s8155_s3 + $0x4f0] ss:$8 sps:$4 sm:$0xff]   ;;  %v2831_v33 = vrot.slane %v6847_v50, 5  ;;  %v5708_v50 = vld [vmem:[%s8155_s3 + $0x4b4] ss:$8 sps:$4 sm:$0xff]  }
 0x1bc   : > { %2718 = vmatprep.subr.bf16.mxu1 %v5678_v63  ;;  %v5709_v63 = vld [vmem:[%s8155_s3 + $0x580] ss:$8 sps:$4 sm:$0xff]  }
 0x1bd   : > { %3097 = vmatpush2.bf16.msra.mxu0 %v5685_v26  ;;  %v5717_v26 = vld [vmem:[%s8155_s3 + $0x774] ss:$8 sps:$4 sm:$0xff]  }
 0x1be   : > { %3098 = vmatprep.subr.bf16.mxu0 %v5693_v17  ;;  %v5032_v17 = vrot.slane %v2795_v44, 9  ;;  %v2835_v44 = vrot.slane %v6895_v25, 5  ;;  %v5727_v25 = vld [vmem:[%s8155_s3 + $0x750] ss:$8 sps:$4 sm:$0xff]  }
 0x1bf   : > { %2719 = vmatpush1.bf16.msra.mxu1 %v5676_v1  ;;  %v2827_v1 = vrot.slane %v6842_v51, 5  ;;  %v5070_v51 = vcombine.low %v7102_v59, %v7090_v6  ;;  %v5714_v6 = vld [vmem:[%s8155_s3 + $0x4a4] ss:$8 sps:$4 sm:$0xff]  }
 0x1c0   : > { %2720 = vmatprep.subr.bf16.mxu1 %v5684_v16  ;;  %v5700_v16 = vld [vmem:[%s8155_s3 + $0x4c0] ss:$8 sps:$4 sm:$0xff]  }
 0x1c1   : > { %3099 = vmatpush2.bf16.msra.mxu0 %v5691_v0  ;;  %v2832_v0 = vsel %vm6754_vm3, %v5033_v15, %v2831_v33  ;;  %v5720_v15 = vld [vmem:[%s8155_s3 + $0x494] ss:$8 sps:$4 sm:$0xff]  }
 0x1c2   : > { %3100 = vmatprep.subr.bf16.mxu0 %v5699_v31  ;;  %v5715_v31 = vld [vmem:[%s8155_s3 + $0x770] ss:$8 sps:$4 sm:$0xff]  }
 0x1c3   : > { %2721 = vmatpush2.bf16.msra.mxu1 %v5682_v22  ;;  %v2798_v22 = vld [vmem:[#allocation2 + $0x58] sm:$0xee] }
 0x1c4   : > { %2722 = vmatprep.subr.bf16.mxu1 %v5690_v9  ;;  %v2828_v9 = vsel %vm6754_vm3, %v5032_v17, %v2827_v1  ;;  %v5035_v59 = vrot.slane %v2798_v22, 9  ;;  %v5735_v1 = vld [vmem:[%s8155_s3 + $0x744] ss:$8 sps:$4 sm:$0xff]  }
 0x1c5   : > { %3101 = vmatpush2.bf16.msra.mxu0 %v5697_v36  ;;  %v5723_v36 = vld [vmem:[%s8155_s3 + $0x764] ss:$8 sps:$4 sm:$0xff]  }
 0x1c6   : > { %3102 = vmatprep.subr.bf16.mxu0 %v5705_v43  ;;  %v5706_v43 = vld [vmem:[%s8155_s3 + $0x4b0] ss:$8 sps:$4 sm:$0xff]  }
 0x1c7   : > { %2723 = vmatpush2.bf16.msra.mxu1 %v5688_v47  ;;  %v5073_v47 = vcombine.high %v2828_v9, %v2832_v0 }
 0x1c8   : > { %2724 = vmatprep.subr.bf16.mxu1 %v5696_v13  ;;  %v2797_v13 = vld [vmem:[#allocation2 + $0x28] sm:$0xee] }
 0x1c9   : > { %3103 = vmatpush2.bf16.msra.mxu0 %v5703_v3  ;;  %v2839_v3 = vrot.slane %v6901_v40, 5  ;;  %v7306_v40 = vld [vmem:[#allocation2 + $0x30] sm:$0xff] }
 0x1ca   : > { %3104 = vmatprep.subr.bf16.mxu0 %v5711_v19  ;;  %v5729_v19 = vld [vmem:[%s8155_s3 + $0x754] ss:$8 sps:$4 sm:$0xff]  }
 0x1cb   : > { %2725 = vmatpush2.bf16.msra.mxu1 %v5694_v29  ;;  %v5034_v29 = vrot.slane %v2797_v13, 9  ;;  %v2840_v33 = vsel %vm6754_vm3, %v5035_v59, %v2839_v3 }
 0x1cc   : > { %2726 = vmatprep.subr.bf16.mxu1 %v5702_v5  ;;  %v5712_v5 = vld [vmem:[%s8155_s3 + $0x4a0] ss:$8 sps:$4 sm:$0xff]  }
 0x1cd   : > { %3105 = vmatpush2.bf16.msra.mxu0 %v5709_v63  ;;  %v2800_v63 = vld [vmem:[#allocation2 + $0x20] sm:$0xee]  ;;  %v2836_v17 = vsel %vm6754_vm3, %v5034_v29, %v2835_v44 }
 0x1ce   : > { %3847 = vmatprep.subr.bf16.mxu0 %v5717_v26  ;;  %v5072_v26 = vcombine.low %v2828_v9, %v2832_v0  ;;  %v5075_v22 = vcombine.high %v2836_v17, %v2840_v33  ;;  %v5726_v0 = vld [vmem:[%s8155_s3 + $0x484] ss:$8 sps:$4 sm:$0xff]   ;;  %v5037_v9 = vrot.slane %v2800_v63, 9  ;;  %v5074_v29 = vcombine.low %v2836_v17, %v2840_v33  ;;  %v5730_v63 = vld [vmem:[%s8155_s3 + $0x670] ss:$8 sps:$4 sm:$0xff]  }
 0x1cf   : > { %2727 = vmatpush2.bf16.msra.mxu1 %v5700_v16  ;;  %v3511_v16 = vshrl.u32 %v7306_v40, 16  ;;  %v5738_v33 = vld [vmem:[%s8155_s3 + $0x664] ss:$8 sps:$4 sm:$0xff]   ;;  %v3520_v17 = vshll.u32 %v7062_v61, 16  ;;  %v5736_v61 = vld [vmem:[%s8155_s3 + $0x660] ss:$8 sps:$4 sm:$0xff]  }
 0x1d0   : > { %2728 = vmatprep.subr.bf16.mxu1 %v5708_v50  ;;  %3107 = vmatmul.mubr.bf16.vlgmr.msra.gmra.mxu0 %v5070_v51  ;;  %v3514_v50 = vshll.u32 %v7306_v40, 16  ;;  %v2799_v51 = vld [vmem:[#allocation2 + $0x98] sm:$0xee] }
 0x1d1   : > { %3116 = vmatprep.mubr.bf16.mxu0 %v5073_v47  ;;  %3848 = vmatpush1.bf16.msra.mxu0 %v5715_v31  ;;  %v5718_v31 = vld [vmem:[%s8155_s3 + $0x490] ss:$8 sps:$4 sm:$0xff]   ;;  %v5741_v47 = vld [vmem:[%s8155_s3 + $0x734] ss:$8 sps:$4 sm:$0xff]   ;;  %v5036_v13 = vrot.slane %v2799_v51, 9  ;;  %v3513_v59 = vrot.slane %v3511_v16, 4 }
 0x1d2   : > { %3849 = vmatprep.subr.bf16.mxu0 %v5723_v36  ;;  %v2847_v36 = vrot.slane %v6949_v45, 5  ;;  %v3516_v3 = vrot.slane %v3514_v50, 5  ;;  %v5724_v45 = vld [vmem:[%s8155_s3 + $0x480] ss:$8 sps:$4 sm:$0xff]   ;;  %v3522_v42 = vrot.slane %v3520_v17, 5 }
 0x1d3   : > { %2729 = vmatpush2.bf16.msra.mxu1 %v5706_v43  ;;  %v5733_v43 = vld [vmem:[%s8155_s3 + $0x740] ss:$8 sps:$4 sm:$0xff]   ;;  %v5759_v51 = vld [vmem:[%s8155_s3 + $0x704] ss:$8 sps:$4 sm:$0xff]   ;;  %v5789_v17 = vld [vmem:[%s8155_s3 + $0x7b0] ss:$8 sps:$4 sm:$0xff]  }
 0x1d4   : > { %2730 = vmatprep.subr.bf16.mxu1 %v5714_v6  ;;  %v2843_v6 = vrot.slane %v6947_v23, 5  ;;  %v5739_v23 = vld [vmem:[%s8155_s3 + $0x730] ss:$8 sps:$4 sm:$0xff]  }
 0x1d5   : > { %3850 = vmatpush1.bf16.msra.mxu0 %v5721_v2  ;;  %v5732_v2 = vld [vmem:[%s8155_s3 + $0x674] ss:$8 sps:$4 sm:$0xff]  }
 0x1d6   : > { %3851 = vmatprep.subr.bf16.mxu0 %v5729_v19  ;;  %v2848_v19 = vsel %vm6754_vm3, %v5037_v9, %v2847_v36  ;;  %v2844_v44 = vsel %vm6754_vm3, %v5036_v13, %v2843_v6  ;;  %v5750_v9 = vld [vmem:[%s8155_s3 + $0x644] ss:$8 sps:$4 sm:$0xff]   ;;  %v5757_v36 = vld [vmem:[%s8155_s3 + $0x700] ss:$8 sps:$4 sm:$0xff]  }
 0x1d7   : > { %2731 = vmatpush2.bf16.msra.mxu1 %v5712_v5  ;;  %v5747_v5 = vld [vmem:[%s8155_s3 + $0x724] ss:$8 sps:$4 sm:$0xff]   ;;  %v5771_v6 = vld [vmem:[%s8155_s3 + $0x7e0] ss:$8 sps:$4 sm:$0xff]  }
 0x1d8   : > { %2732 = vmatprep.subr.bf16.mxu1 %v5720_v15  ;;  %3117 = vmatmul.mubr.bf16.gmra.mxu0 %v5072_v26  ;;  %v3517_v15 = vor.u32 %v3516_v3, %v3513_v59  ;;  %v5077_v26 = vcombine.high %v2844_v44, %v2848_v19  ;;  %v5762_v13 = vld [vmem:[%s8155_s3 + $0x624] ss:$8 sps:$4 sm:$0xff]   ;;  %v5779_v59 = vld [vmem:[%s8155_s3 + $0x7d4] ss:$8 sps:$4 sm:$0xff]   ;;  %v8174_v3 = vcombine.high %v7003_v62, %v7007_v60 }
 0x1d9   : > { %3126 = vmatprep.mubr.bf16.mxu0 %v5075_v22  ;;  %3852 = vmatpush1.bf16.msra.mxu0 %v5727_v25  ;;  %v3534_v25 = vshll.u32 %v7070_v28, 16  ;;  %v5745_v28 = vld [vmem:[%s8155_s3 + $0x720] ss:$8 sps:$4 sm:$0xff]  }
 0x1da   : > { %3853 = vmatprep.subr.bf16.mxu0 %v5735_v1  ;;  %v5753_v1 = vld [vmem:[%s8155_s3 + $0x714] ss:$8 sps:$4 sm:$0xff]   ;;  %v3518_v16 = vrot.slane %v3517_v15, 4  ;;  %v8175_v15 = vcombine.low %v7003_v62, %v7007_v60 }
 0x1db   : > { %2733 = vmatpush2.bf16.msra.mxu1 %v5718_v31  ;;  %v3536_v50 = vrot.slane %v3534_v25, 5  ;;  %v5076_v31 = vcombine.low %v2844_v44, %v2848_v19  ;;  %v5766_v19 = vld [vmem:[%s8155_s3 + $0x610] ss:$8 sps:$4 sm:$0xff]   ;;  %v5783_v44 = vld [vmem:[%s8155_s3 + $0x7c0] ss:$8 sps:$4 sm:$0xff]  }
 0x1dc   : > { %2734 = vmatprep.subr.bf16.mxu1 %v5726_v0  ;;  %v7389_v22 = vsel %vm6504_vm0, %v3518_v16, %v3522_v42  ;;  %v5791_v25 = vld [vmem:[%s8155_s3 + $0x7b4] ss:$8 sps:$4 sm:$0xff]  }
 0x1dd   : > { %3854 = vmatpush1.bf16.msra.mxu0 %v5733_v43  ;;  %v5765_v43 = vld [vmem:[%s8155_s3 + $0x7f4] ss:$8 sps:$4 sm:$0xff]  }
 0x1de   : > { %3855 = vmatprep.subr.bf16.mxu0 %v5741_v47  ;;  %v5748_v47 = vld [vmem:[%s8155_s3 + $0x640] ss:$8 sps:$4 sm:$0xff]  }
 0x1df   : > { %2735 = vmatpush2.bf16.msra.mxu1 %v5724_v45  ;;  %v5760_v45 = vld [vmem:[%s8155_s3 + $0x620] ss:$8 sps:$4 sm:$0xff]  }
 0x1e0   : > { %3405 = vmatprep.subr.bf16.mxu1 %v5732_v2  ;;  %3127 = vmatmul.mubr.bf16.gmra.mxu0 %v5074_v29  ;;  %v5785_v2 = vld [vmem:[%s8155_s3 + $0x7c4] ss:$8 sps:$4 sm:$0xff]  }
 0x1e1   : > { %3136 = vmatprep.mubr.bf16.mxu0 %v5077_v26  ;;  %3856 = vmatpush1.bf16.msra.mxu0 %v5739_v23  ;;  %v5776_v23 = vld [vmem:[%s8155_s3 + $0x604] ss:$8 sps:$4 sm:$0xff]  }
 0x1e2   : > { %2737 = vmatmul.mubr.bf16.vlgmr.msra.gmra.mxu1 %v4990_v18  ;;  %3857 = vmatprep.subr.bf16.mxu0 %v5747_v5  ;;  %v7382_v18 = vsel %vm6504_vm0, %v6892_v7, %v3536_v50  ;;  %v5742_v7 = vld [vmem:[%s8155_s3 + $0x650] ss:$8 sps:$4 sm:$0xff]   ;;  %v7469_v5 = vld [vmem:[#allocation2 + $0x28] sm:$0xff] }
 0x1e3   : > { %2746 = vmatprep.mubr.bf16.mxu1 %v4993_v58  ;;  %3406 = vmatpush1.bf16.msra.mxu1 %v5730_v63  ;;  %v5751_v58 = vld [vmem:[%s8155_s3 + $0x710] ss:$8 sps:$4 sm:$0xff]   ;;  %v5215_v0 = vcombine.high %v7389_v22, %v7382_v18  ;;  %v5774_v63 = vld [vmem:[%s8155_s3 + $0x600] ss:$8 sps:$4 sm:$0xff]   ;;  %v3553_v62 = vshrl.u32 %v7469_v5, 16  ;;  %v3556_v60 = vshll.u32 %v7469_v5, 16 }
 0x1e4   : > { %3407 = vmatprep.subr.bf16.mxu1 %v5738_v33  ;;  %v7480_v26 = vld [vmem:[#allocation2 + $0x8] sm:$0xff]  ;;  %v5782_v33 = vld [vmem:[%s8155_s3 + $0x6f4] ss:$8 sps:$4 sm:$0xff]   ;;  %v5780_v50 = vld [vmem:[%s8155_s3 + $0x6f0] ss:$8 sps:$4 sm:$0xff]  }
 0x1e5   : > { %3858 = vmatpush1.bf16.msra.mxu0 %v5745_v28  ;;  %v5797_v28 = vld [vmem:[%s8155_s3 + $0x7a4] ss:$8 sps:$4 sm:$0xff]   ;;  %v3542_v16 = vshll.u32 %v7480_v26, 16  ;;  %v3558_v42 = vrot.slane %v3556_v60, 5  ;;  %v5145_v10 = vcombine.high %v7480_v26, %v7469_v5 }
 0x1e6   : > { %3859 = vmatprep.subr.bf16.mxu0 %v5753_v1  ;;  %v3539_v1 = vshrl.u32 %v7480_v26, 16 }
 0x1e7   : > { %3408 = vmatpush1.bf16.msra.mxu1 %v5736_v61  ;;  %v5788_v61 = vld [vmem:[%s8155_s3 + $0x6e4] ss:$8 sps:$4 sm:$0xff]  }
 0x1e8   : > { %3409 = vmatprep.subr.bf16.mxu1 %v5744_v48  ;;  %3137 = vmatmul.mubr.bf16.gmra.mxu0 %v5076_v31  ;;  %v3555_v48 = vrot.slane %v3553_v62, 4  ;;  %v7504_v31 = vld [vmem:[#allocation2 + $0x98] sm:$0xff]  ;;  %v7543_v62 = vld [vmem:[#allocation2] sm:$0xff] }
 0x1e9   : > { %3860 = vmatpush1.bf16.msra.mxu0 %v5751_v58  ;;  %3879 = vmatprep.mubr.bf16.mxu0 %v5215_v0  ;;  %v5795_v58 = vld [vmem:[%s8155_s3 + $0x7a0] ss:$8 sps:$4 sm:$0xff]   ;;  %v3544_v0 = vrot.slane %v3542_v16, 5  ;;  %v3609_v60 = vshrl.u32 %v7543_v62, 16 }
 0x1ea   : > { %2747 = vmatmul.mubr.bf16.gmra.mxu1 %v4992_v8  ;;  %3861 = vmatprep.subr.bf16.mxu0 %v5759_v51  ;;  %v5773_v8 = vld [vmem:[%s8155_s3 + $0x7e4] ss:$8 sps:$4 sm:$0xff]   ;;  %v5803_v51 = vld [vmem:[%s8155_s3 + $0x794] ss:$8 sps:$4 sm:$0xff]  }
 0x1eb   : > { %2756 = vmatprep.mubr.bf16.mxu1 %v4995_v39  ;;  %3410 = vmatpush1.bf16.msra.mxu1 %v5742_v7  ;;  %v5754_v39 = vld [vmem:[%s8155_s3 + $0x630] ss:$8 sps:$4 sm:$0xff]   ;;  %v3541_v7 = vrot.slane %v3539_v1, 4 }
 0x1ec   : > { %3411 = vmatprep.subr.bf16.mxu1 %v5750_v9  ;;  %v5786_v9 = vld [vmem:[%s8155_s3 + $0x6e0] ss:$8 sps:$4 sm:$0xff]  }
 0x1ed   : > { %3862 = vmatpush1.bf16.msra.mxu0 %v5757_v36  ;;  %v7512_v36 = vld [vmem:[#allocation2 + $0x58] sm:$0xff] }
 0x1ee   : > { %3863 = vmatprep.subr.bf16.mxu0 %v5765_v43  ;;  %v5794_v43 = vld [vmem:[%s8155_s3 + $0x6d4] ss:$8 sps:$4 sm:$0xff]  }
 0x1ef   : > { %3412 = vmatpush1.bf16.msra.mxu1 %v5748_v47  ;;  %v3559_v47 = vor.u32 %v3558_v42, %v3555_v48  ;;  %v5214_v48 = vcombine.low %v7389_v22, %v7382_v18  ;;  %v5812_v18 = vld [vmem:[%s8155_s3 + $0x6a4] ss:$8 sps:$4 sm:$0xff]  }
 0x1f0   : > { %3413 = vmatprep.subr.bf16.mxu1 %v5756_v46  ;;  %v3581_v46 = vshrl.u32 %v7504_v31, 16 }
 0x1f1   : > { %3864 = vmatpush2.bf16.msra.mxu0 %v5763_v49  ;;  %v3584_v49 = vshll.u32 %v7504_v31, 16 }
 0x1f2   : > { %2757 = vmatmul.mubr.bf16.gmra.mxu1 %v4994_v4  ;;  %3865 = vmatprep.subr.bf16.mxu0 %v5773_v8  ;;  %v7453_v4 = vld [vmem:[#allocation2 + $0x78] sm:$0xff] }
 0x1f3   : > { %2766 = vmatprep.mubr.bf16.mxu1 %v8174_v3  ;;  %3414 = vmatpush1.bf16.msra.mxu1 %v5754_v39  ;;  %v5143_v29 = vcombine.high %v7306_v40, %v7453_v4  ;;  %v5801_v8 = vld [vmem:[%s8155_s3 + $0x790] ss:$8 sps:$4 sm:$0xff]   ;;  %v5809_v39 = vld [vmem:[%s8155_s3 + $0x784] ss:$8 sps:$4 sm:$0xff]   ;;  %v3570_v3 = vshll.u32 %v7512_v36, 16 }
 0x1f4   : > { %3415 = vmatprep.subr.bf16.mxu1 %v5762_v13  ;;  %v3545_v13 = vor.u32 %v3544_v0, %v3541_v7  ;;  %v3590_v7 = vshll.u32 %v7107_v30, 16  ;;  %v5804_v0 = vld [vmem:[%s8155_s3 + $0x6b0] ss:$8 sps:$4 sm:$0xff]  }
 0x1f5   : > { %3866 = vmatpush2.bf16.msra.mxu0 %v5771_v6  ;;  %v3562_v6 = vshll.u32 %v7082_v32, 16  ;;  %v5807_v32 = vld [vmem:[%s8155_s3 + $0x780] ss:$8 sps:$4 sm:$0xff]  }
 0x1f6   : > { %3867 = vmatprep.subr.bf16.mxu0 %v5779_v59  ;;  %v3567_v59 = vshrl.u32 %v7512_v36, 16 }
 0x1f7   : > { %3416 = vmatpush1.bf16.msra.mxu1 %v5760_v45  ;;  %v5792_v45 = vld [vmem:[%s8155_s3 + $0x6d0] ss:$8 sps:$4 sm:$0xff]  }
 0x1f8   : > { %3417 = vmatprep.subr.bf16.mxu1 %v5768_v41  ;;  %v3548_v41 = vshll.u32 %v7072_v11, 16  ;;  %v3572_v11 = vrot.slane %v3570_v3, 5  ;;  %v5810_v3 = vld [vmem:[%s8155_s3 + $0x6a0] ss:$8 sps:$4 sm:$0xff]  }
 0x1f9   : > { %3868 = vmatpush2.bf16.msra.mxu0 %v5777_v57  ;;  %v5800_v57 = vld [vmem:[%s8155_s3 + $0x6c4] ss:$8 sps:$4 sm:$0xff]  }
 0x1fa   : > { %2767 = vmatmul.mubr.bf16.gmra.mxu1 %v8175_v15  ;;  %3869 = vmatprep.subr.bf16.mxu0 %v5785_v2  ;;  %v3560_v2 = vrot.slane %v3559_v47, 4  ;;  %v3564_v15 = vrot.slane %v3562_v6, 5  ;;  %v3592_v6 = vrot.slane %v3590_v7, 5 }
 0x1fb   : > { %3418 = vmatpush1.bf16.msra.mxu1 %v5766_v19  ;;  %3437 = vmatprep.mubr.bf16.mxu1 %v5143_v29  ;;  %v3583_v19 = vrot.slane %v3581_v46, 4  ;;  %v7538_v29 = vld [vmem:[#allocation2 + $0x20] sm:$0xff]  ;;  %v3576_v46 = vshll.u32 %v7092_v56, 16  ;;  %v5815_v56 = vld [vmem:[%s8155_s3 + $0x694] ss:$8 sps:$4 sm:$0xff]  }
 0x1fc   : > { %3419 = vmatprep.subr.bf16.mxu1 %v5776_v23  ;;  %v3586_v23 = vrot.slane %v3584_v49, 5  ;;  %v3565_v1 = vsel %vm6504_vm0, %v3560_v2, %v3564_v15 }
 0x1fd   : > { %3870 = vmatpush2.bf16.msra.mxu0 %v5783_v44  ;;  %v3546_v44 = vrot.slane %v3545_v13, 4 }
 0x1fe   : > { %3871 = vmatprep.subr.bf16.mxu0 %v5791_v25  ;;  %v3569_v25 = vrot.slane %v3567_v59, 4  ;;  %v3587_v16 = vor.u32 %v3586_v23, %v3583_v19  ;;  %v7570_v59 = vld [vmem:[#allocation2 + $0x90] sm:$0x11] }
 0x1ff   : > { %3420 = vmatpush1.bf16.msra.mxu1 %v5774_v63  ;;  %v5798_v63 = vld [vmem:[%s8155_s3 + $0x6c0] ss:$8 sps:$4 sm:$0xff]  }
 0x200   : > { %3421 = vmatprep.subr.bf16.mxu1 %v5782_v33  ;;  %v3550_v33 = vrot.slane %v3548_v41, 5  ;;  %v3588_v49 = vrot.slane %v3587_v16, 4  ;;  %v3618_v41 = vshll.u32 %v7570_v59, 16 }
 0x201   : > { %3872 = vmatpush2.bf16.msra.mxu0 %v5789_v17  ;;  %v3612_v17 = vshll.u32 %v7543_v62, 16 }
 0x202   : > { %3873 = vmatprep.subr.bf16.mxu0 %v5797_v28  ;;  %v5806_v28 = vld [vmem:[%s8155_s3 + $0x6b4] ss:$8 sps:$4 sm:$0xff]   ;;  %v3593_v2 = vsel %vm6504_vm0, %v3588_v49, %v3592_v6 }
 0x203   : > { %3422 = vmatpush2.bf16.msra.mxu1 %v5780_v50  ;;  %v3595_v50 = vshrl.u32 %v7538_v29, 16  ;;  %v3614_v47 = vrot.slane %v3612_v17, 5 }
 0x204   : > { %3423 = vmatprep.subr.bf16.mxu1 %v5788_v61  ;;  %v3598_v61 = vshll.u32 %v7538_v29, 16 }
 0x205   : > { %3874 = vmatpush2.bf16.msra.mxu0 %v5795_v58  ;;  %v3551_v58 = vsel %vm6504_vm0, %v3546_v44, %v3550_v33  ;;  %v3597_v30 = vrot.slane %v3595_v50, 4  ;;  %v5818_v33 = vld [vmem:[%s8155_s3 + $0x684] ss:$8 sps:$4 sm:$0xff]   ;;  %v5816_v50 = vld [vmem:[%s8155_s3 + $0x680] ss:$8 sps:$4 sm:$0xff]  }
 0x206   : > { %3875 = vmatprep.subr.bf16.mxu0 %v5803_v51  ;;  %v3573_v51 = vor.u32 %v3572_v11, %v3569_v25  ;;  %v5216_v44 = vcombine.low %v3551_v58, %v3565_v1  ;;  %v5813_v11 = vld [vmem:[%s8155_s3 + $0x690] ss:$8 sps:$4 sm:$0xff]  }
 0x207   : > { %3424 = vmatpush2.bf16.msra.mxu1 %v5786_v9  ;;  %v5217_v9 = vcombine.high %v3551_v58, %v3565_v1 }
 0x208   : > { %3425 = vmatprep.subr.bf16.mxu1 %v5794_v43  ;;  %v3611_v43 = vrot.slane %v3609_v60, 4  ;;  %v3574_v13 = vrot.slane %v3573_v51, 4 }
 0x209   : > { %3876 = vmatpush2.bf16.msra.mxu0 %v5801_v8  ;;  %v3600_v8 = vrot.slane %v3598_v61, 5 }
 0x20a   : > { %3877 = vmatprep.subr.bf16.mxu0 %v5809_v39  ;;  %v3615_v23 = vor.u32 %v3614_v47, %v3611_v43  ;;  %v5142_v47 = vcombine.low %v7306_v40, %v7453_v4  ;;  %v5822_v40 = vld [vmem:[%s8155_s3 + $0x860] ss:$8 sps:$4 sm:$0xff]  }
 0x20b   : > { %3426 = vmatpush2.bf16.msra.mxu1 %v5792_v45  ;;  %v7575_v45 = vld [vmem:[#allocation2 + $0x48] sm:$0x11]  ;;  %v3601_v19 = vor.u32 %v3600_v8, %v3597_v30 }
 0x20c   : > { %3427 = vmatprep.subr.bf16.mxu1 %v5800_v57  ;;  %v3578_v57 = vrot.slane %v3576_v46, 5  ;;  %v3604_v25 = vshll.u32 %v7575_v45, 16  ;;  %v3616_v17 = vrot.slane %v3615_v23, 4 }
 0x20d   : > { %3878 = vmatpush2.bf16.msra.mxu0 %v5807_v32  ;;  %v3602_v60 = vrot.slane %v3601_v19, 4 }
 0x20e   : > { %v7556_v42 = vpop.f32.mrf.mxu0  ;;  %v3579_v15 = vsel %vm6504_vm0, %v3574_v13, %v3578_v57  ;;  %v3606_v16 = vrot.slane %v3604_v25, 5  ;;  %v5827_v13 = vld [vmem:[%s8155_s3 + $0x854] ss:$8 sps:$4 sm:$0xff]  }
 0x20f   : > { %3428 = vmatpush2.bf16.msra.mxu1 %v5798_v63  ;;  %v5219_v63 = vcombine.high %v3579_v15, %v3593_v2 }
 0x210   : > { %3429 = vmatprep.subr.bf16.mxu1 %v5806_v28  ;;  %3880 = vmatmul.mubr.bf16.vlgmr.msra.gmra.mxu0 %v5214_v48  ;;  %v7567_v22 = vpop.f32.mrf.mxu0  ;;  %v3620_v28 = vrot.slane %v3618_v41, 5  ;;  %v5821_v48 = vld [vmem:[%s8155_s3 + $0x874] ss:$8 sps:$4 sm:$0xff]   ;;  %v3607_v58 = vsel %vm6504_vm0, %v3602_v60, %v3606_v16  ;;  %v5831_v60 = vld [vmem:[%s8155_s3 + $0x830] ss:$8 sps:$4 sm:$0xff]  }
 0x211   : > { %3889 = vmatprep.mubr.bf16.mxu0 %v5217_v9  ;;  %v5819_v9 = vld [vmem:[%s8155_s3 + $0x870] ss:$8 sps:$4 sm:$0xff]   ;;  %v5836_v16 = vld [vmem:[%s8155_s3 + $0x824] ss:$8 sps:$4 sm:$0xff]  }
 0x212   : > { %v1613_v39 = vpop.f32.mrf.mxu0  ;;  %v3621_v51 = vsel %vm6504_vm0, %v3616_v17, %v3620_v28 }
 0x213   : > { %3430 = vmatpush2.bf16.msra.mxu1 %v5804_v0  ;;  %v5218_v0 = vcombine.low %v3579_v15, %v3593_v2  ;;  %v5221_v43 = vcombine.high %v3607_v58, %v3621_v51  ;;  %v5220_v41 = vcombine.low %v3607_v58, %v3621_v51  ;;  %v5144_v2 = vcombine.low %v7480_v26, %v7469_v5  ;;  %v5828_v5 = vld [vmem:[%s8155_s3 + $0x840] ss:$8 sps:$4 sm:$0xff]  }
 0x214   : > { %3431 = vmatprep.subr.bf16.mxu1 %v5812_v18  ;;  %v1615_v32 = vpop.f32.mrf.mxu0  ;;  %v5824_v18 = vld [vmem:[%s8155_s3 + $0x864] ss:$8 sps:$4 sm:$0xff]  }
 0x217   : > { %3432 = vmatpush2.bf16.msra.mxu1 %v5810_v3 }
 0x218   : > { %3433 = vmatprep.subr.bf16.mxu1 %v5815_v56  ;;  %3890 = vmatmul.mubr.bf16.gmra.mxu0 %v5216_v44  ;;  %v5825_v56 = vld [vmem:[%s8155_s3 + $0x850] ss:$8 sps:$4 sm:$0xff]  }
 0x219   : > { %v1619_v1 = vpop.f32.mrf.mxu0  ;;  %3899 = vmatprep.mubr.bf16.mxu0 %v5219_v63 }
 0x21b   : > { %3434 = vmatpush2.bf16.msra.mxu1 %v5813_v11  ;;  %v1621_v61 = vpop.f32.mrf.mxu0 }
 0x21c   : > { %3435 = vmatprep.subr.bf16.mxu1 %v5818_v33 }
 0x21d   : > { %v1623_v7 = vpop.f32.mrf.mxu0 }
 0x21f   : > { %3436 = vmatpush2.bf16.msra.mxu1 %v5816_v50  ;;  %v1625_v46 = vpop.f32.mrf.mxu0 }
 0x220   : > { %4217 = vmatprep.subr.bf16.mxu1 %v5821_v48  ;;  %3900 = vmatmul.mubr.bf16.gmra.mxu0 %v5218_v0 }
 0x221   : > { %3909 = vmatprep.mubr.bf16.mxu0 %v5221_v43 }
 0x222   : > { %3438 = vmatmul.mubr.bf16.vlgmr.msra.gmra.mxu1 %v5142_v47  ;;  %v1336_v49 = vpop.f32.mrf.mxu1  ;;  %v5837_v47 = vld [vmem:[%s8155_s3 + $0x810] ss:$8 sps:$4 sm:$0xff]  }
 0x223   : > { %v7613_v30 = vadd.f32 %v7556_v42, %v1336_v49  ;;  %3447 = vmatprep.mubr.bf16.mxu1 %v5145_v10  ;;  %4218 = vmatpush1.bf16.msra.mxu1 %v5819_v9  ;;  %v1629_v8 = vpop.f32.mrf.mxu0  ;;  %v5148_v10 = vcombine.low %v7538_v29, %v7543_v62  ;;  %v5842_v49 = vld [vmem:[%s8155_s3 + $0x804] ss:$8 sps:$4 sm:$0xff]  }
 0x224   : > { %v1338_v4 = vpop.f32.mrf.mxu1  ;;  %4219 = vmatprep.subr.bf16.mxu1 %v5824_v18 }
 0x225   : > { %v7622_v6 = vadd.f32 %v7567_v22, %v1338_v4  ;;  %v1631_v19 = vpop.f32.mrf.mxu0  ;;  %v5830_v22 = vld [vmem:[%s8155_s3 + $0x844] ss:$8 sps:$4 sm:$0xff]  }
 0x226   : > { %v1340_v3 = vpop.f32.mrf.mxu1 }
 0x227   : > { %v7624_v42 = vadd.f32 %v1613_v39, %v1340_v3  ;;  %4220 = vmatpush1.bf16.msra.mxu1 %v5822_v40  ;;  %v5147_v39 = vcombine.high %v7512_v36, %v7504_v31  ;;  %v1633_v25 = vpop.f32.mrf.mxu0  ;;  %v5845_v3 = vld [vmem:[%s8155_s3 + $0x8f4] ss:$8 sps:$4 sm:$0xff]  }
 0x228   : > { %v1342_v57 = vpop.f32.mrf.mxu1  ;;  %4221 = vmatprep.subr.bf16.mxu1 %v5827_v13  ;;  %3910 = vmatmul.mubr.bf16.gmra.mxu0 %v5220_v41 }
 0x229   : > { %v7634_v23 = vadd.f32 %v1615_v32, %v1342_v57  ;;  %v5833_v32 = vld [vmem:[%s8155_s3 + $0x834] ss:$8 sps:$4 sm:$0xff]   ;;  %v1635_v17 = vpop.f32.mrf.mxu0 }
 0x22a   : > { %3448 = vmatmul.mubr.bf16.gmra.mxu1 %v5144_v2  ;;  %v1346_v44 = vpop.f32.mrf.mxu1 }
 0x22b   : > { %v7638_v15 = vadd.f32 %v1619_v1, %v1346_v44  ;;  %3457 = vmatprep.mubr.bf16.mxu1 %v5147_v39  ;;  %4222 = vmatpush1.bf16.msra.mxu1 %v5825_v56  ;;  %v5146_v1 = vcombine.low %v7512_v36, %v7504_v31  ;;  %v5834_v31 = vld [vmem:[%s8155_s3 + $0x820] ss:$8 sps:$4 sm:$0xff]   ;;  %v1639_v36 = vpop.f32.mrf.mxu0 }
 0x22c   : > { %v1348_v26 = vpop.f32.mrf.mxu1  ;;  %4223 = vmatprep.subr.bf16.mxu1 %v5830_v22  ;;  %v5848_v22 = vld [vmem:[%s8155_s3 + $0x8e4] ss:$8 sps:$4 sm:$0xff]   ;;  %v5846_v44 = vld [vmem:[%s8155_s3 + $0x8e0] ss:$8 sps:$4 sm:$0xff]  }
 0x22d   : > { %v7646_v11 = vadd.f32 %v1621_v61, %v1348_v26  ;;  %v5149_v61 = vcombine.high %v7538_v29, %v7543_v62  ;;  %v1641_v18 = vpop.f32.mrf.mxu0  ;;  %v5840_v29 = vld [vmem:[%s8155_s3 + $0x800] ss:$8 sps:$4 sm:$0xff]   ;;  %v5849_v26 = vld [vmem:[%s8155_s3 + $0x8d0] ss:$8 sps:$4 sm:$0xff]  }
 0x22e   : > { %v1350_v63 = vpop.f32.mrf.mxu1 }
 0x22f   : > { %v7648_v33 = vadd.f32 %v1623_v7, %v1350_v63  ;;  %4224 = vmatpush1.bf16.msra.mxu1 %v5828_v5  ;;  %v5839_v7 = vld [vmem:[%s8155_s3 + $0x814] ss:$8 sps:$4 sm:$0xff]   ;;  %v1643_v62 = vpop.f32.mrf.mxu0 }
 0x230   : > { %v1352_v28 = vpop.f32.mrf.mxu1  ;;  %4225 = vmatprep.subr.bf16.mxu1 %v5833_v32  ;;  %v5851_v5 = vld [vmem:[%s8155_s3 + $0x8d4] ss:$8 sps:$4 sm:$0xff]   ;;  %v5852_v32 = vld [vmem:[%s8155_s3 + $0x8c0] ss:$8 sps:$4 sm:$0xff]  }
 0x231   : > { %v7658_v50 = vadd.f32 %v1625_v46, %v1352_v28  ;;  %v1645_v2 = vpop.f32.mrf.mxu0  ;;  %v5857_v63 = vld [vmem:[%s8155_s3 + $0x8b4] ss:$8 sps:$4 sm:$0xff]   ;;  %v5858_v28 = vld [vmem:[%s8155_s3 + $0x8a0] ss:$8 sps:$4 sm:$0xff]  }
 0x232   : > { %3458 = vmatmul.mubr.bf16.gmra.mxu1 %v5146_v1  ;;  %v1356_v48 = vpop.f32.mrf.mxu1  ;;  %v5863_v1 = vld [vmem:[%s8155_s3 + $0x894] ss:$8 sps:$4 sm:$0xff]  }
 0x233   : > { %v7662_v58 = vadd.f32 %v1629_v8, %v1356_v48  ;;  %3467 = vmatprep.mubr.bf16.mxu1 %v5149_v61  ;;  %4226 = vmatpush1.bf16.msra.mxu1 %v5831_v60  ;;  %v5855_v60 = vld [vmem:[%s8155_s3 + $0x8b0] ss:$8 sps:$4 sm:$0xff]   ;;  %v5866_v61 = vld [vmem:[%s8155_s3 + $0x884] ss:$8 sps:$4 sm:$0xff]   ;;  %v5864_v48 = vld [vmem:[%s8155_s3 + $0x880] ss:$8 sps:$4 sm:$0xff]  }
 0x234   : > { %v1358_v51 = vpop.f32.mrf.mxu1  ;;  %4227 = vmatprep.subr.bf16.mxu1 %v5836_v16  ;;  %v5861_v16 = vld [vmem:[%s8155_s3 + $0x890] ss:$8 sps:$4 sm:$0xff]  }
 0x235   : > { %v7670_v0 = vadd.f32 %v1631_v19, %v1358_v51 }
 0x236   : > { %v1360_v9 = vpop.f32.mrf.mxu1 }
 0x237   : > { %v7672_v43 = vadd.f32 %v1633_v25, %v1360_v9  ;;  %4228 = vmatpush1.bf16.msra.mxu1 %v5834_v31  ;;  %v5854_v25 = vld [vmem:[%s8155_s3 + $0x8c4] ss:$8 sps:$4 sm:$0xff]  }
 0x238   : > { %v1362_v46 = vpop.f32.mrf.mxu1  ;;  %4229 = vmatprep.subr.bf16.mxu1 %v5839_v7 }
 0x239   : > { %v7682_v40 = vadd.f32 %v1635_v17, %v1362_v46  ;;  %v5860_v17 = vld [vmem:[%s8155_s3 + $0x8a4] ss:$8 sps:$4 sm:$0xff]   ;;  %v3943_v46 = vld [vmem:[#allocation2 + $0x70] sm:$0xee] }
 0x23a   : > { %3468 = vmatmul.mubr.bf16.gmra.mxu1 %v5148_v10  ;;  %v1366_v4 = vpop.f32.mrf.mxu1 }
 0x23b   : > { %v7684_v8 = vadd.f32 %v1639_v36, %v1366_v4  ;;  %4230 = vmatpush1.bf16.msra.mxu1 %v5837_v47  ;;  %4249 = vmatprep.mubr.bf16.mxu1 %v5295_v14  ;;  %v5843_v14 = vld [vmem:[%s8155_s3 + $0x8f0] ss:$8 sps:$4 sm:$0xff]  }
 0x23c   : > { %v1368_v13 = vpop.f32.mrf.mxu1  ;;  %4231 = vmatprep.subr.bf16.mxu1 %v5842_v49 }
 0x23d   : > { %v7695_v41 = vadd.f32 %v1641_v18, %v1368_v13  ;;  %v3942_v18 = vld [vmem:[#allocation2 + $0x20] sm:$0xee] }
 0x23e   : > { %v1370_v56 = vpop.f32.mrf.mxu1 }
 0x23f   : > { %v7697_v57 = vadd.f32 %v1643_v62, %v1370_v56  ;;  %4232 = vmatpush1.bf16.msra.mxu1 %v5840_v29 }
 0x240   : > { %v1372_v19 = vpop.f32.mrf.mxu1  ;;  %4233 = vmatprep.subr.bf16.mxu1 %v5845_v3 }
 0x241   : > { %v7705_v39 = vadd.f32 %v1645_v2, %v1372_v19 }
 0x243   : > { %4234 = vmatpush2.bf16.msra.mxu1 %v5843_v14 }
 0x244   : > { %4235 = vmatprep.subr.bf16.mxu1 %v5848_v22 }
 0x247   : > { %4236 = vmatpush2.bf16.msra.mxu1 %v5846_v44 }
 0x248   : > { %4237 = vmatprep.subr.bf16.mxu1 %v5851_v5 }
 0x24b   : > { %4238 = vmatpush2.bf16.msra.mxu1 %v5849_v26 }
 0x24c   : > { %4239 = vmatprep.subr.bf16.mxu1 %v5854_v25 }
 0x24f   : > { %4240 = vmatpush2.bf16.msra.mxu1 %v5852_v32 }
 0x250   : > { %4241 = vmatprep.subr.bf16.mxu1 %v5857_v63  ;;  %v7815_v2 = vpop.f32.mrf.mxu0 }
 0x253   : > { %4242 = vmatpush2.bf16.msra.mxu1 %v5855_v60 }
 0x254   : > { %4243 = vmatprep.subr.bf16.mxu1 %v5860_v17 }
 0x257   : > { %4244 = vmatpush2.bf16.msra.mxu1 %v5858_v28 }
 0x258   : > { %4245 = vmatprep.subr.bf16.mxu1 %v5863_v1 }
 0x25b   : > { %4246 = vmatpush2.bf16.msra.mxu1 %v5861_v16 }
 0x25c   : > { %4247 = vmatprep.subr.bf16.mxu1 %v5866_v61 }
 0x25f   : > { %4248 = vmatpush2.bf16.msra.mxu1 %v5864_v48 }
 0x262   : > { %v1966_v31 = vpop.f32.mrf.mxu1  ;;  %4250 = vmatmul.mubr.bf16.vlgmr.msra.gmra.mxu1 %v5294_v34  ;;  %v5260_v34 = vrot.slane %v3942_v18, 9 }
 0x263   : > { %v7750_v36 = vadd.f32 %v1966_v31, %v7613_v30  ;;  %4259 = vmatprep.mubr.bf16.mxu1 %v5297_v27  ;;  %v3986_v27 = vrot.slane %v7575_v45, 5  ;;  %v5261_v30 = vrot.slane %v3943_v46, 9 }
 0x264   : > { %v1968_v51 = vpop.f32.mrf.mxu1 }
 0x265   : > { %v7756_v7 = vadd.f32 %v1968_v51, %v7622_v6  ;;  %v3990_v6 = vrot.slane %v7570_v59, 5  ;;  %v3987_v54 = vsel %vm6754_vm3, %v5260_v34, %v3986_v27 }
 0x266   : > { %v1970_v9 = vpop.f32.mrf.mxu1 }
 0x267   : > { %v7759_v47 = vadd.f32 %v1970_v9, %v7624_v42  ;;  %v3991_v37 = vsel %vm6754_vm3, %v5261_v30, %v3990_v6 }
 0x268   : > { %v1972_v10 = vpop.f32.mrf.mxu1  ;;  %v5300_v13 = vcombine.low %v3987_v54, %v3991_v37 }
 0x269   : > { %v7762_v55 = vadd.f32 %v1972_v10, %v7634_v23 }
 0x26a   : > { %v1976_v53 = vpop.f32.mrf.mxu1  ;;  %4260 = vmatmul.mubr.bf16.gmra.mxu1 %v5296_v20 }
 0x26b   : > { %v7770_v42 = vadd.f32 %v1976_v53, %v7638_v15  ;;  %4269 = vmatprep.mubr.bf16.mxu1 %v5299_v21  ;;  %v5301_v15 = vcombine.high %v3987_v54, %v3991_v37 }
 0x26c   : > { %v1978_v23 = vpop.f32.mrf.mxu1 }
 0x26d   : > { %v7776_v49 = vadd.f32 %v1978_v23, %v7646_v11 }
 0x26e   : > { %v1980_v4 = vpop.f32.mrf.mxu1 }
 0x26f   : > { %v7783_v20 = vadd.f32 %v1980_v4, %v7648_v33 }
 0x270   : > { %v1982_v59 = vpop.f32.mrf.mxu1 }
 0x271   : > { %v7786_v45 = vadd.f32 %v1982_v59, %v7658_v50 }
 0x272   : > { %v1986_v21 = vpop.f32.mrf.mxu1  ;;  %4270 = vmatmul.mubr.bf16.gmra.mxu1 %v5298_v24 }
 0x273   : > { %v7792_v11 = vadd.f32 %v1986_v21, %v7662_v58  ;;  %4279 = vmatprep.mubr.bf16.mxu1 %v5301_v15 }
 0x274   : > { %v1988_v29 = vpop.f32.mrf.mxu1 }
 0x275   : > { %v7795_v38 = vadd.f32 %v1988_v29, %v7670_v0 }
 0x276   : > { %v1990_v33 = vpop.f32.mrf.mxu1 }
 0x277   : > { %v7798_v62 = vadd.f32 %v1990_v33, %v7672_v43 }
 0x278   : > { %v1992_v50 = vpop.f32.mrf.mxu1 }
 0x279   : > { %v7801_v3 = vadd.f32 %v1992_v50, %v7682_v40  ;;  %v7817_v40 = vpop.f32.mrf.mxu0 }
 0x27a   : > { %v1996_v56 = vpop.f32.mrf.mxu1  ;;  %4280 = vmatmul.mubr.bf16.gmra.mxu1 %v5300_v13 }
 0x27b   : > { %v7804_v35 = vadd.f32 %v1996_v56, %v7684_v8  ;;  %v7819_v19 = vpop.f32.mrf.mxu0 }
 0x27c   : > { %v1998_v12 = vpop.f32.mrf.mxu1 }
 0x27d   : > { %v7807_v24 = vadd.f32 %v1998_v12, %v7695_v41  ;;  %v7821_v8 = vpop.f32.mrf.mxu0 }
 0x27e   : > { %v2000_v58 = vpop.f32.mrf.mxu1 }
 0x27f   : > { %v7810_v0 = vadd.f32 %v2000_v58, %v7697_v57  ;;  %v7823_v22 = vpop.f32.mrf.mxu0 }
 0x280   : > { %v2002_v43 = vpop.f32.mrf.mxu1 }
 0x281   : > { %v7813_v14 = vadd.f32 %v2002_v43, %v7705_v39  ;;  %v7825_v41 = vpop.f32.mrf.mxu0 }
 0x283   : > { %v7827_v44 = vpop.f32.mrf.mxu0 }
 0x285   : > { %v7829_v57 = vpop.f32.mrf.mxu0 }
 0x287   : > { %v7831_v5 = vpop.f32.mrf.mxu0 }
 0x289   : > { %v7833_v26 = vpop.f32.mrf.mxu0 }
 0x28b   : > { %v7835_v32 = vpop.f32.mrf.mxu0 }
 0x28d   : > { %v7837_v60 = vpop.f32.mrf.mxu0 }
 0x28f   : > { %v7841_v28 = vpop.f32.mrf.mxu0 }
 0x291   : > { %v7845_v16 = vpop.f32.mrf.mxu0 }
 0x293   : > { %v7849_v48 = vpop.f32.mrf.mxu0 }
 0x295   : > { %v7853_v51 = vpop.f32.mrf.mxu0 }
 0x297   : > { %v3108_v9 = vpop.f32.mrf.mxu0 }
 0x299   : > { %v3110_v46 = vpop.f32.mrf.mxu0 }
 0x29b   : > { %v7859_v53 = vpop.f32.mrf.mxu0 }
 0x29d   : > { %v7863_v27 = vpop.f32.mrf.mxu0 }
 0x29f   : > { %v7867_v6 = vpop.f32.mrf.mxu0 }
 0x2a1   : > { %v7871_v4 = vpop.f32.mrf.mxu0 }
 0x2a2   : > { %v2738_v39 = vpop.f32.mrf.mxu1  ;;  %8178 = vst [vmem:[#allocation5_spill] sm:$0xff] %v7871_v4 }
 0x2a3   : > { %v7875_v37 = vpop.f32.mrf.mxu0 }
 0x2a4   : > { %v2740_v25 = vpop.f32.mrf.mxu1  ;;  %8180 = vst [vmem:[#allocation7_spill] sm:$0xff] %v7875_v37 }
 0x2a5   : > { %v7879_v15 = vpop.f32.mrf.mxu0 }
 0x2a6   : > { %v2742_v63 = vpop.f32.mrf.mxu1  ;;  %8182 = vst [vmem:[#allocation9_spill] sm:$0xff] %v7879_v15 }
 0x2a7   : > { %v7883_v29 = vpop.f32.mrf.mxu0 }
 0x2a8   : > { %v7839_v17 = vpop.f32.mrf.mxu1  ;;  %8184 = vst [vmem:[#allocation11_spill] sm:$0xff] %v7883_v29 }
 0x2a9   : > { %v7887_v13 = vpop.f32.mrf.mxu0 }
 0x2aa   : > { %v7843_v1 = vpop.f32.mrf.mxu1  ;;  %8186 = vst [vmem:[#allocation13_spill] sm:$0xff] %v7887_v13 }
 0x2ab   : > { %v7889_v12 = vpop.f32.mrf.mxu0 }
 0x2ac   : > { %v7847_v61 = vpop.f32.mrf.mxu1  ;;  %8187 = vst [vmem:[#allocation14_spill] sm:$0xff] %v7889_v12 }
 0x2ad   : > { %v7891_v43 = vpop.f32.mrf.mxu0 }
 0x2ae   : > { %v7851_v31 = vpop.f32.mrf.mxu1  ;;  %8188 = vst [vmem:[#allocation15_spill] sm:$0xff] %v7891_v43 }
 0x2b0   : > { %v7855_v18 = vpop.f32.mrf.mxu1 }
 0x2b2   : > { %v7857_v10 = vpop.f32.mrf.mxu1 }
 0x2b4   : > { %v7861_v34 = vpop.f32.mrf.mxu1 }
 0x2b6   : > { %v7865_v30 = vpop.f32.mrf.mxu1 }
 0x2b7   : > { %8176 = vst [vmem:[#allocation3_spill] sm:$0xff] %v7865_v30 }
 0x2b8   : > { %v7869_v23 = vpop.f32.mrf.mxu1 }
 0x2b9   : > { %8177 = vst [vmem:[#allocation4_spill] sm:$0xff] %v7869_v23 }
 0x2ba   : > { %v7873_v54 = vpop.f32.mrf.mxu1 }
 0x2bb   : > { %8179 = vst [vmem:[#allocation6_spill] sm:$0xff] %v7873_v54 }
 0x2bc   : > { %v7877_v59 = vpop.f32.mrf.mxu1 }
 0x2bd   : > { %8181 = vst [vmem:[#allocation8_spill] sm:$0xff] %v7877_v59  ;;  %v7895_v59 = vpop.f32.mrf.mxu0 }
 0x2be   : > { %v7881_v21 = vpop.f32.mrf.mxu1  ;;  %8190 = vst [vmem:[#allocation17_spill] sm:$0xff] %v7895_v59 }
 0x2bf   : > { %8183 = vst [vmem:[#allocation10_spill] sm:$0xff] %v7881_v21  ;;  %v7899_v21 = vpop.f32.mrf.mxu0 }
 0x2c0   : > { %v7885_v33 = vpop.f32.mrf.mxu1  ;;  %8192 = vst [vmem:[#allocation19_spill] sm:$0xff] %v7899_v21 }
 0x2c1   : > { %8185 = vst [vmem:[#allocation12_spill] sm:$0xff] %v7885_v33  ;;  %v7903_v33 = vpop.f32.mrf.mxu0 }
 0x2c2   : > { %8194 = vst [vmem:[#allocation21_spill] sm:$0xff] %v7903_v33 }
 0x2c3   : > { %v7907_v13 = vpop.f32.mrf.mxu0 }
 0x2c4   : > { %8196 = vst [vmem:[#allocation23_spill] sm:$0xff] %v7907_v13 }
 0x2d0   : > { %v3881_v12 = vpop.f32.mrf.mxu0 }
 0x2d2   : > { %v3883_v43 = vpop.f32.mrf.mxu0 }
 0x2d4   : > { %v7913_v30 = vpop.f32.mrf.mxu0 }
 0x2d5   : > { %8199 = vst [vmem:[#allocation26_spill] sm:$0xff] %v7913_v30  ;;  %v2336_v30 = vadd.f32 %v7817_v40, %v7756_v7  ;;  %v2340_v7 = vadd.f32 %v7825_v41, %v7776_v49  ;;  %v2342_v40 = vadd.f32 %v7829_v57, %v7786_v45  ;;  %v2345_v45 = vadd.f32 %v7835_v32, %v7798_v62 }
 0x2d6   : > { %v2348_v41 = vadd.f32 %v7845_v16, %v7807_v24  ;;  %v7977_v62 = vadd.f32 %v7849_v48, %v7810_v0  ;;  %v7991_v0 = vadd.f32 %v7853_v51, %v7813_v14  ;;  %v8213_v51 = vld [vmem:[#allocation7_spill] sm:$0xff] }
 0x2d7   : > { %v2784_v24 = vadd.f32 %v7855_v18, %v2342_v40 }
 0x2e2   : > { %v3439_v50 = vpop.f32.mrf.mxu1 }
 0x2e4   : > { %v3441_v56 = vpop.f32.mrf.mxu1 }
 0x2e6   : > { %v3443_v58 = vpop.f32.mrf.mxu1 }
 0x2e8   : > { %v7893_v54 = vpop.f32.mrf.mxu1 }
 0x2e9   : > { %8189 = vst [vmem:[#allocation16_spill] sm:$0xff] %v7893_v54 }
 0x2ea   : > { %v7897_v15 = vpop.f32.mrf.mxu1 }
 0x2eb   : > { %8191 = vst [vmem:[#allocation18_spill] sm:$0xff] %v7897_v15  ;;  %v7917_v15 = vpop.f32.mrf.mxu0 }
 0x2ec   : > { %v7901_v29 = vpop.f32.mrf.mxu1  ;;  %8201 = vst [vmem:[#allocation28_spill] sm:$0xff] %v7917_v15 }
 0x2ed   : > { %8193 = vst [vmem:[#allocation20_spill] sm:$0xff] %v7901_v29  ;;  %v7921_v29 = vpop.f32.mrf.mxu0 }
 0x2ee   : > { %v7905_v37 = vpop.f32.mrf.mxu1  ;;  %8203 = vst [vmem:[#allocation30_spill] sm:$0xff] %v7921_v29  ;;  %v2337_v29 = vadd.f32 %v7819_v19, %v7759_v47 }
 0x2ef   : > { %8195 = vst [vmem:[#allocation22_spill] sm:$0xff] %v7905_v37  ;;  %v7925_v37 = vpop.f32.mrf.mxu0 }
 0x2f0   : > { %v7909_v4 = vpop.f32.mrf.mxu1  ;;  %8205 = vst [vmem:[#allocation32_spill] sm:$0xff] %v7925_v37  ;;  %v2338_v37 = vadd.f32 %v7821_v8, %v7762_v55  ;;  %v2343_v55 = vadd.f32 %v7831_v5, %v7792_v11  ;;  %v2347_v11 = vadd.f32 %v7841_v28, %v7804_v35  ;;  %v8207_v35 = vsub.s32 0, %v6375_v52 }
 0x2f1   : > { %8197 = vst [vmem:[#allocation24_spill] sm:$0xff] %v7909_v4  ;;  %v2335_v4 = vadd.f32 %v7815_v2, %v7750_v36  ;;  %v2339_v36 = vadd.f32 %v7823_v22, %v7770_v42  ;;  %v2341_v2 = vadd.f32 %v7827_v44, %v7783_v20  ;;  %v4306_v42 = vld [vmem:[%s8156_s4] sm:$0x3]  ;;  %v2344_v20 = vadd.f32 %v7833_v26, %v7795_v38 }
 0x2f2   : > { %v7911_v23 = vpop.f32.mrf.mxu1  ;;  %v2780_v19 = vadd.f32 %v7839_v17, %v2338_v37  ;;  %v2346_v22 = vadd.f32 %v7837_v60, %v7801_v3  ;;  %v7983_v26 = vrot.slane %v4306_v42, %v8207_v35  ;;  %v2785_v17 = vadd.f32 %v7857_v10, %v2343_v55  ;;  %v8210_v10 = vld [vmem:[#allocation3_spill] sm:$0xff]  ;;  %v8214_v37 = vld [vmem:[#allocation9_spill] sm:$0xff] }
 0x2f3   : > { %8198 = vst [vmem:[#allocation25_spill] sm:$0xff] %v7911_v23  ;;  %v2777_v23 = vadd.f32 %v2738_v39, %v2335_v4  ;;  %v2781_v49 = vadd.f32 %v7843_v1, %v2339_v36  ;;  %v2783_v38 = vadd.f32 %v7851_v31, %v2341_v2  ;;  %v2786_v28 = vadd.f32 %v7861_v34, %v2344_v20  ;;  %v8211_v34 = vld [vmem:[#allocation4_spill] sm:$0xff]  ;;  %v8221_v20 = vld [vmem:[#allocation6_spill] sm:$0xff] }
 0x2f4   : > { %v7915_v59 = vpop.f32.mrf.mxu1 }
 0x2f5   : > { %8200 = vst [vmem:[#allocation27_spill] sm:$0xff] %v7915_v59  ;;  %v7933_v59 = vpop.f32.mrf.mxu0  ;;  %v3151_v1 = vadd.f32 %v7867_v6, %v2781_v49  ;;  %v3153_v4 = vadd.f32 %v8213_v51, %v2783_v38  ;;  %v8224_v38 = vld [vmem:[#allocation15_spill] sm:$0xff]  ;;  %v8230_v51 = vld [vmem:[#allocation17_spill] sm:$0xff] }
 0x2f6   : > { %v7919_v21 = vpop.f32.mrf.mxu1 }
 0x2f7   : > { %8202 = vst [vmem:[#allocation29_spill] sm:$0xff] %v7919_v21  ;;  %v2778_v21 = vadd.f32 %v2740_v25, %v2336_v30  ;;  %v7941_v54 = vpop.f32.mrf.mxu0  ;;  %v2782_v25 = vadd.f32 %v7847_v61, %v2340_v7  ;;  %v8208_v61 = vld [vmem:[#allocation16_spill] sm:$0xff]  ;;  %v2788_v30 = vadd.f32 %v8211_v34, %v2346_v22  ;;  %v8219_v7 = vld [vmem:[#allocation13_spill] sm:$0xff]  ;;  %v8222_v22 = vld [vmem:[#allocation22_spill] sm:$0xff] }
 0x2f8   : > { %v7923_v33 = vpop.f32.mrf.mxu1  ;;  %v3156_v2 = vadd.f32 %v8219_v7, %v2786_v28  ;;  %v8225_v28 = vld [vmem:[#allocation8_spill] sm:$0xff] }
 0x2f9   : > { %8204 = vst [vmem:[#allocation31_spill] sm:$0xff] %v7923_v33  ;;  %v2779_v33 = vadd.f32 %v2742_v63, %v2337_v29  ;;  %v3148_v39 = vadd.f32 %v3110_v46, %v2778_v21  ;;  %v7971_v5 = vpop.f32.mrf.mxu0  ;;  %v3150_v63 = vadd.f32 %v7863_v27, %v2780_v19  ;;  %v8209_v46 = vsub.s32 1, %v6375_v52  ;;  %v8216_v52 = vld [vmem:[#allocation18_spill] sm:$0xff] }
 0x2fa   : > { %v7927_v13 = vpop.f32.mrf.mxu1  ;;  %v2787_v27 = vadd.f32 %v8210_v10, %v2345_v45  ;;  %v3154_v21 = vadd.f32 %v8214_v37, %v2784_v24  ;;  %v2789_v45 = vadd.f32 %v8221_v20, %v2347_v11  ;;  %v3158_v35 = vadd.f32 %v8224_v38, %v2788_v30 }
 0x2fb   : > { %8206 = vst [vmem:[#allocation33_spill] sm:$0xff] %v7927_v13  ;;  %v3147_v13 = vadd.f32 %v3108_v9, %v2777_v23  ;;  %v3479_v44 = vadd.f32 %v3441_v56, %v3148_v39  ;;  %v3149_v57 = vadd.f32 %v7859_v53, %v2779_v33  ;;  %v3481_v48 = vadd.f32 %v8208_v61, %v3150_v63  ;;  %v7995_v31 = vpop.f32.mrf.mxu0  ;;  %v8212_v23 = vld [vmem:[#allocation5_spill] sm:$0xff] }
 0x2fc   : > { %v7935_v15 = vpop.f32.mrf.mxu1  ;;  %v7999_v53 = vrot.slane %v4306_v42, %v8209_v46  ;;  %v3152_v14 = vadd.f32 %v8212_v23, %v2782_v25  ;;  %v3482_v56 = vadd.f32 %v8216_v52, %v3151_v1  ;;  %v8220_v42 = vld [vmem:[#allocation28_spill] sm:$0xff]  ;;  %v2790_v1 = vadd.f32 %v8225_v28, %v2348_v41  ;;  %v8229_v23 = vld [vmem:[#allocation25_spill] sm:$0xff] }
 0x2fd   : > { %v3478_v8 = vadd.f32 %v3439_v50, %v3147_v13  ;;  %v3480_v32 = vadd.f32 %v3443_v58, %v3149_v57  ;;  %v3921_v18 = vadd.f32 %v3883_v43, %v3479_v44  ;;  %v8215_v50 = vld [vmem:[#allocation26_spill] sm:$0xff]  ;;  %v8218_v43 = vld [vmem:[#allocation11_spill] sm:$0xff]  ;;  %v8014_v19 = vpop.f32.mrf.mxu0  ;;  %v3923_v49 = vadd.f32 %v8220_v42, %v3481_v48 }
 0x2fe   : > { %v7951_v47 = vpop.f32.mrf.mxu1  ;;  %v3155_v36 = vadd.f32 %v8218_v43, %v2785_v17  ;;  %v3484_v44 = vadd.f32 %v8222_v22, %v3153_v4  ;;  %v8223_v57 = vld [vmem:[#allocation14_spill] sm:$0xff]  ;;  %v3159_v41 = vadd.f32 %v8230_v51, %v2789_v45  ;;  %v8239_v51 = vld [vmem:[#allocation23_spill] sm:$0xff] }
 0x2ff   : > { %v3920_v60 = vadd.f32 %v3881_v12, %v3478_v8  ;;  %v3922_v13 = vadd.f32 %v8215_v50, %v3480_v32  ;;  %v8217_v12 = vld [vmem:[#allocation20_spill] sm:$0xff]  ;;  %v3157_v25 = vadd.f32 %v8223_v57, %v2787_v27  ;;  %v8227_v48 = vld [vmem:[#allocation30_spill] sm:$0xff]  ;;  %v8033_v10 = vpop.f32.mrf.mxu0 }
 0x300   : > { %v7979_v3 = vpop.f32.mrf.mxu1  ;;  %v3483_v58 = vadd.f32 %v8217_v12, %v3152_v14  ;;  %v3924_v11 = vadd.f32 %v8227_v48, %v3482_v56  ;;  %v3486_v14 = vadd.f32 %v8229_v23, %v3155_v36  ;;  %v3926_v37 = vadd.f32 %v7933_v59, %v3484_v44  ;;  %v8232_v56 = vld [vmem:[#allocation27_spill] sm:$0xff]  ;;  %v8235_v57 = vld [vmem:[#allocation12_spill] sm:$0xff] }
 0x301   : > { %v3487_v12 = vadd.f32 %v8232_v56, %v3156_v2  ;;  %v3911_v7 = vpop.f32.mrf.mxu0  ;;  %v2792_v38 = vadd.f32 %v8235_v57, %v7991_v0  ;;  %v8237_v48 = vld [vmem:[#allocation31_spill] sm:$0xff] }
 0x302   : > { %v3928_v45 = vadd.f32 %v7971_v5, %v3486_v14 }
 0x303   : > { %v3913_v28 = vpop.f32.mrf.mxu0 }
 0x322   : > { %v4251_v16 = vpop.f32.mrf.mxu1 }
 0x323   : > { %v4290_v9 = vadd.f32 %v4251_v16, %v3920_v60  ;;  %v8226_v16 = vld [vmem:[#allocation24_spill] sm:$0xff] }
 0x324   : > { %v4253_v6 = vpop.f32.mrf.mxu1  ;;  %v3485_v61 = vadd.f32 %v8226_v16, %v3154_v21 }
 0x325   : > { %v8007_v29 = vadd.f32 %v7983_v26, %v4290_v9  ;;  %v4291_v33 = vadd.f32 %v4253_v6, %v3921_v18  ;;  %v8228_v18 = vld [vmem:[#allocation32_spill] sm:$0xff] }
 0x326   : > { %v4255_v40 = vpop.f32.mrf.mxu1  ;;  %v3925_v46 = vadd.f32 %v8228_v18, %v3483_v58  ;;  %v3927_v36 = vadd.f32 %v7941_v54, %v3485_v61 }
 0x327   : > { %v4334_v55 = vmin.f32 %v8007_v29, 20.0  ;;  %v8018_v8 = vadd.f32 %v7999_v53, %v4291_v33  ;;  %v4292_v39 = vadd.f32 %v4255_v40, %v3922_v13  ;;  %v8231_v13 = vld [vmem:[#allocation10_spill] sm:$0xff] }
 0x328   : > { %v4257_v24 = vpop.f32.mrf.mxu1  ;;  %v2791_v52 = vadd.f32 %v8231_v13, %v7977_v62 }
 0x329   : > { %v4350_v32 = vmul.f32 1.442695, %v4334_v55  ;;  %v4335_v63 = vmin.f32 %v8018_v8, 20.0  ;;  %v8027_v60 = vadd.f32 %v7983_v26, %v4292_v39  ;;  %v4293_v17 = vadd.f32 %v4257_v24, %v3923_v49  ;;  %v8233_v39 = vld [vmem:[#allocation29_spill] sm:$0xff]  ;;  %v8234_v49 = vld [vmem:[#allocation19_spill] sm:$0xff] }
 0x32a   : > { %v4261_v9 = vpop.f32.mrf.mxu1  ;;  %v3488_v42 = vadd.f32 %v8233_v39, %v3157_v25  ;;  %v3160_v20 = vadd.f32 %v8234_v49, %v2790_v1  ;;  %v8236_v24 = vld [vmem:[#allocation21_spill] sm:$0xff] }
 0x32b   : > { %5931 = vpow2.f32 %v4350_v32  ;;  %v4352_v27 = vmul.f32 1.442695, %v4335_v63  ;;  %v4336_v34 = vmin.f32 %v8027_v60, 20.0  ;;  %v8037_v30 = vadd.f32 %v7999_v53, %v4293_v17 }
 0x32c   : > { %v4294_v4 = vadd.f32 %v4261_v9, %v3924_v11  ;;  %v4263_v6 = vpop.f32.mrf.mxu1  ;;  %v3161_v32 = vadd.f32 %v8236_v24, %v2791_v52  ;;  %v3929_v17 = vadd.f32 %v7995_v31, %v3487_v12  ;;  %v3489_v11 = vadd.f32 %v8237_v48, %v3158_v35  ;;  %v8238_v9 = vld [vmem:[#allocation33_spill] sm:$0xff] }
 0x32d   : > { %5933 = vpow2.f32 %v4352_v27  ;;  %v4354_v21 = vmul.f32 1.442695, %v4336_v34  ;;  %v4337_v33 = vmin.f32 %v8037_v30, 20.0  ;;  %v4295_v50 = vadd.f32 %v4263_v6, %v3925_v46 }
 0x32e   : > { %v8047_v58 = vadd.f32 %v7983_v26, %v4294_v4  ;;  %v4265_v43 = vpop.f32.mrf.mxu1  ;;  %v3490_v18 = vadd.f32 %v8238_v9, %v3159_v41  ;;  %v3930_v46 = vadd.f32 %v8014_v19, %v3488_v42  ;;  %v3491_v23 = vadd.f32 %v7935_v15, %v3160_v20  ;;  %v3915_v41 = vpop.f32.mrf.mxu0 }
 0x32f   : > { %5935 = vpow2.f32 %v4354_v21  ;;  %v4356_v40 = vmul.f32 1.442695, %v4337_v33  ;;  %v8051_v59 = vadd.f32 %v7999_v53, %v4295_v50  ;;  %v4296_v55 = vadd.f32 %v4265_v43, %v3926_v37 }
 0x330   : > { %v4338_v62 = vmin.f32 %v8047_v58, 20.0  ;;  %v4267_v2 = vpop.f32.mrf.mxu1  ;;  %v3492_v14 = vadd.f32 %v7951_v47, %v3161_v32  ;;  %v3162_v4 = vadd.f32 %v8239_v51, %v2792_v38  ;;  %v3931_v15 = vadd.f32 %v8033_v10, %v3489_v11  ;;  %v3917_v49 = vpop.f32.mrf.mxu0 }
 0x331   : > { %5937 = vpow2.f32 %v4356_v40  ;;  %v4339_v22 = vmin.f32 %v8051_v59, 20.0  ;;  %v8059_v54 = vadd.f32 %v7983_v26, %v4296_v55  ;;  %v4297_v44 = vadd.f32 %v4267_v2, %v3927_v36 }
 0x332   : > { %v4358_v25 = vmul.f32 1.442695, %v4338_v62  ;;  %v4271_v63 = vpop.f32.mrf.mxu1  ;;  %v3493_v50 = vadd.f32 %v7979_v3, %v3162_v4  ;;  %v3932_v47 = vadd.f32 %v3911_v7, %v3490_v18  ;;  %v3933_v42 = vadd.f32 %v3913_v28, %v3491_v23 }
 0x333   : > { %v4360_v1 = vmul.f32 1.442695, %v4339_v22  ;;  %v4340_v5 = vmin.f32 %v8059_v54, 20.0  ;;  %v8067_v16 = vadd.f32 %v7999_v53, %v4297_v44  ;;  %v4298_v61 = vadd.f32 %v4271_v63, %v3928_v45 }
 0x334   : > { %5939 = vpow2.f32 %v4358_v25  ;;  %v4273_v0 = vpop.f32.mrf.mxu1  ;;  %v3934_v3 = vadd.f32 %v3915_v41, %v3492_v14  ;;  %v3935_v57 = vadd.f32 %v3917_v49, %v3493_v50 }
 0x335   : > { %5941 = vpow2.f32 %v4360_v1  ;;  %v4362_v27 = vmul.f32 1.442695, %v4340_v5  ;;  %v4341_v31 = vmin.f32 %v8067_v16, 20.0  ;;  %v8074_v34 = vadd.f32 %v7983_v26, %v4298_v61 }
 0x336   : > { %v4299_v35 = vadd.f32 %v4273_v0, %v3929_v17  ;;  %v4275_v6 = vpop.f32.mrf.mxu1 }
 0x337   : > { %5943 = vpow2.f32 %v4362_v27  ;;  %v4364_v37 = vmul.f32 1.442695, %v4341_v31  ;;  %v4342_v19 = vmin.f32 %v8074_v34, 20.0  ;;  %v4300_v21 = vadd.f32 %v4275_v6, %v3930_v46 }
 0x338   : > { %v5932_v33 = vpop.eup %5931  ;;  %v8082_v13 = vadd.f32 %v7999_v53, %v4299_v35  ;;  %v4277_v52 = vpop.f32.mrf.mxu1 }
 0x339   : > { %v4382_v56 = vadd.f32 2.0, %v5932_v33  ;;  %5945 = vpow2.f32 %v4364_v37  ;;  %v4366_v12 = vmul.f32 1.442695, %v4342_v19  ;;  %v8086_v43 = vadd.f32 %v7983_v26, %v4300_v21 }
 0x33a   : > { %v5934_v36 = vpop.eup %5933  ;;  %v4343_v40 = vmin.f32 %v8082_v13, 20.0  ;;  %v4301_v55 = vadd.f32 %v4277_v52, %v3931_v15  ;;  %v4281_v39 = vpop.f32.mrf.mxu1 }
 0x33b   : > { %v4398_v20 = vmul.f32 %v5932_v33, %v4382_v56  ;;  %v4383_v62 = vadd.f32 2.0, %v5934_v36  ;;  %5947 = vpow2.f32 %v4366_v12  ;;  %v4344_v10 = vmin.f32 %v8086_v43, 20.0 }
 0x33c   : > { %v5936_v7 = vpop.eup %5935  ;;  %v4368_v2 = vmul.f32 1.442695, %v4343_v40  ;;  %v8091_v45 = vadd.f32 %v7999_v53, %v4301_v55  ;;  %v4302_v22 = vadd.f32 %v4281_v39, %v3932_v47  ;;  %v4283_v44 = vpop.f32.mrf.mxu1 }
 0x33d   : > { %v4414_v38 = vadd.f32 2.0, %v4398_v20  ;;  %v4399_v24 = vmul.f32 %v5934_v36, %v4383_v62  ;;  %v4384_v32 = vadd.f32 2.0, %v5936_v7  ;;  %v4370_v25 = vmul.f32 1.442695, %v4344_v10 }
 0x33e   : > { %v5938_v63 = vpop.eup %5937  ;;  %5949 = vpow2.f32 %v4368_v2  ;;  %v4345_v17 = vmin.f32 %v8091_v45, 20.0  ;;  %v8095_v28 = vadd.f32 %v7983_v26, %v4302_v22  ;;  %v4303_v1 = vadd.f32 %v4283_v44, %v3933_v42  ;;  %v4285_v5 = vpop.f32.mrf.mxu1 }
 0x33f   : > { %5951 = vrcp.f32 %v4414_v38  ;;  %v4415_v61 = vadd.f32 2.0, %v4399_v24  ;;  %v4400_v48 = vmul.f32 %v5936_v7, %v4384_v32  ;;  %v4385_v11 = vadd.f32 2.0, %v5938_v63 }
 0x340   : > { %5953 = vpow2.f32 %v4370_v25  ;;  %v4372_v9 = vmul.f32 1.442695, %v4345_v17  ;;  %v4346_v18 = vmin.f32 %v8095_v28, 20.0  ;;  %v8099_v0 = vadd.f32 %v7999_v53, %v4303_v1  ;;  %v4287_v14 = vpop.f32.mrf.mxu1 }
 0x341   : > { %v5940_v46 = vpop.eup %5939  ;;  %5955 = vrcp.f32 %v4415_v61  ;;  %v4416_v27 = vadd.f32 2.0, %v4400_v48  ;;  %v4401_v31 = vmul.f32 %v5938_v63, %v4385_v11  ;;  %v4304_v23 = vadd.f32 %v4285_v5, %v3934_v3  ;;  %v5996_v63 = vld [vmem:[%s6092_s22] sm:$0xff]  ;;  %v5997_v11 = vld [vmem:[%s6092_s22 + $0x8] sm:$0xff] }
 0x342   : > { %v5942_v51 = vpop.eup %5941  ;;  %v4386_v4 = vadd.f32 2.0, %v5940_v46  ;;  %5957 = vpow2.f32 %v4372_v9  ;;  %v4374_v35 = vmul.f32 1.442695, %v4346_v18  ;;  %v4347_v6 = vmin.f32 %v8099_v0, 20.0 }
 0x343   : > { %5959 = vrcp.f32 %v4416_v27  ;;  %v4417_v41 = vadd.f32 2.0, %v4401_v31  ;;  %v4387_v37 = vadd.f32 2.0, %v5942_v51  ;;  %v8103_v19 = vadd.f32 %v7983_v26, %v4304_v23 }
 0x344   : > { %v5944_v21 = vpop.eup %5943  ;;  %v4402_v33 = vmul.f32 %v5940_v46, %v4386_v4  ;;  %5961 = vpow2.f32 %v4374_v35  ;;  %v4376_v50 = vmul.f32 1.442695, %v4347_v6  ;;  %v4305_v15 = vadd.f32 %v4287_v14, %v3935_v57 }
 0x345   : > { %5963 = vrcp.f32 %v4417_v41  ;;  %v4403_v52 = vmul.f32 %v5942_v51, %v4387_v37  ;;  %v4388_v47 = vadd.f32 2.0, %v5944_v21  ;;  %v4348_v56 = vmin.f32 %v8103_v19, 20.0  ;;  %v5998_v37 = vld [vmem:[%s6092_s22 + $0x10] sm:$0xff] }
 0x346   : > { %v5946_v12 = vpop.eup %5945  ;;  %v4418_v36 = vadd.f32 2.0, %v4402_v33  ;;  %5965 = vpow2.f32 %v4376_v50  ;;  %v8107_v40 = vadd.f32 %v7999_v53, %v4305_v15  ;;  %v4494_v17 = vunpack.c.l.bf16 %v5996_v63 }
 0x347   : > { %v4419_v55 = vadd.f32 2.0, %v4403_v52  ;;  %v4404_v39 = vmul.f32 %v5944_v21, %v4388_v47  ;;  %v4389_v26 = vadd.f32 2.0, %v5946_v12  ;;  %v4378_v42 = vmul.f32 1.442695, %v4348_v56 }
 0x348   : > { %v5948_v3 = vpop.eup %5947  ;;  %5967 = vrcp.f32 %v4418_v36  ;;  %v4349_v49 = vmin.f32 %v8107_v40, 20.0  ;;  %v4495_v1 = vunpack.c.h.bf16 %v5996_v63  ;;  %v4496_v9 = vunpack.c.l.bf16 %v5997_v11 }
 0x349   : > { %5969 = vrcp.f32 %v4419_v55  ;;  %v4420_v20 = vadd.f32 2.0, %v4404_v39  ;;  %v4405_v62 = vmul.f32 %v5946_v12, %v4389_v26  ;;  %v4390_v10 = vadd.f32 2.0, %v5948_v3 }
 0x34a   : > { %5971 = vpow2.f32 %v4378_v42  ;;  %v4380_v7 = vmul.f32 1.442695, %v4349_v49  ;;  %v4497_v31 = vunpack.c.h.bf16 %v5997_v11  ;;  %v4498_v21 = vunpack.c.l.bf16 %v5998_v37 }
 0x34b   : > { %v5950_v2 = vpop.eup %5949  ;;  %5973 = vrcp.f32 %v4420_v20  ;;  %v4421_v22 = vadd.f32 2.0, %v4405_v62  ;;  %v4406_v53 = vmul.f32 %v5948_v3, %v4390_v10  ;;  %v4499_v62 = vunpack.c.h.bf16 %v5998_v37 }
 0x34c   : > { %v5952_v44 = vpop.eup %5951  ;;  %v4391_v57 = vadd.f32 2.0, %v5950_v2  ;;  %5975 = vpow2.f32 %v4380_v7 }
 0x34d   : > { %v5954_v38 = vpop.eup %5953  ;;  %v4446_v24 = vmul.f32 2.0, %v5952_v44  ;;  %5977 = vrcp.f32 %v4421_v22  ;;  %v4422_v32 = vadd.f32 2.0, %v4406_v53 }
 0x34e   : > { %v5956_v25 = vpop.eup %5955  ;;  %v4407_v5 = vmul.f32 %v5950_v2, %v4391_v57  ;;  %v4392_v61 = vadd.f32 2.0, %v5954_v38 }
 0x34f   : > { %v5958_v48 = vpop.eup %5957  ;;  %v4462_v18 = vsub.f32 1.0, %v4446_v24  ;;  %v4447_v46 = vmul.f32 2.0, %v5956_v25  ;;  %5979 = vrcp.f32 %v4422_v32 }
 0x350   : > { %v5960_v27 = vpop.eup %5959  ;;  %v4423_v23 = vadd.f32 2.0, %v4407_v5  ;;  %v4408_v14 = vmul.f32 %v5954_v38, %v4392_v61  ;;  %v4393_v51 = vadd.f32 2.0, %v5958_v48  ;;  %v5999_v61 = vld [vmem:[%s6092_s22 + $0x18] sm:$0xff] }
 0x351   : > { %v5962_v4 = vpop.eup %5961  ;;  %v4478_v35 = vmul.f32 %v4462_v18, %v8007_v29  ;;  %v4463_v6 = vsub.f32 1.0, %v4447_v46  ;;  %v4448_v41 = vmul.f32 2.0, %v5960_v27 }
 0x352   : > { %v5964_v33 = vpop.eup %5963  ;;  %5981 = vrcp.f32 %v4423_v23  ;;  %v4424_v50 = vadd.f32 2.0, %v4408_v14  ;;  %v4409_v15 = vmul.f32 %v5958_v48, %v4393_v51  ;;  %v4394_v52 = vadd.f32 2.0, %v5962_v4 }
 0x353   : > { %v5966_v47 = vpop.eup %5965  ;;  %v4510_v56 = vadd.f32 %v4494_v17, %v4478_v35  ;;  %v4479_v12 = vmul.f32 %v4463_v6, %v8018_v8  ;;  %v4464_v36 = vsub.f32 1.0, %v4448_v41  ;;  %v4449_v55 = vmul.f32 2.0, %v5964_v33 }
 0x354   : > { %5983 = vrcp.f32 %v4424_v50  ;;  %v4425_v39 = vadd.f32 2.0, %v4409_v15  ;;  %v4410_v26 = vmul.f32 %v5962_v4, %v4394_v52  ;;  %v4395_v29 = vadd.f32 2.0, %v5966_v47 }
 0x355   : > { %v5968_v42 = vpop.eup %5967  ;;  %v4511_v3 = vadd.f32 %v4495_v1, %v4479_v12  ;;  %v4480_v49 = vmul.f32 %v4464_v36, %v8027_v60  ;;  %v4465_v20 = vsub.f32 1.0, %v4449_v55  ;;  %v4500_v48 = vunpack.c.l.bf16 %v5999_v61  ;;  %v6000_v55 = vld [vmem:[%s6092_s22 + $0x20] sm:$0xff] }
 0x356   : > { %v5970_v10 = vpop.eup %5969  ;;  %v4450_v8 = vmul.f32 2.0, %v5968_v42  ;;  %5985 = vrcp.f32 %v4425_v39  ;;  %v4426_v7 = vadd.f32 2.0, %v4410_v26  ;;  %v4411_v2 = vmul.f32 %v5966_v47, %v4395_v29 }
 0x357   : > { %v5972_v22 = vpop.eup %5971  ;;  %v5354_v53 = vpack.c.bf16 %v4511_v3, %v4510_v56  ;;  %v4512_v44 = vadd.f32 %v4496_v9, %v4480_v49  ;;  %v4481_v60 = vmul.f32 %v4465_v20, %v8037_v30  ;;  %v4451_v57 = vmul.f32 2.0, %v5970_v10 }
 0x358   : > { %v5974_v38 = vpop.eup %5973  ;;  %v4466_v24 = vsub.f32 1.0, %v4450_v8  ;;  %5987 = vrcp.f32 %v4426_v7  ;;  %v4427_v32 = vadd.f32 2.0, %v4411_v2  ;;  %v4396_v25 = vadd.f32 2.0, %v5972_v22  ;;  %v6001_v7 = vld [vmem:[%s6092_s22 + $0x28] sm:$0xff] }
 0x359   : > { %v5976_v63 = vpop.eup %5975  ;;  %4574 = vst [vmem:[%s8121_s13] sm:$0xff] %v5354_v53  ;;  %v4513_v17 = vadd.f32 %v4497_v31, %v4481_v60  ;;  %v4467_v1 = vsub.f32 1.0, %v4451_v57  ;;  %v4452_v5 = vmul.f32 2.0, %v5974_v38  ;;  %v4501_v35 = vunpack.c.h.bf16 %v5999_v61 }
 0x35a   : > { %v5978_v11 = vpop.eup %5977  ;;  %v4482_v18 = vmul.f32 %v4466_v24, %v8047_v58  ;;  %5989 = vrcp.f32 %v4427_v32  ;;  %v4412_v9 = vmul.f32 %v5972_v22, %v4396_v25  ;;  %v4397_v30 = vadd.f32 2.0, %v5976_v63 }
 0x35b   : > { %v5355_v46 = vpack.c.bf16 %v4513_v17, %v4512_v44  ;;  %v4483_v27 = vmul.f32 %v4467_v1, %v8051_v59  ;;  %v4468_v23 = vsub.f32 1.0, %v4452_v5  ;;  %v4453_v14 = vmul.f32 2.0, %v5978_v11  ;;  %v6002_v5 = vld [vmem:[%s6092_s22 + $0x30] sm:$0xff] }
 0x35c   : > { %v5980_v51 = vpop.eup %5979  ;;  %v4514_v4 = vadd.f32 %v4498_v21, %v4482_v18  ;;  %v4428_v31 = vadd.f32 2.0, %v4412_v9  ;;  %v4413_v6 = vmul.f32 %v5976_v63, %v4397_v30  ;;  %v4502_v39 = vunpack.c.l.bf16 %v6000_v55 }
 0x35d   : > { %4575 = vst [vmem:[%s8121_s13 + $0x8] sm:$0xff] %v5355_v46  ;;  %v4515_v41 = vadd.f32 %v4499_v62, %v4483_v27  ;;  %v4484_v37 = vmul.f32 %v4468_v23, %v8059_v54  ;;  %v4469_v58 = vsub.f32 1.0, %v4453_v14  ;;  %v4454_v33 = vmul.f32 2.0, %v5980_v51  ;;  %v6003_v51 = vld [vmem:[%s6092_s22 + $0x38] sm:$0xff] }
 0x35e   : > { %5991 = vrcp.f32 %v4428_v31  ;;  %v4429_v50 = vadd.f32 2.0, %v4413_v6  ;;  %v4503_v29 = vunpack.c.h.bf16 %v6000_v55  ;;  %v4504_v2 = vunpack.c.l.bf16 %v6001_v7 }
 0x35f   : > { %v5982_v15 = vpop.eup %5981  ;;  %v5356_v52 = vpack.c.bf16 %v4515_v41, %v4514_v4  ;;  %v4485_v59 = vmul.f32 %v4469_v58, %v8067_v16  ;;  %v4470_v47 = vsub.f32 1.0, %v4454_v33  ;;  %v4516_v12 = vadd.f32 %v4500_v48, %v4484_v37 }
 0x360   : > { %v4455_v56 = vmul.f32 2.0, %v5982_v15  ;;  %5993 = vrcp.f32 %v4429_v50  ;;  %v4505_v22 = vunpack.c.h.bf16 %v6001_v7  ;;  %v4506_v61 = vunpack.c.l.bf16 %v6002_v5 }
 0x361   : > { %v5984_v21 = vpop.eup %5983  ;;  %4576 = vst [vmem:[%s8121_s13 + $0x10] sm:$0xff] %v5356_v52  ;;  %v4517_v36 = vadd.f32 %v4501_v35, %v4485_v59  ;;  %v4486_v54 = vmul.f32 %v4470_v47, %v8074_v34  ;;  %v4509_v35 = vunpack.c.h.bf16 %v6003_v51 }
 0x362   : > { %v4471_v26 = vsub.f32 1.0, %v4455_v56  ;;  %v4456_v42 = vmul.f32 2.0, %v5984_v21 }
 0x363   : > { %v5986_v3 = vpop.eup %5985  ;;  %v5357_v49 = vpack.c.bf16 %v4517_v36, %v4516_v12  ;;  %v4518_v8 = vadd.f32 %v4502_v39, %v4486_v54 }
 0x364   : > { %v4487_v16 = vmul.f32 %v4471_v26, %v8082_v13  ;;  %v4472_v20 = vsub.f32 1.0, %v4456_v42  ;;  %v4457_v62 = vmul.f32 2.0, %v5986_v3 }
 0x365   : > { %v5988_v10 = vpop.eup %5987  ;;  %4577 = vst [vmem:[%s8121_s13 + $0x18] sm:$0xff] %v5357_v49 }
 0x366   : > { %v4519_v34 = vadd.f32 %v4503_v29, %v4487_v16  ;;  %v4488_v53 = vmul.f32 %v4472_v20, %v8086_v43  ;;  %v4473_v44 = vsub.f32 1.0, %v4457_v62  ;;  %v4458_v60 = vmul.f32 2.0, %v5988_v10 }
 0x367   : > { %v5990_v57 = vpop.eup %5989  ;;  %v4507_v43 = vunpack.c.h.bf16 %v6002_v5 }
 0x368   : > { %v5358_v38 = vpack.c.bf16 %v4519_v34, %v4518_v8  ;;  %v4489_v24 = vmul.f32 %v4473_v44, %v8091_v45  ;;  %v4474_v13 = vsub.f32 1.0, %v4458_v60  ;;  %v4459_v32 = vmul.f32 2.0, %v5990_v57 }
 0x369   : > { %v4520_v25 = vadd.f32 %v4504_v2, %v4488_v53 }
 0x36a   : > { %4578 = vst [vmem:[%s8121_s13 + $0x20] sm:$0xff] %v5358_v38  ;;  %v4521_v63 = vadd.f32 %v4505_v22, %v4489_v24  ;;  %v4490_v1 = vmul.f32 %v4474_v13, %v8095_v28  ;;  %v4475_v48 = vsub.f32 1.0, %v4459_v32  ;;  %v4508_v28 = vunpack.c.l.bf16 %v6003_v51 }
 0x36b   : > { %v5992_v17 = vpop.eup %5991 }
 0x36c   : > { %v5359_v11 = vpack.c.bf16 %v4521_v63, %v4520_v25  ;;  %v4460_v18 = vmul.f32 2.0, %v5992_v17  ;;  %v4491_v45 = vmul.f32 %v4475_v48, %v8099_v0  ;;  %v4522_v27 = vadd.f32 %v4506_v61, %v4490_v1 }
 0x36d   : > { %v5994_v9 = vpop.eup %5993 }
 0x36e   : > { %4579 = vst [vmem:[%s8121_s13 + $0x28] sm:$0xff] %v5359_v11  ;;  %v4476_v30 = vsub.f32 1.0, %v4460_v18  ;;  %v4461_v46 = vmul.f32 2.0, %v5994_v9  ;;  %v4523_v23 = vadd.f32 %v4507_v43, %v4491_v45 }
 0x370   : > { %v4492_v14 = vmul.f32 %v4476_v30, %v8103_v19  ;;  %v4477_v4 = vsub.f32 1.0, %v4461_v46  ;;  %v5360_v31 = vpack.c.bf16 %v4523_v23, %v4522_v27 }
 0x372   : > { %v4493_v6 = vmul.f32 %v4477_v4, %v8107_v40  ;;  %4580 = vst [vmem:[%s8121_s13 + $0x30] sm:$0xff] %v5360_v31  ;;  %v4524_v41 = vadd.f32 %v4508_v28, %v4492_v14 }
 0x374   : > { %v4525_v37 = vadd.f32 %v4509_v35, %v4493_v6 }
 0x376   : > { %v5361_v58 = vpack.c.bf16 %v4525_v37, %v4524_v41 }
 0x378   : > { %4581 = vst [vmem:[%s8121_s13 + $0x38] sm:$0xff] %v5361_v58 }
 0x379 PF: > { %s15_s18 = sadd.s32 1, %s6010_s18  }
 0x37a   : > { %p12_p4 = scmp.ge.s32.totalorder %s15_s18, 4  }
 0x37c   :  { %14 = sbr.rel (!%p12_p4) target bundleno = 1 (0x1), region = 80 }

// kernel: downsample4_forward.11
= control target key start
LH: loop header
LB: loop body
LE: loop exit
PB: predicated region body
PF: predicated region fallthrough
CT: control target
= control target key end

     0   :  { %s7796_s12 = smov 0   ;;  %s10491_s0 = inlined_call_operand.vmem [shape: bf16[128,2304], index: 0, kind: input, shape index: {}]   ;;  %s10492_s1 = inlined_call_operand.vmem [shape: bf16[2304,512], index: 1, kind: input, shape index: {}]   ;;  %s10493_s2 = inlined_call_operand.vmem [shape: f32[1,512], index: 2, kind: input, shape index: {}]   ;;  %s10494_s3 = inlined_call_operand.vmem [shape: bf16[128,512], index: 3, kind: output, shape index: {}]  }
   0x1 LB: > { %s5893_s13 = sadd.s32 4294967295, %s7774_s12   ;;  %p5897_p0 = scmp.ge.s32.totalorder %s7774_s12, 1  ;;  %s7774_s12 = sphi %s7796_s12, %s13_s12  }
   0x2   : > { %p139_p1 = scmp.lt.s32.totalorder %s7774_s12, 3 }
   0x4   : > { %p140_p2 = pnand %p5897_p0, %p139_p1 }
   0x6   : > { %143 = sbr.rel (%p140_p2) target bundleno = 866 (0x362), region = 32 }
   0xb   : > { %v6595_v0 = vld [vmem:[%s10492_s1 + $0xe4] ss:$16 sps:$4 sm:$0xff]   ;;  %v6599_v2 = vld [vmem:[%s10492_s1 + $0xe0] ss:$16 sps:$4 sm:$0xff]   ;;  %s5898_s24 = sshll.u32 %s5893_s13, 3 }
   0xc   : > { %v6597_v1 = vld [vmem:[%s10492_s1 + $0x2e4] ss:$16 sps:$4 sm:$0xff]   ;;  %4089 = vmatprep.subr.bf16.mxu0 %v6595_v0  ;;  %v6600_v3 = vld [vmem:[%s10492_s1 + $0x2e0] ss:$16 sps:$4 sm:$0xff]   ;;  %p166_p3 = scmp.lt.s32.totalorder %s5898_s24, 15 }
   0xd   : > { %4162 = vmatprep.subr.bf16.mxu1 %v6597_v1  ;;  %v6601_v4 = vld [vmem:[%s10492_s1 + $0xc4] ss:$16 sps:$4 sm:$0xff]   ;;  %4090 = vmatpush1.bf16.msra.mxu0 %v6599_v2  ;;  %v6605_v6 = vld [vmem:[%s10492_s1 + $0xc0] ss:$16 sps:$4 sm:$0xff]  }
   0xe   : > { %4163 = vmatpush1.bf16.msra.mxu1 %v6600_v3  ;;  %v6603_v5 = vld [vmem:[%s10492_s1 + $0x2c4] ss:$16 sps:$4 sm:$0xff]   ;;  %4091 = vmatprep.subr.bf16.mxu0 %v6601_v4  ;;  %v6606_v7 = vld [vmem:[%s10492_s1 + $0x2c0] ss:$16 sps:$4 sm:$0xff]   ;;  %s10632_s24 = smov (!%p166_p3, %s5898_s24), 15 }
   0xf   : > { %4164 = vmatprep.subr.bf16.mxu1 %v6603_v5  ;;  %v6607_v8 = vld [vmem:[%s10492_s1 + $0xa4] ss:$16 sps:$4 sm:$0xff]   ;;  %v6611_v10 = vld [vmem:[%s10492_s1 + $0xa0] ss:$16 sps:$4 sm:$0xff]   ;;  %s6586_s21 = smul.u32 72, %s10632_s24  ;;  %s6569_s10 = sshll.u32 %s10632_s24, 4 }
  0x10   : > { %v6609_v9 = vld [vmem:[%s10492_s1 + $0x2a4] ss:$16 sps:$4 sm:$0xff]   ;;  %v6612_v11 = vld [vmem:[%s10492_s1 + $0x2a0] ss:$16 sps:$4 sm:$0xff]   ;;  %s10110_s22 = scalar_lea.vmem %s10494_s3, %s6569_s10 }
  0x11   : > { %4092 = vmatpush1.bf16.msra.mxu0 %v6605_v6  ;;  %v6613_v12 = vld [vmem:[%s10492_s1 + $0x84] ss:$16 sps:$4 sm:$0xff]   ;;  %v6617_v14 = vld [vmem:[%s10492_s1 + $0x80] ss:$16 sps:$4 sm:$0xff]   ;;  %s7947_s13 = scalar_lea.vmem %s10491_s0, %s6586_s21 }
  0x12   : > { %4165 = vmatpush1.bf16.msra.mxu1 %v6606_v7  ;;  %4093 = vmatprep.subr.bf16.mxu0 %v6607_v8  ;;  %v6615_v13 = vld [vmem:[%s10492_s1 + $0x284] ss:$16 sps:$4 sm:$0xff]   ;;  %v6618_v15 = vld [vmem:[%s10492_s1 + $0x280] ss:$16 sps:$4 sm:$0xff]  }
  0x13   : > { %4166 = vmatprep.subr.bf16.mxu1 %v6609_v9  ;;  %v6619_v16 = vld [vmem:[%s10492_s1 + $0x64] ss:$16 sps:$4 sm:$0xff]   ;;  %v6623_v18 = vld [vmem:[%s10492_s1 + $0x60] ss:$16 sps:$4 sm:$0xff]  }
  0x14   : > { %v6621_v17 = vld [vmem:[%s10492_s1 + $0x264] ss:$16 sps:$4 sm:$0xff]   ;;  %v6624_v19 = vld [vmem:[%s10492_s1 + $0x260] ss:$16 sps:$4 sm:$0xff]  }
  0x15   : > { %4094 = vmatpush1.bf16.msra.mxu0 %v6611_v10  ;;  %v6625_v20 = vld [vmem:[%s10492_s1 + $0x44] ss:$16 sps:$4 sm:$0xff]   ;;  %v6629_v22 = vld [vmem:[%s10492_s1 + $0x40] ss:$16 sps:$4 sm:$0xff]  }
  0x16   : > { %4167 = vmatpush1.bf16.msra.mxu1 %v6612_v11  ;;  %4095 = vmatprep.subr.bf16.mxu0 %v6613_v12  ;;  %v6627_v21 = vld [vmem:[%s10492_s1 + $0x244] ss:$16 sps:$4 sm:$0xff]   ;;  %v6630_v23 = vld [vmem:[%s10492_s1 + $0x240] ss:$16 sps:$4 sm:$0xff]  }
  0x17   : > { %4168 = vmatprep.subr.bf16.mxu1 %v6615_v13  ;;  %v6631_v24 = vld [vmem:[%s10492_s1 + $0x24] ss:$16 sps:$4 sm:$0xff]   ;;  %v6635_v26 = vld [vmem:[%s10492_s1 + $0x20] ss:$16 sps:$4 sm:$0xff]  }
  0x18   : > { %v6633_v25 = vld [vmem:[%s10492_s1 + $0x224] ss:$16 sps:$4 sm:$0xff]   ;;  %v6636_v27 = vld [vmem:[%s10492_s1 + $0x220] ss:$16 sps:$4 sm:$0xff]  }
  0x19   : > { %4096 = vmatpush1.bf16.msra.mxu0 %v6617_v14  ;;  %v6637_v28 = vld [vmem:[%s10492_s1 + $0x4] ss:$16 sps:$4 sm:$0xff]   ;;  %v6641_v30 = vld [vmem:[%s10492_s1] ss:$16 sps:$4 sm:$0xff]  }
  0x1a   : > { %4169 = vmatpush1.bf16.msra.mxu1 %v6618_v15  ;;  %4097 = vmatprep.subr.bf16.mxu0 %v6619_v16  ;;  %v6639_v29 = vld [vmem:[%s10492_s1 + $0x204] ss:$16 sps:$4 sm:$0xff]   ;;  %v6642_v31 = vld [vmem:[%s10492_s1 + $0x200] ss:$16 sps:$4 sm:$0xff]  }
  0x1b   : > { %4170 = vmatprep.subr.bf16.mxu1 %v6621_v17  ;;  %v6643_v32 = vld [vmem:[%s10492_s1 + $0x1e4] ss:$16 sps:$4 sm:$0xff]   ;;  %v6647_v34 = vld [vmem:[%s10492_s1 + $0x1e0] ss:$16 sps:$4 sm:$0xff]  }
  0x1c   : > { %v6645_v33 = vld [vmem:[%s10492_s1 + $0x3e4] ss:$16 sps:$4 sm:$0xff]   ;;  %v6648_v35 = vld [vmem:[%s10492_s1 + $0x3e0] ss:$16 sps:$4 sm:$0xff]  }
  0x1d   : > { %4098 = vmatpush1.bf16.msra.mxu0 %v6623_v18  ;;  %v6649_v36 = vld [vmem:[%s10492_s1 + $0x1c4] ss:$16 sps:$4 sm:$0xff]   ;;  %v6653_v38 = vld [vmem:[%s10492_s1 + $0x1c0] ss:$16 sps:$4 sm:$0xff]  }
  0x1e   : > { %4171 = vmatpush1.bf16.msra.mxu1 %v6624_v19  ;;  %4099 = vmatprep.subr.bf16.mxu0 %v6625_v20  ;;  %v6651_v37 = vld [vmem:[%s10492_s1 + $0x3c4] ss:$16 sps:$4 sm:$0xff]   ;;  %v6654_v39 = vld [vmem:[%s10492_s1 + $0x3c0] ss:$16 sps:$4 sm:$0xff]  }
  0x1f   : > { %4172 = vmatprep.subr.bf16.mxu1 %v6627_v21  ;;  %v6655_v40 = vld [vmem:[%s10492_s1 + $0x1a4] ss:$16 sps:$4 sm:$0xff]   ;;  %v6659_v42 = vld [vmem:[%s10492_s1 + $0x1a0] ss:$16 sps:$4 sm:$0xff]  }
  0x20   : > { %v6657_v41 = vld [vmem:[%s10492_s1 + $0x3a4] ss:$16 sps:$4 sm:$0xff]   ;;  %v6660_v43 = vld [vmem:[%s10492_s1 + $0x3a0] ss:$16 sps:$4 sm:$0xff]  }
  0x21   : > { %4100 = vmatpush1.bf16.msra.mxu0 %v6629_v22  ;;  %v6661_v44 = vld [vmem:[%s10492_s1 + $0x184] ss:$16 sps:$4 sm:$0xff]   ;;  %v6665_v46 = vld [vmem:[%s10492_s1 + $0x180] ss:$16 sps:$4 sm:$0xff]  }
  0x22   : > { %4173 = vmatpush1.bf16.msra.mxu1 %v6630_v23  ;;  %4101 = vmatprep.subr.bf16.mxu0 %v6631_v24  ;;  %v6663_v45 = vld [vmem:[%s10492_s1 + $0x384] ss:$16 sps:$4 sm:$0xff]   ;;  %v6666_v47 = vld [vmem:[%s10492_s1 + $0x380] ss:$16 sps:$4 sm:$0xff]  }
  0x23   : > { %4174 = vmatprep.subr.bf16.mxu1 %v6633_v25  ;;  %v6667_v48 = vld [vmem:[%s10492_s1 + $0x164] ss:$16 sps:$4 sm:$0xff]   ;;  %v6671_v52 = vld [vmem:[%s10492_s1 + $0x160] ss:$16 sps:$4 sm:$0xff]  }
  0x24   : > { %v6693_v49 = vld [vmem:[%s7947_s13 + $0x4] ss:$72 sps:$4 sm:$0xff]   ;;  %v6672_v53 = vld [vmem:[%s10492_s1 + $0x360] ss:$16 sps:$4 sm:$0xff]   ;;  %v6751_v15 = vld [vmem:[%s7947_s13 + $0x94] ss:$72 sps:$4 sm:$0xff]  }
  0x25   : > { %4102 = vmatpush1.bf16.msra.mxu0 %v6635_v26  ;;  %v6669_v50 = vld [vmem:[%s10492_s1 + $0x364] ss:$16 sps:$4 sm:$0xff]   ;;  %4121 = vmatprep.mubr.bf16.mxu0 %v6693_v49  ;;  %v6677_v56 = vld [vmem:[%s10492_s1 + $0x140] ss:$16 sps:$4 sm:$0xff]  }
  0x26   : > { %4175 = vmatpush1.bf16.msra.mxu1 %v6636_v27  ;;  %4103 = vmatprep.subr.bf16.mxu0 %v6637_v28  ;;  %v6696_v51 = vld [vmem:[%s7947_s13 + $0xc] ss:$72 sps:$4 sm:$0xff]   ;;  %v6678_v57 = vld [vmem:[%s10492_s1 + $0x340] ss:$16 sps:$4 sm:$0xff]   ;;  %v6754_v17 = vld [vmem:[%s7947_s13 + $0x9c] ss:$72 sps:$4 sm:$0xff]  }
  0x27   : > { %4176 = vmatprep.subr.bf16.mxu1 %v6639_v29  ;;  %4194 = vmatprep.mubr.bf16.mxu1 %v6696_v51  ;;  %v6673_v54 = vld [vmem:[%s10492_s1 + $0x144] ss:$16 sps:$4 sm:$0xff]   ;;  %v6683_v60 = vld [vmem:[%s10492_s1 + $0x120] ss:$16 sps:$4 sm:$0xff]  }
  0x28   : > { %v6675_v55 = vld [vmem:[%s10492_s1 + $0x344] ss:$16 sps:$4 sm:$0xff]   ;;  %v6684_v61 = vld [vmem:[%s10492_s1 + $0x320] ss:$16 sps:$4 sm:$0xff]  }
  0x29   : > { %4104 = vmatpush1.bf16.msra.mxu0 %v6641_v30  ;;  %v6679_v58 = vld [vmem:[%s10492_s1 + $0x124] ss:$16 sps:$4 sm:$0xff]   ;;  %v6689_v0 = vld [vmem:[%s10492_s1 + $0x100] ss:$16 sps:$4 sm:$0xff]  }
  0x2a   : > { %4177 = vmatpush1.bf16.msra.mxu1 %v6642_v31  ;;  %4105 = vmatprep.subr.bf16.mxu0 %v6643_v32  ;;  %v6681_v59 = vld [vmem:[%s10492_s1 + $0x324] ss:$16 sps:$4 sm:$0xff]   ;;  %v6690_v1 = vld [vmem:[%s10492_s1 + $0x300] ss:$16 sps:$4 sm:$0xff]  }
  0x2b   : > { %4178 = vmatprep.subr.bf16.mxu1 %v6645_v33  ;;  %v6685_v62 = vld [vmem:[%s10492_s1 + $0x104] ss:$16 sps:$4 sm:$0xff]   ;;  %v6691_v4 = vld [vmem:[%s7947_s13] ss:$72 sps:$4 sm:$0xff]   ;;  %v6753_v16 = vld [vmem:[%s7947_s13 + $0x90] ss:$72 sps:$4 sm:$0xff]  }
  0x2c   : > { %v6687_v63 = vld [vmem:[%s10492_s1 + $0x304] ss:$16 sps:$4 sm:$0xff]   ;;  %v6694_v5 = vld [vmem:[%s7947_s13 + $0x8] ss:$72 sps:$4 sm:$0xff]   ;;  %v6762_v21 = vld [vmem:[%s7947_s13 + $0x98] ss:$72 sps:$4 sm:$0xff]  }
  0x2d   : > { %4106 = vmatpush2.bf16.msra.mxu0 %v6647_v34  ;;  %v6699_v2 = vld [vmem:[%s10492_s1 + $0x4e4] ss:$16 sps:$4 sm:$0xff]   ;;  %v6697_v6 = vld [vmem:[%s10492_s1 + $0x4e0] ss:$16 sps:$4 sm:$0xff]  }
  0x2e   : > { %4179 = vmatpush2.bf16.msra.mxu1 %v6648_v35  ;;  %4107 = vmatprep.subr.bf16.mxu0 %v6649_v36  ;;  %v6702_v3 = vld [vmem:[%s10492_s1 + $0x6e4] ss:$16 sps:$4 sm:$0xff]   ;;  %v6700_v7 = vld [vmem:[%s10492_s1 + $0x6e0] ss:$16 sps:$4 sm:$0xff]  }
  0x2f   : > { %4180 = vmatprep.subr.bf16.mxu1 %v6651_v37  ;;  %v6705_v8 = vld [vmem:[%s10492_s1 + $0x4c4] ss:$16 sps:$4 sm:$0xff]   ;;  %v6703_v10 = vld [vmem:[%s10492_s1 + $0x4c0] ss:$16 sps:$4 sm:$0xff]  }
  0x30   : > { %v6708_v9 = vld [vmem:[%s10492_s1 + $0x6c4] ss:$16 sps:$4 sm:$0xff]   ;;  %v6706_v11 = vld [vmem:[%s10492_s1 + $0x6c0] ss:$16 sps:$4 sm:$0xff]  }
  0x31   : > { %4108 = vmatpush2.bf16.msra.mxu0 %v6653_v38  ;;  %v6711_v12 = vld [vmem:[%s10492_s1 + $0x4a4] ss:$16 sps:$4 sm:$0xff]   ;;  %v6709_v14 = vld [vmem:[%s10492_s1 + $0x4a0] ss:$16 sps:$4 sm:$0xff]  }
  0x32   : > { %4181 = vmatpush2.bf16.msra.mxu1 %v6654_v39  ;;  %4109 = vmatprep.subr.bf16.mxu0 %v6655_v40  ;;  %v6714_v13 = vld [vmem:[%s10492_s1 + $0x6a4] ss:$16 sps:$4 sm:$0xff]   ;;  %v6712_v18 = vld [vmem:[%s10492_s1 + $0x6a0] ss:$16 sps:$4 sm:$0xff]  }
  0x33   : > { %4182 = vmatprep.subr.bf16.mxu1 %v6657_v41  ;;  %v6717_v19 = vld [vmem:[%s10492_s1 + $0x484] ss:$16 sps:$4 sm:$0xff]   ;;  %v6715_v22 = vld [vmem:[%s10492_s1 + $0x480] ss:$16 sps:$4 sm:$0xff]  }
  0x34   : > { %v6720_v20 = vld [vmem:[%s10492_s1 + $0x684] ss:$16 sps:$4 sm:$0xff]   ;;  %v6718_v23 = vld [vmem:[%s10492_s1 + $0x680] ss:$16 sps:$4 sm:$0xff]  }
  0x35   : > { %4110 = vmatpush2.bf16.msra.mxu0 %v6659_v42  ;;  %v6723_v24 = vld [vmem:[%s10492_s1 + $0x464] ss:$16 sps:$4 sm:$0xff]   ;;  %v6721_v26 = vld [vmem:[%s10492_s1 + $0x460] ss:$16 sps:$4 sm:$0xff]  }
  0x36   : > { %4183 = vmatpush2.bf16.msra.mxu1 %v6660_v43  ;;  %4111 = vmatprep.subr.bf16.mxu0 %v6661_v44  ;;  %v6726_v25 = vld [vmem:[%s10492_s1 + $0x664] ss:$16 sps:$4 sm:$0xff]   ;;  %v6771_v28 = vld [vmem:[%s7947_s13 + $0x120] ss:$72 sps:$4 sm:$0xff]   ;;  %v6789_v40 = vld [vmem:[%s7947_s13 + $0x1b0] ss:$72 sps:$4 sm:$0xff]  }
  0x37   : > { %4184 = vmatprep.subr.bf16.mxu1 %v6663_v45  ;;  %v6769_v27 = vld [vmem:[%s7947_s13 + $0x124] ss:$72 sps:$4 sm:$0xff]   ;;  %v6724_v30 = vld [vmem:[%s10492_s1 + $0x660] ss:$16 sps:$4 sm:$0xff]   ;;  %v6787_v39 = vld [vmem:[%s7947_s13 + $0x1b4] ss:$72 sps:$4 sm:$0xff]  }
  0x38   : > { %v6772_v29 = vld [vmem:[%s7947_s13 + $0x12c] ss:$72 sps:$4 sm:$0xff]   ;;  %v6780_v33 = vld [vmem:[%s7947_s13 + $0x128] ss:$72 sps:$4 sm:$0xff]   ;;  %v6790_v41 = vld [vmem:[%s7947_s13 + $0x1bc] ss:$72 sps:$4 sm:$0xff]  }
  0x39   : > { %4112 = vmatpush2.bf16.msra.mxu0 %v6665_v46  ;;  %v6729_v31 = vld [vmem:[%s10492_s1 + $0x444] ss:$16 sps:$4 sm:$0xff]   ;;  %v6727_v34 = vld [vmem:[%s10492_s1 + $0x440] ss:$16 sps:$4 sm:$0xff]  }
  0x3a   : > { %4185 = vmatpush2.bf16.msra.mxu1 %v6666_v47  ;;  %4113 = vmatprep.subr.bf16.mxu0 %v6667_v48  ;;  %v6732_v32 = vld [vmem:[%s10492_s1 + $0x644] ss:$16 sps:$4 sm:$0xff]   ;;  %v6730_v35 = vld [vmem:[%s10492_s1 + $0x640] ss:$16 sps:$4 sm:$0xff]  }
  0x3b   : > { %4186 = vmatprep.subr.bf16.mxu1 %v6669_v50  ;;  %v6735_v36 = vld [vmem:[%s10492_s1 + $0x424] ss:$16 sps:$4 sm:$0xff]   ;;  %v6733_v38 = vld [vmem:[%s10492_s1 + $0x420] ss:$16 sps:$4 sm:$0xff]  }
  0x3c   : > { %v6738_v37 = vld [vmem:[%s10492_s1 + $0x624] ss:$16 sps:$4 sm:$0xff]   ;;  %v6736_v42 = vld [vmem:[%s10492_s1 + $0x620] ss:$16 sps:$4 sm:$0xff]  }
  0x3d   : > { %4114 = vmatpush2.bf16.msra.mxu0 %v6671_v52  ;;  %v6741_v43 = vld [vmem:[%s10492_s1 + $0x404] ss:$16 sps:$4 sm:$0xff]   ;;  %v6798_v45 = vld [vmem:[%s7947_s13 + $0x1b8] ss:$72 sps:$4 sm:$0xff]  }
  0x3e   : > { %4187 = vmatpush2.bf16.msra.mxu1 %v6672_v53  ;;  %4115 = vmatprep.subr.bf16.mxu0 %v6673_v54  ;;  %v6744_v44 = vld [vmem:[%s10492_s1 + $0x604] ss:$16 sps:$4 sm:$0xff]   ;;  %v6739_v46 = vld [vmem:[%s10492_s1 + $0x400] ss:$16 sps:$4 sm:$0xff]  }
  0x3f   : > { %4188 = vmatprep.subr.bf16.mxu1 %v6675_v55  ;;  %v6742_v47 = vld [vmem:[%s10492_s1 + $0x600] ss:$16 sps:$4 sm:$0xff]   ;;  %v6747_v48 = vld [vmem:[%s10492_s1 + $0x5e4] ss:$16 sps:$4 sm:$0xff]  }
  0x40   : > { %v6750_v49 = vld [vmem:[%s10492_s1 + $0x7e4] ss:$16 sps:$4 sm:$0xff]   ;;  %v6745_v50 = vld [vmem:[%s10492_s1 + $0x5e0] ss:$16 sps:$4 sm:$0xff]  }
  0x41   : > { %4116 = vmatpush2.bf16.msra.mxu0 %v6677_v56  ;;  %v6748_v51 = vld [vmem:[%s10492_s1 + $0x7e0] ss:$16 sps:$4 sm:$0xff]   ;;  %v6758_v52 = vld [vmem:[%s10492_s1 + $0x5c4] ss:$16 sps:$4 sm:$0xff]  }
  0x42   : > { %4189 = vmatpush2.bf16.msra.mxu1 %v6678_v57  ;;  %4117 = vmatprep.subr.bf16.mxu0 %v6679_v58  ;;  %v6761_v53 = vld [vmem:[%s10492_s1 + $0x7c4] ss:$16 sps:$4 sm:$0xff]   ;;  %v6756_v56 = vld [vmem:[%s10492_s1 + $0x5c0] ss:$16 sps:$4 sm:$0xff]  }
  0x43   : > { %4190 = vmatprep.subr.bf16.mxu1 %v6681_v59  ;;  %v6813_v54 = vld [vmem:[%s7947_s13 + $0x14] ss:$72 sps:$4 sm:$0xff]   ;;  %v6759_v57 = vld [vmem:[%s10492_s1 + $0x7c0] ss:$16 sps:$4 sm:$0xff]  }
  0x44   : > { %v6816_v55 = vld [vmem:[%s7947_s13 + $0x1c] ss:$72 sps:$4 sm:$0xff]  }
  0x45   : > { %4118 = vmatpush2.bf16.msra.mxu0 %v6683_v60  ;;  %v6765_v58 = vld [vmem:[%s10492_s1 + $0x5a4] ss:$16 sps:$4 sm:$0xff]   ;;  %v6763_v60 = vld [vmem:[%s10492_s1 + $0x5a0] ss:$16 sps:$4 sm:$0xff]  }
  0x46   : > { %4191 = vmatpush2.bf16.msra.mxu1 %v6684_v61  ;;  %4119 = vmatprep.subr.bf16.mxu0 %v6685_v62  ;;  %v6768_v59 = vld [vmem:[%s10492_s1 + $0x7a4] ss:$16 sps:$4 sm:$0xff]   ;;  %v6766_v61 = vld [vmem:[%s10492_s1 + $0x7a0] ss:$16 sps:$4 sm:$0xff]  }
  0x47   : > { %4192 = vmatprep.subr.bf16.mxu1 %v6687_v63  ;;  %v6776_v62 = vld [vmem:[%s10492_s1 + $0x584] ss:$16 sps:$4 sm:$0xff]  }
  0x48   : > { %v6779_v63 = vld [vmem:[%s10492_s1 + $0x784] ss:$16 sps:$4 sm:$0xff]  }
  0x49   : > { %4120 = vmatpush2.bf16.msra.mxu0 %v6689_v0  ;;  %v6774_v0 = vld [vmem:[%s10492_s1 + $0x580] ss:$16 sps:$4 sm:$0xff]  }
  0x4a   : > { %4193 = vmatpush2.bf16.msra.mxu1 %v6690_v1  ;;  %4235 = vmatprep.subr.bf16.mxu0 %v6699_v2  ;;  %v6777_v1 = vld [vmem:[%s10492_s1 + $0x780] ss:$16 sps:$4 sm:$0xff]   ;;  %v6783_v2 = vld [vmem:[%s10492_s1 + $0x564] ss:$16 sps:$4 sm:$0xff]  }
  0x4b   : > { %4308 = vmatprep.subr.bf16.mxu1 %v6702_v3  ;;  %v6786_v3 = vld [vmem:[%s10492_s1 + $0x764] ss:$16 sps:$4 sm:$0xff]  }
  0x4c   : > { %4122 = vmatmul.mubr.bf16.vlgmr.msra.gmra.mxu0 %v6691_v4  ;;  %v6781_v4 = vld [vmem:[%s10492_s1 + $0x560] ss:$16 sps:$4 sm:$0xff]  }
  0x4d   : > { %4195 = vmatmul.mubr.bf16.vlgmr.msra.gmra.mxu1 %v6694_v5  ;;  %4236 = vmatpush1.bf16.msra.mxu0 %v6697_v6  ;;  %v6784_v5 = vld [vmem:[%s10492_s1 + $0x760] ss:$16 sps:$4 sm:$0xff]   ;;  %v6794_v6 = vld [vmem:[%s10492_s1 + $0x544] ss:$16 sps:$4 sm:$0xff]  }
  0x4e   : > { %4309 = vmatpush1.bf16.msra.mxu1 %v6700_v7  ;;  %4237 = vmatprep.subr.bf16.mxu0 %v6705_v8  ;;  %v6797_v7 = vld [vmem:[%s10492_s1 + $0x744] ss:$16 sps:$4 sm:$0xff]   ;;  %v6792_v8 = vld [vmem:[%s10492_s1 + $0x540] ss:$16 sps:$4 sm:$0xff]  }
  0x4f   : > { %4310 = vmatprep.subr.bf16.mxu1 %v6708_v9  ;;  %4131 = vmatprep.mubr.bf16.mxu0 %v6751_v15  ;;  %v6795_v9 = vld [vmem:[%s10492_s1 + $0x740] ss:$16 sps:$4 sm:$0xff]   ;;  %v6810_v15 = vld [vmem:[%s10492_s1 + $0x704] ss:$16 sps:$4 sm:$0xff]  }
  0x50   : > { %4204 = vmatprep.mubr.bf16.mxu1 %v6754_v17  ;;  %v6808_v17 = vld [vmem:[%s10492_s1 + $0x700] ss:$16 sps:$4 sm:$0xff]  }
  0x51   : > { %4238 = vmatpush1.bf16.msra.mxu0 %v6703_v10  ;;  %v6801_v10 = vld [vmem:[%s10492_s1 + $0x524] ss:$16 sps:$4 sm:$0xff]  }
  0x52   : > { %4311 = vmatpush1.bf16.msra.mxu1 %v6706_v11  ;;  %4239 = vmatprep.subr.bf16.mxu0 %v6711_v12  ;;  %v6804_v11 = vld [vmem:[%s10492_s1 + $0x724] ss:$16 sps:$4 sm:$0xff]   ;;  %v6799_v12 = vld [vmem:[%s10492_s1 + $0x520] ss:$16 sps:$4 sm:$0xff]  }
  0x53   : > { %4312 = vmatprep.subr.bf16.mxu1 %v6714_v13  ;;  %v6802_v13 = vld [vmem:[%s10492_s1 + $0x720] ss:$16 sps:$4 sm:$0xff]  }
  0x54   : > { %4132 = vmatmul.mubr.bf16.gmra.mxu0 %v6753_v16  ;;  %v6805_v16 = vld [vmem:[%s10492_s1 + $0x500] ss:$16 sps:$4 sm:$0xff]  }
  0x55   : > { %4240 = vmatpush1.bf16.msra.mxu0 %v6709_v14  ;;  %4205 = vmatmul.mubr.bf16.gmra.mxu1 %v6762_v21  ;;  %v6807_v14 = vld [vmem:[%s10492_s1 + $0x504] ss:$16 sps:$4 sm:$0xff]   ;;  %v6814_v21 = vld [vmem:[%s7947_s13 + $0x18] ss:$72 sps:$4 sm:$0xff]  }
  0x56   : > { %4313 = vmatpush1.bf16.msra.mxu1 %v6712_v18  ;;  %4241 = vmatprep.subr.bf16.mxu0 %v6717_v19  ;;  %v6819_v18 = vld [vmem:[%s10492_s1 + $0x8e4] ss:$16 sps:$4 sm:$0xff]  }
  0x57   : > { %4314 = vmatprep.subr.bf16.mxu1 %v6720_v20  ;;  %4141 = vmatprep.mubr.bf16.mxu0 %v6769_v27  ;;  %v6822_v19 = vld [vmem:[%s10492_s1 + $0xae4] ss:$16 sps:$4 sm:$0xff]   ;;  %v6811_v20 = vld [vmem:[%s7947_s13 + $0x10] ss:$72 sps:$4 sm:$0xff]  }
  0x58   : > { %4214 = vmatprep.mubr.bf16.mxu1 %v6772_v29  ;;  %v6838_v27 = vld [vmem:[%s7947_s13 + $0xac] ss:$72 sps:$4 sm:$0xff]   ;;  %v6826_v29 = vld [vmem:[%s10492_s1 + $0xac0] ss:$16 sps:$4 sm:$0xff]  }
  0x59   : > { %4242 = vmatpush1.bf16.msra.mxu0 %v6715_v22  ;;  %v6817_v22 = vld [vmem:[%s10492_s1 + $0x8e0] ss:$16 sps:$4 sm:$0xff]  }
  0x5a   : > { %4315 = vmatpush1.bf16.msra.mxu1 %v6718_v23  ;;  %4243 = vmatprep.subr.bf16.mxu0 %v6723_v24  ;;  %v6820_v23 = vld [vmem:[%s10492_s1 + $0xae0] ss:$16 sps:$4 sm:$0xff]   ;;  %v6825_v24 = vld [vmem:[%s10492_s1 + $0x8c4] ss:$16 sps:$4 sm:$0xff]  }
  0x5b   : > { %4316 = vmatprep.subr.bf16.mxu1 %v6726_v25  ;;  %v6828_v25 = vld [vmem:[%s10492_s1 + $0xac4] ss:$16 sps:$4 sm:$0xff]  }
  0x5c   : > { %4142 = vmatmul.mubr.bf16.gmra.mxu0 %v6771_v28  ;;  %v6823_v28 = vld [vmem:[%s10492_s1 + $0x8c0] ss:$16 sps:$4 sm:$0xff]  }
  0x5d   : > { %4244 = vmatpush1.bf16.msra.mxu0 %v6721_v26  ;;  %4215 = vmatmul.mubr.bf16.gmra.mxu1 %v6780_v33  ;;  %v6829_v26 = vld [vmem:[%s7947_s13 + $0xa4] ss:$72 sps:$4 sm:$0xff]   ;;  %v6832_v33 = vld [vmem:[%s10492_s1 + $0x8a0] ss:$16 sps:$4 sm:$0xff]  }
  0x5e   : > { %4317 = vmatpush1.bf16.msra.mxu1 %v6724_v30  ;;  %4245 = vmatprep.subr.bf16.mxu0 %v6729_v31  ;;  %v6834_v30 = vld [vmem:[%s10492_s1 + $0x8a4] ss:$16 sps:$4 sm:$0xff]  }
  0x5f   : > { %4318 = vmatprep.subr.bf16.mxu1 %v6732_v32  ;;  %4151 = vmatprep.mubr.bf16.mxu0 %v6787_v39  ;;  %v6837_v31 = vld [vmem:[%s10492_s1 + $0xaa4] ss:$16 sps:$4 sm:$0xff]   ;;  %v6831_v32 = vld [vmem:[%s7947_s13 + $0xa0] ss:$72 sps:$4 sm:$0xff]  }
  0x60   : > { %4224 = vmatprep.mubr.bf16.mxu1 %v6790_v41  ;;  %v6856_v39 = vld [vmem:[%s7947_s13 + $0x13c] ss:$72 sps:$4 sm:$0xff]   ;;  %v6844_v41 = vld [vmem:[%s10492_s1 + $0xa80] ss:$16 sps:$4 sm:$0xff]  }
  0x61   : > { %4246 = vmatpush1.bf16.msra.mxu0 %v6727_v34  ;;  %v6835_v34 = vld [vmem:[%s10492_s1 + $0xaa0] ss:$16 sps:$4 sm:$0xff]  }
  0x62   : > { %4319 = vmatpush1.bf16.msra.mxu1 %v6730_v35  ;;  %4247 = vmatprep.subr.bf16.mxu0 %v6735_v36  ;;  %v6840_v35 = vld [vmem:[%s7947_s13 + $0xa8] ss:$72 sps:$4 sm:$0xff]   ;;  %v6843_v36 = vld [vmem:[%s10492_s1 + $0x884] ss:$16 sps:$4 sm:$0xff]  }
  0x63   : > { %4320 = vmatprep.subr.bf16.mxu1 %v6738_v37  ;;  %v6846_v37 = vld [vmem:[%s10492_s1 + $0xa84] ss:$16 sps:$4 sm:$0xff]  }
  0x64   : > { %4152 = vmatmul.mubr.bf16.gmra.mxu0 %v6789_v40  ;;  %v6841_v40 = vld [vmem:[%s10492_s1 + $0x880] ss:$16 sps:$4 sm:$0xff]  }
  0x65   : > { %4248 = vmatpush1.bf16.msra.mxu0 %v6733_v38  ;;  %4225 = vmatmul.mubr.bf16.gmra.mxu1 %v6798_v45  ;;  %v6847_v38 = vld [vmem:[%s7947_s13 + $0x134] ss:$72 sps:$4 sm:$0xff]   ;;  %v6850_v45 = vld [vmem:[%s10492_s1 + $0x860] ss:$16 sps:$4 sm:$0xff]  }
  0x66   : > { %4321 = vmatpush1.bf16.msra.mxu1 %v6736_v42  ;;  %4249 = vmatprep.subr.bf16.mxu0 %v6741_v43  ;;  %v6852_v42 = vld [vmem:[%s10492_s1 + $0x864] ss:$16 sps:$4 sm:$0xff]  }
  0x67   : > { %4322 = vmatprep.subr.bf16.mxu1 %v6744_v44  ;;  %4267 = vmatprep.mubr.bf16.mxu0 %v6813_v54  ;;  %v6855_v43 = vld [vmem:[%s10492_s1 + $0xa64] ss:$16 sps:$4 sm:$0xff]   ;;  %v6849_v44 = vld [vmem:[%s7947_s13 + $0x130] ss:$72 sps:$4 sm:$0xff]  }
  0x68   : > { %4340 = vmatprep.mubr.bf16.mxu1 %v6816_v55  ;;  %v6870_v54 = vld [vmem:[%s10492_s1 + $0x824] ss:$16 sps:$4 sm:$0xff]  }
  0x69   : > { %4250 = vmatpush1.bf16.msra.mxu0 %v6739_v46  ;;  %v6853_v46 = vld [vmem:[%s10492_s1 + $0xa60] ss:$16 sps:$4 sm:$0xff]   ;;  %v6873_v55 = vld [vmem:[%s10492_s1 + $0xa24] ss:$16 sps:$4 sm:$0xff]  }
  0x6a   : > { %4323 = vmatpush1.bf16.msra.mxu1 %v6742_v47  ;;  %4251 = vmatprep.subr.bf16.mxu0 %v6747_v48  ;;  %v6858_v47 = vld [vmem:[%s7947_s13 + $0x138] ss:$72 sps:$4 sm:$0xff]   ;;  %v6861_v48 = vld [vmem:[%s10492_s1 + $0x844] ss:$16 sps:$4 sm:$0xff]  }
  0x6b   : > { %4324 = vmatprep.subr.bf16.mxu1 %v6750_v49  ;;  %v6864_v49 = vld [vmem:[%s10492_s1 + $0xa44] ss:$16 sps:$4 sm:$0xff]  }
  0x6d   : > { %4252 = vmatpush2.bf16.msra.mxu0 %v6745_v50  ;;  %v6865_v50 = vld [vmem:[%s7947_s13 + $0x1c4] ss:$72 sps:$4 sm:$0xff]  }
  0x6e   : > { %4325 = vmatpush2.bf16.msra.mxu1 %v6748_v51  ;;  %4253 = vmatprep.subr.bf16.mxu0 %v6758_v52  ;;  %v6874_v51 = vld [vmem:[%s7947_s13 + $0x1cc] ss:$72 sps:$4 sm:$0xff]   ;;  %v6859_v52 = vld [vmem:[%s10492_s1 + $0x840] ss:$16 sps:$4 sm:$0xff]  }
  0x6f   : > { %4326 = vmatprep.subr.bf16.mxu1 %v6761_v53  ;;  %v6862_v53 = vld [vmem:[%s10492_s1 + $0xa40] ss:$16 sps:$4 sm:$0xff]  }
  0x71   : > { %4254 = vmatpush2.bf16.msra.mxu0 %v6756_v56  ;;  %v6867_v56 = vld [vmem:[%s7947_s13 + $0x1c0] ss:$72 sps:$4 sm:$0xff]  }
  0x72   : > { %4327 = vmatpush2.bf16.msra.mxu1 %v6759_v57  ;;  %4255 = vmatprep.subr.bf16.mxu0 %v6765_v58  ;;  %v6868_v57 = vld [vmem:[%s10492_s1 + $0x820] ss:$16 sps:$4 sm:$0xff]  }
  0x73   : > { %4328 = vmatprep.subr.bf16.mxu1 %v6768_v59  ;;  %v6871_v58 = vld [vmem:[%s10492_s1 + $0xa20] ss:$16 sps:$4 sm:$0xff]  }
  0x74   : > { %v6876_v59 = vld [vmem:[%s7947_s13 + $0x1c8] ss:$72 sps:$4 sm:$0xff]  }
  0x75   : > { %4256 = vmatpush2.bf16.msra.mxu0 %v6763_v60  ;;  %v6879_v60 = vld [vmem:[%s10492_s1 + $0x804] ss:$16 sps:$4 sm:$0xff]  }
  0x76   : > { %4329 = vmatpush2.bf16.msra.mxu1 %v6766_v61  ;;  %4257 = vmatprep.subr.bf16.mxu0 %v6776_v62  ;;  %v6882_v61 = vld [vmem:[%s10492_s1 + $0xa04] ss:$16 sps:$4 sm:$0xff]  }
  0x77   : > { %4330 = vmatprep.subr.bf16.mxu1 %v6779_v63  ;;  %v6933_v62 = vld [vmem:[%s7947_s13 + $0x24] ss:$72 sps:$4 sm:$0xff]  }
  0x78   : > { %v6936_v63 = vld [vmem:[%s7947_s13 + $0x2c] ss:$72 sps:$4 sm:$0xff]  }
  0x79   : > { %4258 = vmatpush2.bf16.msra.mxu0 %v6774_v0  ;;  %v6877_v0 = vld [vmem:[%s10492_s1 + $0x800] ss:$16 sps:$4 sm:$0xff]  }
  0x7a   : > { %4331 = vmatpush2.bf16.msra.mxu1 %v6777_v1  ;;  %4259 = vmatprep.subr.bf16.mxu0 %v6783_v2  ;;  %v6880_v1 = vld [vmem:[%s10492_s1 + $0xa00] ss:$16 sps:$4 sm:$0xff]   ;;  %v6885_v2 = vld [vmem:[%s10492_s1 + $0x9e4] ss:$16 sps:$4 sm:$0xff]  }
  0x7b   : > { %4332 = vmatprep.subr.bf16.mxu1 %v6786_v3  ;;  %v6888_v3 = vld [vmem:[%s10492_s1 + $0xbe4] ss:$16 sps:$4 sm:$0xff]  }
  0x7d   : > { %4260 = vmatpush2.bf16.msra.mxu0 %v6781_v4  ;;  %v6883_v4 = vld [vmem:[%s10492_s1 + $0x9e0] ss:$16 sps:$4 sm:$0xff]  }
  0x7e   : > { %4333 = vmatpush2.bf16.msra.mxu1 %v6784_v5  ;;  %4261 = vmatprep.subr.bf16.mxu0 %v6794_v6  ;;  %v6886_v5 = vld [vmem:[%s10492_s1 + $0xbe0] ss:$16 sps:$4 sm:$0xff]   ;;  %v6891_v6 = vld [vmem:[%s10492_s1 + $0x9c4] ss:$16 sps:$4 sm:$0xff]  }
  0x7f   : > { %4334 = vmatprep.subr.bf16.mxu1 %v6797_v7  ;;  %v6894_v7 = vld [vmem:[%s10492_s1 + $0xbc4] ss:$16 sps:$4 sm:$0xff]  }
  0x81   : > { %4262 = vmatpush2.bf16.msra.mxu0 %v6792_v8  ;;  %v6889_v8 = vld [vmem:[%s10492_s1 + $0x9c0] ss:$16 sps:$4 sm:$0xff]  }
  0x82   : > { %4335 = vmatpush2.bf16.msra.mxu1 %v6795_v9  ;;  %4263 = vmatprep.subr.bf16.mxu0 %v6801_v10  ;;  %v6892_v9 = vld [vmem:[%s10492_s1 + $0xbc0] ss:$16 sps:$4 sm:$0xff]   ;;  %v6897_v10 = vld [vmem:[%s10492_s1 + $0x9a4] ss:$16 sps:$4 sm:$0xff]  }
  0x83   : > { %4336 = vmatprep.subr.bf16.mxu1 %v6804_v11  ;;  %v6900_v11 = vld [vmem:[%s10492_s1 + $0xba4] ss:$16 sps:$4 sm:$0xff]  }
  0x85   : > { %4264 = vmatpush2.bf16.msra.mxu0 %v6799_v12  ;;  %v6895_v12 = vld [vmem:[%s10492_s1 + $0x9a0] ss:$16 sps:$4 sm:$0xff]  }
  0x86   : > { %4337 = vmatpush2.bf16.msra.mxu1 %v6802_v13  ;;  %4265 = vmatprep.subr.bf16.mxu0 %v6807_v14  ;;  %v6898_v13 = vld [vmem:[%s10492_s1 + $0xba0] ss:$16 sps:$4 sm:$0xff]   ;;  %v6903_v14 = vld [vmem:[%s10492_s1 + $0x984] ss:$16 sps:$4 sm:$0xff]  }
  0x87   : > { %4338 = vmatprep.subr.bf16.mxu1 %v6810_v15  ;;  %v6906_v15 = vld [vmem:[%s10492_s1 + $0xb84] ss:$16 sps:$4 sm:$0xff]  }
  0x89   : > { %4266 = vmatpush2.bf16.msra.mxu0 %v6805_v16  ;;  %v6901_v16 = vld [vmem:[%s10492_s1 + $0x980] ss:$16 sps:$4 sm:$0xff]  }
  0x8a   : > { %4339 = vmatpush2.bf16.msra.mxu1 %v6808_v17  ;;  %4381 = vmatprep.subr.bf16.mxu0 %v6819_v18  ;;  %v6904_v17 = vld [vmem:[%s10492_s1 + $0xb80] ss:$16 sps:$4 sm:$0xff]   ;;  %v6909_v18 = vld [vmem:[%s10492_s1 + $0x964] ss:$16 sps:$4 sm:$0xff]  }
  0x8b   : > { %4454 = vmatprep.subr.bf16.mxu1 %v6822_v19  ;;  %v6912_v19 = vld [vmem:[%s10492_s1 + $0xb64] ss:$16 sps:$4 sm:$0xff]  }
  0x8c   : > { %4268 = vmatmul.mubr.bf16.vlgmr.msra.gmra.mxu0 %v6811_v20  ;;  %v6907_v20 = vld [vmem:[%s10492_s1 + $0x960] ss:$16 sps:$4 sm:$0xff]  }
  0x8d   : > { %4341 = vmatmul.mubr.bf16.vlgmr.msra.gmra.mxu1 %v6814_v21  ;;  %4382 = vmatpush1.bf16.msra.mxu0 %v6817_v22  ;;  %v6910_v21 = vld [vmem:[%s10492_s1 + $0xb60] ss:$16 sps:$4 sm:$0xff]   ;;  %v6915_v22 = vld [vmem:[%s10492_s1 + $0x944] ss:$16 sps:$4 sm:$0xff]  }
  0x8e   : > { %4455 = vmatpush1.bf16.msra.mxu1 %v6820_v23  ;;  %4383 = vmatprep.subr.bf16.mxu0 %v6825_v24  ;;  %v6918_v23 = vld [vmem:[%s10492_s1 + $0xb44] ss:$16 sps:$4 sm:$0xff]   ;;  %v6913_v24 = vld [vmem:[%s10492_s1 + $0x940] ss:$16 sps:$4 sm:$0xff]  }
  0x8f   : > { %4456 = vmatprep.subr.bf16.mxu1 %v6828_v25  ;;  %4277 = vmatprep.mubr.bf16.mxu0 %v6829_v26  ;;  %v6916_v25 = vld [vmem:[%s10492_s1 + $0xb40] ss:$16 sps:$4 sm:$0xff]   ;;  %v6921_v26 = vld [vmem:[%s10492_s1 + $0x924] ss:$16 sps:$4 sm:$0xff]  }
  0x90   : > { %4350 = vmatprep.mubr.bf16.mxu1 %v6838_v27  ;;  %v6924_v27 = vld [vmem:[%s10492_s1 + $0xb24] ss:$16 sps:$4 sm:$0xff]  }
  0x91   : > { %4384 = vmatpush1.bf16.msra.mxu0 %v6823_v28  ;;  %v6919_v28 = vld [vmem:[%s10492_s1 + $0x920] ss:$16 sps:$4 sm:$0xff]  }
  0x92   : > { %4457 = vmatpush1.bf16.msra.mxu1 %v6826_v29  ;;  %4385 = vmatprep.subr.bf16.mxu0 %v6834_v30  ;;  %v6922_v29 = vld [vmem:[%s10492_s1 + $0xb20] ss:$16 sps:$4 sm:$0xff]   ;;  %v6927_v30 = vld [vmem:[%s10492_s1 + $0x904] ss:$16 sps:$4 sm:$0xff]  }
  0x93   : > { %4458 = vmatprep.subr.bf16.mxu1 %v6837_v31  ;;  %v6930_v31 = vld [vmem:[%s10492_s1 + $0xb04] ss:$16 sps:$4 sm:$0xff]  }
  0x94   : > { %4278 = vmatmul.mubr.bf16.gmra.mxu0 %v6831_v32  ;;  %v6925_v32 = vld [vmem:[%s10492_s1 + $0x900] ss:$16 sps:$4 sm:$0xff]  }
  0x95   : > { %4351 = vmatmul.mubr.bf16.gmra.mxu1 %v6840_v35  ;;  %4386 = vmatpush1.bf16.msra.mxu0 %v6832_v33  ;;  %v6928_v33 = vld [vmem:[%s10492_s1 + $0xb00] ss:$16 sps:$4 sm:$0xff]   ;;  %v6942_v35 = vld [vmem:[%s10492_s1 + $0xee4] ss:$16 sps:$4 sm:$0xff]  }
  0x96   : > { %4459 = vmatpush1.bf16.msra.mxu1 %v6835_v34  ;;  %4387 = vmatprep.subr.bf16.mxu0 %v6843_v36  ;;  %v6939_v34 = vld [vmem:[%s10492_s1 + $0xce4] ss:$16 sps:$4 sm:$0xff]   ;;  %v6931_v36 = vld [vmem:[%s7947_s13 + $0x20] ss:$72 sps:$4 sm:$0xff]  }
  0x97   : > { %4460 = vmatprep.subr.bf16.mxu1 %v6846_v37  ;;  %4287 = vmatprep.mubr.bf16.mxu0 %v6847_v38  ;;  %v6934_v37 = vld [vmem:[%s7947_s13 + $0x28] ss:$72 sps:$4 sm:$0xff]  }
  0x98   : > { %4360 = vmatprep.mubr.bf16.mxu1 %v6856_v39  ;;  %v6937_v38 = vld [vmem:[%s10492_s1 + $0xce0] ss:$16 sps:$4 sm:$0xff]  }
  0x99   : > { %4388 = vmatpush1.bf16.msra.mxu0 %v6841_v40  ;;  %v6940_v39 = vld [vmem:[%s10492_s1 + $0xee0] ss:$16 sps:$4 sm:$0xff]   ;;  %v6945_v40 = vld [vmem:[%s10492_s1 + $0xcc4] ss:$16 sps:$4 sm:$0xff]  }
  0x9a   : > { %4461 = vmatpush1.bf16.msra.mxu1 %v6844_v41  ;;  %4389 = vmatprep.subr.bf16.mxu0 %v6852_v42  ;;  %v6948_v41 = vld [vmem:[%s10492_s1 + $0xec4] ss:$16 sps:$4 sm:$0xff]  }
  0x9b   : > { %4462 = vmatprep.subr.bf16.mxu1 %v6855_v43  ;;  %v6949_v42 = vld [vmem:[%s7947_s13 + $0xb4] ss:$72 sps:$4 sm:$0xff]  }
  0x9c   : > { %4288 = vmatmul.mubr.bf16.gmra.mxu0 %v6849_v44  ;;  %v6958_v43 = vld [vmem:[%s7947_s13 + $0xbc] ss:$72 sps:$4 sm:$0xff]   ;;  %v6943_v44 = vld [vmem:[%s10492_s1 + $0xcc0] ss:$16 sps:$4 sm:$0xff]  }
  0x9d   : > { %4361 = vmatmul.mubr.bf16.gmra.mxu1 %v6858_v47  ;;  %4390 = vmatpush1.bf16.msra.mxu0 %v6850_v45  ;;  %v6946_v45 = vld [vmem:[%s10492_s1 + $0xec0] ss:$16 sps:$4 sm:$0xff]   ;;  %v6957_v47 = vld [vmem:[%s10492_s1 + $0xea4] ss:$16 sps:$4 sm:$0xff]  }
  0x9e   : > { %4463 = vmatpush1.bf16.msra.mxu1 %v6853_v46  ;;  %4391 = vmatprep.subr.bf16.mxu0 %v6861_v48  ;;  %v6954_v46 = vld [vmem:[%s10492_s1 + $0xca4] ss:$16 sps:$4 sm:$0xff]   ;;  %v6951_v48 = vld [vmem:[%s7947_s13 + $0xb0] ss:$72 sps:$4 sm:$0xff]  }
  0x9f   : > { %4464 = vmatprep.subr.bf16.mxu1 %v6864_v49  ;;  %4297 = vmatprep.mubr.bf16.mxu0 %v6865_v50  ;;  %v6952_v49 = vld [vmem:[%s10492_s1 + $0xca0] ss:$16 sps:$4 sm:$0xff]  }
  0xa0   : > { %4370 = vmatprep.mubr.bf16.mxu1 %v6874_v51  ;;  %v6955_v50 = vld [vmem:[%s10492_s1 + $0xea0] ss:$16 sps:$4 sm:$0xff]  }
  0xa1   : > { %4392 = vmatpush1.bf16.msra.mxu0 %v6859_v52  ;;  %v6960_v51 = vld [vmem:[%s7947_s13 + $0xb8] ss:$72 sps:$4 sm:$0xff]   ;;  %v6963_v52 = vld [vmem:[%s10492_s1 + $0xc84] ss:$16 sps:$4 sm:$0xff]  }
  0xa2   : > { %4465 = vmatpush1.bf16.msra.mxu1 %v6862_v53  ;;  %4393 = vmatprep.subr.bf16.mxu0 %v6870_v54  ;;  %v6966_v53 = vld [vmem:[%s10492_s1 + $0xe84] ss:$16 sps:$4 sm:$0xff]  }
  0xa3   : > { %4466 = vmatprep.subr.bf16.mxu1 %v6873_v55  ;;  %v6967_v54 = vld [vmem:[%s7947_s13 + $0x144] ss:$72 sps:$4 sm:$0xff]  }
  0xa4   : > { %4298 = vmatmul.mubr.bf16.gmra.mxu0 %v6867_v56  ;;  %v6976_v55 = vld [vmem:[%s7947_s13 + $0x14c] ss:$72 sps:$4 sm:$0xff]   ;;  %v6961_v56 = vld [vmem:[%s10492_s1 + $0xc80] ss:$16 sps:$4 sm:$0xff]  }
  0xa5   : > { %4371 = vmatmul.mubr.bf16.gmra.mxu1 %v6876_v59  ;;  %4394 = vmatpush1.bf16.msra.mxu0 %v6868_v57  ;;  %v6964_v57 = vld [vmem:[%s10492_s1 + $0xe80] ss:$16 sps:$4 sm:$0xff]   ;;  %v6975_v59 = vld [vmem:[%s10492_s1 + $0xe64] ss:$16 sps:$4 sm:$0xff]  }
  0xa6   : > { %4467 = vmatpush1.bf16.msra.mxu1 %v6871_v58  ;;  %4395 = vmatprep.subr.bf16.mxu0 %v6879_v60  ;;  %v6972_v58 = vld [vmem:[%s10492_s1 + $0xc64] ss:$16 sps:$4 sm:$0xff]   ;;  %v6969_v60 = vld [vmem:[%s7947_s13 + $0x140] ss:$72 sps:$4 sm:$0xff]  }
  0xa7   : > { %4468 = vmatprep.subr.bf16.mxu1 %v6882_v61  ;;  %4413 = vmatprep.mubr.bf16.mxu0 %v6933_v62  ;;  %v6970_v61 = vld [vmem:[%s10492_s1 + $0xc60] ss:$16 sps:$4 sm:$0xff]  }
  0xa8   : > { %4486 = vmatprep.mubr.bf16.mxu1 %v6936_v63  ;;  %v6978_v62 = vld [vmem:[%s7947_s13 + $0x148] ss:$72 sps:$4 sm:$0xff]  }
  0xa9   : > { %4396 = vmatpush1.bf16.msra.mxu0 %v6877_v0  ;;  %v6973_v63 = vld [vmem:[%s10492_s1 + $0xe60] ss:$16 sps:$4 sm:$0xff]   ;;  %v6981_v0 = vld [vmem:[%s10492_s1 + $0xc44] ss:$16 sps:$4 sm:$0xff]  }
  0xaa   : > { %4469 = vmatpush1.bf16.msra.mxu1 %v6880_v1  ;;  %4397 = vmatprep.subr.bf16.mxu0 %v6885_v2  ;;  %v6984_v1 = vld [vmem:[%s10492_s1 + $0xe44] ss:$16 sps:$4 sm:$0xff]  }
  0xab   : > { %4470 = vmatprep.subr.bf16.mxu1 %v6888_v3  ;;  %v6985_v2 = vld [vmem:[%s7947_s13 + $0x1d4] ss:$72 sps:$4 sm:$0xff]  }
  0xac   : > { %v6994_v3 = vld [vmem:[%s7947_s13 + $0x1dc] ss:$72 sps:$4 sm:$0xff]  }
  0xad   : > { %4398 = vmatpush2.bf16.msra.mxu0 %v6883_v4  ;;  %v6979_v4 = vld [vmem:[%s10492_s1 + $0xc40] ss:$16 sps:$4 sm:$0xff]  }
  0xae   : > { %4471 = vmatpush2.bf16.msra.mxu1 %v6886_v5  ;;  %4399 = vmatprep.subr.bf16.mxu0 %v6891_v6  ;;  %v6982_v5 = vld [vmem:[%s10492_s1 + $0xe40] ss:$16 sps:$4 sm:$0xff]   ;;  %v6990_v6 = vld [vmem:[%s10492_s1 + $0xc24] ss:$16 sps:$4 sm:$0xff]  }
  0xaf   : > { %4472 = vmatprep.subr.bf16.mxu1 %v6894_v7  ;;  %v6993_v7 = vld [vmem:[%s10492_s1 + $0xe24] ss:$16 sps:$4 sm:$0xff]  }
  0xb1   : > { %4400 = vmatpush2.bf16.msra.mxu0 %v6889_v8  ;;  %v6987_v8 = vld [vmem:[%s7947_s13 + $0x1d0] ss:$72 sps:$4 sm:$0xff]  }
  0xb2   : > { %4473 = vmatpush2.bf16.msra.mxu1 %v6892_v9  ;;  %4401 = vmatprep.subr.bf16.mxu0 %v6897_v10  ;;  %v6988_v9 = vld [vmem:[%s10492_s1 + $0xc20] ss:$16 sps:$4 sm:$0xff]  }
  0xb3   : > { %4474 = vmatprep.subr.bf16.mxu1 %v6900_v11  ;;  %v6996_v10 = vld [vmem:[%s7947_s13 + $0x1d8] ss:$72 sps:$4 sm:$0xff]  }
  0xb4   : > { %v6991_v11 = vld [vmem:[%s10492_s1 + $0xe20] ss:$16 sps:$4 sm:$0xff]  }
  0xb5   : > { %4402 = vmatpush2.bf16.msra.mxu0 %v6895_v12  ;;  %v6999_v12 = vld [vmem:[%s10492_s1 + $0xc04] ss:$16 sps:$4 sm:$0xff]  }
  0xb6   : > { %4475 = vmatpush2.bf16.msra.mxu1 %v6898_v13  ;;  %4403 = vmatprep.subr.bf16.mxu0 %v6903_v14  ;;  %v7002_v13 = vld [vmem:[%s10492_s1 + $0xe04] ss:$16 sps:$4 sm:$0xff]  }
  0xb7   : > { %4476 = vmatprep.subr.bf16.mxu1 %v6906_v15  ;;  %v7053_v14 = vld [vmem:[%s7947_s13 + $0x34] ss:$72 sps:$4 sm:$0xff]  }
  0xb8   : > { %v7056_v15 = vld [vmem:[%s7947_s13 + $0x3c] ss:$72 sps:$4 sm:$0xff]  }
  0xb9   : > { %4404 = vmatpush2.bf16.msra.mxu0 %v6901_v16  ;;  %v6997_v16 = vld [vmem:[%s10492_s1 + $0xc00] ss:$16 sps:$4 sm:$0xff]  }
  0xba   : > { %4477 = vmatpush2.bf16.msra.mxu1 %v6904_v17  ;;  %4405 = vmatprep.subr.bf16.mxu0 %v6909_v18  ;;  %v7000_v17 = vld [vmem:[%s10492_s1 + $0xe00] ss:$16 sps:$4 sm:$0xff]   ;;  %v7005_v18 = vld [vmem:[%s10492_s1 + $0xde4] ss:$16 sps:$4 sm:$0xff]  }
  0xbb   : > { %4478 = vmatprep.subr.bf16.mxu1 %v6912_v19  ;;  %v7008_v19 = vld [vmem:[%s10492_s1 + $0xfe4] ss:$16 sps:$4 sm:$0xff]  }
  0xbd   : > { %4406 = vmatpush2.bf16.msra.mxu0 %v6907_v20  ;;  %v7003_v20 = vld [vmem:[%s10492_s1 + $0xde0] ss:$16 sps:$4 sm:$0xff]  }
  0xbe   : > { %4479 = vmatpush2.bf16.msra.mxu1 %v6910_v21  ;;  %4407 = vmatprep.subr.bf16.mxu0 %v6915_v22  ;;  %v7006_v21 = vld [vmem:[%s10492_s1 + $0xfe0] ss:$16 sps:$4 sm:$0xff]   ;;  %v7011_v22 = vld [vmem:[%s10492_s1 + $0xdc4] ss:$16 sps:$4 sm:$0xff]  }
  0xbf   : > { %4480 = vmatprep.subr.bf16.mxu1 %v6918_v23  ;;  %v7014_v23 = vld [vmem:[%s10492_s1 + $0xfc4] ss:$16 sps:$4 sm:$0xff]  }
  0xc1   : > { %4408 = vmatpush2.bf16.msra.mxu0 %v6913_v24  ;;  %v7009_v24 = vld [vmem:[%s10492_s1 + $0xdc0] ss:$16 sps:$4 sm:$0xff]  }
  0xc2   : > { %4481 = vmatpush2.bf16.msra.mxu1 %v6916_v25  ;;  %4409 = vmatprep.subr.bf16.mxu0 %v6921_v26  ;;  %v7012_v25 = vld [vmem:[%s10492_s1 + $0xfc0] ss:$16 sps:$4 sm:$0xff]   ;;  %v7017_v26 = vld [vmem:[%s10492_s1 + $0xda4] ss:$16 sps:$4 sm:$0xff]  }
  0xc3   : > { %4482 = vmatprep.subr.bf16.mxu1 %v6924_v27  ;;  %v7020_v27 = vld [vmem:[%s10492_s1 + $0xfa4] ss:$16 sps:$4 sm:$0xff]  }
  0xc5   : > { %4410 = vmatpush2.bf16.msra.mxu0 %v6919_v28  ;;  %v7015_v28 = vld [vmem:[%s10492_s1 + $0xda0] ss:$16 sps:$4 sm:$0xff]  }
  0xc6   : > { %4483 = vmatpush2.bf16.msra.mxu1 %v6922_v29  ;;  %4411 = vmatprep.subr.bf16.mxu0 %v6927_v30  ;;  %v7018_v29 = vld [vmem:[%s10492_s1 + $0xfa0] ss:$16 sps:$4 sm:$0xff]   ;;  %v7023_v30 = vld [vmem:[%s10492_s1 + $0xd84] ss:$16 sps:$4 sm:$0xff]  }
  0xc7   : > { %4484 = vmatprep.subr.bf16.mxu1 %v6930_v31  ;;  %v7026_v31 = vld [vmem:[%s10492_s1 + $0xf84] ss:$16 sps:$4 sm:$0xff]  }
  0xc9   : > { %4412 = vmatpush2.bf16.msra.mxu0 %v6925_v32  ;;  %v7021_v32 = vld [vmem:[%s10492_s1 + $0xd80] ss:$16 sps:$4 sm:$0xff]  }
  0xca   : > { %4485 = vmatpush2.bf16.msra.mxu1 %v6928_v33  ;;  %4527 = vmatprep.subr.bf16.mxu0 %v6939_v34  ;;  %v7024_v33 = vld [vmem:[%s10492_s1 + $0xf80] ss:$16 sps:$4 sm:$0xff]   ;;  %v7029_v34 = vld [vmem:[%s10492_s1 + $0xd64] ss:$16 sps:$4 sm:$0xff]  }
  0xcb   : > { %4600 = vmatprep.subr.bf16.mxu1 %v6942_v35  ;;  %v7032_v35 = vld [vmem:[%s10492_s1 + $0xf64] ss:$16 sps:$4 sm:$0xff]  }
  0xcc   : > { %4414 = vmatmul.mubr.bf16.vlgmr.msra.gmra.mxu0 %v6931_v36  ;;  %v7027_v36 = vld [vmem:[%s10492_s1 + $0xd60] ss:$16 sps:$4 sm:$0xff]  }
  0xcd   : > { %4487 = vmatmul.mubr.bf16.vlgmr.msra.gmra.mxu1 %v6934_v37  ;;  %4528 = vmatpush1.bf16.msra.mxu0 %v6937_v38  ;;  %v7030_v37 = vld [vmem:[%s10492_s1 + $0xf60] ss:$16 sps:$4 sm:$0xff]   ;;  %v7035_v38 = vld [vmem:[%s10492_s1 + $0xd44] ss:$16 sps:$4 sm:$0xff]  }
  0xce   : > { %4601 = vmatpush1.bf16.msra.mxu1 %v6940_v39  ;;  %4529 = vmatprep.subr.bf16.mxu0 %v6945_v40  ;;  %v7038_v39 = vld [vmem:[%s10492_s1 + $0xf44] ss:$16 sps:$4 sm:$0xff]   ;;  %v7033_v40 = vld [vmem:[%s10492_s1 + $0xd40] ss:$16 sps:$4 sm:$0xff]  }
  0xcf   : > { %4602 = vmatprep.subr.bf16.mxu1 %v6948_v41  ;;  %4423 = vmatprep.mubr.bf16.mxu0 %v6949_v42  ;;  %v7036_v41 = vld [vmem:[%s10492_s1 + $0xf40] ss:$16 sps:$4 sm:$0xff]   ;;  %v829_v42 = vlaneseq }
  0xd0   : > { %4496 = vmatprep.mubr.bf16.mxu1 %v6958_v43  ;;  %v7041_v43 = vld [vmem:[%s10492_s1 + $0xd24] ss:$16 sps:$4 sm:$0xff]  }
  0xd1   : > { %4530 = vmatpush1.bf16.msra.mxu0 %v6943_v44  ;;  %v7044_v44 = vld [vmem:[%s10492_s1 + $0xf24] ss:$16 sps:$4 sm:$0xff]  }
  0xd2   : > { %4603 = vmatpush1.bf16.msra.mxu1 %v6946_v45  ;;  %4531 = vmatprep.subr.bf16.mxu0 %v6954_v46  ;;  %v7039_v45 = vld [vmem:[%s10492_s1 + $0xd20] ss:$16 sps:$4 sm:$0xff]  }
  0xd3   : > { %4604 = vmatprep.subr.bf16.mxu1 %v6957_v47  ;;  %v7042_v46 = vld [vmem:[%s10492_s1 + $0xf20] ss:$16 sps:$4 sm:$0xff]   ;;  %v8620_v47 = vshrl.u32 %v829_v42, 7 }
  0xd4   : > { %4424 = vmatmul.mubr.bf16.gmra.mxu0 %v6951_v48  ;;  %v7047_v48 = vld [vmem:[%s10492_s1 + $0xd04] ss:$16 sps:$4 sm:$0xff]  }
  0xd5   : > { %4497 = vmatmul.mubr.bf16.gmra.mxu1 %v6960_v51  ;;  %4532 = vmatpush1.bf16.msra.mxu0 %v6952_v49  ;;  %10497 = vst [vmem:[#allocation2_spill] sm:$0xff] %v8620_v47  ;;  %v7050_v49 = vld [vmem:[%s10492_s1 + $0xf04] ss:$16 sps:$4 sm:$0xff]   ;;  %v7048_v51 = vld [vmem:[%s10492_s1 + $0xf00] ss:$16 sps:$4 sm:$0xff]  }
  0xd6   : > { %4605 = vmatpush1.bf16.msra.mxu1 %v6955_v50  ;;  %4533 = vmatprep.subr.bf16.mxu0 %v6963_v52  ;;  %v7045_v50 = vld [vmem:[%s10492_s1 + $0xd00] ss:$16 sps:$4 sm:$0xff]  }
  0xd7   : > { %4606 = vmatprep.subr.bf16.mxu1 %v6966_v53  ;;  %4433 = vmatprep.mubr.bf16.mxu0 %v6967_v54  ;;  %v827_v52 = vld [vmem:[%s10493_s2] sm:$0xf]  ;;  %v831_v53 = vsub.s32 0, %v8620_v47  ;;  %v7059_v54 = vld [vmem:[%s10492_s1 + $0x10e4] ss:$16 sps:$4 sm:$0xff]  }
  0xd8   : > { %4506 = vmatprep.mubr.bf16.mxu1 %v6976_v55  ;;  %v7062_v55 = vld [vmem:[%s10492_s1 + $0xec] ss:$16 sps:$4 sm:$0xff]  }
  0xd9   : > { %4534 = vmatpush1.bf16.msra.mxu0 %v6961_v56  ;;  %v7051_v56 = vld [vmem:[%s7947_s13 + $0x30] ss:$72 sps:$4 sm:$0xff]  }
  0xda   : > { %4607 = vmatpush1.bf16.msra.mxu1 %v6964_v57  ;;  %4535 = vmatprep.subr.bf16.mxu0 %v6972_v58  ;;  %v7054_v57 = vld [vmem:[%s7947_s13 + $0x38] ss:$72 sps:$4 sm:$0xff]   ;;  %v835_v58 = vsub.s32 1, %v8620_v47  ;;  %v7720_v47 = vld [vmem:[%s7947_s13 + $0x24] ss:$72 sps:$4 sm:$0xff]  }
  0xdb   : > { %4608 = vmatprep.subr.bf16.mxu1 %v6975_v59  ;;  %v7057_v59 = vld [vmem:[%s10492_s1 + $0x10e0] ss:$16 sps:$4 sm:$0xff]  }
  0xdc   : > { %4434 = vmatmul.mubr.bf16.gmra.mxu0 %v6969_v60  ;;  %v8650_v60 = vrot.slane %v827_v52, %v831_v53 }
  0xdd   : > { %4507 = vmatmul.mubr.bf16.gmra.mxu1 %v6978_v62  ;;  %4536 = vmatpush1.bf16.msra.mxu0 %v6970_v61  ;;  %v7060_v61 = vld [vmem:[%s10492_s1 + $0xe8] ss:$16 sps:$4 sm:$0xff]   ;;  %v7065_v62 = vld [vmem:[%s10492_s1 + $0x10c4] ss:$16 sps:$4 sm:$0xff]  }
  0xde   : > { %4609 = vmatpush1.bf16.msra.mxu1 %v6973_v63  ;;  %4537 = vmatprep.subr.bf16.mxu0 %v6981_v0  ;;  %v7068_v63 = vld [vmem:[%s10492_s1 + $0xcc] ss:$16 sps:$4 sm:$0xff]   ;;  %v8661_v0 = vrot.slane %v827_v52, %v835_v58 }
  0xdf   : > { %4610 = vmatprep.subr.bf16.mxu1 %v6984_v1  ;;  %4443 = vmatprep.mubr.bf16.mxu0 %v6985_v2  ;;  %v7069_v1 = vld [vmem:[%s7947_s13 + $0xc4] ss:$72 sps:$4 sm:$0xff]  }
  0xe0   : > { %4516 = vmatprep.mubr.bf16.mxu1 %v6994_v3  ;;  %v7078_v2 = vld [vmem:[%s7947_s13 + $0xcc] ss:$72 sps:$4 sm:$0xff]  }
  0xe1   : > { %4538 = vmatpush1.bf16.msra.mxu0 %v6979_v4  ;;  %v7114_v52 = vld [vmem:[%s7947_s13 + $0x1ec] ss:$72 sps:$4 sm:$0xff]  }
  0xe2   : > { %4611 = vmatpush1.bf16.msra.mxu1 %v6982_v5  ;;  %4539 = vmatprep.subr.bf16.mxu0 %v6990_v6  ;;  %v7063_v5 = vld [vmem:[%s10492_s1 + $0x10c0] ss:$16 sps:$4 sm:$0xff]  }
  0xe3   : > { %4612 = vmatprep.subr.bf16.mxu1 %v6993_v7  ;;  %v7066_v7 = vld [vmem:[%s10492_s1 + $0xc8] ss:$16 sps:$4 sm:$0xff]  }
  0xe4   : > { %4444 = vmatmul.mubr.bf16.gmra.mxu0 %v6987_v8 }
  0xe5   : > { %4517 = vmatmul.mubr.bf16.gmra.mxu1 %v6996_v10  ;;  %4540 = vmatpush1.bf16.msra.mxu0 %v6988_v9  ;;  %v7074_v10 = vld [vmem:[%s10492_s1 + $0x10a4] ss:$16 sps:$4 sm:$0xff]  }
  0xe6   : > { %4613 = vmatpush1.bf16.msra.mxu1 %v6991_v11  ;;  %4541 = vmatprep.subr.bf16.mxu0 %v6999_v12  ;;  %v7077_v11 = vld [vmem:[%s10492_s1 + $0xac] ss:$16 sps:$4 sm:$0xff]  }
  0xe7   : > { %4614 = vmatprep.subr.bf16.mxu1 %v7002_v13  ;;  %4559 = vmatprep.mubr.bf16.mxu0 %v7053_v14  ;;  %v7071_v14 = vld [vmem:[%s7947_s13 + $0xc0] ss:$72 sps:$4 sm:$0xff]  }
  0xe8   : > { %4632 = vmatprep.mubr.bf16.mxu1 %v7056_v15  ;;  %v7072_v15 = vld [vmem:[%s10492_s1 + $0x10a0] ss:$16 sps:$4 sm:$0xff]  }
  0xe9   : > { %4542 = vmatpush1.bf16.msra.mxu0 %v6997_v16 }
  0xea   : > { %4615 = vmatpush1.bf16.msra.mxu1 %v7000_v17  ;;  %4543 = vmatprep.subr.bf16.mxu0 %v7005_v18  ;;  %v7080_v17 = vld [vmem:[%s7947_s13 + $0xc8] ss:$72 sps:$4 sm:$0xff]  }
  0xeb   : > { %4616 = vmatprep.subr.bf16.mxu1 %v7008_v19 }
  0xed   : > { %4544 = vmatpush2.bf16.msra.mxu0 %v7003_v20 }
  0xee   : > { %4617 = vmatpush2.bf16.msra.mxu1 %v7006_v21  ;;  %4545 = vmatprep.subr.bf16.mxu0 %v7011_v22  ;;  %v7075_v21 = vld [vmem:[%s10492_s1 + $0xa8] ss:$16 sps:$4 sm:$0xff]  }
  0xef   : > { %4618 = vmatprep.subr.bf16.mxu1 %v7014_v23  ;;  %v7083_v23 = vld [vmem:[%s10492_s1 + $0x1084] ss:$16 sps:$4 sm:$0xff]  }
  0xf1   : > { %4546 = vmatpush2.bf16.msra.mxu0 %v7009_v24  ;;  %v7086_v24 = vld [vmem:[%s10492_s1 + $0x8c] ss:$16 sps:$4 sm:$0xff]  }
  0xf2   : > { %4619 = vmatpush2.bf16.msra.mxu1 %v7012_v25  ;;  %4547 = vmatprep.subr.bf16.mxu0 %v7017_v26  ;;  %v7087_v26 = vld [vmem:[%s7947_s13 + $0x154] ss:$72 sps:$4 sm:$0xff]  }
  0xf3   : > { %4620 = vmatprep.subr.bf16.mxu1 %v7020_v27  ;;  %v7096_v27 = vld [vmem:[%s7947_s13 + $0x15c] ss:$72 sps:$4 sm:$0xff]  }
  0xf5   : > { %4548 = vmatpush2.bf16.msra.mxu0 %v7015_v28  ;;  %v7081_v28 = vld [vmem:[%s10492_s1 + $0x1080] ss:$16 sps:$4 sm:$0xff]  }
  0xf6   : > { %4621 = vmatpush2.bf16.msra.mxu1 %v7018_v29  ;;  %4549 = vmatprep.subr.bf16.mxu0 %v7023_v30 }
  0xf7   : > { %4622 = vmatprep.subr.bf16.mxu1 %v7026_v31  ;;  %v7084_v31 = vld [vmem:[%s10492_s1 + $0x88] ss:$16 sps:$4 sm:$0xff]  }
  0xf9   : > { %4550 = vmatpush2.bf16.msra.mxu0 %v7021_v32 }
  0xfa   : > { %4623 = vmatpush2.bf16.msra.mxu1 %v7024_v33  ;;  %4551 = vmatprep.subr.bf16.mxu0 %v7029_v34  ;;  %v7092_v33 = vld [vmem:[%s10492_s1 + $0x1064] ss:$16 sps:$4 sm:$0xff]   ;;  %v7095_v34 = vld [vmem:[%s10492_s1 + $0x6c] ss:$16 sps:$4 sm:$0xff]  }
  0xfb   : > { %4624 = vmatprep.subr.bf16.mxu1 %v7032_v35 }
  0xfd   : > { %4552 = vmatpush2.bf16.msra.mxu0 %v7027_v36  ;;  %v7089_v36 = vld [vmem:[%s7947_s13 + $0x150] ss:$72 sps:$4 sm:$0xff]  }
  0xfe   : > { %4625 = vmatpush2.bf16.msra.mxu1 %v7030_v37  ;;  %4553 = vmatprep.subr.bf16.mxu0 %v7035_v38  ;;  %v7090_v37 = vld [vmem:[%s10492_s1 + $0x1060] ss:$16 sps:$4 sm:$0xff]  }
  0xff   : > { %4626 = vmatprep.subr.bf16.mxu1 %v7038_v39 }
 0x101   : > { %4554 = vmatpush2.bf16.msra.mxu0 %v7033_v40  ;;  %v7098_v40 = vld [vmem:[%s7947_s13 + $0x158] ss:$72 sps:$4 sm:$0xff]  }
 0x102   : > { %4627 = vmatpush2.bf16.msra.mxu1 %v7036_v41  ;;  %4555 = vmatprep.subr.bf16.mxu0 %v7041_v43  ;;  %v7093_v43 = vld [vmem:[%s10492_s1 + $0x68] ss:$16 sps:$4 sm:$0xff]  }
 0x103   : > { %4628 = vmatprep.subr.bf16.mxu1 %v7044_v44 }
 0x105   : > { %4556 = vmatpush2.bf16.msra.mxu0 %v7039_v45 }
 0x106   : > { %4629 = vmatpush2.bf16.msra.mxu1 %v7042_v46  ;;  %4557 = vmatprep.subr.bf16.mxu0 %v7047_v48  ;;  %v7101_v46 = vld [vmem:[%s10492_s1 + $0x1044] ss:$16 sps:$4 sm:$0xff]   ;;  %v7104_v48 = vld [vmem:[%s10492_s1 + $0x4c] ss:$16 sps:$4 sm:$0xff]  }
 0x107   : > { %4630 = vmatprep.subr.bf16.mxu1 %v7050_v49 }
 0x109   : > { %4558 = vmatpush2.bf16.msra.mxu0 %v7045_v50 }
 0x10a   : > { %4631 = vmatpush2.bf16.msra.mxu1 %v7048_v51  ;;  %4673 = vmatprep.subr.bf16.mxu0 %v7059_v54  ;;  %v7105_v51 = vld [vmem:[%s7947_s13 + $0x1e4] ss:$72 sps:$4 sm:$0xff]   ;;  %v7099_v54 = vld [vmem:[%s10492_s1 + $0x1040] ss:$16 sps:$4 sm:$0xff]  }
 0x10b   : > { %4746 = vmatprep.subr.bf16.mxu1 %v7062_v55 }
 0x10c   : > { %v4123_v3 = vpop.f32.mrf.mxu0  ;;  %4560 = vmatmul.mubr.bf16.vlgmr.msra.gmra.mxu0 %v7051_v56 }
 0x10d   : > { %v4196_v4 = vpop.f32.mrf.mxu1  ;;  %4633 = vmatmul.mubr.bf16.vlgmr.msra.gmra.mxu1 %v7054_v57  ;;  %v4124_v6 = vadd.f32 %v4123_v3, %v8650_v60  ;;  %4674 = vmatpush1.bf16.msra.mxu0 %v7057_v59  ;;  %v7102_v57 = vld [vmem:[%s10492_s1 + $0x48] ss:$16 sps:$4 sm:$0xff]  }
 0x10e   : > { %4747 = vmatpush1.bf16.msra.mxu1 %v7060_v61  ;;  %v4125_v8 = vpop.f32.mrf.mxu0  ;;  %4675 = vmatprep.subr.bf16.mxu0 %v7065_v62  ;;  %v7110_v61 = vld [vmem:[%s10492_s1 + $0x1024] ss:$16 sps:$4 sm:$0xff]   ;;  %v7113_v62 = vld [vmem:[%s10492_s1 + $0x2c] ss:$16 sps:$4 sm:$0xff]  }
 0x10f   : > { %v4198_v9 = vpop.f32.mrf.mxu1  ;;  %4748 = vmatprep.subr.bf16.mxu1 %v7068_v63  ;;  %v8678_v12 = vadd.f32 %v4196_v4, %v4124_v6  ;;  %v4126_v13 = vadd.f32 %v4125_v8, %v8661_v0  ;;  %4569 = vmatprep.mubr.bf16.mxu0 %v7069_v1  ;;  %v7107_v1 = vld [vmem:[%s7947_s13 + $0x1e0] ss:$72 sps:$4 sm:$0xff]  }
 0x110   : > { %4642 = vmatprep.mubr.bf16.mxu1 %v7078_v2  ;;  %v4127_v16 = vpop.f32.mrf.mxu0  ;;  %v7108_v2 = vld [vmem:[%s10492_s1 + $0x1020] ss:$16 sps:$4 sm:$0xff]   ;;  %v7111_v8 = vld [vmem:[%s10492_s1 + $0x28] ss:$16 sps:$4 sm:$0xff]  }
 0x111   : > { %v8686_v18 = vadd.f32 %v4198_v9, %v4126_v13  ;;  %v4128_v19 = vadd.f32 %v4127_v16, %v8650_v60  ;;  %v4200_v20 = vpop.f32.mrf.mxu1  ;;  %4676 = vmatpush1.bf16.msra.mxu0 %v7063_v5  ;;  %v7116_v5 = vld [vmem:[%s7947_s13 + $0x1e8] ss:$72 sps:$4 sm:$0xff]   ;;  %v7122_v13 = vld [vmem:[%s10492_s1 + $0xc] ss:$16 sps:$4 sm:$0xff]  }
 0x112   : > { %4749 = vmatpush1.bf16.msra.mxu1 %v7066_v7  ;;  %v8692_v22 = vpop.f32.mrf.mxu0  ;;  %4677 = vmatprep.subr.bf16.mxu0 %v7074_v10 }
 0x113   : > { %4750 = vmatprep.subr.bf16.mxu1 %v7077_v11  ;;  %v8700_v25 = vadd.f32 %v4200_v20, %v4128_v19  ;;  %v8707_v30 = vpop.f32.mrf.mxu1  ;;  %v7119_v11 = vld [vmem:[%s10492_s1 + $0x1004] ss:$16 sps:$4 sm:$0xff]   ;;  %v7117_v19 = vld [vmem:[%s10492_s1 + $0x1000] ss:$16 sps:$4 sm:$0xff]  }
 0x114   : > { %4570 = vmatmul.mubr.bf16.gmra.mxu0 %v7071_v14  ;;  %v4133_v29 = vpop.f32.mrf.mxu0 }
 0x115   : > { %4643 = vmatmul.mubr.bf16.gmra.mxu1 %v7080_v17  ;;  %4678 = vmatpush1.bf16.msra.mxu0 %v7072_v15  ;;  %v4134_v32 = vadd.f32 %v4133_v29, %v8650_v60  ;;  %v4206_v39 = vpop.f32.mrf.mxu1  ;;  %v7173_v17 = vld [vmem:[%s7947_s13 + $0x44] ss:$72 sps:$4 sm:$0xff]  }
 0x116   : > { %4751 = vmatpush1.bf16.msra.mxu1 %v7075_v21  ;;  %4679 = vmatprep.subr.bf16.mxu0 %v7083_v23  ;;  %v4135_v35 = vpop.f32.mrf.mxu0  ;;  %v7120_v23 = vld [vmem:[%s10492_s1 + $0x8] ss:$16 sps:$4 sm:$0xff]  }
 0x117   : > { %4752 = vmatprep.subr.bf16.mxu1 %v7086_v24  ;;  %4579 = vmatprep.mubr.bf16.mxu0 %v7087_v26  ;;  %v4136_v38 = vadd.f32 %v4135_v35, %v8661_v0  ;;  %v8725_v41 = vadd.f32 %v4206_v39, %v4134_v32  ;;  %v4208_v45 = vpop.f32.mrf.mxu1 }
 0x118   : > { %4652 = vmatprep.mubr.bf16.mxu1 %v7096_v27  ;;  %v4137_v42 = vpop.f32.mrf.mxu0  ;;  %v7125_v27 = vld [vmem:[%s10492_s1 + $0x11e4] ss:$16 sps:$4 sm:$0xff]  }
 0x119   : > { %4680 = vmatpush1.bf16.msra.mxu0 %v7081_v28  ;;  %v4138_v44 = vadd.f32 %v4137_v42, %v8650_v60  ;;  %v8737_v49 = vadd.f32 %v4208_v45, %v4136_v38  ;;  %v4210_v53 = vpop.f32.mrf.mxu1  ;;  %v7128_v28 = vld [vmem:[%s10492_s1 + $0x1ec] ss:$16 sps:$4 sm:$0xff]   ;;  %v7129_v45 = vld [vmem:[%s10492_s1 + $0x11c0] ss:$16 sps:$4 sm:$0xff]  }
 0x11a   : > { %4753 = vmatpush1.bf16.msra.mxu1 %v7084_v31  ;;  %4681 = vmatprep.subr.bf16.mxu0 %v7092_v33  ;;  %v8739_v50 = vpop.f32.mrf.mxu0  ;;  %v7695_v33 = vld [vmem:[%s7947_s13 + $0x4] ss:$72 sps:$4 sm:$0xff]  }
 0x11b   : > { %4754 = vmatprep.subr.bf16.mxu1 %v7095_v34  ;;  %v8746_v55 = vadd.f32 %v4210_v53, %v4138_v44  ;;  %v8752_v59 = vpop.f32.mrf.mxu1  ;;  %v7123_v34 = vld [vmem:[%s10492_s1 + $0x11e0] ss:$16 sps:$4 sm:$0xff]   ;;  %v7134_v42 = vld [vmem:[%s10492_s1 + $0x1cc] ss:$16 sps:$4 sm:$0xff]   ;;  %v7138_v53 = vld [vmem:[%s10492_s1 + $0x1a8] ss:$16 sps:$4 sm:$0xff]  }
 0x11c   : > { %4580 = vmatmul.mubr.bf16.gmra.mxu0 %v7089_v36  ;;  %v4143_v56 = vpop.f32.mrf.mxu0 }
 0x11d   : > { %4653 = vmatmul.mubr.bf16.gmra.mxu1 %v7098_v40  ;;  %4682 = vmatpush1.bf16.msra.mxu0 %v7090_v37  ;;  %v4144_v58 = vadd.f32 %v4143_v56, %v8650_v60  ;;  %v4216_v4 = vpop.f32.mrf.mxu1  ;;  %v7126_v37 = vld [vmem:[%s10492_s1 + $0x1e8] ss:$16 sps:$4 sm:$0xff]   ;;  %v7131_v40 = vld [vmem:[%s10492_s1 + $0x11c4] ss:$16 sps:$4 sm:$0xff]   ;;  %v7146_v56 = vld [vmem:[%s10492_s1 + $0x18c] ss:$16 sps:$4 sm:$0xff]  }
 0x11e   : > { %4755 = vmatpush1.bf16.msra.mxu1 %v7093_v43  ;;  %4683 = vmatprep.subr.bf16.mxu0 %v7101_v46  ;;  %v4145_v63 = vpop.f32.mrf.mxu0 }
 0x11f   : > { %4756 = vmatprep.subr.bf16.mxu1 %v7104_v48  ;;  %4589 = vmatprep.mubr.bf16.mxu0 %v7105_v51  ;;  %v4146_v3 = vadd.f32 %v4145_v63, %v8661_v0  ;;  %v8766_v6 = vadd.f32 %v4216_v4, %v4144_v58  ;;  %v4218_v10 = vpop.f32.mrf.mxu1  ;;  %v7137_v48 = vld [vmem:[%s10492_s1 + $0x11a4] ss:$16 sps:$4 sm:$0xff]   ;;  %v7140_v51 = vld [vmem:[%s10492_s1 + $0x1ac] ss:$16 sps:$4 sm:$0xff]   ;;  %v7144_v58 = vld [vmem:[%s10492_s1 + $0x188] ss:$16 sps:$4 sm:$0xff]  }
 0x120   : > { %4662 = vmatprep.mubr.bf16.mxu1 %v7114_v52  ;;  %v4147_v7 = vpop.f32.mrf.mxu0  ;;  %v7135_v52 = vld [vmem:[%s10492_s1 + $0x11a0] ss:$16 sps:$4 sm:$0xff]  }
 0x121   : > { %4684 = vmatpush1.bf16.msra.mxu0 %v7099_v54  ;;  %v4148_v9 = vadd.f32 %v4147_v7, %v8650_v60  ;;  %v8778_v14 = vadd.f32 %v4218_v10, %v4146_v3  ;;  %v4220_v16 = vpop.f32.mrf.mxu1  ;;  %v7143_v54 = vld [vmem:[%s10492_s1 + $0x1184] ss:$16 sps:$4 sm:$0xff]   ;;  %v7147_v63 = vld [vmem:[%s10492_s1 + $0x1160] ss:$16 sps:$4 sm:$0xff]   ;;  %v7158_v3 = vld [vmem:[%s10492_s1 + $0x14c] ss:$16 sps:$4 sm:$0xff]  }
 0x122   : > { %4757 = vmatpush1.bf16.msra.mxu1 %v7102_v57  ;;  %4685 = vmatprep.subr.bf16.mxu0 %v7110_v61  ;;  %v8780_v15 = vpop.f32.mrf.mxu0  ;;  %v7141_v57 = vld [vmem:[%s10492_s1 + $0x1180] ss:$16 sps:$4 sm:$0xff]   ;;  %v7149_v61 = vld [vmem:[%s10492_s1 + $0x1164] ss:$16 sps:$4 sm:$0xff]   ;;  %v7162_v10 = vld [vmem:[%s10492_s1 + $0x128] ss:$16 sps:$4 sm:$0xff]  }
 0x123   : > { %4758 = vmatprep.subr.bf16.mxu1 %v7113_v62  ;;  %v8786_v20 = vadd.f32 %v4220_v16, %v4148_v9  ;;  %v8792_v26 = vpop.f32.mrf.mxu1  ;;  %v7152_v62 = vld [vmem:[%s10492_s1 + $0x16c] ss:$16 sps:$4 sm:$0xff]   ;;  %v7153_v4 = vld [vmem:[%s10492_s1 + $0x1140] ss:$16 sps:$4 sm:$0xff]   ;;  %v7161_v7 = vld [vmem:[%s10492_s1 + $0x1124] ss:$16 sps:$4 sm:$0xff]  }
 0x124   : > { %4590 = vmatmul.mubr.bf16.gmra.mxu0 %v7107_v1  ;;  %v4153_v21 = vpop.f32.mrf.mxu0  ;;  %v7150_v1 = vld [vmem:[%s10492_s1 + $0x168] ss:$16 sps:$4 sm:$0xff]   ;;  %v7159_v9 = vld [vmem:[%s10492_s1 + $0x1120] ss:$16 sps:$4 sm:$0xff]  }
 0x125   : > { %4663 = vmatmul.mubr.bf16.gmra.mxu1 %v7116_v5  ;;  %4686 = vmatpush1.bf16.msra.mxu0 %v7108_v2  ;;  %v4154_v24 = vadd.f32 %v4153_v21, %v8650_v60  ;;  %v4226_v32 = vpop.f32.mrf.mxu1  ;;  %v7155_v2 = vld [vmem:[%s10492_s1 + $0x1144] ss:$16 sps:$4 sm:$0xff]   ;;  %v7156_v5 = vld [vmem:[%s10492_s1 + $0x148] ss:$16 sps:$4 sm:$0xff]   ;;  %v7165_v16 = vld [vmem:[%s10492_s1 + $0x1100] ss:$16 sps:$4 sm:$0xff]  }
 0x126   : > { %4759 = vmatpush1.bf16.msra.mxu1 %v7111_v8  ;;  %4687 = vmatprep.subr.bf16.mxu0 %v7119_v11  ;;  %v4155_v29 = vpop.f32.mrf.mxu0  ;;  %v7164_v8 = vld [vmem:[%s10492_s1 + $0x12c] ss:$16 sps:$4 sm:$0xff]   ;;  %v7167_v11 = vld [vmem:[%s10492_s1 + $0x1104] ss:$16 sps:$4 sm:$0xff]  }
 0x127   : > { %4760 = vmatprep.subr.bf16.mxu1 %v7122_v13  ;;  %v4156_v31 = vadd.f32 %v4155_v29, %v8661_v0  ;;  %4705 = vmatprep.mubr.bf16.mxu0 %v7173_v17  ;;  %v8805_v35 = vadd.f32 %v4226_v32, %v4154_v24  ;;  %v4228_v39 = vpop.f32.mrf.mxu1  ;;  %v7170_v13 = vld [vmem:[%s10492_s1 + $0x10c] ss:$16 sps:$4 sm:$0xff]   ;;  %v7168_v17 = vld [vmem:[%s10492_s1 + $0x108] ss:$16 sps:$4 sm:$0xff]  }
 0x128   : > { %4778 = vmatprep.mubr.bf16.mxu1 %v7695_v33  ;;  %v4157_v36 = vpop.f32.mrf.mxu0  ;;  %v7179_v21 = vld [vmem:[%s10492_s1 + $0x4ec] ss:$16 sps:$4 sm:$0xff]   ;;  %v7174_v24 = vld [vmem:[%s10492_s1 + $0x2e8] ss:$16 sps:$4 sm:$0xff]  }
 0x129   : > { %4688 = vmatpush1.bf16.msra.mxu0 %v7117_v19  ;;  %v4158_v38 = vadd.f32 %v4157_v36, %v8650_v60  ;;  %v8817_v43 = vadd.f32 %v4228_v39, %v4156_v31  ;;  %v4230_v44 = vpop.f32.mrf.mxu1  ;;  %v7132_v60 = vld [vmem:[%s10492_s1 + $0x1c8] ss:$16 sps:$4 sm:$0xff]   ;;  %v7176_v19 = vld [vmem:[%s10492_s1 + $0x2ec] ss:$16 sps:$4 sm:$0xff]  }
 0x12a   : > { %4761 = vmatpush1.bf16.msra.mxu1 %v7120_v23  ;;  %4689 = vmatprep.subr.bf16.mxu0 %v7125_v27  ;;  %v7171_v23 = vld [vmem:[%s7947_s13 + $0x40] ss:$72 sps:$4 sm:$0xff]   ;;  %v7182_v29 = vld [vmem:[%s10492_s1 + $0x2cc] ss:$16 sps:$4 sm:$0xff]  }
 0x12b   : > { %4762 = vmatprep.subr.bf16.mxu1 %v7128_v28  ;;  %v8822_v46 = vadd.f32 %v4230_v44, %v4158_v38  ;;  %v7177_v27 = vld [vmem:[%s10492_s1 + $0x4e8] ss:$16 sps:$4 sm:$0xff]   ;;  %v8912_v28 = vpop.f32.mrf.mxu0  ;;  %v7185_v31 = vld [vmem:[%s10492_s1 + $0x4cc] ss:$16 sps:$4 sm:$0xff]  }
 0x12c   : > { %v7186_v32 = vld [vmem:[%s7947_s13 + $0xd4] ss:$72 sps:$4 sm:$0xff]   ;;  %v7180_v36 = vld [vmem:[%s10492_s1 + $0x2c8] ss:$16 sps:$4 sm:$0xff]  }
 0x12d   : > { %4690 = vmatpush2.bf16.msra.mxu0 %v7123_v34  ;;  %v7696_v34 = vld [vmem:[%s7947_s13] ss:$72 sps:$4 sm:$0xff]   ;;  %v7188_v44 = vld [vmem:[%s7947_s13 + $0xd0] ss:$72 sps:$4 sm:$0xff]  }
 0x12e   : > { %4763 = vmatpush2.bf16.msra.mxu1 %v7126_v37  ;;  %4691 = vmatprep.subr.bf16.mxu0 %v7131_v40  ;;  %v7183_v38 = vld [vmem:[%s10492_s1 + $0x4c8] ss:$16 sps:$4 sm:$0xff]   ;;  %v7191_v40 = vld [vmem:[%s10492_s1 + $0x2ac] ss:$16 sps:$4 sm:$0xff]  }
 0x12f   : > { %4764 = vmatprep.subr.bf16.mxu1 %v7134_v42  ;;  %v7194_v42 = vld [vmem:[%s10492_s1 + $0x4ac] ss:$16 sps:$4 sm:$0xff]  }
 0x131   : > { %4692 = vmatpush2.bf16.msra.mxu0 %v7129_v45  ;;  %v7697_v45 = vld [vmem:[%s7947_s13 + $0x94] ss:$72 sps:$4 sm:$0xff]  }
 0x132   : > { %4765 = vmatpush2.bf16.msra.mxu1 %v7132_v60  ;;  %4693 = vmatprep.subr.bf16.mxu0 %v7137_v48  ;;  %v7189_v48 = vld [vmem:[%s10492_s1 + $0x2a8] ss:$16 sps:$4 sm:$0xff]  }
 0x133   : > { %4766 = vmatprep.subr.bf16.mxu1 %v7140_v51 }
 0x135   : > { %4694 = vmatpush2.bf16.msra.mxu0 %v7135_v52 }
 0x136   : > { %4767 = vmatpush2.bf16.msra.mxu1 %v7138_v53  ;;  %4695 = vmatprep.subr.bf16.mxu0 %v7143_v54  ;;  %v7197_v53 = vld [vmem:[%s10492_s1 + $0x28c] ss:$16 sps:$4 sm:$0xff]  }
 0x137   : > { %4768 = vmatprep.subr.bf16.mxu1 %v7146_v56  ;;  %v7200_v54 = vld [vmem:[%s10492_s1 + $0x48c] ss:$16 sps:$4 sm:$0xff]  }
 0x139   : > { %4696 = vmatpush2.bf16.msra.mxu0 %v7141_v57  ;;  %v7195_v57 = vld [vmem:[%s10492_s1 + $0x288] ss:$16 sps:$4 sm:$0xff]  }
 0x13a   : > { %4769 = vmatpush2.bf16.msra.mxu1 %v7144_v58  ;;  %4697 = vmatprep.subr.bf16.mxu0 %v7149_v61  ;;  %v7698_v58 = vld [vmem:[%s7947_s13 + $0x90] ss:$72 sps:$4 sm:$0xff]  }
 0x13b   : > { %4770 = vmatprep.subr.bf16.mxu1 %v7152_v62  ;;  %v7198_v62 = vld [vmem:[%s10492_s1 + $0x488] ss:$16 sps:$4 sm:$0xff]  }
 0x13d   : > { %4698 = vmatpush2.bf16.msra.mxu0 %v7147_v63 }
 0x13e   : > { %4771 = vmatpush2.bf16.msra.mxu1 %v7150_v1  ;;  %4699 = vmatprep.subr.bf16.mxu0 %v7155_v2  ;;  %v7206_v1 = vld [vmem:[%s10492_s1 + $0x26c] ss:$16 sps:$4 sm:$0xff]  }
 0x13f   : > { %4772 = vmatprep.subr.bf16.mxu1 %v7158_v3  ;;  %v7209_v2 = vld [vmem:[%s10492_s1 + $0x46c] ss:$16 sps:$4 sm:$0xff]   ;;  %v7203_v3 = vld [vmem:[%s7947_s13 + $0x160] ss:$72 sps:$4 sm:$0xff]  }
 0x141   : > { %4700 = vmatpush2.bf16.msra.mxu0 %v7153_v4  ;;  %v7699_v4 = vld [vmem:[%s7947_s13 + $0x124] ss:$72 sps:$4 sm:$0xff]  }
 0x142   : > { %4773 = vmatpush2.bf16.msra.mxu1 %v7156_v5  ;;  %4701 = vmatprep.subr.bf16.mxu0 %v7161_v7  ;;  %v7204_v7 = vld [vmem:[%s10492_s1 + $0x268] ss:$16 sps:$4 sm:$0xff]  }
 0x143   : > { %4774 = vmatprep.subr.bf16.mxu1 %v7164_v8 }
 0x145   : > { %4702 = vmatpush2.bf16.msra.mxu0 %v7159_v9  ;;  %v8990_v9 = vpop.f32.mrf.mxu1 }
 0x146   : > { %4775 = vmatpush2.bf16.msra.mxu1 %v7162_v10  ;;  %4703 = vmatprep.subr.bf16.mxu0 %v7167_v11  ;;  %v7212_v11 = vld [vmem:[%s10492_s1 + $0x24c] ss:$16 sps:$4 sm:$0xff]  }
 0x147   : > { %4776 = vmatprep.subr.bf16.mxu1 %v7170_v13  ;;  %v7216_v13 = vld [vmem:[%s7947_s13 + $0x1f4] ss:$72 sps:$4 sm:$0xff]  }
 0x149   : > { %4704 = vmatpush2.bf16.msra.mxu0 %v7165_v16 }
 0x14a   : > { %4777 = vmatpush2.bf16.msra.mxu1 %v7168_v17  ;;  %4819 = vmatprep.subr.bf16.mxu0 %v7176_v19  ;;  %v7210_v19 = vld [vmem:[%s10492_s1 + $0x248] ss:$16 sps:$4 sm:$0xff]  }
 0x14b   : > { %4892 = vmatprep.subr.bf16.mxu1 %v7179_v21  ;;  %v7700_v21 = vld [vmem:[%s7947_s13 + $0x120] ss:$72 sps:$4 sm:$0xff]  }
 0x14c   : > { %v4269_v33 = vpop.f32.mrf.mxu0  ;;  %4706 = vmatmul.mubr.bf16.vlgmr.msra.gmra.mxu0 %v7171_v23 }
 0x14d   : > { %4779 = vmatmul.mubr.bf16.vlgmr.msra.gmra.mxu1 %v7696_v34  ;;  %v8926_v37 = vadd.f32 %v4269_v33, %v8678_v12  ;;  %4820 = vmatpush1.bf16.msra.mxu0 %v7174_v24  ;;  %v9001_v16 = vpop.f32.mrf.mxu1  ;;  %v7213_v24 = vld [vmem:[%s10492_s1 + $0x448] ss:$16 sps:$4 sm:$0xff]   ;;  %v7701_v33 = vld [vmem:[%s7947_s13 + $0x1b4] ss:$72 sps:$4 sm:$0xff]  }
 0x14e   : > { %4893 = vmatpush1.bf16.msra.mxu1 %v7177_v27  ;;  %v4271_v39 = vpop.f32.mrf.mxu0  ;;  %4821 = vmatprep.subr.bf16.mxu0 %v7182_v29  ;;  %v7221_v29 = vld [vmem:[%s10492_s1 + $0x22c] ss:$16 sps:$4 sm:$0xff]  }
 0x14f   : > { %4894 = vmatprep.subr.bf16.mxu1 %v7185_v31  ;;  %v8938_v12 = vadd.f32 %v4271_v39, %v8686_v18  ;;  %4715 = vmatprep.mubr.bf16.mxu0 %v7186_v32  ;;  %v7192_v18 = vld [vmem:[%s10492_s1 + $0x4a8] ss:$16 sps:$4 sm:$0xff]   ;;  %v7224_v31 = vld [vmem:[%s10492_s1 + $0x42c] ss:$16 sps:$4 sm:$0xff]   ;;  %v9024_v34 = vpop.f32.mrf.mxu1 }
 0x150   : > { %4788 = vmatprep.mubr.bf16.mxu1 %v7697_v45  ;;  %v4273_v60 = vpop.f32.mrf.mxu0  ;;  %v7218_v32 = vld [vmem:[%s7947_s13 + $0x1f0] ss:$72 sps:$4 sm:$0xff]  }
 0x151   : > { %v8946_v51 = vadd.f32 %v4273_v60, %v8700_v25  ;;  %4822 = vmatpush1.bf16.msra.mxu0 %v7180_v36  ;;  %v7201_v25 = vld [vmem:[%s7947_s13 + $0x164] ss:$72 sps:$4 sm:$0xff]   ;;  %v7225_v60 = vld [vmem:[%s10492_s1 + $0x208] ss:$16 sps:$4 sm:$0xff]  }
 0x152   : > { %4895 = vmatpush1.bf16.msra.mxu1 %v7183_v38  ;;  %v8951_v52 = vpop.f32.mrf.mxu0  ;;  %4823 = vmatprep.subr.bf16.mxu0 %v7191_v40  ;;  %v7219_v38 = vld [vmem:[%s10492_s1 + $0x228] ss:$16 sps:$4 sm:$0xff]  }
 0x153   : > { %4896 = vmatprep.subr.bf16.mxu1 %v7194_v42  ;;  %v7227_v42 = vld [vmem:[%s10492_s1 + $0x20c] ss:$16 sps:$4 sm:$0xff]  }
 0x154   : > { %v4279_v56 = vpop.f32.mrf.mxu0  ;;  %4716 = vmatmul.mubr.bf16.gmra.mxu0 %v7188_v44  ;;  %v7230_v44 = vld [vmem:[%s10492_s1 + $0x40c] ss:$16 sps:$4 sm:$0xff]  }
 0x155   : > { %4789 = vmatmul.mubr.bf16.gmra.mxu1 %v7698_v58  ;;  %v8965_v61 = vadd.f32 %v4279_v56, %v8725_v41  ;;  %4824 = vmatpush1.bf16.msra.mxu0 %v7189_v48  ;;  %v7702_v48 = vld [vmem:[%s7947_s13 + $0x1b0] ss:$72 sps:$4 sm:$0xff]   ;;  %v7236_v56 = vld [vmem:[%s10492_s1 + $0x5ec] ss:$16 sps:$4 sm:$0xff]  }
 0x156   : > { %4897 = vmatpush1.bf16.msra.mxu1 %v7192_v18  ;;  %v4281_v63 = vpop.f32.mrf.mxu0  ;;  %4825 = vmatprep.subr.bf16.mxu0 %v7197_v53  ;;  %v7228_v53 = vld [vmem:[%s10492_s1 + $0x408] ss:$16 sps:$4 sm:$0xff]   ;;  %v7704_v58 = vld [vmem:[%s7947_s13 + $0x14] ss:$72 sps:$4 sm:$0xff]  }
 0x157   : > { %4898 = vmatprep.subr.bf16.mxu1 %v7200_v54  ;;  %v8977_v41 = vadd.f32 %v4281_v63, %v8737_v49  ;;  %4725 = vmatprep.mubr.bf16.mxu0 %v7201_v25  ;;  %v7207_v49 = vld [vmem:[%s10492_s1 + $0x468] ss:$16 sps:$4 sm:$0xff]   ;;  %v7233_v25 = vld [vmem:[%s10492_s1 + $0x3ec] ss:$16 sps:$4 sm:$0xff]  }
 0x158   : > { %4798 = vmatprep.mubr.bf16.mxu1 %v7699_v4  ;;  %v4283_v5 = vpop.f32.mrf.mxu0  ;;  %v7239_v4 = vld [vmem:[%s10492_s1 + $0x3cc] ss:$16 sps:$4 sm:$0xff]  }
 0x159   : > { %v8985_v8 = vadd.f32 %v4283_v5, %v8746_v55  ;;  %4826 = vmatpush1.bf16.msra.mxu0 %v7195_v57  ;;  %v7215_v55 = vld [vmem:[%s10492_s1 + $0x44c] ss:$16 sps:$4 sm:$0xff]  }
 0x15a   : > { %4899 = vmatpush1.bf16.msra.mxu1 %v7198_v62  ;;  %v8992_v10 = vpop.f32.mrf.mxu0  ;;  %4827 = vmatprep.subr.bf16.mxu0 %v7206_v1  ;;  %v7703_v57 = vld [vmem:[%s7947_s13 + $0xc] ss:$72 sps:$4 sm:$0xff]   ;;  %v7231_v1 = vld [vmem:[%s10492_s1 + $0x3e8] ss:$16 sps:$4 sm:$0xff]  }
 0x15b   : > { %4900 = vmatprep.subr.bf16.mxu1 %v7209_v2  ;;  %v7242_v5 = vld [vmem:[%s10492_s1 + $0x5cc] ss:$16 sps:$4 sm:$0xff]  }
 0x15c   : > { %v4289_v17 = vpop.f32.mrf.mxu0  ;;  %4726 = vmatmul.mubr.bf16.gmra.mxu0 %v7203_v3 }
 0x15d   : > { %4799 = vmatmul.mubr.bf16.gmra.mxu1 %v7700_v21  ;;  %v9008_v23 = vadd.f32 %v4289_v17, %v8766_v6  ;;  %4828 = vmatpush1.bf16.msra.mxu0 %v7204_v7  ;;  %v7240_v7 = vld [vmem:[%s10492_s1 + $0x5c8] ss:$16 sps:$4 sm:$0xff]   ;;  %v7251_v21 = vld [vmem:[%s10492_s1 + $0x38c] ss:$16 sps:$4 sm:$0xff]  }
 0x15e   : > { %4901 = vmatpush1.bf16.msra.mxu1 %v7207_v49  ;;  %v4291_v27 = vpop.f32.mrf.mxu0  ;;  %4829 = vmatprep.subr.bf16.mxu0 %v7212_v11  ;;  %v7245_v11 = vld [vmem:[%s10492_s1 + $0x3ac] ss:$16 sps:$4 sm:$0xff]   ;;  %v7246_v17 = vld [vmem:[%s10492_s1 + $0x5a8] ss:$16 sps:$4 sm:$0xff]  }
 0x15f   : > { %4902 = vmatprep.subr.bf16.mxu1 %v7215_v55  ;;  %v9020_v6 = vadd.f32 %v4291_v27, %v8778_v14  ;;  %4735 = vmatprep.mubr.bf16.mxu0 %v7216_v13  ;;  %v7222_v14 = vld [vmem:[%s10492_s1 + $0x428] ss:$16 sps:$4 sm:$0xff]   ;;  %v7248_v55 = vld [vmem:[%s10492_s1 + $0x5ac] ss:$16 sps:$4 sm:$0xff]  }
 0x160   : > { %4808 = vmatprep.mubr.bf16.mxu1 %v7701_v33  ;;  %v4293_v36 = vpop.f32.mrf.mxu0  ;;  %v7243_v13 = vld [vmem:[%s10492_s1 + $0x3a8] ss:$16 sps:$4 sm:$0xff]   ;;  %v7260_v33 = vld [vmem:[%s10492_s1 + $0x56c] ss:$16 sps:$4 sm:$0xff]  }
 0x161   : > { %v9030_v39 = vadd.f32 %v4293_v36, %v8786_v20  ;;  %4830 = vmatpush1.bf16.msra.mxu0 %v7210_v19  ;;  %v9043_v20 = vpop.f32.mrf.mxu1  ;;  %v7249_v27 = vld [vmem:[%s10492_s1 + $0x388] ss:$16 sps:$4 sm:$0xff]  }
 0x162   : > { %4903 = vmatpush1.bf16.msra.mxu1 %v7213_v24  ;;  %v9035_v40 = vpop.f32.mrf.mxu0  ;;  %4831 = vmatprep.subr.bf16.mxu0 %v7221_v29  ;;  %v7254_v24 = vld [vmem:[%s10492_s1 + $0x58c] ss:$16 sps:$4 sm:$0xff]   ;;  %v7252_v29 = vld [vmem:[%s10492_s1 + $0x588] ss:$16 sps:$4 sm:$0xff]  }
 0x163   : > { %4904 = vmatprep.subr.bf16.mxu1 %v7224_v31  ;;  %v9066_v62 = vpop.f32.mrf.mxu1  ;;  %v7255_v36 = vld [vmem:[%s10492_s1 + $0x368] ss:$16 sps:$4 sm:$0xff]  }
 0x164   : > { %v4299_v45 = vpop.f32.mrf.mxu0  ;;  %4736 = vmatmul.mubr.bf16.gmra.mxu0 %v7218_v32  ;;  %v7257_v32 = vld [vmem:[%s10492_s1 + $0x36c] ss:$16 sps:$4 sm:$0xff]  }
 0x165   : > { %4809 = vmatmul.mubr.bf16.gmra.mxu1 %v7702_v48  ;;  %v9050_v18 = vadd.f32 %v4299_v45, %v8805_v35  ;;  %4832 = vmatpush1.bf16.msra.mxu0 %v7219_v38  ;;  %v9077_v3 = vpop.f32.mrf.mxu1  ;;  %v7258_v38 = vld [vmem:[%s10492_s1 + $0x568] ss:$16 sps:$4 sm:$0xff]  }
 0x166   : > { %4905 = vmatpush1.bf16.msra.mxu1 %v7222_v14  ;;  %v4301_v54 = vpop.f32.mrf.mxu0  ;;  %4833 = vmatprep.subr.bf16.mxu0 %v7227_v42  ;;  %v7263_v42 = vld [vmem:[%s10492_s1 + $0x34c] ss:$16 sps:$4 sm:$0xff]   ;;  %v7261_v45 = vld [vmem:[%s10492_s1 + $0x348] ss:$16 sps:$4 sm:$0xff]  }
 0x167   : > { %4906 = vmatprep.subr.bf16.mxu1 %v7230_v44  ;;  %v9062_v35 = vadd.f32 %v4301_v54, %v8817_v43  ;;  %4851 = vmatprep.mubr.bf16.mxu0 %v7703_v57  ;;  %v7234_v43 = vld [vmem:[%s10492_s1 + $0x5e8] ss:$16 sps:$4 sm:$0xff]   ;;  %v9091_v49 = vpop.f32.mrf.mxu1  ;;  %v7266_v44 = vld [vmem:[%s10492_s1 + $0x54c] ss:$16 sps:$4 sm:$0xff]  }
 0x168   : > { %4924 = vmatprep.mubr.bf16.mxu1 %v7704_v58  ;;  %v4303_v63 = vpop.f32.mrf.mxu0  ;;  %v7272_v54 = vld [vmem:[%s10492_s1 + $0x52c] ss:$16 sps:$4 sm:$0xff]  }
 0x169   : > { %v9072_v2 = vadd.f32 %v4303_v63, %v8822_v46  ;;  %4834 = vmatpush1.bf16.msra.mxu0 %v7225_v60  ;;  %v7237_v46 = vld [vmem:[%s10492_s1 + $0x3c8] ss:$16 sps:$4 sm:$0xff]   ;;  %v9105_v19 = vpop.f32.mrf.mxu1  ;;  %v7275_v58 = vld [vmem:[%s10492_s1 + $0x30c] ss:$16 sps:$4 sm:$0xff]  }
 0x16a   : > { %4907 = vmatpush1.bf16.msra.mxu1 %v7228_v53  ;;  %4835 = vmatprep.subr.bf16.mxu0 %v7233_v25  ;;  %v7264_v60 = vld [vmem:[%s10492_s1 + $0x548] ss:$16 sps:$4 sm:$0xff]   ;;  %v7269_v53 = vld [vmem:[%s10492_s1 + $0x32c] ss:$16 sps:$4 sm:$0xff]  }
 0x16b   : > { %4908 = vmatprep.subr.bf16.mxu1 %v7236_v56  ;;  %v9119_v31 = vpop.f32.mrf.mxu1  ;;  %v7267_v25 = vld [vmem:[%s10492_s1 + $0x328] ss:$16 sps:$4 sm:$0xff]   ;;  %v7278_v63 = vld [vmem:[%s10492_s1 + $0x50c] ss:$16 sps:$4 sm:$0xff]  }
 0x16c   : > { %v7270_v56 = vld [vmem:[%s10492_s1 + $0x528] ss:$16 sps:$4 sm:$0xff]  }
 0x16d   : > { %4836 = vmatpush2.bf16.msra.mxu0 %v7231_v1  ;;  %v9133_v14 = vpop.f32.mrf.mxu1  ;;  %v7273_v1 = vld [vmem:[%s10492_s1 + $0x308] ss:$16 sps:$4 sm:$0xff]  }
 0x16e   : > { %4909 = vmatpush2.bf16.msra.mxu1 %v7234_v43  ;;  %4837 = vmatprep.subr.bf16.mxu0 %v7239_v4  ;;  %v7276_v43 = vld [vmem:[%s10492_s1 + $0x508] ss:$16 sps:$4 sm:$0xff]  }
 0x16f   : > { %4910 = vmatprep.subr.bf16.mxu1 %v7242_v5  ;;  %v9147_v48 = vpop.f32.mrf.mxu1  ;;  %v7281_v5 = vld [vmem:[%s10492_s1 + $0x6ec] ss:$16 sps:$4 sm:$0xff]  }
 0x171   : > { %4838 = vmatpush2.bf16.msra.mxu0 %v7237_v46  ;;  %v9161_v57 = vpop.f32.mrf.mxu1  ;;  %v7284_v46 = vld [vmem:[%s10492_s1 + $0x8ec] ss:$16 sps:$4 sm:$0xff]  }
 0x172   : > { %4911 = vmatpush2.bf16.msra.mxu1 %v7240_v7  ;;  %4839 = vmatprep.subr.bf16.mxu0 %v7245_v11  ;;  %v7279_v7 = vld [vmem:[%s10492_s1 + $0x6e8] ss:$16 sps:$4 sm:$0xff]  }
 0x173   : > { %4912 = vmatprep.subr.bf16.mxu1 %v7248_v55  ;;  %v9175_v4 = vpop.f32.mrf.mxu1  ;;  %v7282_v11 = vld [vmem:[%s10492_s1 + $0x8e8] ss:$16 sps:$4 sm:$0xff]  }
 0x175   : > { %4840 = vmatpush2.bf16.msra.mxu0 %v7243_v13  ;;  %v9189_v55 = vpop.f32.mrf.mxu1  ;;  %v7287_v13 = vld [vmem:[%s10492_s1 + $0x6cc] ss:$16 sps:$4 sm:$0xff]  }
 0x176   : > { %4913 = vmatpush2.bf16.msra.mxu1 %v7246_v17  ;;  %4841 = vmatprep.subr.bf16.mxu0 %v7251_v21  ;;  %v7290_v17 = vld [vmem:[%s10492_s1 + $0x8cc] ss:$16 sps:$4 sm:$0xff]   ;;  %v7705_v21 = vld [vmem:[%s7947_s13 + $0x8] ss:$72 sps:$4 sm:$0xff]  }
 0x177   : > { %4914 = vmatprep.subr.bf16.mxu1 %v7254_v24  ;;  %v7706_v24 = vld [vmem:[%s7947_s13 + $0x10] ss:$72 sps:$4 sm:$0xff]  }
 0x179   : > { %4842 = vmatpush2.bf16.msra.mxu0 %v7249_v27  ;;  %v7285_v27 = vld [vmem:[%s10492_s1 + $0x6c8] ss:$16 sps:$4 sm:$0xff]  }
 0x17a   : > { %4915 = vmatpush2.bf16.msra.mxu1 %v7252_v29  ;;  %4843 = vmatprep.subr.bf16.mxu0 %v7257_v32  ;;  %v7288_v29 = vld [vmem:[%s10492_s1 + $0x8c8] ss:$16 sps:$4 sm:$0xff]   ;;  %v9205_v32 = vpop.f32.mrf.mxu1 }
 0x17b   : > { %4916 = vmatprep.subr.bf16.mxu1 %v7260_v33  ;;  %v9207_v33 = vpop.f32.mrf.mxu0 }
 0x17d   : > { %4844 = vmatpush2.bf16.msra.mxu0 %v7255_v36  ;;  %v7293_v36 = vld [vmem:[%s10492_s1 + $0x6ac] ss:$16 sps:$4 sm:$0xff]  }
 0x17e   : > { %4917 = vmatpush2.bf16.msra.mxu1 %v7258_v38  ;;  %4845 = vmatprep.subr.bf16.mxu0 %v7263_v42  ;;  %v7296_v38 = vld [vmem:[%s10492_s1 + $0x8ac] ss:$16 sps:$4 sm:$0xff]  }
 0x17f   : > { %4918 = vmatprep.subr.bf16.mxu1 %v7266_v44  ;;  %v7707_v42 = vld [vmem:[%s7947_s13 + $0x9c] ss:$72 sps:$4 sm:$0xff]  }
 0x180   : > { %v7708_v44 = vld [vmem:[%s7947_s13 + $0xa4] ss:$72 sps:$4 sm:$0xff]  }
 0x181   : > { %4846 = vmatpush2.bf16.msra.mxu0 %v7261_v45 }
 0x182   : > { %4919 = vmatpush2.bf16.msra.mxu1 %v7264_v60  ;;  %4847 = vmatprep.subr.bf16.mxu0 %v7269_v53  ;;  %v7291_v60 = vld [vmem:[%s10492_s1 + $0x6a8] ss:$16 sps:$4 sm:$0xff]  }
 0x183   : > { %4920 = vmatprep.subr.bf16.mxu1 %v7272_v54  ;;  %v7294_v53 = vld [vmem:[%s10492_s1 + $0x8a8] ss:$16 sps:$4 sm:$0xff]   ;;  %v9225_v54 = vpop.f32.mrf.mxu1 }
 0x185   : > { %4848 = vmatpush2.bf16.msra.mxu0 %v7267_v25  ;;  %v7299_v25 = vld [vmem:[%s10492_s1 + $0x68c] ss:$16 sps:$4 sm:$0xff]  }
 0x186   : > { %4921 = vmatpush2.bf16.msra.mxu1 %v7270_v56  ;;  %4849 = vmatprep.subr.bf16.mxu0 %v7275_v58  ;;  %v7302_v56 = vld [vmem:[%s10492_s1 + $0x88c] ss:$16 sps:$4 sm:$0xff]  }
 0x187   : > { %4922 = vmatprep.subr.bf16.mxu1 %v7278_v63  ;;  %v7709_v63 = vld [vmem:[%s7947_s13 + $0x98] ss:$72 sps:$4 sm:$0xff]  }
 0x189   : > { %4850 = vmatpush2.bf16.msra.mxu0 %v7273_v1  ;;  %v7710_v1 = vld [vmem:[%s7947_s13 + $0xa0] ss:$72 sps:$4 sm:$0xff]  }
 0x18a   : > { %4923 = vmatpush2.bf16.msra.mxu1 %v7276_v43  ;;  %4965 = vmatprep.subr.bf16.mxu0 %v7281_v5  ;;  %v7297_v43 = vld [vmem:[%s10492_s1 + $0x688] ss:$16 sps:$4 sm:$0xff]  }
 0x18b   : > { %5038 = vmatprep.subr.bf16.mxu1 %v7284_v46  ;;  %v7300_v5 = vld [vmem:[%s10492_s1 + $0x888] ss:$16 sps:$4 sm:$0xff]   ;;  %v9243_v46 = vpop.f32.mrf.mxu1 }
 0x18c   : > { %4852 = vmatmul.mubr.bf16.vlgmr.msra.gmra.mxu0 %v7705_v21  ;;  %v9217_v45 = vpop.f32.mrf.mxu0  ;;  %v7712_v21 = vld [vmem:[%s7947_s13 + $0x134] ss:$72 sps:$4 sm:$0xff]  }
 0x18d   : > { %4925 = vmatmul.mubr.bf16.vlgmr.msra.gmra.mxu1 %v7706_v24  ;;  %4966 = vmatpush1.bf16.msra.mxu0 %v7279_v7  ;;  %v7305_v7 = vld [vmem:[%s10492_s1 + $0x66c] ss:$16 sps:$4 sm:$0xff]   ;;  %v9256_v24 = vpop.f32.mrf.mxu1 }
 0x18e   : > { %5039 = vmatpush1.bf16.msra.mxu1 %v7282_v11  ;;  %4967 = vmatprep.subr.bf16.mxu0 %v7287_v13  ;;  %v9233_v58 = vpop.f32.mrf.mxu0  ;;  %v7308_v11 = vld [vmem:[%s10492_s1 + $0x86c] ss:$16 sps:$4 sm:$0xff]  }
 0x18f   : > { %5040 = vmatprep.subr.bf16.mxu1 %v7290_v17  ;;  %4861 = vmatprep.mubr.bf16.mxu0 %v7707_v42  ;;  %v7711_v13 = vld [vmem:[%s7947_s13 + $0x12c] ss:$72 sps:$4 sm:$0xff]   ;;  %v7303_v17 = vld [vmem:[%s10492_s1 + $0x668] ss:$16 sps:$4 sm:$0xff]  }
 0x190   : > { %4934 = vmatprep.mubr.bf16.mxu1 %v7708_v44  ;;  %v7309_v42 = vld [vmem:[%s10492_s1 + $0x648] ss:$16 sps:$4 sm:$0xff]  }
 0x191   : > { %4968 = vmatpush1.bf16.msra.mxu0 %v7285_v27  ;;  %v9258_v27 = vpop.f32.mrf.mxu0  ;;  %v7312_v44 = vld [vmem:[%s10492_s1 + $0x848] ss:$16 sps:$4 sm:$0xff]  }
 0x192   : > { %5041 = vmatpush1.bf16.msra.mxu1 %v7288_v29  ;;  %4969 = vmatprep.subr.bf16.mxu0 %v7293_v36  ;;  %v7306_v29 = vld [vmem:[%s10492_s1 + $0x868] ss:$16 sps:$4 sm:$0xff]   ;;  %v7311_v36 = vld [vmem:[%s10492_s1 + $0x64c] ss:$16 sps:$4 sm:$0xff]  }
 0x193   : > { %5042 = vmatprep.subr.bf16.mxu1 %v7296_v38  ;;  %v7314_v38 = vld [vmem:[%s10492_s1 + $0x84c] ss:$16 sps:$4 sm:$0xff]  }
 0x194   : > { %4862 = vmatmul.mubr.bf16.gmra.mxu0 %v7709_v63  ;;  %v7317_v63 = vld [vmem:[%s10492_s1 + $0x62c] ss:$16 sps:$4 sm:$0xff]  }
 0x195   : > { %4935 = vmatmul.mubr.bf16.gmra.mxu1 %v7710_v1  ;;  %4970 = vmatpush1.bf16.msra.mxu0 %v7291_v60  ;;  %v9275_v60 = vpop.f32.mrf.mxu1  ;;  %v7320_v1 = vld [vmem:[%s10492_s1 + $0x82c] ss:$16 sps:$4 sm:$0xff]  }
 0x196   : > { %5043 = vmatpush1.bf16.msra.mxu1 %v7294_v53  ;;  %4971 = vmatprep.subr.bf16.mxu0 %v7299_v25  ;;  %v9277_v53 = vpop.f32.mrf.mxu0  ;;  %v7713_v25 = vld [vmem:[%s7947_s13 + $0x128] ss:$72 sps:$4 sm:$0xff]  }
 0x197   : > { %5044 = vmatprep.subr.bf16.mxu1 %v7302_v56  ;;  %4871 = vmatprep.mubr.bf16.mxu0 %v7711_v13  ;;  %v7714_v56 = vld [vmem:[%s7947_s13 + $0x130] ss:$72 sps:$4 sm:$0xff]   ;;  %v9295_v13 = vpop.f32.mrf.mxu1 }
 0x198   : > { %4944 = vmatprep.mubr.bf16.mxu1 %v7712_v21  ;;  %v7323_v21 = vld [vmem:[%s10492_s1 + $0x60c] ss:$16 sps:$4 sm:$0xff]  }
 0x199   : > { %4972 = vmatpush1.bf16.msra.mxu0 %v7297_v43  ;;  %v7715_v43 = vld [vmem:[%s7947_s13 + $0x1bc] ss:$72 sps:$4 sm:$0xff]  }
 0x19a   : > { %5045 = vmatpush1.bf16.msra.mxu1 %v7300_v5  ;;  %4973 = vmatprep.subr.bf16.mxu0 %v7305_v7  ;;  %v7315_v5 = vld [vmem:[%s10492_s1 + $0x628] ss:$16 sps:$4 sm:$0xff]  }
 0x19b   : > { %5046 = vmatprep.subr.bf16.mxu1 %v7308_v11  ;;  %v7318_v7 = vld [vmem:[%s10492_s1 + $0x828] ss:$16 sps:$4 sm:$0xff]   ;;  %v7716_v11 = vld [vmem:[%s7947_s13 + $0x1c4] ss:$72 sps:$4 sm:$0xff]  }
 0x19c   : > { %4872 = vmatmul.mubr.bf16.gmra.mxu0 %v7713_v25  ;;  %v9311_v25 = vpop.f32.mrf.mxu1 }
 0x19d   : > { %4945 = vmatmul.mubr.bf16.gmra.mxu1 %v7714_v56  ;;  %4974 = vmatpush1.bf16.msra.mxu0 %v7303_v17  ;;  %v9297_v17 = vpop.f32.mrf.mxu0  ;;  %10498 = vst [vmem:[#allocation3_spill] sm:$0xff] %v9311_v25 }
 0x19e   : > { %5047 = vmatpush1.bf16.msra.mxu1 %v7306_v29  ;;  %4975 = vmatprep.subr.bf16.mxu0 %v7311_v36  ;;  %v7326_v29 = vld [vmem:[%s10492_s1 + $0x80c] ss:$16 sps:$4 sm:$0xff]   ;;  %v7321_v36 = vld [vmem:[%s10492_s1 + $0x608] ss:$16 sps:$4 sm:$0xff]  }
 0x19f   : > { %5048 = vmatprep.subr.bf16.mxu1 %v7314_v38  ;;  %4881 = vmatprep.mubr.bf16.mxu0 %v7715_v43  ;;  %v7324_v38 = vld [vmem:[%s10492_s1 + $0x808] ss:$16 sps:$4 sm:$0xff]   ;;  %v9313_v56 = vpop.f32.mrf.mxu0 }
 0x1a0   : > { %4954 = vmatprep.mubr.bf16.mxu1 %v7716_v11  ;;  %v7717_v43 = vld [vmem:[%s7947_s13 + $0x1b8] ss:$72 sps:$4 sm:$0xff]  }
 0x1a1   : > { %4976 = vmatpush1.bf16.msra.mxu0 %v7309_v42  ;;  %v7718_v42 = vld [vmem:[%s7947_s13 + $0x1c0] ss:$72 sps:$4 sm:$0xff]   ;;  %v9333_v25 = vpop.f32.mrf.mxu0 }
 0x1a2   : > { %5049 = vmatpush1.bf16.msra.mxu1 %v7312_v44  ;;  %4977 = vmatprep.subr.bf16.mxu0 %v7317_v63  ;;  %v7329_v44 = vld [vmem:[%s10492_s1 + $0x7ec] ss:$16 sps:$4 sm:$0xff]   ;;  %v7327_v11 = vld [vmem:[%s10492_s1 + $0x7e8] ss:$16 sps:$4 sm:$0xff]  }
 0x1a3   : > { %5050 = vmatprep.subr.bf16.mxu1 %v7320_v1  ;;  %v7332_v63 = vld [vmem:[%s10492_s1 + $0x9ec] ss:$16 sps:$4 sm:$0xff]   ;;  %v9323_v1 = vpop.f32.mrf.mxu1 }
 0x1a4   : > { %4882 = vmatmul.mubr.bf16.gmra.mxu0 %v7717_v43  ;;  %10499 = vst [vmem:[#allocation4_spill] sm:$0xff] %v9323_v1  ;;  %v7330_v43 = vld [vmem:[%s10492_s1 + $0x9e8] ss:$16 sps:$4 sm:$0xff]   ;;  %v7341_v1 = vld [vmem:[%s10492_s1 + $0x7ac] ss:$16 sps:$4 sm:$0xff]  }
 0x1a5   : > { %4955 = vmatmul.mubr.bf16.gmra.mxu1 %v7718_v42  ;;  %4978 = vmatpush1.bf16.msra.mxu0 %v7315_v5  ;;  %v7719_v42 = vld [vmem:[%s7947_s13 + $0x1c] ss:$72 sps:$4 sm:$0xff]  }
 0x1a6   : > { %5051 = vmatpush1.bf16.msra.mxu1 %v7318_v7  ;;  %4979 = vmatprep.subr.bf16.mxu0 %v7323_v21  ;;  %v7335_v5 = vld [vmem:[%s10492_s1 + $0x7cc] ss:$16 sps:$4 sm:$0xff]   ;;  %v9341_v21 = vpop.f32.mrf.mxu1 }
 0x1a7   : > { %5052 = vmatprep.subr.bf16.mxu1 %v7326_v29  ;;  %4997 = vmatprep.mubr.bf16.mxu0 %v7719_v42  ;;  %v7338_v7 = vld [vmem:[%s10492_s1 + $0x9cc] ss:$16 sps:$4 sm:$0xff]   ;;  %10500 = vst [vmem:[#allocation5_spill] sm:$0xff] %v9341_v21  ;;  %v7336_v29 = vld [vmem:[%s10492_s1 + $0x9c8] ss:$16 sps:$4 sm:$0xff]   ;;  %v9349_v42 = vpop.f32.mrf.mxu0 }
 0x1a8   : > { %5070 = vmatprep.mubr.bf16.mxu1 %v7720_v47  ;;  %v7333_v47 = vld [vmem:[%s10492_s1 + $0x7c8] ss:$16 sps:$4 sm:$0xff]   ;;  %10501 = vst [vmem:[#allocation6_spill] sm:$0xff] %v9349_v42 }
 0x1a9   : > { %4980 = vmatpush1.bf16.msra.mxu0 %v7321_v36  ;;  %v7344_v36 = vld [vmem:[%s10492_s1 + $0x9ac] ss:$16 sps:$4 sm:$0xff]   ;;  %v7342_v21 = vld [vmem:[%s10492_s1 + $0x9a8] ss:$16 sps:$4 sm:$0xff]  }
 0x1aa   : > { %5053 = vmatpush1.bf16.msra.mxu1 %v7324_v38  ;;  %4981 = vmatprep.subr.bf16.mxu0 %v7329_v44  ;;  %v9357_v38 = vpop.f32.mrf.mxu1  ;;  %v9359_v44 = vpop.f32.mrf.mxu0 }
 0x1ab   : > { %5054 = vmatprep.subr.bf16.mxu1 %v7332_v63  ;;  %10502 = vst [vmem:[#allocation7_spill] sm:$0xff] %v9357_v38  ;;  %10503 = vst [vmem:[#allocation8_spill] sm:$0xff] %v9359_v44  ;;  %v7339_v63 = vld [vmem:[%s10492_s1 + $0x7a8] ss:$16 sps:$4 sm:$0xff]  }
 0x1ac   : > { %v9367_v42 = vpop.f32.mrf.mxu1  ;;  %v7722_v38 = vld [vmem:[%s7947_s13 + $0x20] ss:$72 sps:$4 sm:$0xff]  }
 0x1ad   : > { %4982 = vmatpush2.bf16.msra.mxu0 %v7327_v11  ;;  %10504 = vst [vmem:[#allocation9_spill] sm:$0xff] %v9367_v42  ;;  %v7347_v11 = vld [vmem:[%s10492_s1 + $0x78c] ss:$16 sps:$4 sm:$0xff]   ;;  %v7357_v42 = vld [vmem:[%s10492_s1 + $0x748] ss:$16 sps:$4 sm:$0xff]  }
 0x1ae   : > { %5055 = vmatpush2.bf16.msra.mxu1 %v7330_v43  ;;  %4983 = vmatprep.subr.bf16.mxu0 %v7335_v5  ;;  %v7350_v43 = vld [vmem:[%s10492_s1 + $0x98c] ss:$16 sps:$4 sm:$0xff]   ;;  %v9375_v5 = vpop.f32.mrf.mxu0 }
 0x1af   : > { %5056 = vmatprep.subr.bf16.mxu1 %v7338_v7  ;;  %10505 = vst [vmem:[#allocation10_spill] sm:$0xff] %v9375_v5  ;;  %v7345_v7 = vld [vmem:[%s10492_s1 + $0x788] ss:$16 sps:$4 sm:$0xff]  }
 0x1b0   : > { %v7726_v5 = vld [vmem:[%s7947_s13 + $0xb0] ss:$72 sps:$4 sm:$0xff]  }
 0x1b1   : > { %4984 = vmatpush2.bf16.msra.mxu0 %v7333_v47  ;;  %v9383_v47 = vpop.f32.mrf.mxu1 }
 0x1b2   : > { %5057 = vmatpush2.bf16.msra.mxu1 %v7336_v29  ;;  %4985 = vmatprep.subr.bf16.mxu0 %v7341_v1  ;;  %v7348_v1 = vld [vmem:[%s10492_s1 + $0x988] ss:$16 sps:$4 sm:$0xff]   ;;  %10506 = vst [vmem:[#allocation11_spill] sm:$0xff] %v9383_v47  ;;  %v7353_v29 = vld [vmem:[%s10492_s1 + $0x76c] ss:$16 sps:$4 sm:$0xff]  }
 0x1b3   : > { %5058 = vmatprep.subr.bf16.mxu1 %v7344_v36  ;;  %v9391_v36 = vpop.f32.mrf.mxu0  ;;  %v7359_v47 = vld [vmem:[%s10492_s1 + $0x74c] ss:$16 sps:$4 sm:$0xff]  }
 0x1b4   : > { %10507 = vst [vmem:[#allocation12_spill] sm:$0xff] %v9391_v36 }
 0x1b5   : > { %4986 = vmatpush2.bf16.msra.mxu0 %v7339_v63  ;;  %v7351_v63 = vld [vmem:[%s10492_s1 + $0x768] ss:$16 sps:$4 sm:$0xff]  }
 0x1b6   : > { %5059 = vmatpush2.bf16.msra.mxu1 %v7342_v21  ;;  %4987 = vmatprep.subr.bf16.mxu0 %v7347_v11  ;;  %v7356_v21 = vld [vmem:[%s10492_s1 + $0x96c] ss:$16 sps:$4 sm:$0xff]   ;;  %v7354_v11 = vld [vmem:[%s10492_s1 + $0x968] ss:$16 sps:$4 sm:$0xff]  }
 0x1b7   : > { %5060 = vmatprep.subr.bf16.mxu1 %v7350_v43  ;;  %v9399_v43 = vpop.f32.mrf.mxu1 }
 0x1b8   : > { %10508 = vst [vmem:[#allocation13_spill] sm:$0xff] %v9399_v43  ;;  %v7365_v43 = vld [vmem:[%s10492_s1 + $0x72c] ss:$16 sps:$4 sm:$0xff]  }
 0x1b9   : > { %4988 = vmatpush2.bf16.msra.mxu0 %v7345_v7  ;;  %v7362_v7 = vld [vmem:[%s10492_s1 + $0x94c] ss:$16 sps:$4 sm:$0xff]  }
 0x1ba   : > { %5061 = vmatpush2.bf16.msra.mxu1 %v7348_v1  ;;  %4989 = vmatprep.subr.bf16.mxu0 %v7353_v29  ;;  %v9407_v1 = vpop.f32.mrf.mxu0  ;;  %v7360_v29 = vld [vmem:[%s10492_s1 + $0x948] ss:$16 sps:$4 sm:$0xff]  }
 0x1bb   : > { %5062 = vmatprep.subr.bf16.mxu1 %v7356_v21  ;;  %10509 = vst [vmem:[#allocation14_spill] sm:$0xff] %v9407_v1  ;;  %v9415_v21 = vpop.f32.mrf.mxu1  ;;  %v7363_v1 = vld [vmem:[%s10492_s1 + $0x728] ss:$16 sps:$4 sm:$0xff]  }
 0x1bc   : > { %10510 = vst [vmem:[#allocation15_spill] sm:$0xff] %v9415_v21  ;;  %v7371_v21 = vld [vmem:[%s10492_s1 + $0x70c] ss:$16 sps:$4 sm:$0xff]  }
 0x1bd   : > { %4990 = vmatpush2.bf16.msra.mxu0 %v7351_v63  ;;  %v7368_v63 = vld [vmem:[%s10492_s1 + $0x92c] ss:$16 sps:$4 sm:$0xff]  }
 0x1be   : > { %5063 = vmatpush2.bf16.msra.mxu1 %v7354_v11  ;;  %4991 = vmatprep.subr.bf16.mxu0 %v7359_v47  ;;  %v9423_v11 = vpop.f32.mrf.mxu0  ;;  %v7366_v47 = vld [vmem:[%s10492_s1 + $0x928] ss:$16 sps:$4 sm:$0xff]  }
 0x1bf   : > { %5064 = vmatprep.subr.bf16.mxu1 %v7362_v7  ;;  %10511 = vst [vmem:[#allocation16_spill] sm:$0xff] %v9423_v11  ;;  %v9431_v7 = vpop.f32.mrf.mxu1  ;;  %v7369_v11 = vld [vmem:[%s10492_s1 + $0x708] ss:$16 sps:$4 sm:$0xff]  }
 0x1c0   : > { %10512 = vst [vmem:[#allocation17_spill] sm:$0xff] %v9431_v7  ;;  %v7383_v7 = vld [vmem:[%s10492_s1 + $0xacc] ss:$16 sps:$4 sm:$0xff]  }
 0x1c1   : > { %4992 = vmatpush2.bf16.msra.mxu0 %v7357_v42  ;;  %v7374_v42 = vld [vmem:[%s10492_s1 + $0x90c] ss:$16 sps:$4 sm:$0xff]  }
 0x1c2   : > { %5065 = vmatpush2.bf16.msra.mxu1 %v7360_v29  ;;  %4993 = vmatprep.subr.bf16.mxu0 %v7365_v43  ;;  %v9439_v29 = vpop.f32.mrf.mxu0  ;;  %v7372_v43 = vld [vmem:[%s10492_s1 + $0x908] ss:$16 sps:$4 sm:$0xff]  }
 0x1c3   : > { %5066 = vmatprep.subr.bf16.mxu1 %v7368_v63  ;;  %10513 = vst [vmem:[#allocation18_spill] sm:$0xff] %v9439_v29  ;;  %v9447_v63 = vpop.f32.mrf.mxu1  ;;  %v7377_v29 = vld [vmem:[%s10492_s1 + $0xaec] ss:$16 sps:$4 sm:$0xff]  }
 0x1c4   : > { %10514 = vst [vmem:[#allocation19_spill] sm:$0xff] %v9447_v63  ;;  %v7375_v63 = vld [vmem:[%s10492_s1 + $0xae8] ss:$16 sps:$4 sm:$0xff]  }
 0x1c5   : > { %4994 = vmatpush2.bf16.msra.mxu0 %v7363_v1  ;;  %v7380_v1 = vld [vmem:[%s10492_s1 + $0xcec] ss:$16 sps:$4 sm:$0xff]  }
 0x1c6   : > { %5067 = vmatpush2.bf16.msra.mxu1 %v7366_v47  ;;  %4995 = vmatprep.subr.bf16.mxu0 %v7371_v21  ;;  %v9455_v47 = vpop.f32.mrf.mxu0  ;;  %v7378_v21 = vld [vmem:[%s10492_s1 + $0xce8] ss:$16 sps:$4 sm:$0xff]  }
 0x1c7   : > { %5068 = vmatprep.subr.bf16.mxu1 %v7374_v42  ;;  %10515 = vst [vmem:[#allocation20_spill] sm:$0xff] %v9455_v47  ;;  %v9463_v42 = vpop.f32.mrf.mxu1  ;;  %v7721_v47 = vld [vmem:[%s7947_s13 + $0x18] ss:$72 sps:$4 sm:$0xff]  }
 0x1c8   : > { %10516 = vst [vmem:[#allocation21_spill] sm:$0xff] %v9463_v42 }
 0x1c9   : > { %4996 = vmatpush2.bf16.msra.mxu0 %v7369_v11  ;;  %v7386_v11 = vld [vmem:[%s10492_s1 + $0xccc] ss:$16 sps:$4 sm:$0xff]   ;;  %v9481_v42 = vpop.f32.mrf.mxu1 }
 0x1ca   : > { %5069 = vmatpush2.bf16.msra.mxu1 %v7372_v43  ;;  %5111 = vmatprep.subr.bf16.mxu0 %v7377_v29  ;;  %v9471_v43 = vpop.f32.mrf.mxu0  ;;  %v7381_v29 = vld [vmem:[%s10492_s1 + $0xac8] ss:$16 sps:$4 sm:$0xff]   ;;  %10518 = vst [vmem:[#allocation23_spill] sm:$0xff] %v9481_v42 }
 0x1cb   : > { %5184 = vmatprep.subr.bf16.mxu1 %v7380_v1  ;;  %10517 = vst [vmem:[#allocation22_spill] sm:$0xff] %v9471_v43  ;;  %v7384_v1 = vld [vmem:[%s10492_s1 + $0xcc8] ss:$16 sps:$4 sm:$0xff]   ;;  %v9499_v42 = vpop.f32.mrf.mxu1 }
 0x1cc   : > { %4998 = vmatmul.mubr.bf16.vlgmr.msra.gmra.mxu0 %v7721_v47  ;;  %v9483_v36 = vpop.f32.mrf.mxu0  ;;  %v7723_v47 = vld [vmem:[%s7947_s13 + $0xac] ss:$72 sps:$4 sm:$0xff]   ;;  %10519 = vst [vmem:[#allocation24_spill] sm:$0xff] %v9499_v42 }
 0x1cd   : > { %5071 = vmatmul.mubr.bf16.vlgmr.msra.gmra.mxu1 %v7722_v38  ;;  %5112 = vmatpush1.bf16.msra.mxu0 %v7375_v63  ;;  %v7389_v38 = vld [vmem:[%s10492_s1 + $0xaac] ss:$16 sps:$4 sm:$0xff]  }
 0x1ce   : > { %5185 = vmatpush1.bf16.msra.mxu1 %v7378_v21  ;;  %5113 = vmatprep.subr.bf16.mxu0 %v7383_v7  ;;  %v7392_v63 = vld [vmem:[%s10492_s1 + $0xcac] ss:$16 sps:$4 sm:$0xff]   ;;  %v7387_v7 = vld [vmem:[%s10492_s1 + $0xaa8] ss:$16 sps:$4 sm:$0xff]   ;;  %v9501_v43 = vpop.f32.mrf.mxu0 }
 0x1cf   : > { %5186 = vmatprep.subr.bf16.mxu1 %v7386_v11  ;;  %5007 = vmatprep.mubr.bf16.mxu0 %v7723_v47  ;;  %v7724_v21 = vld [vmem:[%s7947_s13 + $0xb4] ss:$72 sps:$4 sm:$0xff]   ;;  %v7390_v11 = vld [vmem:[%s10492_s1 + $0xca8] ss:$16 sps:$4 sm:$0xff]  }
 0x1d0   : > { %5080 = vmatprep.mubr.bf16.mxu1 %v7724_v21  ;;  %v7395_v47 = vld [vmem:[%s10492_s1 + $0xa8c] ss:$16 sps:$4 sm:$0xff]   ;;  %v7725_v21 = vld [vmem:[%s7947_s13 + $0xa8] ss:$72 sps:$4 sm:$0xff]   ;;  %v9519_v42 = vpop.f32.mrf.mxu0 }
 0x1d1   : > { %5114 = vmatpush1.bf16.msra.mxu0 %v7381_v29  ;;  %v7398_v29 = vld [vmem:[%s10492_s1 + $0xc8c] ss:$16 sps:$4 sm:$0xff]   ;;  %10521 = vst [vmem:[#allocation26_spill] sm:$0xff] %v9519_v42 }
 0x1d2   : > { %5187 = vmatpush1.bf16.msra.mxu1 %v7384_v1  ;;  %5115 = vmatprep.subr.bf16.mxu0 %v7389_v38  ;;  %v9509_v1 = vpop.f32.mrf.mxu1  ;;  %v7393_v38 = vld [vmem:[%s10492_s1 + $0xa88] ss:$16 sps:$4 sm:$0xff]   ;;  %v9537_v42 = vpop.f32.mrf.mxu0 }
 0x1d3   : > { %5188 = vmatprep.subr.bf16.mxu1 %v7392_v63  ;;  %10520 = vst [vmem:[#allocation25_spill] sm:$0xff] %v9509_v1  ;;  %v7396_v63 = vld [vmem:[%s10492_s1 + $0xc88] ss:$16 sps:$4 sm:$0xff]   ;;  %10523 = vst [vmem:[#allocation28_spill] sm:$0xff] %v9537_v42 }
 0x1d4   : > { %5008 = vmatmul.mubr.bf16.gmra.mxu0 %v7725_v21  ;;  %v7401_v21 = vld [vmem:[%s10492_s1 + $0xa6c] ss:$16 sps:$4 sm:$0xff]   ;;  %v9529_v1 = vpop.f32.mrf.mxu1  ;;  %v9555_v42 = vpop.f32.mrf.mxu0 }
 0x1d5   : > { %5081 = vmatmul.mubr.bf16.gmra.mxu1 %v7726_v5  ;;  %5116 = vmatpush1.bf16.msra.mxu0 %v7387_v7  ;;  %v7404_v5 = vld [vmem:[%s10492_s1 + $0xc6c] ss:$16 sps:$4 sm:$0xff]   ;;  %10522 = vst [vmem:[#allocation27_spill] sm:$0xff] %v9529_v1  ;;  %v7730_v1 = vld [vmem:[%s7947_s13 + $0x140] ss:$72 sps:$4 sm:$0xff]   ;;  %10525 = vst [vmem:[#allocation30_spill] sm:$0xff] %v9555_v42 }
 0x1d6   : > { %5189 = vmatpush1.bf16.msra.mxu1 %v7390_v11  ;;  %5117 = vmatprep.subr.bf16.mxu0 %v7395_v47  ;;  %v7727_v7 = vld [vmem:[%s7947_s13 + $0x13c] ss:$72 sps:$4 sm:$0xff]   ;;  %v7399_v47 = vld [vmem:[%s10492_s1 + $0xa68] ss:$16 sps:$4 sm:$0xff]   ;;  %v9573_v42 = vpop.f32.mrf.mxu0 }
 0x1d7   : > { %5190 = vmatprep.subr.bf16.mxu1 %v7398_v29  ;;  %5017 = vmatprep.mubr.bf16.mxu0 %v7727_v7  ;;  %v7728_v11 = vld [vmem:[%s7947_s13 + $0x144] ss:$72 sps:$4 sm:$0xff]   ;;  %v7402_v29 = vld [vmem:[%s10492_s1 + $0xc68] ss:$16 sps:$4 sm:$0xff]   ;;  %10527 = vst [vmem:[#allocation32_spill] sm:$0xff] %v9573_v42  ;;  %v4150_v42 = vadd.f32 %v8780_v15, %v8661_v0 }
 0x1d8   : > { %5090 = vmatprep.mubr.bf16.mxu1 %v7728_v11  ;;  %v7407_v7 = vld [vmem:[%s10492_s1 + $0xa4c] ss:$16 sps:$4 sm:$0xff]   ;;  %v7729_v11 = vld [vmem:[%s7947_s13 + $0x138] ss:$72 sps:$4 sm:$0xff]  }
 0x1d9   : > { %5118 = vmatpush1.bf16.msra.mxu0 %v7393_v38  ;;  %v7410_v38 = vld [vmem:[%s10492_s1 + $0xc4c] ss:$16 sps:$4 sm:$0xff]  }
 0x1da   : > { %5191 = vmatpush1.bf16.msra.mxu1 %v7396_v63  ;;  %5119 = vmatprep.subr.bf16.mxu0 %v7401_v21  ;;  %v9545_v63 = vpop.f32.mrf.mxu1  ;;  %v7405_v21 = vld [vmem:[%s10492_s1 + $0xa48] ss:$16 sps:$4 sm:$0xff]   ;;  %v7461_v15 = vld [vmem:[%s10492_s1 + $0xb2c] ss:$16 sps:$4 sm:$0xff]  }
 0x1db   : > { %5192 = vmatprep.subr.bf16.mxu1 %v7404_v5  ;;  %10524 = vst [vmem:[#allocation29_spill] sm:$0xff] %v9545_v63  ;;  %v7408_v5 = vld [vmem:[%s10492_s1 + $0xc48] ss:$16 sps:$4 sm:$0xff]  }
 0x1dc   : > { %5018 = vmatmul.mubr.bf16.gmra.mxu0 %v7729_v11  ;;  %v7413_v11 = vld [vmem:[%s10492_s1 + $0xa2c] ss:$16 sps:$4 sm:$0xff]   ;;  %v9565_v63 = vpop.f32.mrf.mxu1 }
 0x1dd   : > { %5091 = vmatmul.mubr.bf16.gmra.mxu1 %v7730_v1  ;;  %5120 = vmatpush1.bf16.msra.mxu0 %v7399_v47  ;;  %v7416_v1 = vld [vmem:[%s10492_s1 + $0xc2c] ss:$16 sps:$4 sm:$0xff]   ;;  %10526 = vst [vmem:[#allocation31_spill] sm:$0xff] %v9565_v63 }
 0x1de   : > { %5193 = vmatpush1.bf16.msra.mxu1 %v7402_v29  ;;  %5121 = vmatprep.subr.bf16.mxu0 %v7407_v7  ;;  %v7731_v47 = vld [vmem:[%s7947_s13 + $0x1cc] ss:$72 sps:$4 sm:$0xff]   ;;  %v7411_v7 = vld [vmem:[%s10492_s1 + $0xa28] ss:$16 sps:$4 sm:$0xff]   ;;  %v9575_v44 = vpop.f32.mrf.mxu1 }
 0x1df   : > { %5194 = vmatprep.subr.bf16.mxu1 %v7410_v38  ;;  %5027 = vmatprep.mubr.bf16.mxu0 %v7731_v47  ;;  %v7732_v29 = vld [vmem:[%s7947_s13 + $0x1d4] ss:$72 sps:$4 sm:$0xff]   ;;  %v7414_v38 = vld [vmem:[%s10492_s1 + $0xc28] ss:$16 sps:$4 sm:$0xff]   ;;  %10528 = vst [vmem:[#allocation33_spill] sm:$0xff] %v9575_v44  ;;  %v9591_v44 = vpop.f32.mrf.mxu0 }
 0x1e0   : > { %5100 = vmatprep.mubr.bf16.mxu1 %v7732_v29  ;;  %v7419_v47 = vld [vmem:[%s10492_s1 + $0xa0c] ss:$16 sps:$4 sm:$0xff]   ;;  %v7734_v29 = vld [vmem:[%s7947_s13 + $0x1d0] ss:$72 sps:$4 sm:$0xff]   ;;  %10529 = vst [vmem:[#allocation34_spill] sm:$0xff] %v9591_v44  ;;  %v9593_v63 = vpop.f32.mrf.mxu1 }
 0x1e1   : > { %5122 = vmatpush1.bf16.msra.mxu0 %v7405_v21  ;;  %v7422_v21 = vld [vmem:[%s10492_s1 + $0xc0c] ss:$16 sps:$4 sm:$0xff]   ;;  %10530 = vst [vmem:[#allocation35_spill] sm:$0xff] %v9593_v63  ;;  %v7423_v63 = vld [vmem:[%s10492_s1 + $0xbe8] ss:$16 sps:$4 sm:$0xff]  }
 0x1e2   : > { %5195 = vmatpush1.bf16.msra.mxu1 %v7408_v5  ;;  %5123 = vmatprep.subr.bf16.mxu0 %v7413_v11  ;;  %v7733_v5 = vld [vmem:[%s7947_s13 + $0x1c8] ss:$72 sps:$4 sm:$0xff]   ;;  %v9611_v44 = vpop.f32.mrf.mxu1 }
 0x1e3   : > { %5196 = vmatprep.subr.bf16.mxu1 %v7416_v1  ;;  %v7417_v11 = vld [vmem:[%s10492_s1 + $0xa08] ss:$16 sps:$4 sm:$0xff]   ;;  %10532 = vst [vmem:[#allocation37_spill] sm:$0xff] %v9611_v44  ;;  %v7437_v44 = vld [vmem:[%s10492_s1 + $0xbac] ss:$16 sps:$4 sm:$0xff]  }
 0x1e4   : > { %5028 = vmatmul.mubr.bf16.gmra.mxu0 %v7733_v5  ;;  %v7420_v1 = vld [vmem:[%s10492_s1 + $0xc08] ss:$16 sps:$4 sm:$0xff]   ;;  %v7425_v5 = vld [vmem:[%s10492_s1 + $0xbec] ss:$16 sps:$4 sm:$0xff]  }
 0x1e5   : > { %5101 = vmatmul.mubr.bf16.gmra.mxu1 %v7734_v29  ;;  %5124 = vmatpush1.bf16.msra.mxu0 %v7411_v7  ;;  %v7428_v7 = vld [vmem:[%s10492_s1 + $0xdec] ss:$16 sps:$4 sm:$0xff]  }
 0x1e6   : > { %5197 = vmatpush1.bf16.msra.mxu1 %v7414_v38  ;;  %5125 = vmatprep.subr.bf16.mxu0 %v7419_v47  ;;  %v7735_v38 = vld [vmem:[%s7947_s13 + $0x2c] ss:$72 sps:$4 sm:$0xff]   ;;  %v7426_v47 = vld [vmem:[%s10492_s1 + $0xde8] ss:$16 sps:$4 sm:$0xff]  }
 0x1e7   : > { %5198 = vmatprep.subr.bf16.mxu1 %v7422_v21  ;;  %5143 = vmatprep.mubr.bf16.mxu0 %v7735_v38  ;;  %v7736_v29 = vld [vmem:[%s7947_s13 + $0x34] ss:$72 sps:$4 sm:$0xff]   ;;  %v9609_v21 = vpop.f32.mrf.mxu0 }
 0x1e8   : > { %5216 = vmatprep.mubr.bf16.mxu1 %v7736_v29  ;;  %10531 = vst [vmem:[#allocation36_spill] sm:$0xff] %v9609_v21  ;;  %v7431_v38 = vld [vmem:[%s10492_s1 + $0xbcc] ss:$16 sps:$4 sm:$0xff]   ;;  %v7432_v29 = vld [vmem:[%s10492_s1 + $0xdc8] ss:$16 sps:$4 sm:$0xff]  }
 0x1e9   : > { %5126 = vmatpush1.bf16.msra.mxu0 %v7417_v11  ;;  %v7434_v11 = vld [vmem:[%s10492_s1 + $0xdcc] ss:$16 sps:$4 sm:$0xff]  }
 0x1ea   : > { %5199 = vmatpush1.bf16.msra.mxu1 %v7420_v1  ;;  %5127 = vmatprep.subr.bf16.mxu0 %v7425_v5  ;;  %v7429_v1 = vld [vmem:[%s10492_s1 + $0xbc8] ss:$16 sps:$4 sm:$0xff]   ;;  %v9625_v5 = vpop.f32.mrf.mxu0 }
 0x1eb   : > { %5200 = vmatprep.subr.bf16.mxu1 %v7428_v7  ;;  %10533 = vst [vmem:[#allocation38_spill] sm:$0xff] %v9625_v5  ;;  %v9627_v7 = vpop.f32.mrf.mxu1  ;;  %v7443_v5 = vld [vmem:[%s10492_s1 + $0xb8c] ss:$16 sps:$4 sm:$0xff]  }
 0x1ec   : > { %10534 = vst [vmem:[#allocation39_spill] sm:$0xff] %v9627_v7  ;;  %v7438_v7 = vld [vmem:[%s10492_s1 + $0xda8] ss:$16 sps:$4 sm:$0xff]  }
 0x1ed   : > { %5128 = vmatpush2.bf16.msra.mxu0 %v7423_v63  ;;  %v7440_v63 = vld [vmem:[%s10492_s1 + $0xdac] ss:$16 sps:$4 sm:$0xff]  }
 0x1ee   : > { %5201 = vmatpush2.bf16.msra.mxu1 %v7426_v47  ;;  %5129 = vmatprep.subr.bf16.mxu0 %v7431_v38  ;;  %v7435_v47 = vld [vmem:[%s10492_s1 + $0xba8] ss:$16 sps:$4 sm:$0xff]   ;;  %v9641_v38 = vpop.f32.mrf.mxu0 }
 0x1ef   : > { %5202 = vmatprep.subr.bf16.mxu1 %v7434_v11  ;;  %10535 = vst [vmem:[#allocation40_spill] sm:$0xff] %v9641_v38  ;;  %v9643_v11 = vpop.f32.mrf.mxu1  ;;  %v7449_v38 = vld [vmem:[%s10492_s1 + $0xb6c] ss:$16 sps:$4 sm:$0xff]  }
 0x1f0   : > { %10536 = vst [vmem:[#allocation41_spill] sm:$0xff] %v9643_v11  ;;  %v7444_v11 = vld [vmem:[%s10492_s1 + $0xd88] ss:$16 sps:$4 sm:$0xff]  }
 0x1f1   : > { %5130 = vmatpush2.bf16.msra.mxu0 %v7429_v1  ;;  %v7446_v1 = vld [vmem:[%s10492_s1 + $0xd8c] ss:$16 sps:$4 sm:$0xff]  }
 0x1f2   : > { %5203 = vmatpush2.bf16.msra.mxu1 %v7432_v29  ;;  %5131 = vmatprep.subr.bf16.mxu0 %v7437_v44  ;;  %v7441_v29 = vld [vmem:[%s10492_s1 + $0xb88] ss:$16 sps:$4 sm:$0xff]   ;;  %v9657_v44 = vpop.f32.mrf.mxu0 }
 0x1f3   : > { %5204 = vmatprep.subr.bf16.mxu1 %v7440_v63  ;;  %10537 = vst [vmem:[#allocation42_spill] sm:$0xff] %v9657_v44  ;;  %v9659_v63 = vpop.f32.mrf.mxu1  ;;  %v7447_v44 = vld [vmem:[%s10492_s1 + $0xb68] ss:$16 sps:$4 sm:$0xff]  }
 0x1f4   : > { %10538 = vst [vmem:[#allocation43_spill] sm:$0xff] %v9659_v63  ;;  %v9677_v63 = vpop.f32.mrf.mxu0 }
 0x1f5   : > { %5132 = vmatpush2.bf16.msra.mxu0 %v7435_v47  ;;  %v4130_v47 = vadd.f32 %v8692_v22, %v8661_v0  ;;  %10539 = vst [vmem:[#allocation44_spill] sm:$0xff] %v9677_v63  ;;  %v9679_v21 = vpop.f32.mrf.mxu1  ;;  %v7455_v22 = vld [vmem:[%s10492_s1 + $0xb4c] ss:$16 sps:$4 sm:$0xff]  }
 0x1f6   : > { %5205 = vmatpush2.bf16.msra.mxu1 %v7438_v7  ;;  %5133 = vmatprep.subr.bf16.mxu0 %v7443_v5  ;;  %v7452_v7 = vld [vmem:[%s10492_s1 + $0xd6c] ss:$16 sps:$4 sm:$0xff]   ;;  %v7450_v5 = vld [vmem:[%s10492_s1 + $0xd68] ss:$16 sps:$4 sm:$0xff]   ;;  %10540 = vst [vmem:[#allocation45_spill] sm:$0xff] %v9679_v21  ;;  %v4160_v21 = vadd.f32 %v8912_v28, %v8661_v0  ;;  %v9699_v63 = vpop.f32.mrf.mxu0  ;;  %v4223_v28 = vadd.f32 %v8792_v26, %v4150_v42 }
 0x1f7   : > { %5206 = vmatprep.subr.bf16.mxu1 %v7446_v1  ;;  %v4140_v1 = vadd.f32 %v8739_v50, %v8661_v0  ;;  %v7453_v50 = vld [vmem:[%s10492_s1 + $0xb48] ss:$16 sps:$4 sm:$0xff]   ;;  %v4347_v26 = vadd.f32 %v9043_v20, %v8946_v51  ;;  %v4355_v42 = vadd.f32 %v9091_v49, %v8977_v41 }
 0x1f8   : > { %v4296_v51 = vadd.f32 %v9035_v40, %v4223_v28  ;;  %v7465_v41 = vld [vmem:[%s10492_s1 + $0xb08] ss:$16 sps:$4 sm:$0xff]   ;;  %v4365_v40 = vadd.f32 %v9147_v48, %v9020_v6 }
 0x1f9   : > { %5134 = vmatpush2.bf16.msra.mxu0 %v7441_v29  ;;  %v4203_v29 = vadd.f32 %v8707_v30, %v4130_v47  ;;  %v9701_v30 = vpop.f32.mrf.mxu1 }
 0x1fa   : > { %5207 = vmatpush2.bf16.msra.mxu1 %v7444_v11  ;;  %5135 = vmatprep.subr.bf16.mxu0 %v7449_v38  ;;  %v7458_v11 = vld [vmem:[%s10492_s1 + $0xd4c] ss:$16 sps:$4 sm:$0xff]   ;;  %v7456_v38 = vld [vmem:[%s10492_s1 + $0xd48] ss:$16 sps:$4 sm:$0xff]   ;;  %v4369_v6 = vadd.f32 %v9175_v4, %v4296_v51  ;;  %v4428_v4 = vadd.f32 %v9313_v56, %v4355_v42 }
 0x1fb   : > { %5208 = vmatprep.subr.bf16.mxu1 %v7452_v7  ;;  %v4213_v7 = vadd.f32 %v8752_v59, %v4140_v1  ;;  %v4343_v59 = vadd.f32 %v9001_v16, %v8926_v37  ;;  %v4276_v47 = vadd.f32 %v8951_v52, %v4203_v29  ;;  %v7462_v37 = vld [vmem:[%s10492_s1 + $0xd28] ss:$16 sps:$4 sm:$0xff]   ;;  %v4233_v52 = vadd.f32 %v8990_v9, %v4160_v21  ;;  %v7467_v16 = vld [vmem:[%s10492_s1 + $0xb0c] ss:$16 sps:$4 sm:$0xff]  }
 0x1fc   : > { %v4353_v9 = vadd.f32 %v9077_v3, %v8965_v61  ;;  %v4357_v21 = vadd.f32 %v9105_v19, %v8985_v8  ;;  %v4363_v29 = vadd.f32 %v9133_v14, %v9008_v23  ;;  %v4420_v61 = vadd.f32 %v9258_v27, %v4347_v26  ;;  %v7468_v8 = vld [vmem:[%s10492_s1 + $0xd08] ss:$16 sps:$4 sm:$0xff]   ;;  %v7476_v14 = vld [vmem:[%s10492_s1 + $0x10ec] ss:$16 sps:$4 sm:$0xff]  }
 0x1fd   : > { %5136 = vmatpush2.bf16.msra.mxu0 %v7447_v44  ;;  %v7464_v44 = vld [vmem:[%s10492_s1 + $0xd2c] ss:$16 sps:$4 sm:$0xff]   ;;  %v4286_v0 = vadd.f32 %v8992_v10, %v4213_v7  ;;  %v4416_v1 = vadd.f32 %v9217_v45, %v4343_v59  ;;  %v9726_v10 = vpop.f32.mrf.mxu0  ;;  %v4349_v45 = vadd.f32 %v9066_v62, %v4276_v47  ;;  %v4306_v62 = vadd.f32 %v9207_v33, %v4233_v52  ;;  %v10546_v59 = vld [vmem:[#allocation26_spill] sm:$0xff]  ;;  %v7737_v26 = vld [vmem:[%s7947_s13 + $0x28] ss:$72 sps:$4 sm:$0xff]  }
 0x1fe   : > { %5209 = vmatpush2.bf16.msra.mxu1 %v7450_v5  ;;  %5137 = vmatprep.subr.bf16.mxu0 %v7455_v22  ;;  %v4345_v5 = vadd.f32 %v9024_v34, %v8938_v12  ;;  %v7459_v22 = vld [vmem:[%s10492_s1 + $0xb28] ss:$16 sps:$4 sm:$0xff]   ;;  %v9728_v12 = vpop.f32.mrf.mxu1  ;;  %v7470_v34 = vld [vmem:[%s10492_s1 + $0xd0c] ss:$16 sps:$4 sm:$0xff]   ;;  %v4367_v23 = vadd.f32 %v9161_v57, %v9030_v39  ;;  %v4426_v48 = vadd.f32 %v9297_v17, %v4353_v9  ;;  %v10551_v9 = vld [vmem:[#allocation28_spill] sm:$0xff] }
 0x1ff   : > { %5210 = vmatprep.subr.bf16.mxu1 %v7458_v11  ;;  %v4359_v11 = vadd.f32 %v9119_v31, %v4286_v0  ;;  %v4422_v3 = vadd.f32 %v9277_v53, %v4349_v45  ;;  %v9762_v49 = vpop.f32.mrf.mxu0  ;;  %v7473_v31 = vld [vmem:[%s10492_s1 + $0xeec] ss:$16 sps:$4 sm:$0xff]   ;;  %v9778_v33 = vadd.f32 %v9189_v55, %v9050_v18  ;;  %v9790_v27 = vadd.f32 %v9243_v46, %v4306_v62  ;;  %v7471_v18 = vld [vmem:[%s10492_s1 + $0xee8] ss:$16 sps:$4 sm:$0xff]  }
 0x200   : > { %v4418_v20 = vadd.f32 %v9233_v58, %v4345_v5  ;;  %v9764_v19 = vpop.f32.mrf.mxu1  ;;  %v9782_v58 = vadd.f32 %v9205_v32, %v9062_v35  ;;  %v7474_v35 = vld [vmem:[%s10492_s1 + $0x10e8] ss:$16 sps:$4 sm:$0xff]   ;;  %v4430_v32 = vadd.f32 %v9333_v25, %v4357_v21  ;;  %v7479_v56 = vld [vmem:[%s10492_s1 + $0xecc] ss:$16 sps:$4 sm:$0xff]   ;;  %v10548_v5 = vld [vmem:[#allocation10_spill] sm:$0xff] }
 0x201   : > { %5138 = vmatpush2.bf16.msra.mxu0 %v7453_v50  ;;  %v4489_v50 = vadd.f32 %v9256_v24, %v4416_v1  ;;  %v9786_v24 = vadd.f32 %v9225_v54, %v9072_v2  ;;  %v10541_v2 = vld [vmem:[#allocation3_spill] sm:$0xff]  ;;  %v10542_v54 = vld [vmem:[#allocation6_spill] sm:$0xff]  ;;  %v10547_v0 = vld [vmem:[#allocation5_spill] sm:$0xff]  ;;  %v4438_v1 = vadd.f32 %v10548_v5, %v4365_v40 }
 0x202   : > { %5211 = vmatpush2.bf16.msra.mxu1 %v7456_v38  ;;  %5139 = vmatprep.subr.bf16.mxu0 %v7461_v15  ;;  %v4491_v39 = vadd.f32 %v9275_v60, %v4418_v20  ;;  %v4493_v60 = vadd.f32 %v9295_v13, %v4420_v61  ;;  %v4495_v55 = vadd.f32 %v10541_v2, %v4422_v3  ;;  %v9803_v13 = vpop.f32.mrf.mxu0  ;;  %v9805_v17 = vpop.f32.mrf.mxu1  ;;  %v10544_v38 = vld [vmem:[#allocation8_spill] sm:$0xff]  ;;  %v10545_v15 = vld [vmem:[#allocation25_spill] sm:$0xff]  ;;  %v10554_v61 = vld [vmem:[#allocation30_spill] sm:$0xff] }
 0x203   : > { %5212 = vmatprep.subr.bf16.mxu1 %v7464_v44  ;;  %v4562_v57 = vadd.f32 %v9483_v36, %v4489_v50  ;;  %v4432_v46 = vadd.f32 %v10542_v54, %v4359_v11  ;;  %v7482_v36 = vld [vmem:[%s10492_s1 + $0x10cc] ss:$16 sps:$4 sm:$0xff]   ;;  %v4436_v7 = vadd.f32 %v10544_v38, %v4363_v29  ;;  %v4501_v28 = vadd.f32 %v10547_v0, %v4428_v4  ;;  %v7477_v42 = vld [vmem:[%s10492_s1 + $0xec8] ss:$16 sps:$4 sm:$0xff]   ;;  %v10558_v2 = vld [vmem:[#allocation14_spill] sm:$0xff] }
 0x204   : > { %v4564_v53 = vadd.f32 %v9501_v43, %v4491_v39  ;;  %v10543_v43 = vld [vmem:[#allocation4_spill] sm:$0xff]  ;;  %v4566_v47 = vadd.f32 %v10546_v59, %v4493_v60  ;;  %v4568_v51 = vadd.f32 %v10551_v9, %v4495_v55  ;;  %v7480_v21 = vld [vmem:[%s10492_s1 + $0x10c8] ss:$16 sps:$4 sm:$0xff]   ;;  %v7488_v3 = vld [vmem:[%s10492_s1 + $0x10ac] ss:$16 sps:$4 sm:$0xff]   ;;  %v4442_v55 = vadd.f32 %v10558_v2, %v4369_v6 }
 0x205   : > { %5140 = vmatpush2.bf16.msra.mxu0 %v7459_v22  ;;  %v4499_v25 = vadd.f32 %v10543_v43, %v4426_v48  ;;  %v4635_v44 = vadd.f32 %v10545_v15, %v4562_v57  ;;  %v10549_v22 = vld [vmem:[#allocation12_spill] sm:$0xff]  ;;  %v10552_v11 = vld [vmem:[#allocation7_spill] sm:$0xff]  ;;  %v10553_v62 = vld [vmem:[#allocation9_spill] sm:$0xff] }
 0x206   : > { %5213 = vmatpush2.bf16.msra.mxu1 %v7462_v37  ;;  %5141 = vmatprep.subr.bf16.mxu0 %v7467_v16  ;;  %v4440_v37 = vadd.f32 %v10549_v22, %v4367_v23  ;;  %v7738_v16 = vld [vmem:[%s7947_s13 + $0x30] ss:$72 sps:$4 sm:$0xff]   ;;  %v4503_v29 = vadd.f32 %v10552_v11, %v4430_v32  ;;  %v4505_v50 = vadd.f32 %v10553_v62, %v4432_v46  ;;  %v7485_v23 = vld [vmem:[%s10492_s1 + $0xeac] ss:$16 sps:$4 sm:$0xff]  }
 0x207   : > { %5214 = vmatprep.subr.bf16.mxu1 %v7470_v34  ;;  %v10550_v34 = vld [vmem:[#allocation27_spill] sm:$0xff]  ;;  %v10556_v39 = vld [vmem:[#allocation29_spill] sm:$0xff]  ;;  %v10560_v46 = vld [vmem:[#allocation32_spill] sm:$0xff] }
 0x208   : > { %v4637_v45 = vadd.f32 %v10550_v34, %v4564_v53  ;;  %v4639_v48 = vadd.f32 %v10556_v39, %v4566_v47  ;;  %v7739_v60 = vld [vmem:[%s7947_s13 + $0xbc] ss:$72 sps:$4 sm:$0xff]   ;;  %v10559_v32 = vld [vmem:[#allocation15_spill] sm:$0xff]  ;;  %v10562_v47 = vld [vmem:[#allocation16_spill] sm:$0xff] }
 0x209   : > { %5142 = vmatpush2.bf16.msra.mxu0 %v7465_v41  ;;  %v4572_v41 = vadd.f32 %v10554_v61, %v4499_v25  ;;  %v7740_v53 = vld [vmem:[%s7947_s13 + $0xc4] ss:$72 sps:$4 sm:$0xff]   ;;  %v9853_v54 = vadd.f32 %v10559_v32, %v4440_v37  ;;  %v7483_v25 = vld [vmem:[%s10492_s1 + $0xea8] ss:$16 sps:$4 sm:$0xff]   ;;  %v4446_v0 = vadd.f32 %v10562_v47, %v9778_v33  ;;  %v10574_v47 = vld [vmem:[#allocation40_spill] sm:$0xff] }
 0x20a   : > { %5215 = vmatpush2.bf16.msra.mxu1 %v7468_v8  ;;  %5257 = vmatprep.subr.bf16.mxu0 %v7473_v31  ;;  %v9835_v8 = vpop.f32.mrf.mxu1  ;;  %v10555_v31 = vld [vmem:[#allocation11_spill] sm:$0xff]  ;;  %v7741_v61 = vld [vmem:[%s7947_s13 + $0xb8] ss:$72 sps:$4 sm:$0xff]  }
 0x20b   : > { %5330 = vmatprep.subr.bf16.mxu1 %v7476_v14  ;;  %v4509_v14 = vadd.f32 %v10555_v31, %v4436_v7  ;;  %v10561_v38 = vld [vmem:[#allocation31_spill] sm:$0xff]  ;;  %v10568_v39 = vld [vmem:[#allocation18_spill] sm:$0xff] }
 0x20c   : > { %v4707_v52 = vpop.f32.mrf.mxu0  ;;  %5144 = vmatmul.mubr.bf16.vlgmr.msra.gmra.mxu0 %v7737_v26  ;;  %v4641_v7 = vadd.f32 %v10561_v38, %v4568_v51  ;;  %v7486_v6 = vld [vmem:[%s10492_s1 + $0x10a8] ss:$16 sps:$4 sm:$0xff]   ;;  %v7494_v26 = vld [vmem:[%s10492_s1 + $0x108c] ss:$16 sps:$4 sm:$0xff]  }
 0x20d   : > { %5217 = vmatmul.mubr.bf16.vlgmr.msra.gmra.mxu1 %v7738_v16  ;;  %v9824_v20 = vadd.f32 %v4707_v52, %v4635_v44  ;;  %5258 = vmatpush1.bf16.msra.mxu0 %v7471_v18  ;;  %v10557_v18 = vld [vmem:[#allocation13_spill] sm:$0xff]  ;;  %v10566_v51 = vld [vmem:[#allocation35_spill] sm:$0xff] }
 0x20e   : > { %5331 = vmatpush1.bf16.msra.mxu1 %v7474_v35  ;;  %v4709_v40 = vpop.f32.mrf.mxu0  ;;  %5259 = vmatprep.subr.bf16.mxu0 %v7479_v56  ;;  %v4511_v35 = vadd.f32 %v10557_v18, %v4438_v1  ;;  %v4574_v56 = vadd.f32 %v10560_v46, %v4501_v28  ;;  %v10563_v28 = vld [vmem:[#allocation33_spill] sm:$0xff]  ;;  %v10564_v1 = vld [vmem:[#allocation34_spill] sm:$0xff] }
 0x20f   : > { %5332 = vmatprep.subr.bf16.mxu1 %v7482_v36  ;;  %v5403_v57 = vmin.f32 %v9824_v20, 20.0  ;;  %v9846_v4 = vadd.f32 %v4709_v40, %v4637_v45  ;;  %5153 = vmatprep.mubr.bf16.mxu0 %v7739_v60  ;;  %v9856_v36 = vpop.f32.mrf.mxu1  ;;  %v4645_v5 = vadd.f32 %v10563_v28, %v4572_v41  ;;  %v4576_v22 = vadd.f32 %v10564_v1, %v4503_v29  ;;  %v7491_v52 = vld [vmem:[%s10492_s1 + $0xe8c] ss:$16 sps:$4 sm:$0xff]   ;;  %v7742_v41 = vld [vmem:[%s7947_s13 + $0xc0] ss:$72 sps:$4 sm:$0xff]  }
 0x210   : > { %5226 = vmatprep.mubr.bf16.mxu1 %v7740_v53  ;;  %v4711_v43 = vpop.f32.mrf.mxu0  ;;  %v10565_v45 = vld [vmem:[#allocation17_spill] sm:$0xff]  ;;  %v10570_v53 = vld [vmem:[#allocation38_spill] sm:$0xff]  ;;  %v4584_v28 = vadd.f32 %v10574_v47, %v4511_v35 }
 0x211   : > { %v5435_v15 = vmul.f32 1.442695, %v5403_v57  ;;  %v5404_v44 = vmin.f32 %v9846_v4, 20.0  ;;  %v9863_v59 = vadd.f32 %v4711_v43, %v4639_v48  ;;  %5260 = vmatpush1.bf16.msra.mxu0 %v7477_v42  ;;  %v4515_v9 = vadd.f32 %v10565_v45, %v4442_v55  ;;  %v9884_v29 = vpop.f32.mrf.mxu1  ;;  %v7489_v40 = vld [vmem:[%s10492_s1 + $0xe88] ss:$16 sps:$4 sm:$0xff]  }
 0x212   : > { %5333 = vmatpush1.bf16.msra.mxu1 %v7480_v21  ;;  %v4713_v37 = vpop.f32.mrf.mxu0  ;;  %5261 = vmatprep.subr.bf16.mxu0 %v7485_v23  ;;  %v4647_v42 = vadd.f32 %v10566_v51, %v4574_v56  ;;  %v10567_v21 = vld [vmem:[#allocation36_spill] sm:$0xff]  ;;  %v4448_v48 = vadd.f32 %v10568_v39, %v9782_v58  ;;  %v10569_v57 = vld [vmem:[#allocation37_spill] sm:$0xff]  ;;  %v4582_v18 = vadd.f32 %v10570_v53, %v4509_v14 }
 0x213   : > { %5334 = vmatprep.subr.bf16.mxu1 %v7488_v3  ;;  %7567 = vpow2.f32 %v5435_v15  ;;  %v5437_v16 = vmul.f32 1.442695, %v5404_v44  ;;  %v5407_v33 = vmin.f32 %v9863_v59, 20.0  ;;  %v9879_v34 = vadd.f32 %v4713_v37, %v4641_v7  ;;  %v7497_v55 = vld [vmem:[%s10492_s1 + $0xe6c] ss:$16 sps:$4 sm:$0xff]   ;;  %v10572_v7 = vld [vmem:[#allocation20_spill] sm:$0xff] }
 0x214   : > { %v4578_v11 = vadd.f32 %v10567_v21, %v4505_v50  ;;  %v4717_v62 = vpop.f32.mrf.mxu0  ;;  %5154 = vmatmul.mubr.bf16.gmra.mxu0 %v7741_v61  ;;  %v7492_v50 = vld [vmem:[%s10492_s1 + $0x1088] ss:$16 sps:$4 sm:$0xff]   ;;  %v4649_v60 = vadd.f32 %v10569_v57, %v4576_v22  ;;  %v7500_v32 = vld [vmem:[%s10492_s1 + $0x106c] ss:$16 sps:$4 sm:$0xff]   ;;  %v4450_v15 = vadd.f32 %v10572_v7, %v9786_v24 }
 0x215   : > { %5227 = vmatmul.mubr.bf16.gmra.mxu1 %v7742_v41  ;;  %7569 = vpow2.f32 %v5437_v16  ;;  %v5443_v23 = vmul.f32 1.442695, %v5407_v33  ;;  %v5408_v3 = vmin.f32 %v9879_v34, 20.0  ;;  %v9892_v31 = vadd.f32 %v4717_v62, %v4645_v5  ;;  %5262 = vmatpush1.bf16.msra.mxu0 %v7483_v25  ;;  %v7743_v43 = vld [vmem:[%s7947_s13 + $0x14c] ss:$72 sps:$4 sm:$0xff]   ;;  %v9917_v5 = vpop.f32.mrf.mxu1  ;;  %v10575_v35 = vld [vmem:[#allocation21_spill] sm:$0xff] }
 0x216   : > { %5335 = vmatpush1.bf16.msra.mxu1 %v7486_v6  ;;  %v4719_v2 = vpop.f32.mrf.mxu0  ;;  %5263 = vmatprep.subr.bf16.mxu0 %v7491_v52  ;;  %v7744_v14 = vld [vmem:[%s7947_s13 + $0x154] ss:$72 sps:$4 sm:$0xff]   ;;  %v10571_v25 = vld [vmem:[#allocation19_spill] sm:$0xff]  ;;  %v10576_v16 = vld [vmem:[#allocation22_spill] sm:$0xff] }
 0x217   : > { %5336 = vmatprep.subr.bf16.mxu1 %v7494_v26  ;;  %7571 = vpow2.f32 %v5443_v23  ;;  %v5445_v46 = vmul.f32 1.442695, %v5408_v3  ;;  %v5411_v56 = vmin.f32 %v9892_v31, 20.0  ;;  %v9908_v58 = vadd.f32 %v4719_v2, %v4647_v42  ;;  %5163 = vmatprep.mubr.bf16.mxu0 %v7743_v43  ;;  %v10573_v44 = vld [vmem:[#allocation39_spill] sm:$0xff]  ;;  %v10577_v45 = vld [vmem:[#allocation41_spill] sm:$0xff]  ;;  %v10578_v41 = vld [vmem:[#allocation42_spill] sm:$0xff] }
 0x218   : > { %5236 = vmatprep.mubr.bf16.mxu1 %v7744_v14  ;;  %v4519_v38 = vadd.f32 %v10571_v25, %v4446_v0  ;;  %v4651_v6 = vadd.f32 %v10573_v44, %v4578_v11  ;;  %v4721_v1 = vpop.f32.mrf.mxu0  ;;  %v7495_v22 = vld [vmem:[%s10492_s1 + $0xe68] ss:$16 sps:$4 sm:$0xff]   ;;  %v4521_v0 = vadd.f32 %v10575_v35, %v4448_v48  ;;  %v4452_v33 = vadd.f32 %v10576_v16, %v9790_v27  ;;  %v7503_v21 = vld [vmem:[%s10492_s1 + $0xe4c] ss:$16 sps:$4 sm:$0xff]   ;;  %v9945_v48 = vpop.f32.mrf.mxu1 }
 0x219   : > { %7573 = vpow2.f32 %v5445_v46  ;;  %v5451_v37 = vmul.f32 1.442695, %v5411_v56  ;;  %v5412_v52 = vmin.f32 %v9908_v58, 20.0  ;;  %v9923_v26 = vadd.f32 %v4721_v1, %v4649_v60  ;;  %5264 = vmatpush1.bf16.msra.mxu0 %v7489_v40  ;;  %v7498_v24 = vld [vmem:[%s10492_s1 + $0x1068] ss:$16 sps:$4 sm:$0xff]   ;;  %v10582_v56 = vld [vmem:[#allocation24_spill] sm:$0xff] }
 0x21a   : > { %5337 = vmatpush1.bf16.msra.mxu1 %v7492_v50  ;;  %v4655_v51 = vadd.f32 %v10577_v45, %v4582_v18  ;;  %v4723_v42 = vpop.f32.mrf.mxu0  ;;  %5265 = vmatprep.subr.bf16.mxu0 %v7497_v55  ;;  %v7506_v11 = vld [vmem:[%s10492_s1 + $0x104c] ss:$16 sps:$4 sm:$0xff]   ;;  %v4586_v40 = vadd.f32 %v10578_v41, %v9853_v54  ;;  %v10580_v50 = vld [vmem:[#allocation44_spill] sm:$0xff]  ;;  %v7501_v18 = vld [vmem:[%s10492_s1 + $0xe48] ss:$16 sps:$4 sm:$0xff]   ;;  %v4525_v43 = vadd.f32 %v10582_v56, %v4452_v33 }
 0x21b   : > { %5338 = vmatprep.subr.bf16.mxu1 %v7500_v32  ;;  %7575 = vpow2.f32 %v5451_v37  ;;  %v5453_v62 = vmul.f32 1.442695, %v5412_v52  ;;  %v5415_v61 = vmin.f32 %v9923_v26, 20.0  ;;  %v9939_v27 = vadd.f32 %v4723_v42, %v4651_v6  ;;  %v10579_v23 = vld [vmem:[#allocation43_spill] sm:$0xff]  ;;  %v7746_v53 = vld [vmem:[%s7947_s13 + $0x150] ss:$72 sps:$4 sm:$0xff]   ;;  %v9967_v6 = vpop.f32.mrf.mxu1 }
 0x21c   : > { %v4657_v3 = vadd.f32 %v10579_v23, %v4584_v28  ;;  %v4588_v39 = vadd.f32 %v10580_v50, %v4515_v9  ;;  %v4727_v57 = vpop.f32.mrf.mxu0  ;;  %v7745_v60 = vld [vmem:[%s7947_s13 + $0x148] ss:$72 sps:$4 sm:$0xff]   ;;  %v4592_v14 = vadd.f32 %v9699_v63, %v4519_v38  ;;  %v7509_v7 = vld [vmem:[%s10492_s1 + $0xe2c] ss:$16 sps:$4 sm:$0xff]  }
 0x21d   : > { %5164 = vmatmul.mubr.bf16.gmra.mxu0 %v7745_v60  ;;  %5237 = vmatmul.mubr.bf16.gmra.mxu1 %v7746_v53  ;;  %7577 = vpow2.f32 %v5453_v62  ;;  %v5459_v2 = vmul.f32 1.442695, %v5415_v61  ;;  %v5416_v55 = vmin.f32 %v9939_v27, 20.0  ;;  %v9953_v54 = vadd.f32 %v4727_v57, %v4655_v51  ;;  %v7504_v9 = vld [vmem:[%s10492_s1 + $0x1048] ss:$16 sps:$4 sm:$0xff]   ;;  %v9995_v41 = vpop.f32.mrf.mxu1 }
 0x21e   : > { %5266 = vmatpush1.bf16.msra.mxu0 %v7495_v22  ;;  %5339 = vmatpush1.bf16.msra.mxu1 %v7498_v24  ;;  %v10581_v32 = vld [vmem:[#allocation23_spill] sm:$0xff]  ;;  %v4729_v25 = vpop.f32.mrf.mxu0  ;;  %v7747_v63 = vld [vmem:[%s7947_s13 + $0x1dc] ss:$72 sps:$4 sm:$0xff]   ;;  %v4661_v52 = vadd.f32 %v9701_v30, %v4588_v39  ;;  %v4594_v24 = vadd.f32 %v9726_v10, %v4521_v0  ;;  %v4665_v10 = vadd.f32 %v9728_v12, %v4592_v14  ;;  %v7749_v53 = vld [vmem:[%s7947_s13 + $0x1d8] ss:$72 sps:$4 sm:$0xff]  }
 0x21f   : > { %v4523_v46 = vadd.f32 %v10581_v32, %v4450_v15  ;;  %5267 = vmatprep.subr.bf16.mxu0 %v7503_v21  ;;  %5340 = vmatprep.subr.bf16.mxu1 %v7506_v11  ;;  %v7512_v44 = vld [vmem:[%s10492_s1 + $0x102c] ss:$16 sps:$4 sm:$0xff]   ;;  %7579 = vpow2.f32 %v5459_v2  ;;  %v5461_v47 = vmul.f32 1.442695, %v5416_v55  ;;  %v5419_v15 = vmin.f32 %v9953_v54, 20.0 }
 0x220   : > { %v9970_v28 = vadd.f32 %v4729_v25, %v4657_v3  ;;  %5173 = vmatprep.mubr.bf16.mxu0 %v7747_v63  ;;  %v7748_v38 = vld [vmem:[%s7947_s13 + $0x1e4] ss:$72 sps:$4 sm:$0xff]   ;;  %v7568_v1 = vpop.eup %7567  ;;  %v10583_v22 = vld [vmem:[#allocation45_spill] sm:$0xff]  ;;  %v4731_v16 = vpop.f32.mrf.mxu0  ;;  %v4667_v3 = vadd.f32 %v9764_v19, %v4594_v24 }
 0x221   : > { %5246 = vmatprep.mubr.bf16.mxu1 %v7748_v38  ;;  %v4659_v37 = vadd.f32 %v10583_v22, %v4586_v40  ;;  %v4596_v35 = vadd.f32 %v9762_v49, %v4523_v46  ;;  %v7507_v33 = vld [vmem:[%s10492_s1 + $0xe28] ss:$16 sps:$4 sm:$0xff]   ;;  %v5499_v45 = vadd.f32 2.0, %v7568_v1  ;;  %7581 = vpow2.f32 %v5461_v47  ;;  %v7515_v62 = vld [vmem:[%s10492_s1 + $0xe0c] ss:$16 sps:$4 sm:$0xff]   ;;  %v10020_v47 = vpop.f32.mrf.mxu1 }
 0x222   : > { %v5467_v51 = vmul.f32 1.442695, %v5419_v15  ;;  %v5420_v42 = vmin.f32 %v9970_v28, 20.0  ;;  %5268 = vmatpush1.bf16.msra.mxu0 %v7501_v18  ;;  %5341 = vmatpush1.bf16.msra.mxu1 %v7504_v9  ;;  %v7510_v30 = vld [vmem:[%s10492_s1 + $0x1028] ss:$16 sps:$4 sm:$0xff]   ;;  %v7570_v21 = vpop.eup %7569  ;;  %v4598_v49 = vadd.f32 %v9803_v13, %v4525_v43  ;;  %v4733_v11 = vpop.f32.mrf.mxu0 }
 0x223   : > { %v9987_v0 = vadd.f32 %v4731_v16, %v4659_v37  ;;  %5269 = vmatprep.subr.bf16.mxu0 %v7509_v7  ;;  %5342 = vmatprep.subr.bf16.mxu1 %v7512_v44  ;;  %v7518_v61 = vld [vmem:[%s10492_s1 + $0x100c] ss:$16 sps:$4 sm:$0xff]   ;;  %v5531_v12 = vmul.f32 %v7568_v1, %v5499_v45  ;;  %v5500_v40 = vadd.f32 2.0, %v7570_v21  ;;  %v4669_v50 = vadd.f32 %v9805_v17, %v4596_v35  ;;  %v7750_v18 = vld [vmem:[%s7947_s13 + $0x1e0] ss:$72 sps:$4 sm:$0xff]  }
 0x224   : > { %7583 = vpow2.f32 %v5467_v51  ;;  %v5469_v13 = vmul.f32 1.442695, %v5420_v42  ;;  %v7572_v23 = vpop.eup %7571  ;;  %v10000_v57 = vadd.f32 %v4733_v11, %v4661_v52  ;;  %v4737_v60 = vpop.f32.mrf.mxu0  ;;  %v7513_v2 = vld [vmem:[%s10492_s1 + $0xe08] ss:$16 sps:$4 sm:$0xff]   ;;  %v7521_v17 = vld [vmem:[%s10492_s1 + $0xfec] ss:$16 sps:$4 sm:$0xff]   ;;  %v4671_v56 = vadd.f32 %v9835_v8, %v4598_v49 }
 0x225   : > { %v5423_v39 = vmin.f32 %v9987_v0, 20.0  ;;  %5174 = vmatmul.mubr.bf16.gmra.mxu0 %v7749_v53  ;;  %5247 = vmatmul.mubr.bf16.gmra.mxu1 %v7750_v18  ;;  %v5563_v55 = vadd.f32 2.0, %v5531_v12  ;;  %v5532_v9 = vmul.f32 %v7570_v21, %v5500_v40  ;;  %v5503_v32 = vadd.f32 2.0, %v7572_v23  ;;  %v7516_v19 = vld [vmem:[%s10492_s1 + $0x1008] ss:$16 sps:$4 sm:$0xff]   ;;  %v10042_v12 = vpop.f32.mrf.mxu1 }
 0x226   : > { %7585 = vpow2.f32 %v5469_v13  ;;  %5270 = vmatpush1.bf16.msra.mxu0 %v7507_v33  ;;  %5343 = vmatpush1.bf16.msra.mxu1 %v7510_v30  ;;  %v7574_v46 = vpop.eup %7573  ;;  %v5424_v14 = vmin.f32 %v10000_v57, 20.0  ;;  %v10015_v25 = vadd.f32 %v4737_v60, %v4665_v10  ;;  %v4739_v7 = vpop.f32.mrf.mxu0  ;;  %v7524_v44 = vld [vmem:[%s10492_s1 + $0x11ec] ss:$16 sps:$4 sm:$0xff]   ;;  %v7519_v16 = vld [vmem:[%s10492_s1 + $0xfe8] ss:$16 sps:$4 sm:$0xff]  }
 0x227   : > { %v5475_v43 = vmul.f32 1.442695, %v5423_v39  ;;  %5271 = vmatprep.subr.bf16.mxu0 %v7515_v62  ;;  %5344 = vmatprep.subr.bf16.mxu1 %v7518_v61  ;;  %7587 = vrcp.f32 %v5563_v55  ;;  %v5564_v15 = vadd.f32 2.0, %v5532_v9  ;;  %v5535_v63 = vmul.f32 %v7572_v23, %v5503_v32  ;;  %v7751_v1 = vld [vmem:[%s7947_s13 + $0x3c] ss:$72 sps:$4 sm:$0xff]  }
 0x228   : > { %v5504_v38 = vadd.f32 2.0, %v7574_v46  ;;  %5289 = vmatprep.mubr.bf16.mxu0 %v7751_v1  ;;  %v7752_v8 = vld [vmem:[%s7947_s13 + $0x44] ss:$72 sps:$4 sm:$0xff]   ;;  %v7576_v22 = vpop.eup %7575  ;;  %v5477_v37 = vmul.f32 1.442695, %v5424_v14  ;;  %v5427_v52 = vmin.f32 %v10015_v25, 20.0  ;;  %v10025_v24 = vadd.f32 %v4739_v7, %v4667_v3  ;;  %v4741_v35 = vpop.f32.mrf.mxu0 }
 0x229   : > { %5362 = vmatprep.mubr.bf16.mxu1 %v7752_v8  ;;  %7589 = vpow2.f32 %v5475_v43  ;;  %v5567_v33 = vadd.f32 2.0, %v5535_v63  ;;  %v5507_v51 = vadd.f32 2.0, %v7576_v22  ;;  %v7522_v42 = vld [vmem:[%s10492_s1 + $0x11e8] ss:$16 sps:$4 sm:$0xff]   ;;  %v7527_v30 = vld [vmem:[%s10492_s1 + $0xfcc] ss:$16 sps:$4 sm:$0xff]   ;;  %v10037_v11 = vadd.f32 %v4741_v35, %v4669_v50  ;;  %v10060_v43 = vpop.f32.mrf.mxu1 }
 0x22a   : > { %7591 = vrcp.f32 %v5564_v15  ;;  %v5536_v45 = vmul.f32 %v7574_v46, %v5504_v38  ;;  %5272 = vmatpush1.bf16.msra.mxu0 %v7513_v2  ;;  %5345 = vmatpush1.bf16.msra.mxu1 %v7516_v19  ;;  %v7578_v21 = vpop.eup %7577  ;;  %v5483_v10 = vmul.f32 1.442695, %v5427_v52  ;;  %v5428_v49 = vmin.f32 %v10025_v24, 20.0  ;;  %v4743_v62 = vpop.f32.mrf.mxu0  ;;  %v7530_v61 = vld [vmem:[%s10492_s1 + $0x11cc] ss:$16 sps:$4 sm:$0xff]  }
 0x22b   : > { %7593 = vpow2.f32 %v5477_v37  ;;  %5273 = vmatprep.subr.bf16.mxu0 %v7521_v17  ;;  %5346 = vmatprep.subr.bf16.mxu1 %v7524_v44  ;;  %v5539_v13 = vmul.f32 %v7576_v22, %v5507_v51  ;;  %v5508_v23 = vadd.f32 2.0, %v7578_v21  ;;  %v5431_v60 = vmin.f32 %v10037_v11, 20.0  ;;  %v7525_v53 = vld [vmem:[%s10492_s1 + $0xfc8] ss:$16 sps:$4 sm:$0xff]   ;;  %v7533_v32 = vld [vmem:[%s10492_s1 + $0xfac] ss:$16 sps:$4 sm:$0xff]  }
 0x22c   : > { %7595 = vrcp.f32 %v5567_v33  ;;  %v5568_v40 = vadd.f32 2.0, %v5536_v45  ;;  %v7580_v3 = vpop.eup %7579  ;;  %v5485_v39 = vmul.f32 1.442695, %v5428_v49  ;;  %v10045_v50 = vadd.f32 %v4743_v62, %v4671_v56  ;;  %v7528_v9 = vld [vmem:[%s10492_s1 + $0x11c8] ss:$16 sps:$4 sm:$0xff]   ;;  %v10074_v33 = vpop.f32.mrf.mxu1 }
 0x22d   : > { %7597 = vpow2.f32 %v5483_v10  ;;  %v5571_v18 = vadd.f32 2.0, %v5539_v13  ;;  %v5540_v2 = vmul.f32 %v7578_v21, %v5508_v23  ;;  %v5511_v55 = vadd.f32 2.0, %v7580_v3  ;;  %v7536_v56 = vld [vmem:[%s10492_s1 + $0x11ac] ss:$16 sps:$4 sm:$0xff]   ;;  %v7531_v22 = vld [vmem:[%s10492_s1 + $0xfa8] ss:$16 sps:$4 sm:$0xff]  }
 0x22e   : > { %7599 = vrcp.f32 %v5568_v40  ;;  %5274 = vmatpush2.bf16.msra.mxu0 %v7519_v16  ;;  %5347 = vmatpush2.bf16.msra.mxu1 %v7522_v42  ;;  %v7582_v19 = vpop.eup %7581  ;;  %v5491_v17 = vmul.f32 1.442695, %v5431_v60  ;;  %v5432_v46 = vmin.f32 %v10045_v50, 20.0  ;;  %v7534_v37 = vld [vmem:[%s10492_s1 + $0x11a8] ss:$16 sps:$4 sm:$0xff]   ;;  %v10088_v60 = vpop.f32.mrf.mxu1 }
 0x22f   : > { %7601 = vpow2.f32 %v5485_v39  ;;  %5275 = vmatprep.subr.bf16.mxu0 %v7527_v30  ;;  %5348 = vmatprep.subr.bf16.mxu1 %v7530_v61  ;;  %v5572_v14 = vadd.f32 2.0, %v5540_v2  ;;  %v5543_v7 = vmul.f32 %v7580_v3, %v5511_v55  ;;  %v5512_v44 = vadd.f32 2.0, %v7582_v19  ;;  %v7539_v35 = vld [vmem:[%s10492_s1 + $0xf8c] ss:$16 sps:$4 sm:$0xff]   ;;  %v7537_v61 = vld [vmem:[%s10492_s1 + $0xf88] ss:$16 sps:$4 sm:$0xff]  }
 0x230   : > { %7603 = vrcp.f32 %v5571_v18  ;;  %v5493_v63 = vmul.f32 1.442695, %v5432_v46  ;;  %v7542_v16 = vld [vmem:[%s10492_s1 + $0x118c] ss:$16 sps:$4 sm:$0xff]   ;;  %v7540_v40 = vld [vmem:[%s10492_s1 + $0x1188] ss:$16 sps:$4 sm:$0xff]  }
 0x231   : > { %v7584_v15 = vpop.eup %7583  ;;  %7605 = vpow2.f32 %v5491_v17  ;;  %v5575_v38 = vadd.f32 2.0, %v5543_v7  ;;  %v5544_v1 = vmul.f32 %v7582_v19, %v5512_v44  ;;  %v7545_v3 = vld [vmem:[%s10492_s1 + $0xf6c] ss:$16 sps:$4 sm:$0xff]   ;;  %v7546_v7 = vld [vmem:[%s10492_s1 + $0x1168] ss:$16 sps:$4 sm:$0xff]  }
 0x232   : > { %7607 = vrcp.f32 %v5572_v14  ;;  %v5515_v8 = vadd.f32 2.0, %v7584_v15  ;;  %5276 = vmatpush2.bf16.msra.mxu0 %v7525_v53  ;;  %5349 = vmatpush2.bf16.msra.mxu1 %v7528_v9  ;;  %v7548_v39 = vld [vmem:[%s10492_s1 + $0x116c] ss:$16 sps:$4 sm:$0xff]   ;;  %v7543_v14 = vld [vmem:[%s10492_s1 + $0xf68] ss:$16 sps:$4 sm:$0xff]  }
 0x233   : > { %v7586_v52 = vpop.eup %7585  ;;  %7609 = vpow2.f32 %v5493_v63  ;;  %5277 = vmatprep.subr.bf16.mxu0 %v7533_v32  ;;  %5350 = vmatprep.subr.bf16.mxu1 %v7536_v56  ;;  %v5576_v45 = vadd.f32 2.0, %v5544_v1  ;;  %v10097_v1 = vpop.f32.mrf.mxu1 }
 0x234   : > { %7611 = vrcp.f32 %v5575_v38  ;;  %v5547_v51 = vmul.f32 %v7584_v15, %v5515_v8  ;;  %v5516_v42 = vadd.f32 2.0, %v7586_v52  ;;  %v7588_v30 = vpop.eup %7587  ;;  %v7551_v8 = vld [vmem:[%s10492_s1 + $0xf4c] ss:$16 sps:$4 sm:$0xff]  }
 0x235   : > { %v5627_v10 = vmul.f32 2.0, %v7588_v30  ;;  %7613 = vrcp.f32 %v5576_v45 }
 0x236   : > { %v7590_v21 = vpop.eup %7589  ;;  %v5579_v49 = vadd.f32 2.0, %v5547_v51  ;;  %v5548_v62 = vmul.f32 %v7586_v52, %v5516_v42  ;;  %5278 = vmatpush2.bf16.msra.mxu0 %v7531_v22  ;;  %5351 = vmatpush2.bf16.msra.mxu1 %v7534_v37  ;;  %v7554_v22 = vld [vmem:[%s10492_s1 + $0x114c] ss:$16 sps:$4 sm:$0xff]  }
 0x237   : > { %v7592_v13 = vpop.eup %7591  ;;  %v5519_v23 = vadd.f32 2.0, %v7590_v21  ;;  %5279 = vmatprep.subr.bf16.mxu0 %v7539_v35  ;;  %5352 = vmatprep.subr.bf16.mxu1 %v7542_v16  ;;  %v5659_v18 = vsub.f32 1.0, %v5627_v10 }
 0x238   : > { %v7594_v53 = vpop.eup %7593  ;;  %v5628_v2 = vmul.f32 2.0, %v7592_v13  ;;  %7615 = vrcp.f32 %v5579_v49  ;;  %v5580_v55 = vadd.f32 2.0, %v5548_v62 }
 0x239   : > { %v7596_v9 = vpop.eup %7595  ;;  %v5551_v32 = vmul.f32 %v7590_v21, %v5519_v23  ;;  %v5520_v19 = vadd.f32 2.0, %v7594_v53  ;;  %v5691_v52 = vmul.f32 %v5659_v18, %v9824_v20  ;;  %v7549_v20 = vld [vmem:[%s10492_s1 + $0xf48] ss:$16 sps:$4 sm:$0xff]   ;;  %v7560_v18 = vld [vmem:[%s10492_s1 + $0x112c] ss:$16 sps:$4 sm:$0xff]  }
 0x23a   : > { %v7598_v17 = vpop.eup %7597  ;;  %v5660_v46 = vsub.f32 1.0, %v5628_v2  ;;  %v5631_v56 = vmul.f32 2.0, %v7596_v9  ;;  %7617 = vrcp.f32 %v5580_v55  ;;  %5280 = vmatpush2.bf16.msra.mxu0 %v7537_v61  ;;  %5353 = vmatpush2.bf16.msra.mxu1 %v7540_v40 }
 0x23b   : > { %v7600_v44 = vpop.eup %7599  ;;  %v5583_v15 = vadd.f32 2.0, %v5551_v32  ;;  %v5552_v63 = vmul.f32 %v7594_v53, %v5520_v19  ;;  %v5523_v38 = vadd.f32 2.0, %v7598_v17  ;;  %5281 = vmatprep.subr.bf16.mxu0 %v7545_v3  ;;  %5354 = vmatprep.subr.bf16.mxu1 %v7548_v39  ;;  %v10118_v39 = vpop.f32.mrf.mxu1  ;;  %v7557_v53 = vld [vmem:[%s10492_s1 + $0xf2c] ss:$16 sps:$4 sm:$0xff]  }
 0x23c   : > { %v7602_v37 = vpop.eup %7601  ;;  %v5692_v35 = vmul.f32 %v5660_v46, %v9846_v4  ;;  %v5663_v16 = vsub.f32 1.0, %v5631_v56  ;;  %v5632_v45 = vmul.f32 2.0, %v7600_v44  ;;  %v7552_v4 = vld [vmem:[%s10492_s1 + $0x1148] ss:$16 sps:$4 sm:$0xff]  }
 0x23d   : > { %v7604_v51 = vpop.eup %7603  ;;  %7619 = vrcp.f32 %v5583_v15  ;;  %v5584_v42 = vadd.f32 2.0, %v5552_v63  ;;  %v5555_v30 = vmul.f32 %v7598_v17, %v5523_v38  ;;  %v5524_v21 = vadd.f32 2.0, %v7602_v37  ;;  %v7555_v63 = vld [vmem:[%s10492_s1 + $0xf28] ss:$16 sps:$4 sm:$0xff]   ;;  %v10584_v38 = vld [vmem:[#allocation2_spill] sm:$0xff] }
 0x23e   : > { %v7606_v10 = vpop.eup %7605  ;;  %v6570_v49 = vpack.c.bf16 %v5692_v35, %v5691_v52  ;;  %v5664_v62 = vsub.f32 1.0, %v5632_v45  ;;  %v5635_v61 = vmul.f32 2.0, %v7604_v51  ;;  %5282 = vmatpush2.bf16.msra.mxu0 %v7543_v14  ;;  %5355 = vmatpush2.bf16.msra.mxu1 %v7546_v7  ;;  %v5695_v55 = vmul.f32 %v5663_v16, %v9863_v59  ;;  %v7558_v59 = vld [vmem:[%s10492_s1 + $0x1128] ss:$16 sps:$4 sm:$0xff]   ;;  %v10136_v52 = vpop.f32.mrf.mxu1  ;;  %v7563_v35 = vld [vmem:[%s10492_s1 + $0xf0c] ss:$16 sps:$4 sm:$0xff]  }
 0x23f   : > { %v7608_v40 = vpop.eup %7607  ;;  %7621 = vrcp.f32 %v5584_v42  ;;  %v5587_v13 = vadd.f32 2.0, %v5555_v30  ;;  %v5556_v23 = vmul.f32 %v7602_v37, %v5524_v21  ;;  %v5527_v3 = vadd.f32 2.0, %v7606_v10  ;;  %5283 = vmatprep.subr.bf16.mxu0 %v7551_v8  ;;  %5356 = vmatprep.subr.bf16.mxu1 %v7554_v22  ;;  %v7566_v16 = vld [vmem:[%s10492_s1 + $0x110c] ss:$16 sps:$4 sm:$0xff]  }
 0x240   : > { %v7610_v2 = vpop.eup %7609  ;;  %5819 = vst [vmem:[%s10110_s22] sm:$0xff] %v6570_v49  ;;  %v5696_v9 = vmul.f32 %v5664_v62, %v9879_v34  ;;  %v5667_v32 = vsub.f32 1.0, %v5635_v61  ;;  %v5636_v19 = vmul.f32 2.0, %v7608_v40  ;;  %v839_v8 = vsub.s32 2, %v10584_v38  ;;  %v7753_v40 = vld [vmem:[%s10493_s2] sm:$0xf] }
 0x241   : > { %v7612_v17 = vpop.eup %7611  ;;  %7623 = vrcp.f32 %v5587_v13  ;;  %v5588_v46 = vadd.f32 2.0, %v5556_v23  ;;  %v5559_v56 = vmul.f32 %v7606_v10, %v5527_v3  ;;  %v5528_v14 = vadd.f32 2.0, %v7610_v2  ;;  %v10159_v23 = vpop.f32.mrf.mxu1 }
 0x242   : > { %v6572_v7 = vpack.c.bf16 %v5696_v9, %v5695_v55  ;;  %v5668_v44 = vsub.f32 1.0, %v5636_v19  ;;  %v5639_v15 = vmul.f32 2.0, %v7612_v17  ;;  %5284 = vmatpush2.bf16.msra.mxu0 %v7549_v20  ;;  %5357 = vmatpush2.bf16.msra.mxu1 %v7552_v4  ;;  %v7614_v34 = vpop.eup %7613  ;;  %v5699_v45 = vmul.f32 %v5667_v32, %v9892_v31  ;;  %v7561_v4 = vld [vmem:[%s10492_s1 + $0xf08] ss:$16 sps:$4 sm:$0xff]  }
 0x243   : > { %7625 = vrcp.f32 %v5588_v46  ;;  %v5591_v22 = vadd.f32 2.0, %v5559_v56  ;;  %v5560_v37 = vmul.f32 %v7610_v2, %v5528_v14  ;;  %5285 = vmatprep.subr.bf16.mxu0 %v7557_v53  ;;  %5358 = vmatprep.subr.bf16.mxu1 %v7560_v18  ;;  %v5640_v30 = vmul.f32 2.0, %v7614_v34  ;;  %v7564_v31 = vld [vmem:[%s10492_s1 + $0x1108] ss:$16 sps:$4 sm:$0xff]   ;;  %v10166_v46 = vpop.f32.mrf.mxu1 }
 0x244   : > { %5821 = vst [vmem:[%s10110_s22 + $0x10] sm:$0xff] %v6572_v7  ;;  %v5700_v51 = vmul.f32 %v5668_v44, %v9908_v58  ;;  %v5671_v42 = vsub.f32 1.0, %v5639_v15  ;;  %v843_v10 = vsub.s32 3, %v10584_v38  ;;  %v10157_v13 = vrot.slane %v7753_v40, %v839_v8  ;;  %v7755_v34 = vld [vmem:[%s7947_s13 + $0x40] ss:$72 sps:$4 sm:$0xff]  }
 0x245   : > { %v7616_v21 = vpop.eup %7615  ;;  %7627 = vrcp.f32 %v5591_v22  ;;  %v5592_v49 = vadd.f32 2.0, %v5560_v37  ;;  %v5672_v61 = vsub.f32 1.0, %v5640_v30  ;;  %v7756_v37 = vld [vmem:[%s7947_s13 + $0xcc] ss:$72 sps:$4 sm:$0xff]  }
 0x246   : > { %v6574_v62 = vpack.c.bf16 %v5700_v51, %v5699_v45  ;;  %v5643_v20 = vmul.f32 2.0, %v7616_v21  ;;  %5286 = vmatpush2.bf16.msra.mxu0 %v7555_v63  ;;  %5359 = vmatpush2.bf16.msra.mxu1 %v7558_v59  ;;  %v5703_v3 = vmul.f32 %v5671_v42, %v9923_v26  ;;  %v10164_v9 = vrot.slane %v7753_v40, %v843_v10  ;;  %v7754_v59 = vld [vmem:[%s7947_s13 + $0x38] ss:$72 sps:$4 sm:$0xff]  }
 0x247   : > { %v7618_v58 = vpop.eup %7617  ;;  %7629 = vrcp.f32 %v5592_v49  ;;  %5287 = vmatprep.subr.bf16.mxu0 %v7563_v35  ;;  %5360 = vmatprep.subr.bf16.mxu1 %v7566_v16  ;;  %v5704_v53 = vmul.f32 %v5672_v61, %v9939_v27  ;;  %v4781_v26 = vadd.f32 %v9856_v36, %v10157_v13  ;;  %v4785_v42 = vadd.f32 %v9917_v5, %v10157_v13 }
 0x248   : > { %5823 = vst [vmem:[%s10110_s22 + $0x20] sm:$0xff] %v6574_v62  ;;  %v5675_v18 = vsub.f32 1.0, %v5643_v20  ;;  %v5644_v2 = vmul.f32 2.0, %v7618_v58  ;;  %v4783_v36 = vadd.f32 %v9884_v29, %v10164_v9 }
 0x249   : > { %v6576_v32 = vpack.c.bf16 %v5704_v53, %v5703_v3 }
 0x24a   : > { %v7620_v55 = vpop.eup %7619  ;;  %v5676_v19 = vsub.f32 1.0, %v5644_v2  ;;  %5288 = vmatpush2.bf16.msra.mxu0 %v7561_v4  ;;  %5361 = vmatpush2.bf16.msra.mxu1 %v7564_v31  ;;  %v5707_v27 = vmul.f32 %v5675_v18, %v9953_v54  ;;  %v7757_v54 = vld [vmem:[%s7947_s13 + $0xd4] ss:$72 sps:$4 sm:$0xff]   ;;  %v4787_v31 = vadd.f32 %v9945_v48, %v10164_v9  ;;  %v4791_v2 = vadd.f32 %v9967_v6, %v10157_v13 }
 0x24b   : > { %v5647_v17 = vmul.f32 2.0, %v7620_v55  ;;  %5825 = vst [vmem:[%s10110_s22 + $0x30] sm:$0xff] %v6576_v32  ;;  %v4793_v6 = vadd.f32 %v9995_v41, %v10164_v9 }
 0x24c   : > { %v7622_v56 = vpop.eup %7621  ;;  %v5708_v14 = vmul.f32 %v5676_v19, %v9970_v28  ;;  %v4853_v15 = vpop.f32.mrf.mxu0 }
 0x24d   : > { %v5679_v7 = vsub.f32 1.0, %v5647_v17  ;;  %v5648_v44 = vmul.f32 2.0, %v7622_v56  ;;  %v4926_v63 = vpop.f32.mrf.mxu1  ;;  %5290 = vmatmul.mubr.bf16.vlgmr.msra.gmra.mxu0 %v7754_v59  ;;  %5363 = vmatmul.mubr.bf16.vlgmr.msra.gmra.mxu1 %v7755_v34  ;;  %v4854_v22 = vadd.f32 %v4853_v15, %v4781_v26 }
 0x24e   : > { %v7624_v38 = vpop.eup %7623  ;;  %v6578_v8 = vpack.c.bf16 %v5708_v14, %v5707_v27  ;;  %5299 = vmatprep.mubr.bf16.mxu0 %v7756_v37  ;;  %5372 = vmatprep.mubr.bf16.mxu1 %v7757_v54  ;;  %v4855_v16 = vpop.f32.mrf.mxu0  ;;  %v7758_v27 = vld [vmem:[%s7947_s13 + $0xc8] ss:$72 sps:$4 sm:$0xff]  }
 0x24f   : > { %v5680_v28 = vsub.f32 1.0, %v5648_v44  ;;  %v5651_v35 = vmul.f32 2.0, %v7624_v38  ;;  %v4928_v45 = vpop.f32.mrf.mxu1  ;;  %v10182_v30 = vadd.f32 %v4926_v63, %v4854_v22  ;;  %v4856_v21 = vadd.f32 %v4855_v16, %v4783_v36  ;;  %v7759_v14 = vld [vmem:[%s7947_s13 + $0xd0] ss:$72 sps:$4 sm:$0xff]   ;;  %v7760_v63 = vld [vmem:[%s7947_s13 + $0x15c] ss:$72 sps:$4 sm:$0xff]  }
 0x250   : > { %v7626_v51 = vpop.eup %7625  ;;  %5827 = vst [vmem:[%s10110_s22 + $0x40] sm:$0xff] %v6578_v8  ;;  %v5711_v29 = vmul.f32 %v5679_v7, %v9987_v0  ;;  %v4857_v61 = vpop.f32.mrf.mxu0  ;;  %v4795_v36 = vadd.f32 %v10020_v47, %v10157_v13 }
 0x251   : > { %v5712_v10 = vmul.f32 %v5680_v28, %v10000_v57  ;;  %v5683_v49 = vsub.f32 1.0, %v5651_v35  ;;  %v5652_v62 = vmul.f32 2.0, %v7626_v51  ;;  %v4930_v20 = vpop.f32.mrf.mxu1  ;;  %v10188_v58 = vadd.f32 %v4928_v45, %v4856_v21 }
 0x252   : > { %v7628_v4 = vpop.eup %7627  ;;  %v4858_v5 = vadd.f32 %v4857_v61, %v4785_v42  ;;  %v4859_v0 = vpop.f32.mrf.mxu0  ;;  %v4797_v35 = vadd.f32 %v10042_v12, %v10164_v9  ;;  %v4801_v21 = vadd.f32 %v10060_v43, %v10157_v13 }
 0x253   : > { %v6580_v40 = vpack.c.bf16 %v5712_v10, %v5711_v29  ;;  %v5684_v3 = vsub.f32 1.0, %v5652_v62  ;;  %v5655_v53 = vmul.f32 2.0, %v7628_v4  ;;  %v4932_v18 = vpop.f32.mrf.mxu1  ;;  %v4860_v32 = vadd.f32 %v4859_v0, %v4787_v31  ;;  %v7762_v10 = vld [vmem:[%s7947_s13 + $0x158] ss:$72 sps:$4 sm:$0xff]   ;;  %v7764_v4 = vld [vmem:[%s7947_s13 + $0x1ec] ss:$72 sps:$4 sm:$0xff]  }
 0x254   : > { %v7630_v57 = vpop.eup %7629  ;;  %v10192_v55 = vadd.f32 %v4930_v20, %v4858_v5  ;;  %v5715_v48 = vmul.f32 %v5683_v49, %v10015_v25  ;;  %v4863_v26 = vpop.f32.mrf.mxu0  ;;  %v7761_v25 = vld [vmem:[%s7947_s13 + $0x164] ss:$72 sps:$4 sm:$0xff]   ;;  %v7763_v49 = vld [vmem:[%s7947_s13 + $0x160] ss:$72 sps:$4 sm:$0xff]   ;;  %v4803_v62 = vadd.f32 %v10074_v33, %v10164_v9  ;;  %v7765_v31 = vld [vmem:[%s7947_s13 + $0x1f4] ss:$72 sps:$4 sm:$0xff]   ;;  %v4807_v33 = vadd.f32 %v10097_v1, %v10164_v9 }
 0x255   : > { %5829 = vst [vmem:[%s10110_s22 + $0x50] sm:$0xff] %v6580_v40  ;;  %v5716_v19 = vmul.f32 %v5684_v3, %v10025_v24  ;;  %v5687_v17 = vsub.f32 1.0, %v5655_v53  ;;  %v5656_v56 = vmul.f32 2.0, %v7630_v57  ;;  %5300 = vmatmul.mubr.bf16.gmra.mxu0 %v7758_v27  ;;  %5373 = vmatmul.mubr.bf16.gmra.mxu1 %v7759_v14  ;;  %v4936_v7 = vpop.f32.mrf.mxu1  ;;  %v10201_v44 = vadd.f32 %v4932_v18, %v4860_v32  ;;  %v7767_v27 = vld [vmem:[%s7947_s13 + $0x1f0] ss:$72 sps:$4 sm:$0xff]  }
 0x256   : > { %v4864_v15 = vadd.f32 %v4863_v26, %v4791_v2  ;;  %5309 = vmatprep.mubr.bf16.mxu0 %v7760_v63  ;;  %5382 = vmatprep.mubr.bf16.mxu1 %v7761_v25  ;;  %v4865_v34 = vpop.f32.mrf.mxu0  ;;  %v4805_v40 = vadd.f32 %v10088_v60, %v10157_v13  ;;  %v7766_v26 = vld [vmem:[%s7947_s13 + $0x1e8] ss:$72 sps:$4 sm:$0xff]   ;;  %v4813_v1 = vadd.f32 %v10136_v52, %v10164_v9 }
 0x257   : > { %v6582_v24 = vpack.c.bf16 %v5716_v19, %v5715_v48  ;;  %v5688_v59 = vsub.f32 1.0, %v5656_v56  ;;  %v4938_v38 = vpop.f32.mrf.mxu1  ;;  %v4866_v8 = vadd.f32 %v4865_v34, %v4793_v6  ;;  %v5719_v41 = vmul.f32 %v5687_v17, %v10037_v11 }
 0x258   : > { %v10207_v22 = vadd.f32 %v4936_v7, %v4864_v15  ;;  %v4867_v54 = vpop.f32.mrf.mxu0  ;;  %v4811_v19 = vadd.f32 %v10118_v39, %v10157_v13  ;;  %v4815_v39 = vadd.f32 %v10159_v23, %v10157_v13 }
 0x259   : > { %5831 = vst [vmem:[%s10110_s22 + $0x60] sm:$0xff] %v6582_v24  ;;  %v5720_v37 = vmul.f32 %v5688_v59, %v10045_v50  ;;  %v4940_v28 = vpop.f32.mrf.mxu1  ;;  %v4868_v16 = vadd.f32 %v4867_v54, %v4795_v36  ;;  %v10214_v45 = vadd.f32 %v4938_v38, %v4866_v8  ;;  %v4817_v38 = vadd.f32 %v10166_v46, %v10164_v9 }
 0x25a   : > { %v4869_v51 = vpop.f32.mrf.mxu0 }
 0x25b   : > { %v6584_v47 = vpack.c.bf16 %v5720_v37, %v5719_v41  ;;  %v4942_v42 = vpop.f32.mrf.mxu1  ;;  %v4870_v11 = vadd.f32 %v4869_v51, %v4797_v35  ;;  %v10218_v29 = vadd.f32 %v4940_v28, %v4868_v16 }
 0x25c   : > { %v4873_v50 = vpop.f32.mrf.mxu0 }
 0x25d   : > { %5833 = vst [vmem:[%s10110_s22 + $0x70] sm:$0xff] %v6584_v47  ;;  %5310 = vmatmul.mubr.bf16.gmra.mxu0 %v7762_v10  ;;  %5383 = vmatmul.mubr.bf16.gmra.mxu1 %v7763_v49  ;;  %v4946_v12 = vpop.f32.mrf.mxu1  ;;  %v4874_v61 = vadd.f32 %v4873_v50, %v4801_v21  ;;  %v10225_v20 = vadd.f32 %v4942_v42, %v4870_v11 }
 0x25e   : > { %5319 = vmatprep.mubr.bf16.mxu0 %v7764_v4  ;;  %5392 = vmatprep.mubr.bf16.mxu1 %v7765_v31  ;;  %v4875_v43 = vpop.f32.mrf.mxu0 }
 0x25f   : > { %v4948_v5 = vpop.f32.mrf.mxu1  ;;  %v4876_v3 = vadd.f32 %v4875_v43, %v4803_v62  ;;  %v10231_v53 = vadd.f32 %v4946_v12, %v4874_v61 }
 0x260   : > { %v4877_v0 = vpop.f32.mrf.mxu0 }
 0x261   : > { %v4950_v18 = vpop.f32.mrf.mxu1  ;;  %v4878_v57 = vadd.f32 %v4877_v0, %v4805_v40  ;;  %v10235_v2 = vadd.f32 %v4948_v5, %v4876_v3 }
 0x262   : > { %v4879_v32 = vpop.f32.mrf.mxu0 }
 0x263   : > { %v4952_v48 = vpop.f32.mrf.mxu1  ;;  %v4880_v17 = vadd.f32 %v4879_v32, %v4807_v33  ;;  %v10239_v56 = vadd.f32 %v4950_v18, %v4878_v57 }
 0x264   : > { %v4883_v60 = vpop.f32.mrf.mxu0 }
 0x265   : > { %5320 = vmatmul.mubr.bf16.gmra.mxu0 %v7766_v26  ;;  %5393 = vmatmul.mubr.bf16.gmra.mxu1 %v7767_v27  ;;  %v4956_v14 = vpop.f32.mrf.mxu1  ;;  %v4884_v7 = vadd.f32 %v4883_v60, %v4811_v19  ;;  %v10245_v6 = vadd.f32 %v4952_v48, %v4880_v17 }
 0x266   : > { %v4885_v15 = vpop.f32.mrf.mxu0 }
 0x267   : > { %v4958_v63 = vpop.f32.mrf.mxu1  ;;  %v4886_v25 = vadd.f32 %v4885_v15, %v4813_v1  ;;  %v10249_v24 = vadd.f32 %v4956_v14, %v4884_v7 }
 0x268   : > { %v4887_v59 = vpop.f32.mrf.mxu0 }
 0x269   : > { %v4960_v34 = vpop.f32.mrf.mxu1  ;;  %v4888_v36 = vadd.f32 %v4887_v59, %v4815_v39  ;;  %v10253_v8 = vadd.f32 %v4958_v63, %v4886_v25 }
 0x26a   : > { %v4889_v52 = vpop.f32.mrf.mxu0 }
 0x26b   : > { %v4962_v41 = vpop.f32.mrf.mxu1  ;;  %v4890_v37 = vadd.f32 %v4889_v52, %v4817_v38  ;;  %v10255_v54 = vadd.f32 %v4960_v34, %v4888_v36 }
 0x26d   : > { %10585 = vst [vmem:[#allocation3_spill] sm:$0xff] %v10255_v54  ;;  %v10257_v28 = vadd.f32 %v4962_v41, %v4890_v37 }
 0x26f   : > { %10586 = vst [vmem:[#allocation6_spill] sm:$0xff] %v10257_v28 }
 0x28c   : > { %v4999_v35 = vpop.f32.mrf.mxu0 }
 0x28d   : > { %v5072_v13 = vpop.f32.mrf.mxu1 }
 0x28e   : > { %v5001_v23 = vpop.f32.mrf.mxu0 }
 0x28f   : > { %v10259_v16 = vpop.f32.mrf.mxu1 }
 0x290   : > { %v5003_v47 = vpop.f32.mrf.mxu0 }
 0x291   : > { %v10261_v51 = vpop.f32.mrf.mxu1 }
 0x292   : > { %v5005_v42 = vpop.f32.mrf.mxu0 }
 0x293   : > { %v10263_v9 = vpop.f32.mrf.mxu1 }
 0x294   : > { %v5009_v46 = vpop.f32.mrf.mxu0 }
 0x295   : > { %v10265_v21 = vpop.f32.mrf.mxu1 }
 0x296   : > { %v5011_v11 = vpop.f32.mrf.mxu0 }
 0x297   : > { %v10267_v50 = vpop.f32.mrf.mxu1 }
 0x298   : > { %v5013_v10 = vpop.f32.mrf.mxu0 }
 0x299   : > { %v10269_v49 = vpop.f32.mrf.mxu1 }
 0x29a   : > { %v10271_v12 = vpop.f32.mrf.mxu0 }
 0x29b   : > { %v10273_v62 = vpop.f32.mrf.mxu1 }
 0x29c   : > { %v10275_v61 = vpop.f32.mrf.mxu0 }
 0x29d   : > { %v10277_v4 = vpop.f32.mrf.mxu1 }
 0x29e   : > { %v10279_v31 = vpop.f32.mrf.mxu0 }
 0x29f   : > { %v10281_v43 = vpop.f32.mrf.mxu1 }
 0x2a0   : > { %v10283_v5 = vpop.f32.mrf.mxu0 }
 0x2a1   : > { %v10285_v40 = vpop.f32.mrf.mxu1 }
 0x2a2   : > { %v10287_v3 = vpop.f32.mrf.mxu0 }
 0x2a3   : > { %v10289_v0 = vpop.f32.mrf.mxu1 }
 0x2a4   : > { %v10291_v18 = vpop.f32.mrf.mxu0 }
 0x2a5   : > { %v10293_v33 = vpop.f32.mrf.mxu1 }
 0x2a6   : > { %10587 = vst [vmem:[#allocation4_spill] sm:$0xff] %v10293_v33  ;;  %v10295_v57 = vpop.f32.mrf.mxu0 }
 0x2a7   : > { %v10297_v32 = vpop.f32.mrf.mxu1 }
 0x2a8   : > { %10588 = vst [vmem:[#allocation8_spill] sm:$0xff] %v10297_v32  ;;  %v10299_v48 = vpop.f32.mrf.mxu0 }
 0x2a9   : > { %10589 = vst [vmem:[#allocation25_spill] sm:$0xff] %v10299_v48  ;;  %v10301_v19 = vpop.f32.mrf.mxu1 }
 0x2aa   : > { %10590 = vst [vmem:[#allocation26_spill] sm:$0xff] %v10301_v19  ;;  %v10303_v17 = vpop.f32.mrf.mxu0 }
 0x2ab   : > { %10591 = vst [vmem:[#allocation5_spill] sm:$0xff] %v10303_v17  ;;  %v10305_v60 = vpop.f32.mrf.mxu1 }
 0x2ac   : > { %10592 = vst [vmem:[#allocation10_spill] sm:$0xff] %v10305_v60 }
 0x2cc   : > { %v5145_v26 = vpop.f32.mrf.mxu0 }
 0x2cd   : > { %v5218_v27 = vpop.f32.mrf.mxu1 }
 0x2ce   : > { %v5147_v14 = vpop.f32.mrf.mxu0 }
 0x2cf   : > { %v5220_v1 = vpop.f32.mrf.mxu1 }
 0x2d0   : > { %v5149_v7 = vpop.f32.mrf.mxu0 }
 0x2d1   : > { %v5222_v15 = vpop.f32.mrf.mxu1 }
 0x2d2   : > { %v5151_v63 = vpop.f32.mrf.mxu0 }
 0x2d3   : > { %v10307_v39 = vpop.f32.mrf.mxu1 }
 0x2d4   : > { %v5155_v25 = vpop.f32.mrf.mxu0 }
 0x2d5   : > { %v10309_v59 = vpop.f32.mrf.mxu1 }
 0x2d6   : > { %v5157_v34 = vpop.f32.mrf.mxu0 }
 0x2d7   : > { %v10311_v38 = vpop.f32.mrf.mxu1 }
 0x2d8   : > { %v10313_v36 = vpop.f32.mrf.mxu0 }
 0x2d9   : > { %v10315_v52 = vpop.f32.mrf.mxu1 }
 0x2da   : > { %10593 = vst [vmem:[#allocation12_spill] sm:$0xff] %v10315_v52  ;;  %v10317_v41 = vpop.f32.mrf.mxu0 }
 0x2db   : > { %10594 = vst [vmem:[#allocation27_spill] sm:$0xff] %v10317_v41  ;;  %v10319_v37 = vpop.f32.mrf.mxu1 }
 0x2dc   : > { %10595 = vst [vmem:[#allocation28_spill] sm:$0xff] %v10319_v37  ;;  %v5000_v37 = vadd.f32 %v4999_v35, %v10182_v30  ;;  %v5010_v35 = vadd.f32 %v5009_v46, %v10207_v22  ;;  %v5022_v22 = vadd.f32 %v10279_v31, %v10235_v2 }
 0x2dd   : > { %v10321_v60 = vpop.f32.mrf.mxu0  ;;  %v10323_v19 = vpop.f32.mrf.mxu1 }
 0x2de   : > { %10596 = vst [vmem:[#allocation7_spill] sm:$0xff] %v10321_v60  ;;  %10597 = vst [vmem:[#allocation9_spill] sm:$0xff] %v10323_v19 }
 0x2df   : > { %v10325_v17 = vpop.f32.mrf.mxu0  ;;  %v10327_v28 = vpop.f32.mrf.mxu1 }
 0x2e0   : > { %10598 = vst [vmem:[#allocation30_spill] sm:$0xff] %v10325_v17  ;;  %10599 = vst [vmem:[#allocation11_spill] sm:$0xff] %v10327_v28  ;;  %v5002_v28 = vadd.f32 %v5001_v23, %v10188_v58  ;;  %v5073_v17 = vadd.f32 %v5072_v13, %v5000_v37  ;;  %v5014_v58 = vadd.f32 %v5013_v10, %v10218_v29  ;;  %v10609_v37 = vld [vmem:[#allocation4_spill] sm:$0xff] }
 0x2e1   : > { %v10329_v32 = vpop.f32.mrf.mxu0  ;;  %v10331_v48 = vpop.f32.mrf.mxu1  ;;  %v5083_v29 = vadd.f32 %v10265_v21, %v5010_v35  ;;  %v10610_v35 = vld [vmem:[#allocation12_spill] sm:$0xff] }
 0x2e2   : > { %10600 = vst [vmem:[#allocation29_spill] sm:$0xff] %v10329_v32  ;;  %10601 = vst [vmem:[#allocation13_spill] sm:$0xff] %v10331_v48  ;;  %v5004_v32 = vadd.f32 %v5003_v47, %v10192_v55  ;;  %v5020_v47 = vadd.f32 %v10275_v61, %v10231_v53  ;;  %v5087_v10 = vadd.f32 %v10269_v49, %v5014_v58 }
 0x2e3   : > { %v10333_v54 = vpop.f32.mrf.mxu0  ;;  %v10335_v33 = vpop.f32.mrf.mxu1  ;;  %v5026_v53 = vadd.f32 %v10287_v3, %v10245_v6 }
 0x2e4   : > { %10602 = vst [vmem:[#allocation14_spill] sm:$0xff] %v10333_v54  ;;  %10603 = vst [vmem:[#allocation15_spill] sm:$0xff] %v10335_v33  ;;  %v5075_v33 = vadd.f32 %v10259_v16, %v5002_v28  ;;  %v5077_v30 = vadd.f32 %v10261_v51, %v5004_v32  ;;  %v5016_v28 = vadd.f32 %v10271_v12, %v10225_v20 }
 0x2e5   : > { %v10337_v52 = vpop.f32.mrf.mxu0  ;;  %v10339_v41 = vpop.f32.mrf.mxu1  ;;  %v5024_v20 = vadd.f32 %v10283_v5, %v10239_v56  ;;  %v5093_v32 = vadd.f32 %v10277_v4, %v5020_v47  ;;  %v5099_v4 = vadd.f32 %v10289_v0, %v5026_v53  ;;  %v10612_v47 = vld [vmem:[#allocation3_spill] sm:$0xff] }
 0x2e6   : > { %10604 = vst [vmem:[#allocation32_spill] sm:$0xff] %v10337_v52  ;;  %10605 = vst [vmem:[#allocation31_spill] sm:$0xff] %v10339_v41  ;;  %v5006_v52 = vadd.f32 %v5005_v42, %v10201_v44  ;;  %v5146_v41 = vadd.f32 %v5145_v26, %v5073_v17  ;;  %v5150_v16 = vadd.f32 %v5149_v7, %v5077_v30 }
 0x2e7   : > { %v10342_v60 = vpop.f32.mrf.mxu0  ;;  %v10344_v19 = vpop.f32.mrf.mxu1  ;;  %v5089_v2 = vadd.f32 %v10273_v62, %v5016_v28  ;;  %v5097_v62 = vadd.f32 %v10285_v40, %v5024_v20  ;;  %v5030_v26 = vadd.f32 %v10291_v18, %v10249_v24  ;;  %v10608_v24 = vld [vmem:[#allocation27_spill] sm:$0xff] }
 0x2e8   : > { %10606 = vst [vmem:[#allocation16_spill] sm:$0xff] %v10342_v60  ;;  %10607 = vst [vmem:[#allocation33_spill] sm:$0xff] %v10344_v19  ;;  %v5148_v60 = vadd.f32 %v5147_v14, %v5075_v33  ;;  %v5012_v19 = vadd.f32 %v5011_v11, %v10214_v45  ;;  %v5079_v23 = vadd.f32 %v10263_v9, %v5006_v52 }
 0x2e9   : > { %v10348_v48 = vpop.f32.mrf.mxu0  ;;  %v10350_v54 = vpop.f32.mrf.mxu1  ;;  %v5219_v44 = vadd.f32 %v5218_v27, %v5146_v41  ;;  %v5223_v31 = vadd.f32 %v5222_v15, %v5150_v16  ;;  %v5162_v18 = vadd.f32 %v10608_v24, %v5089_v2  ;;  %v5103_v30 = vadd.f32 %v10609_v37, %v5030_v26  ;;  %v10620_v26 = vld [vmem:[#allocation5_spill] sm:$0xff] }
 0x2ea   : > { %v5221_v42 = vadd.f32 %v5220_v1, %v5148_v60  ;;  %v5152_v46 = vadd.f32 %v5151_v63, %v5079_v23  ;;  %v5085_v9 = vadd.f32 %v10267_v50, %v5012_v19  ;;  %v5095_v50 = vadd.f32 %v10281_v43, %v5022_v22  ;;  %v10611_v23 = vld [vmem:[#allocation7_spill] sm:$0xff]  ;;  %v10613_v22 = vld [vmem:[#allocation25_spill] sm:$0xff] }
 0x2eb   : > { %v10358_v13 = vpop.f32.mrf.mxu0  ;;  %v10360_v55 = vpop.f32.mrf.mxu1  ;;  %v5156_v19 = vadd.f32 %v5155_v25, %v5083_v29  ;;  %v5160_v43 = vadd.f32 %v10313_v36, %v5087_v10 }
 0x2ec   : > { %v5158_v49 = vadd.f32 %v5157_v34, %v5085_v9  ;;  %v5225_v56 = vadd.f32 %v10307_v39, %v5152_v46  ;;  %v5032_v39 = vadd.f32 %v10295_v57, %v10253_v8  ;;  %v5166_v8 = vadd.f32 %v10611_v23, %v5093_v32  ;;  %v10618_v32 = vld [vmem:[#allocation29_spill] sm:$0xff] }
 0x2ed   : > { %v5229_v40 = vadd.f32 %v10309_v59, %v5156_v19  ;;  %v5233_v58 = vadd.f32 %v10610_v35, %v5160_v43  ;;  %v5170_v19 = vadd.f32 %v10618_v32, %v5097_v62  ;;  %v10625_v37 = vld [vmem:[#allocation32_spill] sm:$0xff] }
 0x2ee   : > { %v5231_v25 = vadd.f32 %v10311_v38, %v5158_v49  ;;  %v5176_v35 = vadd.f32 %v10625_v37, %v5103_v30 }
 0x30d   : > { %v5291_v45 = vpop.f32.mrf.mxu0  ;;  %v5364_v51 = vpop.f32.mrf.mxu1 }
 0x30e   : > { %v5292_v11 = vadd.f32 %v5291_v45, %v5219_v44  ;;  %v5034_v45 = vadd.f32 %v10613_v22, %v10612_v47 }
 0x30f   : > { %v5293_v12 = vpop.f32.mrf.mxu0  ;;  %v5366_v61 = vpop.f32.mrf.mxu1 }
 0x310   : > { %v10377_v33 = vadd.f32 %v5364_v51, %v5292_v11  ;;  %v5294_v21 = vadd.f32 %v5293_v12, %v5221_v42  ;;  %v10614_v51 = vld [vmem:[#allocation28_spill] sm:$0xff]  ;;  %v10615_v42 = vld [vmem:[#allocation30_spill] sm:$0xff] }
 0x311   : > { %v5295_v17 = vpop.f32.mrf.mxu0  ;;  %v5368_v60 = vpop.f32.mrf.mxu1  ;;  %v5235_v29 = vadd.f32 %v10614_v51, %v5162_v18  ;;  %v5168_v46 = vadd.f32 %v10615_v42, %v5095_v50 }
 0x312   : > { %v5405_v6 = vmin.f32 %v10377_v33, 20.0  ;;  %v10383_v5 = vadd.f32 %v5366_v61, %v5294_v21  ;;  %v5296_v3 = vadd.f32 %v5295_v17, %v5223_v31  ;;  %v10616_v61 = vld [vmem:[#allocation8_spill] sm:$0xff]  ;;  %v10617_v31 = vld [vmem:[#allocation9_spill] sm:$0xff] }
 0x313   : > { %v5297_v27 = vpop.f32.mrf.mxu0  ;;  %v5370_v14 = vpop.f32.mrf.mxu1  ;;  %v5105_v2 = vadd.f32 %v10616_v61, %v5032_v39  ;;  %v5239_v21 = vadd.f32 %v10617_v31, %v5166_v8 }
 0x314   : > { %v5439_v1 = vmul.f32 1.442695, %v5405_v6  ;;  %v5406_v7 = vmin.f32 %v10383_v5, 20.0  ;;  %v10391_v15 = vadd.f32 %v5368_v60, %v5296_v3  ;;  %v5298_v63 = vadd.f32 %v5297_v27, %v5225_v56  ;;  %v10619_v3 = vld [vmem:[#allocation6_spill] sm:$0xff] }
 0x315   : > { %v5301_v0 = vpop.f32.mrf.mxu0  ;;  %v5374_v34 = vpop.f32.mrf.mxu1  ;;  %v5036_v43 = vadd.f32 %v10620_v26, %v10619_v3  ;;  %v10621_v27 = vld [vmem:[#allocation26_spill] sm:$0xff] }
 0x316   : > { %7631 = vpow2.f32 %v5439_v1  ;;  %v5441_v36 = vmul.f32 1.442695, %v5406_v7  ;;  %v5409_v52 = vmin.f32 %v10391_v15, 20.0  ;;  %v10399_v41 = vadd.f32 %v5370_v14, %v5298_v63  ;;  %v10622_v1 = vld [vmem:[#allocation11_spill] sm:$0xff] }
 0x317   : > { %v5302_v57 = vadd.f32 %v5301_v0, %v5229_v40  ;;  %v5303_v59 = vpop.f32.mrf.mxu0  ;;  %v5376_v28 = vpop.f32.mrf.mxu1  ;;  %v5107_v14 = vadd.f32 %v10621_v27, %v5034_v45  ;;  %v5241_v7 = vadd.f32 %v10622_v1, %v5168_v46  ;;  %v10623_v0 = vld [vmem:[#allocation14_spill] sm:$0xff]  ;;  %v10628_v46 = vld [vmem:[#allocation15_spill] sm:$0xff] }
 0x318   : > { %7633 = vpow2.f32 %v5441_v36  ;;  %v5447_v38 = vmul.f32 1.442695, %v5409_v52  ;;  %v5410_v44 = vmin.f32 %v10399_v41, 20.0  ;;  %v5304_v16 = vadd.f32 %v5303_v59, %v5231_v25  ;;  %v10624_v36 = vld [vmem:[#allocation13_spill] sm:$0xff] }
 0x319   : > { %v10409_v11 = vadd.f32 %v5374_v34, %v5302_v57  ;;  %v5305_v9 = vpop.f32.mrf.mxu0  ;;  %v5378_v10 = vpop.f32.mrf.mxu1  ;;  %v5172_v34 = vadd.f32 %v10623_v0, %v5099_v4  ;;  %v5243_v52 = vadd.f32 %v10624_v36, %v5170_v19  ;;  %v5180_v47 = vadd.f32 %v10348_v48, %v5107_v14 }
 0x31a   : > { %7635 = vpow2.f32 %v5447_v38  ;;  %v5449_v20 = vmul.f32 1.442695, %v5410_v44  ;;  %v10411_v53 = vadd.f32 %v5376_v28, %v5304_v16  ;;  %v5306_v12 = vadd.f32 %v5305_v9, %v5233_v58  ;;  %v10626_v28 = vld [vmem:[#allocation10_spill] sm:$0xff]  ;;  %v10627_v44 = vld [vmem:[#allocation16_spill] sm:$0xff] }
 0x31b   : > { %v5413_v49 = vmin.f32 %v10409_v11, 20.0  ;;  %v5307_v17 = vpop.f32.mrf.mxu0  ;;  %v5380_v60 = vpop.f32.mrf.mxu1  ;;  %v5109_v38 = vadd.f32 %v10626_v28, %v5036_v43  ;;  %v5178_v16 = vadd.f32 %v10627_v44, %v5105_v2  ;;  %v5245_v9 = vadd.f32 %v10628_v46, %v5172_v34 }
 0x31c   : > { %7637 = vpow2.f32 %v5449_v20  ;;  %v5414_v50 = vmin.f32 %v10411_v53, 20.0  ;;  %v10418_v56 = vadd.f32 %v5378_v10, %v5306_v12  ;;  %v5308_v6 = vadd.f32 %v5307_v17, %v5235_v29  ;;  %v10629_v10 = vld [vmem:[#allocation31_spill] sm:$0xff] }
 0x31d   : > { %v5455_v63 = vmul.f32 1.442695, %v5413_v49  ;;  %v5311_v39 = vpop.f32.mrf.mxu0  ;;  %v5384_v62 = vpop.f32.mrf.mxu1  ;;  %v5249_v20 = vadd.f32 %v10629_v10, %v5176_v35  ;;  %v5182_v12 = vadd.f32 %v10358_v13, %v5109_v38  ;;  %v10630_v49 = vld [vmem:[#allocation33_spill] sm:$0xff] }
 0x31e   : > { %v5457_v40 = vmul.f32 1.442695, %v5414_v50  ;;  %v5417_v25 = vmin.f32 %v10418_v56, 20.0  ;;  %v10425_v24 = vadd.f32 %v5380_v60, %v5308_v6  ;;  %v5312_v18 = vadd.f32 %v5311_v39, %v5239_v21 }
 0x31f   : > { %7639 = vpow2.f32 %v5455_v63  ;;  %v5313_v58 = vpop.f32.mrf.mxu0  ;;  %v5386_v23 = vpop.f32.mrf.mxu1  ;;  %v5251_v17 = vadd.f32 %v10630_v49, %v5178_v16  ;;  %v5253_v60 = vadd.f32 %v10350_v54, %v5180_v47  ;;  %v5255_v1 = vadd.f32 %v10360_v55, %v5182_v12 }
 0x320   : > { %7641 = vpow2.f32 %v5457_v40  ;;  %v5463_v8 = vmul.f32 1.442695, %v5417_v25  ;;  %v5418_v57 = vmin.f32 %v10425_v24, 20.0  ;;  %v10431_v59 = vadd.f32 %v5384_v62, %v5312_v18 }
 0x321   : > { %v5314_v4 = vadd.f32 %v5313_v58, %v5241_v7  ;;  %v5315_v22 = vpop.f32.mrf.mxu0  ;;  %v5388_v45 = vpop.f32.mrf.mxu1 }
 0x322   : > { %7643 = vpow2.f32 %v5463_v8  ;;  %v5465_v30 = vmul.f32 1.442695, %v5418_v57  ;;  %v5421_v51 = vmin.f32 %v10431_v59, 20.0  ;;  %v5316_v29 = vadd.f32 %v5315_v22, %v5243_v52 }
 0x323   : > { %v7632_v42 = vpop.eup %7631  ;;  %v10440_v61 = vadd.f32 %v5386_v23, %v5314_v4  ;;  %v5317_v2 = vpop.f32.mrf.mxu0 }
 0x324   : > { %v5390_v31 = vpop.f32.mrf.mxu1  ;;  %v5501_v48 = vadd.f32 2.0, %v7632_v42  ;;  %7645 = vpow2.f32 %v5465_v30  ;;  %v5471_v21 = vmul.f32 1.442695, %v5421_v51  ;;  %v10442_v32 = vadd.f32 %v5388_v45, %v5316_v29 }
 0x325   : > { %v7634_v19 = vpop.eup %7633  ;;  %v5422_v50 = vmin.f32 %v10440_v61, 20.0  ;;  %v5318_v6 = vadd.f32 %v5317_v2, %v5245_v9  ;;  %v5321_v3 = vpop.f32.mrf.mxu0 }
 0x326   : > { %v5394_v26 = vpop.f32.mrf.mxu1  ;;  %v5533_v13 = vmul.f32 %v7632_v42, %v5501_v48  ;;  %v5502_v43 = vadd.f32 2.0, %v7634_v19  ;;  %7647 = vpow2.f32 %v5471_v21  ;;  %v5425_v27 = vmin.f32 %v10442_v32, 20.0 }
 0x327   : > { %v7636_v14 = vpop.eup %7635  ;;  %v5473_v7 = vmul.f32 1.442695, %v5422_v50  ;;  %v10449_v63 = vadd.f32 %v5390_v31, %v5318_v6  ;;  %v5322_v39 = vadd.f32 %v5321_v3, %v5249_v20  ;;  %v5323_v62 = vpop.f32.mrf.mxu0 }
 0x328   : > { %v5565_v40 = vadd.f32 2.0, %v5533_v13  ;;  %v5534_v54 = vmul.f32 %v7634_v19, %v5502_v43  ;;  %v5505_v25 = vadd.f32 2.0, %v7636_v14  ;;  %v5479_v18 = vmul.f32 1.442695, %v5425_v27  ;;  %v5396_v0 = vpop.f32.mrf.mxu1 }
 0x329   : > { %v7638_v34 = vpop.eup %7637  ;;  %7649 = vpow2.f32 %v5473_v7  ;;  %v5426_v36 = vmin.f32 %v10449_v63, 20.0  ;;  %v10452_v52 = vadd.f32 %v5394_v26, %v5322_v39  ;;  %v5324_v37 = vadd.f32 %v5323_v62, %v5251_v17  ;;  %v5325_v35 = vpop.f32.mrf.mxu0 }
 0x32a   : > { %7651 = vrcp.f32 %v5565_v40  ;;  %v5566_v55 = vadd.f32 2.0, %v5534_v54  ;;  %v5537_v58 = vmul.f32 %v7636_v14, %v5505_v25  ;;  %v5506_v23 = vadd.f32 2.0, %v7638_v34  ;;  %v5398_v4 = vpop.f32.mrf.mxu1 }
 0x32b   : > { %7653 = vpow2.f32 %v5479_v18  ;;  %v5481_v8 = vmul.f32 1.442695, %v5426_v36  ;;  %v5429_v57 = vmin.f32 %v10452_v52, 20.0  ;;  %v10455_v28 = vadd.f32 %v5396_v0, %v5324_v37  ;;  %v5327_v22 = vpop.f32.mrf.mxu0 }
 0x32c   : > { %v7640_v38 = vpop.eup %7639  ;;  %7655 = vrcp.f32 %v5566_v55  ;;  %v5569_v44 = vadd.f32 2.0, %v5537_v58  ;;  %v5538_v16 = vmul.f32 %v7638_v34, %v5506_v23  ;;  %v5326_v47 = vadd.f32 %v5325_v35, %v5253_v60  ;;  %v5400_v19 = vpop.f32.mrf.mxu1 }
 0x32d   : > { %v7642_v45 = vpop.eup %7641  ;;  %v5509_v30 = vadd.f32 2.0, %v7640_v38  ;;  %7657 = vpow2.f32 %v5481_v8  ;;  %v5487_v51 = vmul.f32 1.442695, %v5429_v57  ;;  %v5430_v29 = vmin.f32 %v10455_v28, 20.0 }
 0x32e   : > { %7659 = vrcp.f32 %v5569_v44  ;;  %v5570_v42 = vadd.f32 2.0, %v5538_v16  ;;  %v5510_v46 = vadd.f32 2.0, %v7642_v45  ;;  %v10458_v9 = vadd.f32 %v5398_v4, %v5326_v47 }
 0x32f   : > { %v7644_v10 = vpop.eup %7643  ;;  %v5541_v20 = vmul.f32 %v7640_v38, %v5509_v30  ;;  %7661 = vpow2.f32 %v5487_v51  ;;  %v5489_v12 = vmul.f32 1.442695, %v5430_v29  ;;  %v5328_v2 = vadd.f32 %v5327_v22, %v5255_v1 }
 0x330   : > { %7663 = vrcp.f32 %v5570_v42  ;;  %v5542_v31 = vmul.f32 %v7642_v45, %v5510_v46  ;;  %v5513_v48 = vadd.f32 2.0, %v7644_v10  ;;  %v5433_v21 = vmin.f32 %v10458_v9, 20.0 }
 0x331   : > { %v7646_v49 = vpop.eup %7645  ;;  %v5573_v17 = vadd.f32 2.0, %v5541_v20  ;;  %7665 = vpow2.f32 %v5489_v12  ;;  %v10461_v60 = vadd.f32 %v5400_v19, %v5328_v2 }
 0x332   : > { %v5574_v50 = vadd.f32 2.0, %v5542_v31  ;;  %v5545_v6 = vmul.f32 %v7644_v10, %v5513_v48  ;;  %v5514_v3 = vadd.f32 2.0, %v7646_v49  ;;  %v5495_v26 = vmul.f32 1.442695, %v5433_v21 }
 0x333   : > { %v7648_v13 = vpop.eup %7647  ;;  %7667 = vrcp.f32 %v5573_v17  ;;  %v5434_v43 = vmin.f32 %v10461_v60, 20.0 }
 0x334   : > { %7669 = vrcp.f32 %v5574_v50  ;;  %v5577_v27 = vadd.f32 2.0, %v5545_v6  ;;  %v5546_v14 = vmul.f32 %v7646_v49, %v5514_v3  ;;  %v5517_v1 = vadd.f32 2.0, %v7648_v13 }
 0x335   : > { %7671 = vpow2.f32 %v5495_v26  ;;  %v5497_v7 = vmul.f32 1.442695, %v5434_v43 }
 0x336   : > { %v7650_v39 = vpop.eup %7649  ;;  %7673 = vrcp.f32 %v5577_v27  ;;  %v5578_v62 = vadd.f32 2.0, %v5546_v14  ;;  %v5549_v40 = vmul.f32 %v7648_v13, %v5517_v1 }
 0x337   : > { %v7652_v54 = vpop.eup %7651  ;;  %v5518_v25 = vadd.f32 2.0, %v7650_v39  ;;  %7675 = vpow2.f32 %v5497_v7 }
 0x338   : > { %v7654_v18 = vpop.eup %7653  ;;  %v5629_v0 = vmul.f32 2.0, %v7652_v54  ;;  %7677 = vrcp.f32 %v5578_v62  ;;  %v5581_v34 = vadd.f32 2.0, %v5549_v40 }
 0x339   : > { %v7656_v36 = vpop.eup %7655  ;;  %v5550_v37 = vmul.f32 %v7650_v39, %v5518_v25  ;;  %v5521_v35 = vadd.f32 2.0, %v7654_v18 }
 0x33a   : > { %v7658_v55 = vpop.eup %7657  ;;  %v5661_v58 = vsub.f32 1.0, %v5629_v0  ;;  %v5630_v23 = vmul.f32 2.0, %v7656_v36  ;;  %7679 = vrcp.f32 %v5581_v34 }
 0x33b   : > { %v7660_v8 = vpop.eup %7659  ;;  %v5582_v57 = vadd.f32 2.0, %v5550_v37  ;;  %v5553_v38 = vmul.f32 %v7654_v18, %v5521_v35  ;;  %v5522_v44 = vadd.f32 2.0, %v7658_v55 }
 0x33c   : > { %v7662_v16 = vpop.eup %7661  ;;  %v5662_v47 = vsub.f32 1.0, %v5630_v23  ;;  %v5633_v4 = vmul.f32 2.0, %v7660_v8  ;;  %v5693_v42 = vmul.f32 %v5661_v58, %v10377_v33 }
 0x33d   : > { %v7664_v22 = vpop.eup %7663  ;;  %7681 = vrcp.f32 %v5582_v57  ;;  %v5585_v45 = vadd.f32 2.0, %v5553_v38  ;;  %v5554_v30 = vmul.f32 %v7658_v55, %v5522_v44  ;;  %v5525_v51 = vadd.f32 2.0, %v7662_v16 }
 0x33e   : > { %v7666_v29 = vpop.eup %7665  ;;  %v5694_v46 = vmul.f32 %v5662_v47, %v10383_v5  ;;  %v5665_v10 = vsub.f32 1.0, %v5633_v4  ;;  %v5634_v20 = vmul.f32 2.0, %v7664_v22 }
 0x33f   : > { %7683 = vrcp.f32 %v5585_v45  ;;  %v5586_v12 = vadd.f32 2.0, %v5554_v30  ;;  %v5557_v2 = vmul.f32 %v7662_v16, %v5525_v51  ;;  %v5526_v31 = vadd.f32 2.0, %v7666_v29 }
 0x340   : > { %v7668_v48 = vpop.eup %7667  ;;  %v6571_v21 = vpack.c.bf16 %v5694_v46, %v5693_v42  ;;  %v5666_v19 = vsub.f32 1.0, %v5634_v20  ;;  %v5697_v33 = vmul.f32 %v5665_v10, %v10391_v15 }
 0x341   : > { %v7670_v49 = vpop.eup %7669  ;;  %v5637_v17 = vmul.f32 2.0, %v7668_v48  ;;  %7685 = vrcp.f32 %v5586_v12  ;;  %v5589_v50 = vadd.f32 2.0, %v5557_v2  ;;  %v5558_v6 = vmul.f32 %v7666_v29, %v5526_v31 }
 0x342   : > { %v7672_v3 = vpop.eup %7671  ;;  %5820 = vst [vmem:[%s10110_s22 + $0x8] sm:$0xff] %v6571_v21  ;;  %v5698_v5 = vmul.f32 %v5666_v19, %v10399_v41  ;;  %v5638_v26 = vmul.f32 2.0, %v7670_v49 }
 0x343   : > { %v7674_v13 = vpop.eup %7673  ;;  %v5669_v43 = vsub.f32 1.0, %v5637_v17  ;;  %7687 = vrcp.f32 %v5589_v50  ;;  %v5590_v27 = vadd.f32 2.0, %v5558_v6  ;;  %v5529_v14 = vadd.f32 2.0, %v7672_v3 }
 0x344   : > { %v7676_v1 = vpop.eup %7675  ;;  %v6573_v7 = vpack.c.bf16 %v5698_v5, %v5697_v33  ;;  %v5670_v39 = vsub.f32 1.0, %v5638_v26  ;;  %v5641_v62 = vmul.f32 2.0, %v7674_v13 }
 0x345   : > { %v7678_v40 = vpop.eup %7677  ;;  %7689 = vrcp.f32 %v5590_v27  ;;  %v5561_v54 = vmul.f32 %v7672_v3, %v5529_v14  ;;  %v5530_v25 = vadd.f32 2.0, %v7676_v1  ;;  %v5701_v15 = vmul.f32 %v5669_v43, %v10409_v11 }
 0x346   : > { %5822 = vst [vmem:[%s10110_s22 + $0x18] sm:$0xff] %v6573_v7  ;;  %v5702_v41 = vmul.f32 %v5670_v39, %v10411_v53  ;;  %v5673_v18 = vsub.f32 1.0, %v5641_v62  ;;  %v5642_v0 = vmul.f32 2.0, %v7678_v40 }
 0x347   : > { %v7680_v34 = vpop.eup %7679  ;;  %v5593_v36 = vadd.f32 2.0, %v5561_v54  ;;  %v5562_v37 = vmul.f32 %v7676_v1, %v5530_v25 }
 0x348   : > { %v6575_v35 = vpack.c.bf16 %v5702_v41, %v5701_v15  ;;  %v5674_v55 = vsub.f32 1.0, %v5642_v0  ;;  %v5645_v58 = vmul.f32 2.0, %v7680_v34  ;;  %v5705_v57 = vmul.f32 %v5673_v18, %v10418_v56 }
 0x349   : > { %7691 = vrcp.f32 %v5593_v36  ;;  %v5594_v23 = vadd.f32 2.0, %v5562_v37 }
 0x34a   : > { %v7682_v8 = vpop.eup %7681  ;;  %5824 = vst [vmem:[%s10110_s22 + $0x28] sm:$0xff] %v6575_v35  ;;  %v5706_v38 = vmul.f32 %v5674_v55, %v10425_v24  ;;  %v5677_v11 = vsub.f32 1.0, %v5645_v58 }
 0x34b   : > { %v5646_v44 = vmul.f32 2.0, %v7682_v8  ;;  %7693 = vrcp.f32 %v5594_v23 }
 0x34c   : > { %v7684_v53 = vpop.eup %7683  ;;  %v6577_v16 = vpack.c.bf16 %v5706_v38, %v5705_v57  ;;  %v5709_v45 = vmul.f32 %v5677_v11, %v10431_v59 }
 0x34d   : > { %v5678_v47 = vsub.f32 1.0, %v5646_v44  ;;  %v5649_v4 = vmul.f32 2.0, %v7684_v53 }
 0x34e   : > { %v7686_v22 = vpop.eup %7685  ;;  %5826 = vst [vmem:[%s10110_s22 + $0x38] sm:$0xff] %v6577_v16 }
 0x34f   : > { %v5710_v30 = vmul.f32 %v5678_v47, %v10440_v61  ;;  %v5681_v51 = vsub.f32 1.0, %v5649_v4  ;;  %v5650_v29 = vmul.f32 2.0, %v7686_v22 }
 0x350   : > { %v7688_v56 = vpop.eup %7687 }
 0x351   : > { %v6579_v42 = vpack.c.bf16 %v5710_v30, %v5709_v45  ;;  %v5682_v24 = vsub.f32 1.0, %v5650_v29  ;;  %v5653_v46 = vmul.f32 2.0, %v7688_v56  ;;  %v5713_v20 = vmul.f32 %v5681_v51, %v10442_v32 }
 0x352   : > { %v7690_v10 = vpop.eup %7689 }
 0x353   : > { %5828 = vst [vmem:[%s10110_s22 + $0x48] sm:$0xff] %v6579_v42  ;;  %v5714_v12 = vmul.f32 %v5682_v24, %v10449_v63  ;;  %v5685_v2 = vsub.f32 1.0, %v5653_v46  ;;  %v5654_v31 = vmul.f32 2.0, %v7690_v10 }
 0x355   : > { %v6581_v48 = vpack.c.bf16 %v5714_v12, %v5713_v20  ;;  %v5686_v59 = vsub.f32 1.0, %v5654_v31  ;;  %v5717_v21 = vmul.f32 %v5685_v2, %v10452_v52 }
 0x356   : > { %v7692_v61 = vpop.eup %7691 }
 0x357   : > { %5830 = vst [vmem:[%s10110_s22 + $0x58] sm:$0xff] %v6581_v48  ;;  %v5718_v19 = vmul.f32 %v5686_v59, %v10455_v28  ;;  %v5657_v49 = vmul.f32 2.0, %v7692_v61 }
 0x358   : > { %v7694_v17 = vpop.eup %7693 }
 0x359   : > { %v6583_v50 = vpack.c.bf16 %v5718_v19, %v5717_v21  ;;  %v5689_v6 = vsub.f32 1.0, %v5657_v49  ;;  %v5658_v3 = vmul.f32 2.0, %v7694_v17 }
 0x35b   : > { %5832 = vst [vmem:[%s10110_s22 + $0x68] sm:$0xff] %v6583_v50  ;;  %v5690_v32 = vsub.f32 1.0, %v5658_v3  ;;  %v5721_v63 = vmul.f32 %v5689_v6, %v10458_v9 }
 0x35d   : > { %v5722_v33 = vmul.f32 %v5690_v32, %v10461_v60 }
 0x35f   : > { %v6585_v5 = vpack.c.bf16 %v5722_v33, %v5721_v63 }
 0x361   : > { %5834 = vst [vmem:[%s10110_s22 + $0x78] sm:$0xff] %v6585_v5 }
 0x362 PF: > { %s13_s12 = sadd.s32 1, %s7774_s12  }
 0x363   : > { %p10_p4 = scmp.ge.s32.totalorder %s13_s12, 4  }
 0x365   :  { %12 = sbr.rel (!%p10_p4) target bundleno = 1 (0x1), region = 62 }

</bundles_post_ra>
